<compile_context>
chip_gen: v5e
topology: v5e:2x2
jax: 0.10.0
libtpu: 0.0.40
codegen_flags: <defaults>
</compile_context>

<pallas_src>
import functools

import jax
import jax.numpy as jnp
import numpy as np
from jax import lax
from jax.experimental import pallas as pl
from jax.experimental.pallas import tpu as pltpu


def _round_up(x, m):
    return ((x + m - 1) // m) * m


# ---------------------------------------------------------------------------
# Direct (im2col-free) convolution kernel
# ---------------------------------------------------------------------------

def _conv_taps_kernel(xm_ref, xh_ref, w_ref, b_ref, o_ref, *, taps_by_phase, tm, act):
    """o = act(sum_taps W_t @ shift_d(x) + b) for one lane-dense M-tile.

    xm_ref: (n_ph, Cin, tm)   this tile's flat activation columns.
    xh_ref: (n_ph, Cin, HW)   right halo (covers every tap's lane shift d <= HW).
    w_ref : (k*k, Cout, Cin)  per-tap weights, resident across the grid.
    b_ref : (Cout, 1)         bias, resident.
    o_ref : (Cout, tm)        lane-dense output tile.
    """
    acc = None
    for ph, taps in taps_by_phase:
        # Tile + halo window for this phase; both widths are multiples of 128 so the
        # lane concatenation is tile-aligned (no relayout).
        win = jnp.concatenate([xm_ref[ph], xh_ref[ph]], axis=1)       # (Cin, tm + HW)
        wlen = win.shape[1]
        for t, d in taps:
            # Tap = static lane shift (XLU roll, overlaps with MXU) + aligned slice.
            xs = win if d == 0 else pltpu.roll(win, wlen - d, axis=1)
            y = jnp.dot(w_ref[t], xs[:, :tm], preferred_element_type=jnp.float32)
            acc = y if acc is None else acc + y
    acc = acc + b_ref[...]
    if act == "relu":
        acc = jnp.maximum(acc, 0.0)
    elif act == "tanh":
        acc = jnp.tanh(acc)
    o_ref[...] = acc


def _pick_tm(M, Cin, Cout, halo):
    """Lane-tile size: big enough to amortize per-step overhead, small enough to keep the
    accumulator + one (Cin, tm+halo) window in registers/VMEM, and >=2 tiles when the
    layer has enough columns so v7x's two TensorCores both get work."""
    cap = max(128, min(2048, ((128 * 1024) // (4 * (Cin + Cout))) // 128 * 128))
    want = _round_up(max(-(-M // 2), 1), 128)
    tm = max(128, min(cap, want))
    if halo > 128:
        tm = _round_up(tm, halo)
    return tm


def conv2d(x, w, b, stride, pad, act=None):
    """Direct conv on internal (Cin, B, H, W) activations -> (Cout, B, Ho, Wo).

    w: (Cout, Cin, k, k) (PyTorch Conv2d layout), b: (Cout,).
    The activation is phase-split by the stride and flattened to a lane-dense
    (n_ph, Cin, B*Hh*Wh) image so every tap is a static lane shift; no im2col tensor
    is materialized in HBM.
    """
    Cin, B, H, W = x.shape
    Cout, Cin2, k, _ = w.shape
    assert Cin == Cin2
    s = stride
    if pad:
        x = jnp.pad(x, ((0, 0), (0, 0), (pad, pad), (pad, pad)))
    Hp, Wp = x.shape[2], x.shape[3]
    Ho = (Hp - k) // s + 1
    Wo = (Wp - k) // s + 1
    Hh = -(-Hp // s)
    Wh = -(-Wp // s)
    if Hh * s != Hp or Wh * s != Wp:
        x = jnp.pad(x, ((0, 0), (0, 0), (0, Hh * s - Hp), (0, Wh * s - Wp)))
    n_ph = s * s

    # Phase split + flatten batch/space into the lane dim: (n_ph, Cin, M), M = B*Hh*Wh.
    x_flat = (x.reshape(Cin, B, Hh, s, Wh, s)
                .transpose(3, 5, 0, 1, 2, 4)
                .reshape(n_ph, Cin, B * Hh * Wh)).astype(jnp.float32)
    M = B * Hh * Wh

    # Per-tap (phase, lane-shift) table; tap t=(i*k+j) reads phase (i%s, j%s) shifted by d.
    groups = {}
    for i in range(k):
        for j in range(k):
            ph = (i % s) * s + (j % s)
            d = (i // s) * Wh + (j // s)
            groups.setdefault(ph, []).append((i * k + j, d))
    taps_by_phase = tuple((ph, tuple(ts)) for ph, ts in sorted(groups.items()))
    d_max = ((k - 1) // s) * (Wh + 1)

    HW = _round_up(max(d_max, 1), 128)            # halo width (lane-tile aligned)
    tm = _pick_tm(M, Cin, Cout, HW)
    n_tiles = -(-M // tm)
    L = n_tiles * tm + HW
    x_flat = jnp.pad(x_flat, ((0, 0), (0, 0), (0, L - M)))   # tail zeros for halo/ragged tile

    w_taps = jnp.transpose(w, (2, 3, 0, 1)).reshape(k * k, Cout, Cin).astype(jnp.float32)
    b2 = b.reshape(Cout, 1).astype(jnp.float32)

    y = pl.pallas_call(
        functools.partial(_conv_taps_kernel, taps_by_phase=taps_by_phase, tm=tm, act=act),
        grid=(n_tiles,),
        out_shape=jax.ShapeDtypeStruct((Cout, n_tiles * tm), jnp.float32),
        in_specs=[
            pl.BlockSpec((n_ph, Cin, tm), lambda m: (0, 0, m)),                       # M tile
            pl.BlockSpec((n_ph, Cin, HW), lambda m: (0, 0, (m + 1) * (tm // HW))),    # halo
            pl.BlockSpec((k * k, Cout, Cin), lambda m: (0, 0, 0)),                    # weights
            pl.BlockSpec((Cout, 1), lambda m: (0, 0)),                                # bias
        ],
        out_specs=pl.BlockSpec((Cout, tm), lambda m: (0, m)),
        compiler_params=pltpu.CompilerParams(dimension_semantics=("parallel",)),
    )(x_flat, x_flat, w_taps, b2)

    return y[:, :M].reshape(Cout, B, Hh, Wh)[:, :, :Ho, :Wo]


def conv_transpose2d(x, w, b, stride, pad, out_pad, act=None):
    """ConvTranspose2d on internal (Cin, B, H, W) activations via zero-dilation + conv.

    w: (Cin, Cout, k, k) (PyTorch ConvTranspose2d layout).
    """
    Cin, Cout, k, _ = w.shape
    C, B, H, W = x.shape
    assert C == Cin
    if stride > 1:
        Hd = (H - 1) * stride + 1
        Wd = (W - 1) * stride + 1
        xd = jnp.zeros((C, B, Hd, Wd), x.dtype).at[:, :, ::stride, ::stride].set(x)
    else:
        xd = x
    p = k - 1 - pad
    xp = jnp.pad(xd, ((0, 0), (0, 0), (p, p + out_pad), (p, p + out_pad)))
    w_conv = jnp.flip(jnp.transpose(w, (1, 0, 2, 3)), axis=(2, 3))    # (Cout, Cin, k, k)
    # TODO(synk): sub-pixel phase decomposition would remove the ~4x zero MACs from dilation.
    return conv2d(xp, w_conv, b, stride=1, pad=0, act=act)


# ---------------------------------------------------------------------------
# Self-attention + fused JPEG-surrogate quantization
# ---------------------------------------------------------------------------

def _self_attn_jpeg_kernel(x_ref, wqkv_ref, bqkv_ref, gamma_ref, o_ref, *, C, Cpad):
    """Self_Attn forward + fused per-image JPEG-surrogate quantization for one batch item.

    x:(1,C,N).  wqkv:(3*Cpad,C) / bqkv:(3*Cpad,1) are the q/k/v 1x1-conv weights stacked
    and zero-padded to Cpad sublanes each, so one MXU push computes all three projections
    and the subsequent slices are sublane-tile aligned.
    """
    x = x_ref[0]                                                          # (C, N)
    qkv = jnp.dot(wqkv_ref[...], x, preferred_element_type=jnp.float32) + bqkv_ref[...]
    q = qkv[0:Cpad]                     # (Cpad, N); rows >= C are exactly zero
    k = qkv[Cpad:2 * Cpad]
    v = qkv[2 * Cpad:3 * Cpad]

    # energy[n, m] = sum_c q[c, n] * k[c, m]  -- contract dim 0 of both; no q.T materialized.
    energy = lax.dot_general(q, k, (((0,), (0,)), ((), ())),
                             preferred_element_type=jnp.float32)          # (N, N)
    # softmax(dim=-1), exact f32 (overwrite the same buffer; fewer live N*N temporaries)
    energy = energy - jnp.max(energy, axis=-1, keepdims=True)
    energy = jnp.exp(energy)
    attn = energy / jnp.sum(energy, axis=-1, keepdims=True)

    # out[c, n] = sum_m v[c, m] * attn[n, m]  -- contract dim 1 of both; no attn.T materialized.
    out = lax.dot_general(v, attn, (((1,), (1,)), ((), ())),
                          preferred_element_type=jnp.float32)             # (Cpad, N)
    res = gamma_ref[0] * out[0:C] + x                                     # (C, N)

    # --- fused JPEG-surrogate quantization round-trip (per image; JPEG codec omitted) ---
    mn = jnp.min(res)
    mx = jnp.max(res)
    scale = mx - mn
    safe = jnp.where(scale == 0.0, 1.0, scale)          # guard constant image -> identity
    q255 = jnp.round((res - mn) * (255.0 / safe))
    o_ref[0] = q255 * (safe * (1.0 / 255.0)) + mn


def self_attention_jpeg(x, wq, bq, wk, bk, wv, bv, gamma):
    """x: (B, C, H, W) -> (B, C, H, W): Self_Attn followed by per-image quantization."""
    B, C, H, W = x.shape
    N = H * W
    Cpad = _round_up(max(C, 1), 8)

    def padw(w):
        return jnp.zeros((Cpad, C), jnp.float32).at[:C, :].set(w.astype(jnp.float32))

    def padb(b):
        return jnp.zeros((Cpad, 1), jnp.float32).at[:C, 0].set(b.astype(jnp.float32))

    wqkv = jnp.concatenate([padw(wq), padw(wk), padw(wv)], axis=0)        # (3*Cpad, C)
    bqkv = jnp.concatenate([padb(bq), padb(bk), padb(bv)], axis=0)        # (3*Cpad, 1)
    xf = x.reshape(B, C, N).astype(jnp.float32)

    # TODO(synk): for N >~ 1024 switch to a flash-style KV-tiled online softmax; the dense
    #             (N,N) buffers below exceed v7x's 64 MiB VMEM / v5e's 16 MiB scoped default.
    out = pl.pallas_call(
        functools.partial(_self_attn_jpeg_kernel, C=C, Cpad=Cpad),
        grid=(B,),
        out_shape=jax.ShapeDtypeStruct((B, C, N), jnp.float32),
        in_specs=[
            pl.BlockSpec((1, C, N), lambda b: (b, 0, 0)),
            pl.BlockSpec((3 * Cpad, C), lambda b: (0, 0)),
            pl.BlockSpec((3 * Cpad, 1), lambda b: (0, 0)),
            pl.BlockSpec(memory_space=pltpu.MemorySpace.SMEM),
        ],
        out_specs=pl.BlockSpec((1, C, N), lambda b: (b, 0, 0)),
        compiler_params=pltpu.CompilerParams(
            dimension_semantics=("parallel",),
            vmem_limit_bytes=32 * 1024 * 1024),          # raises v5e's 16 MiB scoped default
    )(xf, wqkv, bqkv, gamma.astype(jnp.float32))

    return out.reshape(B, C, H, W)


# ---------------------------------------------------------------------------
# Parameters (deterministic init) and full forward
# ---------------------------------------------------------------------------

def _init_wb(key, shape_w, fan_in, n_bias):
    bound = 1.0 / np.sqrt(fan_in)
    kw, kb = jax.random.split(key)
    w = jax.random.uniform(kw, shape_w, jnp.float32, -bound, bound)
    b = jax.random.uniform(kb, (n_bias,), jnp.float32, -bound, bound)
    return w, b


def init_params(key):
    keys = jax.random.split(key, 12)
    p = {}
    # encoder: Conv2d weight layout (Cout, Cin, k, k)
    p["e1_w"], p["e1_b"] = _init_wb(keys[0], (16, 3, 3, 3), 3 * 9, 16)
    p["e2_w"], p["e2_b"] = _init_wb(keys[1], (32, 16, 3, 3), 16 * 9, 32)
    p["e3_w"], p["e3_b"] = _init_wb(keys[2], (32, 32, 3, 3), 32 * 9, 32)
    p["e4_w"], p["e4_b"] = _init_wb(keys[3], (3, 32, 3, 3), 32 * 9, 3)
    # attention: 1x1 convs on 3 channels, stored as (C, C); gamma initialized to zeros
    p["a_q_w"], p["a_q_b"] = _init_wb(keys[4], (3, 3), 3, 3)
    p["a_k_w"], p["a_k_b"] = _init_wb(keys[5], (3, 3), 3, 3)
    p["a_v_w"], p["a_v_b"] = _init_wb(keys[6], (3, 3), 3, 3)
    p["a_gamma"] = jnp.zeros((1,), jnp.float32)
    # decoder: ConvTranspose2d weight layout (Cin, Cout, k, k)
    p["d1_w"], p["d1_b"] = _init_wb(keys[7], (3, 32, 3, 3), 3 * 9, 32)
    p["d2_w"], p["d2_b"] = _init_wb(keys[8], (32, 32, 3, 3), 32 * 9, 32)
    p["d3_w"], p["d3_b"] = _init_wb(keys[9], (32, 16, 3, 3), 32 * 9, 16)
    p["d4_w"], p["d4_b"] = _init_wb(keys[10], (16, 3, 3, 3), 16 * 9, 3)
    return p


def jpg_with_attention_forward(x, p):
    # Internal activation layout: (C, B, H, W) so the conv kernels stay lane-dense over
    # B*H*W and no per-layer NCHW transposes are needed; transpose only at the boundaries.
    xc = jnp.transpose(x.astype(jnp.float32), (1, 0, 2, 3))                # (3, B, H, W)

    # encoder
    h = conv2d(xc, p["e1_w"], p["e1_b"], stride=2, pad=1, act="relu")      # (16, B, 8, 8)
    h = conv2d(h, p["e2_w"], p["e2_b"], stride=1, pad=1, act="relu")       # (32, B, 8, 8)
    h = conv2d(h, p["e3_w"], p["e3_b"], stride=2, pad=1, act="relu")       # (32, B, 4, 4)
    com = conv2d(h, p["e4_w"], p["e4_b"], stride=1, pad=1, act=None)       # (3,  B, 4, 4)
    com_img = jnp.transpose(com, (1, 0, 2, 3))                             # (B, 3, 4, 4)

    # self-attention + fused JPEG-surrogate quantization round-trip (per image)
    rec = self_attention_jpeg(com_img, p["a_q_w"], p["a_q_b"], p["a_k_w"], p["a_k_b"],
                              p["a_v_w"], p["a_v_b"], p["a_gamma"])        # (B, 3, 4, 4)
    rec_c = jnp.transpose(rec, (1, 0, 2, 3))                               # (3, B, 4, 4)

    # decoder
    d = conv_transpose2d(rec_c, p["d1_w"], p["d1_b"], 1, 1, 0, act="relu")  # (32, B, 4, 4)
    d = conv_transpose2d(d, p["d2_w"], p["d2_b"], 2, 1, 1, act="relu")      # (32, B, 8, 8)
    d = conv_transpose2d(d, p["d3_w"], p["d3_b"], 1, 1, 0, act="relu")      # (16, B, 8, 8)
    d = conv_transpose2d(d, p["d4_w"], p["d4_b"], 2, 1, 1, act="tanh")      # (3, B, 16, 16)
    decomp = jnp.transpose(d, (1, 0, 2, 3))                                 # (B, 3, 16, 16)
    return com_img, decomp


if __name__ == "__main__":
    key = jax.random.PRNGKey(0)
    k_params, k_x = jax.random.split(key)
    params = init_params(k_params)
    x = jax.random.normal(k_x, (2, 3, 16, 16), jnp.float32)   # NCHW, like PyTorch

    fwd = jax.jit(jpg_with_attention_forward)
    com_img, decomp_img = fwd(x, params)
    jax.block_until_ready(com_img)
    jax.block_until_ready(decomp_img)

    assert com_img.shape == (2, 3, 4, 4), com_img.shape
    assert decomp_img.shape == (2, 3, 16, 16), decomp_img.shape
    print("KERNEL_OK")
</pallas_src>

<mosaic_0001>
module attributes {stable_mosaic.version = 11 : i64} {
  func.func @_conv_taps_kernel(%arg0: i32, %arg1: memref<4x3x128xf32, #tpu.memory_space<vmem>>, %arg2: memref<4x3x128xf32, #tpu.memory_space<vmem>>, %arg3: memref<9x16x3xf32, #tpu.memory_space<vmem>>, %arg4: memref<16x1xf32, #tpu.memory_space<vmem>>, %arg5: memref<16x128xf32, #tpu.memory_space<vmem>>) attributes {dimension_semantics = [#tpu.dimension_semantics<parallel>], iteration_bounds = array<i64: 2>, scalar_prefetch = 0 : i64, scratch_operands = 0 : i64, tpu.core_type = #tpu.core_type<tc>, window_params = [{transform_indices = @transform_0, window_bounds = array<i64: 4, 3, 128>}, {transform_indices = @transform_1, window_bounds = array<i64: 4, 3, 128>}, {pipeline_mode = #tpu.pipeline_mode<synchronous>, transform_indices = @transform_2, window_bounds = array<i64: 9, 16, 3>}, {pipeline_mode = #tpu.pipeline_mode<synchronous>, transform_indices = @transform_3, window_bounds = array<i64: 16, 1>}, {transform_indices = @transform_4, window_bounds = array<i64: 16, 128>}]} {
    %c0 = arith.constant 0 : index
    %c0_0 = arith.constant 0 : index
    %c0_1 = arith.constant 0 : index
    %0 = vector.load %arg1[%c0, %c0_0, %c0_1] : memref<4x3x128xf32, #tpu.memory_space<vmem>>, vector<1x3x128xf32>
    %1 = vector.shape_cast %0 : vector<1x3x128xf32> to vector<3x128xf32>
    %c0_2 = arith.constant 0 : index
    %c0_3 = arith.constant 0 : index
    %c0_4 = arith.constant 0 : index
    %2 = vector.load %arg2[%c0_2, %c0_3, %c0_4] : memref<4x3x128xf32, #tpu.memory_space<vmem>>, vector<1x3x128xf32>
    %3 = vector.shape_cast %2 : vector<1x3x128xf32> to vector<3x128xf32>
    %4 = tpu.concatenate %1, %3 in 1 : vector<3x128xf32>, vector<3x128xf32> -> vector<3x256xf32>
    %c0_5 = arith.constant 0 : index
    %c0_6 = arith.constant 0 : index
    %c0_7 = arith.constant 0 : index
    %5 = vector.load %arg3[%c0_5, %c0_6, %c0_7] : memref<9x16x3xf32, #tpu.memory_space<vmem>>, vector<1x16x3xf32>
    %6 = vector.shape_cast %5 : vector<1x16x3xf32> to vector<16x3xf32>
    %7 = vector.extract_strided_slice %4 {offsets = [0, 0], sizes = [3, 128], strides = [1, 1]} : vector<3x256xf32> to vector<3x128xf32>
    %cst = arith.constant dense<0.000000e+00> : vector<16x128xf32>
    %8 = tpu.matmul %6, %7, %cst {dimension_numbers = #tpu.dot_dimension_numbers<[1], [0], [0], [1], [0, 0, 1, 1], [], []>} : vector<16x3xf32>, vector<3x128xf32>, vector<16x128xf32> -> vector<16x128xf32>
    %c255_i32 = arith.constant 255 : i32
    %9 = tpu.dynamic_rotate %4 by %c255_i32 dim 1 : vector<3x256xf32>, i32 -> vector<3x256xf32>
    %c2 = arith.constant 2 : index
    %c0_8 = arith.constant 0 : index
    %c0_9 = arith.constant 0 : index
    %10 = vector.load %arg3[%c2, %c0_8, %c0_9] : memref<9x16x3xf32, #tpu.memory_space<vmem>>, vector<1x16x3xf32>
    %11 = vector.shape_cast %10 : vector<1x16x3xf32> to vector<16x3xf32>
    %12 = vector.extract_strided_slice %9 {offsets = [0, 0], sizes = [3, 128], strides = [1, 1]} : vector<3x256xf32> to vector<3x128xf32>
    %cst_10 = arith.constant dense<0.000000e+00> : vector<16x128xf32>
    %13 = tpu.matmul %11, %12, %cst_10 {dimension_numbers = #tpu.dot_dimension_numbers<[1], [0], [0], [1], [0, 0, 1, 1], [], []>} : vector<16x3xf32>, vector<3x128xf32>, vector<16x128xf32> -> vector<16x128xf32>
    %14 = arith.addf %8, %13 : vector<16x128xf32>
    %c247_i32 = arith.constant 247 : i32
    %15 = tpu.dynamic_rotate %4 by %c247_i32 dim 1 : vector<3x256xf32>, i32 -> vector<3x256xf32>
    %c6 = arith.constant 6 : index
    %c0_11 = arith.constant 0 : index
    %c0_12 = arith.constant 0 : index
    %16 = vector.load %arg3[%c6, %c0_11, %c0_12] : memref<9x16x3xf32, #tpu.memory_space<vmem>>, vector<1x16x3xf32>
    %17 = vector.shape_cast %16 : vector<1x16x3xf32> to vector<16x3xf32>
    %18 = vector.extract_strided_slice %15 {offsets = [0, 0], sizes = [3, 128], strides = [1, 1]} : vector<3x256xf32> to vector<3x128xf32>
    %cst_13 = arith.constant dense<0.000000e+00> : vector<16x128xf32>
    %19 = tpu.matmul %17, %18, %cst_13 {dimension_numbers = #tpu.dot_dimension_numbers<[1], [0], [0], [1], [0, 0, 1, 1], [], []>} : vector<16x3xf32>, vector<3x128xf32>, vector<16x128xf32> -> vector<16x128xf32>
    %20 = arith.addf %14, %19 : vector<16x128xf32>
    %c246_i32 = arith.constant 246 : i32
    %21 = tpu.dynamic_rotate %4 by %c246_i32 dim 1 : vector<3x256xf32>, i32 -> vector<3x256xf32>
    %c8 = arith.constant 8 : index
    %c0_14 = arith.constant 0 : index
    %c0_15 = arith.constant 0 : index
    %22 = vector.load %arg3[%c8, %c0_14, %c0_15] : memref<9x16x3xf32, #tpu.memory_space<vmem>>, vector<1x16x3xf32>
    %23 = vector.shape_cast %22 : vector<1x16x3xf32> to vector<16x3xf32>
    %24 = vector.extract_strided_slice %21 {offsets = [0, 0], sizes = [3, 128], strides = [1, 1]} : vector<3x256xf32> to vector<3x128xf32>
    %cst_16 = arith.constant dense<0.000000e+00> : vector<16x128xf32>
    %25 = tpu.matmul %23, %24, %cst_16 {dimension_numbers = #tpu.dot_dimension_numbers<[1], [0], [0], [1], [0, 0, 1, 1], [], []>} : vector<16x3xf32>, vector<3x128xf32>, vector<16x128xf32> -> vector<16x128xf32>
    %26 = arith.addf %20, %25 : vector<16x128xf32>
    %c1 = arith.constant 1 : index
    %c0_17 = arith.constant 0 : index
    %c0_18 = arith.constant 0 : index
    %27 = vector.load %arg1[%c1, %c0_17, %c0_18] : memref<4x3x128xf32, #tpu.memory_space<vmem>>, vector<1x3x128xf32>
    %28 = vector.shape_cast %27 : vector<1x3x128xf32> to vector<3x128xf32>
    %c1_19 = arith.constant 1 : index
    %c0_20 = arith.constant 0 : index
    %c0_21 = arith.constant 0 : index
    %29 = vector.load %arg2[%c1_19, %c0_20, %c0_21] : memref<4x3x128xf32, #tpu.memory_space<vmem>>, vector<1x3x128xf32>
    %30 = vector.shape_cast %29 : vector<1x3x128xf32> to vector<3x128xf32>
    %31 = tpu.concatenate %28, %30 in 1 : vector<3x128xf32>, vector<3x128xf32> -> vector<3x256xf32>
    %c1_22 = arith.constant 1 : index
    %c0_23 = arith.constant 0 : index
    %c0_24 = arith.constant 0 : index
    %32 = vector.load %arg3[%c1_22, %c0_23, %c0_24] : memref<9x16x3xf32, #tpu.memory_space<vmem>>, vector<1x16x3xf32>
    %33 = vector.shape_cast %32 : vector<1x16x3xf32> to vector<16x3xf32>
    %34 = vector.extract_strided_slice %31 {offsets = [0, 0], sizes = [3, 128], strides = [1, 1]} : vector<3x256xf32> to vector<3x128xf32>
    %cst_25 = arith.constant dense<0.000000e+00> : vector<16x128xf32>
    %35 = tpu.matmul %33, %34, %cst_25 {dimension_numbers = #tpu.dot_dimension_numbers<[1], [0], [0], [1], [0, 0, 1, 1], [], []>} : vector<16x3xf32>, vector<3x128xf32>, vector<16x128xf32> -> vector<16x128xf32>
    %36 = arith.addf %26, %35 : vector<16x128xf32>
    %c247_i32_26 = arith.constant 247 : i32
    %37 = tpu.dynamic_rotate %31 by %c247_i32_26 dim 1 : vector<3x256xf32>, i32 -> vector<3x256xf32>
    %c7 = arith.constant 7 : index
    %c0_27 = arith.constant 0 : index
    %c0_28 = arith.constant 0 : index
    %38 = vector.load %arg3[%c7, %c0_27, %c0_28] : memref<9x16x3xf32, #tpu.memory_space<vmem>>, vector<1x16x3xf32>
    %39 = vector.shape_cast %38 : vector<1x16x3xf32> to vector<16x3xf32>
    %40 = vector.extract_strided_slice %37 {offsets = [0, 0], sizes = [3, 128], strides = [1, 1]} : vector<3x256xf32> to vector<3x128xf32>
    %cst_29 = arith.constant dense<0.000000e+00> : vector<16x128xf32>
    %41 = tpu.matmul %39, %40, %cst_29 {dimension_numbers = #tpu.dot_dimension_numbers<[1], [0], [0], [1], [0, 0, 1, 1], [], []>} : vector<16x3xf32>, vector<3x128xf32>, vector<16x128xf32> -> vector<16x128xf32>
    %42 = arith.addf %36, %41 : vector<16x128xf32>
    %c2_30 = arith.constant 2 : index
    %c0_31 = arith.constant 0 : index
    %c0_32 = arith.constant 0 : index
    %43 = vector.load %arg1[%c2_30, %c0_31, %c0_32] : memref<4x3x128xf32, #tpu.memory_space<vmem>>, vector<1x3x128xf32>
    %44 = vector.shape_cast %43 : vector<1x3x128xf32> to vector<3x128xf32>
    %c2_33 = arith.constant 2 : index
    %c0_34 = arith.constant 0 : index
    %c0_35 = arith.constant 0 : index
    %45 = vector.load %arg2[%c2_33, %c0_34, %c0_35] : memref<4x3x128xf32, #tpu.memory_space<vmem>>, vector<1x3x128xf32>
    %46 = vector.shape_cast %45 : vector<1x3x128xf32> to vector<3x128xf32>
    %47 = tpu.concatenate %44, %46 in 1 : vector<3x128xf32>, vector<3x128xf32> -> vector<3x256xf32>
    %c3 = arith.constant 3 : index
    %c0_36 = arith.constant 0 : index
    %c0_37 = arith.constant 0 : index
    %48 = vector.load %arg3[%c3, %c0_36, %c0_37] : memref<9x16x3xf32, #tpu.memory_space<vmem>>, vector<1x16x3xf32>
    %49 = vector.shape_cast %48 : vector<1x16x3xf32> to vector<16x3xf32>
    %50 = vector.extract_strided_slice %47 {offsets = [0, 0], sizes = [3, 128], strides = [1, 1]} : vector<3x256xf32> to vector<3x128xf32>
    %cst_38 = arith.constant dense<0.000000e+00> : vector<16x128xf32>
    %51 = tpu.matmul %49, %50, %cst_38 {dimension_numbers = #tpu.dot_dimension_numbers<[1], [0], [0], [1], [0, 0, 1, 1], [], []>} : vector<16x3xf32>, vector<3x128xf32>, vector<16x128xf32> -> vector<16x128xf32>
    %52 = arith.addf %42, %51 : vector<16x128xf32>
    %c255_i32_39 = arith.constant 255 : i32
    %53 = tpu.dynamic_rotate %47 by %c255_i32_39 dim 1 : vector<3x256xf32>, i32 -> vector<3x256xf32>
    %c5 = arith.constant 5 : index
    %c0_40 = arith.constant 0 : index
    %c0_41 = arith.constant 0 : index
    %54 = vector.load %arg3[%c5, %c0_40, %c0_41] : memref<9x16x3xf32, #tpu.memory_space<vmem>>, vector<1x16x3xf32>
    %55 = vector.shape_cast %54 : vector<1x16x3xf32> to vector<16x3xf32>
    %56 = vector.extract_strided_slice %53 {offsets = [0, 0], sizes = [3, 128], strides = [1, 1]} : vector<3x256xf32> to vector<3x128xf32>
    %cst_42 = arith.constant dense<0.000000e+00> : vector<16x128xf32>
    %57 = tpu.matmul %55, %56, %cst_42 {dimension_numbers = #tpu.dot_dimension_numbers<[1], [0], [0], [1], [0, 0, 1, 1], [], []>} : vector<16x3xf32>, vector<3x128xf32>, vector<16x128xf32> -> vector<16x128xf32>
    %58 = arith.addf %52, %57 : vector<16x128xf32>
    %c3_43 = arith.constant 3 : index
    %c0_44 = arith.constant 0 : index
    %c0_45 = arith.constant 0 : index
    %59 = vector.load %arg1[%c3_43, %c0_44, %c0_45] : memref<4x3x128xf32, #tpu.memory_space<vmem>>, vector<1x3x128xf32>
    %60 = vector.shape_cast %59 : vector<1x3x128xf32> to vector<3x128xf32>
    %c3_46 = arith.constant 3 : index
    %c0_47 = arith.constant 0 : index
    %c0_48 = arith.constant 0 : index
    %61 = vector.load %arg2[%c3_46, %c0_47, %c0_48] : memref<4x3x128xf32, #tpu.memory_space<vmem>>, vector<1x3x128xf32>
    %62 = vector.shape_cast %61 : vector<1x3x128xf32> to vector<3x128xf32>
    %63 = tpu.concatenate %60, %62 in 1 : vector<3x128xf32>, vector<3x128xf32> -> vector<3x256xf32>
    %c4 = arith.constant 4 : index
    %c0_49 = arith.constant 0 : index
    %c0_50 = arith.constant 0 : index
    %64 = vector.load %arg3[%c4, %c0_49, %c0_50] : memref<9x16x3xf32, #tpu.memory_space<vmem>>, vector<1x16x3xf32>
    %65 = vector.shape_cast %64 : vector<1x16x3xf32> to vector<16x3xf32>
    %66 = vector.extract_strided_slice %63 {offsets = [0, 0], sizes = [3, 128], strides = [1, 1]} : vector<3x256xf32> to vector<3x128xf32>
    %cst_51 = arith.constant dense<0.000000e+00> : vector<16x128xf32>
    %67 = tpu.matmul %65, %66, %cst_51 {dimension_numbers = #tpu.dot_dimension_numbers<[1], [0], [0], [1], [0, 0, 1, 1], [], []>} : vector<16x3xf32>, vector<3x128xf32>, vector<16x128xf32> -> vector<16x128xf32>
    %68 = arith.addf %58, %67 : vector<16x128xf32>
    %c0_52 = arith.constant 0 : index
    %c0_53 = arith.constant 0 : index
    %69 = vector.load %arg4[%c0_52, %c0_53] : memref<16x1xf32, #tpu.memory_space<vmem>>, vector<16x1xf32>
    %70 = vector.broadcast %69 : vector<16x1xf32> to vector<16x128xf32>
    %71 = arith.addf %68, %70 : vector<16x128xf32>
    %cst_54 = arith.constant 0.000000e+00 : f32
    %72 = vector.broadcast %cst_54 : f32 to vector<16x128xf32>
    %73 = arith.maximumf %71, %72 : vector<16x128xf32>
    %c0_55 = arith.constant 0 : index
    %c0_56 = arith.constant 0 : index
    %74 = vector.load %arg5[%c0_55, %c0_56] : memref<16x128xf32, #tpu.memory_space<vmem>>, vector<16x128xf32>
    tpu.vector_store %arg5[%c0_55, %c0_56], %73 {strides = array<i32>} : memref<16x128xf32, #tpu.memory_space<vmem>>, vector<16x128xf32>,
    return
  }
  func.func @transform_0(%arg0: i32) -> (i32, i32, i32) {
    %c0_i32 = arith.constant 0 : i32
    %c0_i32_0 = arith.constant 0 : i32
    %c0_i32_1 = arith.constant 0 : i32
    return %c0_i32, %c0_i32_0, %arg0 : i32, i32, i32
  }
  func.func @transform_1(%arg0: i32) -> (i32, i32, i32) {
    %c1_i32 = arith.constant 1 : i32
    %0 = arith.addi %arg0, %c1_i32 : i32
    %c1_i32_0 = arith.constant 1 : i32
    %1 = arith.muli %0, %c1_i32_0 : i32
    %c0_i32 = arith.constant 0 : i32
    %c0_i32_1 = arith.constant 0 : i32
    %c0_i32_2 = arith.constant 0 : i32
    return %c0_i32, %c0_i32_1, %1 : i32, i32, i32
  }
  func.func @transform_2(%arg0: i32) -> (i32, i32, i32) {
    %c0_i32 = arith.constant 0 : i32
    %c0_i32_0 = arith.constant 0 : i32
    %c0_i32_1 = arith.constant 0 : i32
    %c0_i32_2 = arith.constant 0 : i32
    return %c0_i32, %c0_i32_0, %c0_i32_1 : i32, i32, i32
  }
  func.func @transform_3(%arg0: i32) -> (i32, i32) {
    %c0_i32 = arith.constant 0 : i32
    %c0_i32_0 = arith.constant 0 : i32
    %c0_i32_1 = arith.constant 0 : i32
    return %c0_i32, %c0_i32_0 : i32, i32
  }
  func.func @transform_4(%arg0: i32) -> (i32, i32) {
    %c0_i32 = arith.constant 0 : i32
    %c0_i32_0 = arith.constant 0 : i32
    return %c0_i32, %arg0 : i32, i32
  }
}

module attributes {stable_mosaic.version = 11 : i64} {
  func.func @_conv_taps_kernel(%arg0: i32, %arg1: memref<1x16x128xf32, #tpu.memory_space<vmem>>, %arg2: memref<1x16x128xf32, #tpu.memory_space<vmem>>, %arg3: memref<9x32x16xf32, #tpu.memory_space<vmem>>, %arg4: memref<32x1xf32, #tpu.memory_space<vmem>>, %arg5: memref<32x128xf32, #tpu.memory_space<vmem>>) attributes {dimension_semantics = [#tpu.dimension_semantics<parallel>], iteration_bounds = array<i64: 2>, scalar_prefetch = 0 : i64, scratch_operands = 0 : i64, tpu.core_type = #tpu.core_type<tc>, window_params = [{transform_indices = @transform_0, window_bounds = array<i64: 1, 16, 128>}, {transform_indices = @transform_1, window_bounds = array<i64: 1, 16, 128>}, {pipeline_mode = #tpu.pipeline_mode<synchronous>, transform_indices = @transform_2, window_bounds = array<i64: 9, 32, 16>}, {pipeline_mode = #tpu.pipeline_mode<synchronous>, transform_indices = @transform_3, window_bounds = array<i64: 32, 1>}, {transform_indices = @transform_4, window_bounds = array<i64: 32, 128>}]} {
    %c0 = arith.constant 0 : index
    %c0_0 = arith.constant 0 : index
    %c0_1 = arith.constant 0 : index
    %0 = vector.load %arg1[%c0, %c0_0, %c0_1] : memref<1x16x128xf32, #tpu.memory_space<vmem>>, vector<1x16x128xf32>
    %1 = vector.shape_cast %0 : vector<1x16x128xf32> to vector<16x128xf32>
    %c0_2 = arith.constant 0 : index
    %c0_3 = arith.constant 0 : index
    %c0_4 = arith.constant 0 : index
    %2 = vector.load %arg2[%c0_2, %c0_3, %c0_4] : memref<1x16x128xf32, #tpu.memory_space<vmem>>, vector<1x16x128xf32>
    %3 = vector.shape_cast %2 : vector<1x16x128xf32> to vector<16x128xf32>
    %4 = tpu.concatenate %1, %3 in 1 : vector<16x128xf32>, vector<16x128xf32> -> vector<16x256xf32>
    %c0_5 = arith.constant 0 : index
    %c0_6 = arith.constant 0 : index
    %c0_7 = arith.constant 0 : index
    %5 = vector.load %arg3[%c0_5, %c0_6, %c0_7] : memref<9x32x16xf32, #tpu.memory_space<vmem>>, vector<1x32x16xf32>
    %6 = vector.shape_cast %5 : vector<1x32x16xf32> to vector<32x16xf32>
    %7 = vector.extract_strided_slice %4 {offsets = [0, 0], sizes = [16, 128], strides = [1, 1]} : vector<16x256xf32> to vector<16x128xf32>
    %cst = arith.constant dense<0.000000e+00> : vector<32x128xf32>
    %8 = tpu.matmul %6, %7, %cst {dimension_numbers = #tpu.dot_dimension_numbers<[1], [0], [0], [1], [0, 0, 1, 1], [], []>} : vector<32x16xf32>, vector<16x128xf32>, vector<32x128xf32> -> vector<32x128xf32>
    %c255_i32 = arith.constant 255 : i32
    %9 = tpu.dynamic_rotate %4 by %c255_i32 dim 1 : vector<16x256xf32>, i32 -> vector<16x256xf32>
    %c1 = arith.constant 1 : index
    %c0_8 = arith.constant 0 : index
    %c0_9 = arith.constant 0 : index
    %10 = vector.load %arg3[%c1, %c0_8, %c0_9] : memref<9x32x16xf32, #tpu.memory_space<vmem>>, vector<1x32x16xf32>
    %11 = vector.shape_cast %10 : vector<1x32x16xf32> to vector<32x16xf32>
    %12 = vector.extract_strided_slice %9 {offsets = [0, 0], sizes = [16, 128], strides = [1, 1]} : vector<16x256xf32> to vector<16x128xf32>
    %cst_10 = arith.constant dense<0.000000e+00> : vector<32x128xf32>
    %13 = tpu.matmul %11, %12, %cst_10 {dimension_numbers = #tpu.dot_dimension_numbers<[1], [0], [0], [1], [0, 0, 1, 1], [], []>} : vector<32x16xf32>, vector<16x128xf32>, vector<32x128xf32> -> vector<32x128xf32>
    %14 = arith.addf %8, %13 : vector<32x128xf32>
    %c254_i32 = arith.constant 254 : i32
    %15 = tpu.dynamic_rotate %4 by %c254_i32 dim 1 : vector<16x256xf32>, i32 -> vector<16x256xf32>
    %c2 = arith.constant 2 : index
    %c0_11 = arith.constant 0 : index
    %c0_12 = arith.constant 0 : index
    %16 = vector.load %arg3[%c2, %c0_11, %c0_12] : memref<9x32x16xf32, #tpu.memory_space<vmem>>, vector<1x32x16xf32>
    %17 = vector.shape_cast %16 : vector<1x32x16xf32> to vector<32x16xf32>
    %18 = vector.extract_strided_slice %15 {offsets = [0, 0], sizes = [16, 128], strides = [1, 1]} : vector<16x256xf32> to vector<16x128xf32>
    %cst_13 = arith.constant dense<0.000000e+00> : vector<32x128xf32>
    %19 = tpu.matmul %17, %18, %cst_13 {dimension_numbers = #tpu.dot_dimension_numbers<[1], [0], [0], [1], [0, 0, 1, 1], [], []>} : vector<32x16xf32>, vector<16x128xf32>, vector<32x128xf32> -> vector<32x128xf32>
    %20 = arith.addf %14, %19 : vector<32x128xf32>
    %c246_i32 = arith.constant 246 : i32
    %21 = tpu.dynamic_rotate %4 by %c246_i32 dim 1 : vector<16x256xf32>, i32 -> vector<16x256xf32>
    %c3 = arith.constant 3 : index
    %c0_14 = arith.constant 0 : index
    %c0_15 = arith.constant 0 : index
    %22 = vector.load %arg3[%c3, %c0_14, %c0_15] : memref<9x32x16xf32, #tpu.memory_space<vmem>>, vector<1x32x16xf32>
    %23 = vector.shape_cast %22 : vector<1x32x16xf32> to vector<32x16xf32>
    %24 = vector.extract_strided_slice %21 {offsets = [0, 0], sizes = [16, 128], strides = [1, 1]} : vector<16x256xf32> to vector<16x128xf32>
    %cst_16 = arith.constant dense<0.000000e+00> : vector<32x128xf32>
    %25 = tpu.matmul %23, %24, %cst_16 {dimension_numbers = #tpu.dot_dimension_numbers<[1], [0], [0], [1], [0, 0, 1, 1], [], []>} : vector<32x16xf32>, vector<16x128xf32>, vector<32x128xf32> -> vector<32x128xf32>
    %26 = arith.addf %20, %25 : vector<32x128xf32>
    %c245_i32 = arith.constant 245 : i32
    %27 = tpu.dynamic_rotate %4 by %c245_i32 dim 1 : vector<16x256xf32>, i32 -> vector<16x256xf32>
    %c4 = arith.constant 4 : index
    %c0_17 = arith.constant 0 : index
    %c0_18 = arith.constant 0 : index
    %28 = vector.load %arg3[%c4, %c0_17, %c0_18] : memref<9x32x16xf32, #tpu.memory_space<vmem>>, vector<1x32x16xf32>
    %29 = vector.shape_cast %28 : vector<1x32x16xf32> to vector<32x16xf32>
    %30 = vector.extract_strided_slice %27 {offsets = [0, 0], sizes = [16, 128], strides = [1, 1]} : vector<16x256xf32> to vector<16x128xf32>
    %cst_19 = arith.constant dense<0.000000e+00> : vector<32x128xf32>
    %31 = tpu.matmul %29, %30, %cst_19 {dimension_numbers = #tpu.dot_dimension_numbers<[1], [0], [0], [1], [0, 0, 1, 1], [], []>} : vector<32x16xf32>, vector<16x128xf32>, vector<32x128xf32> -> vector<32x128xf32>
    %32 = arith.addf %26, %31 : vector<32x128xf32>
    %c244_i32 = arith.constant 244 : i32
    %33 = tpu.dynamic_rotate %4 by %c244_i32 dim 1 : vector<16x256xf32>, i32 -> vector<16x256xf32>
    %c5 = arith.constant 5 : index
    %c0_20 = arith.constant 0 : index
    %c0_21 = arith.constant 0 : index
    %34 = vector.load %arg3[%c5, %c0_20, %c0_21] : memref<9x32x16xf32, #tpu.memory_space<vmem>>, vector<1x32x16xf32>
    %35 = vector.shape_cast %34 : vector<1x32x16xf32> to vector<32x16xf32>
    %36 = vector.extract_strided_slice %33 {offsets = [0, 0], sizes = [16, 128], strides = [1, 1]} : vector<16x256xf32> to vector<16x128xf32>
    %cst_22 = arith.constant dense<0.000000e+00> : vector<32x128xf32>
    %37 = tpu.matmul %35, %36, %cst_22 {dimension_numbers = #tpu.dot_dimension_numbers<[1], [0], [0], [1], [0, 0, 1, 1], [], []>} : vector<32x16xf32>, vector<16x128xf32>, vector<32x128xf32> -> vector<32x128xf32>
    %38 = arith.addf %32, %37 : vector<32x128xf32>
    %c236_i32 = arith.constant 236 : i32
    %39 = tpu.dynamic_rotate %4 by %c236_i32 dim 1 : vector<16x256xf32>, i32 -> vector<16x256xf32>
    %c6 = arith.constant 6 : index
    %c0_23 = arith.constant 0 : index
    %c0_24 = arith.constant 0 : index
    %40 = vector.load %arg3[%c6, %c0_23, %c0_24] : memref<9x32x16xf32, #tpu.memory_space<vmem>>, vector<1x32x16xf32>
    %41 = vector.shape_cast %40 : vector<1x32x16xf32> to vector<32x16xf32>
    %42 = vector.extract_strided_slice %39 {offsets = [0, 0], sizes = [16, 128], strides = [1, 1]} : vector<16x256xf32> to vector<16x128xf32>
    %cst_25 = arith.constant dense<0.000000e+00> : vector<32x128xf32>
    %43 = tpu.matmul %41, %42, %cst_25 {dimension_numbers = #tpu.dot_dimension_numbers<[1], [0], [0], [1], [0, 0, 1, 1], [], []>} : vector<32x16xf32>, vector<16x128xf32>, vector<32x128xf32> -> vector<32x128xf32>
    %44 = arith.addf %38, %43 : vector<32x128xf32>
    %c235_i32 = arith.constant 235 : i32
    %45 = tpu.dynamic_rotate %4 by %c235_i32 dim 1 : vector<16x256xf32>, i32 -> vector<16x256xf32>
    %c7 = arith.constant 7 : index
    %c0_26 = arith.constant 0 : index
    %c0_27 = arith.constant 0 : index
    %46 = vector.load %arg3[%c7, %c0_26, %c0_27] : memref<9x32x16xf32, #tpu.memory_space<vmem>>, vector<1x32x16xf32>
    %47 = vector.shape_cast %46 : vector<1x32x16xf32> to vector<32x16xf32>
    %48 = vector.extract_strided_slice %45 {offsets = [0, 0], sizes = [16, 128], strides = [1, 1]} : vector<16x256xf32> to vector<16x128xf32>
    %cst_28 = arith.constant dense<0.000000e+00> : vector<32x128xf32>
    %49 = tpu.matmul %47, %48, %cst_28 {dimension_numbers = #tpu.dot_dimension_numbers<[1], [0], [0], [1], [0, 0, 1, 1], [], []>} : vector<32x16xf32>, vector<16x128xf32>, vector<32x128xf32> -> vector<32x128xf32>
    %50 = arith.addf %44, %49 : vector<32x128xf32>
    %c234_i32 = arith.constant 234 : i32
    %51 = tpu.dynamic_rotate %4 by %c234_i32 dim 1 : vector<16x256xf32>, i32 -> vector<16x256xf32>
    %c8 = arith.constant 8 : index
    %c0_29 = arith.constant 0 : index
    %c0_30 = arith.constant 0 : index
    %52 = vector.load %arg3[%c8, %c0_29, %c0_30] : memref<9x32x16xf32, #tpu.memory_space<vmem>>, vector<1x32x16xf32>
    %53 = vector.shape_cast %52 : vector<1x32x16xf32> to vector<32x16xf32>
    %54 = vector.extract_strided_slice %51 {offsets = [0, 0], sizes = [16, 128], strides = [1, 1]} : vector<16x256xf32> to vector<16x128xf32>
    %cst_31 = arith.constant dense<0.000000e+00> : vector<32x128xf32>
    %55 = tpu.matmul %53, %54, %cst_31 {dimension_numbers = #tpu.dot_dimension_numbers<[1], [0], [0], [1], [0, 0, 1, 1], [], []>} : vector<32x16xf32>, vector<16x128xf32>, vector<32x128xf32> -> vector<32x128xf32>
    %56 = arith.addf %50, %55 : vector<32x128xf32>
    %c0_32 = arith.constant 0 : index
    %c0_33 = arith.constant 0 : index
    %57 = vector.load %arg4[%c0_32, %c0_33] : memref<32x1xf32, #tpu.memory_space<vmem>>, vector<32x1xf32>
    %58 = vector.broadcast %57 : vector<32x1xf32> to vector<32x128xf32>
    %59 = arith.addf %56, %58 : vector<32x128xf32>
    %cst_34 = arith.constant 0.000000e+00 : f32
    %60 = vector.broadcast %cst_34 : f32 to vector<32x128xf32>
    %61 = arith.maximumf %59, %60 : vector<32x128xf32>
    %c0_35 = arith.constant 0 : index
    %c0_36 = arith.constant 0 : index
    %62 = vector.load %arg5[%c0_35, %c0_36] : memref<32x128xf32, #tpu.memory_space<vmem>>, vector<32x128xf32>
    tpu.vector_store %arg5[%c0_35, %c0_36], %61 {strides = array<i32>} : memref<32x128xf32, #tpu.memory_space<vmem>>, vector<32x128xf32>,
    return
  }
  func.func @transform_0(%arg0: i32) -> (i32, i32, i32) {
    %c0_i32 = arith.constant 0 : i32
    %c0_i32_0 = arith.constant 0 : i32
    %c0_i32_1 = arith.constant 0 : i32
    return %c0_i32, %c0_i32_0, %arg0 : i32, i32, i32
  }
  func.func @transform_1(%arg0: i32) -> (i32, i32, i32) {
    %c1_i32 = arith.constant 1 : i32
    %0 = arith.addi %arg0, %c1_i32 : i32
    %c1_i32_0 = arith.constant 1 : i32
    %1 = arith.muli %0, %c1_i32_0 : i32
    %c0_i32 = arith.constant 0 : i32
    %c0_i32_1 = arith.constant 0 : i32
    %c0_i32_2 = arith.constant 0 : i32
    return %c0_i32, %c0_i32_1, %1 : i32, i32, i32
  }
  func.func @transform_2(%arg0: i32) -> (i32, i32, i32) {
    %c0_i32 = arith.constant 0 : i32
    %c0_i32_0 = arith.constant 0 : i32
    %c0_i32_1 = arith.constant 0 : i32
    %c0_i32_2 = arith.constant 0 : i32
    return %c0_i32, %c0_i32_0, %c0_i32_1 : i32, i32, i32
  }
  func.func @transform_3(%arg0: i32) -> (i32, i32) {
    %c0_i32 = arith.constant 0 : i32
    %c0_i32_0 = arith.constant 0 : i32
    %c0_i32_1 = arith.constant 0 : i32
    return %c0_i32, %c0_i32_0 : i32, i32
  }
  func.func @transform_4(%arg0: i32) -> (i32, i32) {
    %c0_i32 = arith.constant 0 : i32
    %c0_i32_0 = arith.constant 0 : i32
    return %c0_i32, %arg0 : i32, i32
  }
}

module attributes {stable_mosaic.version = 11 : i64} {
  func.func @_conv_taps_kernel(%arg0: i32, %arg1: memref<4x32x128xf32, #tpu.memory_space<vmem>>, %arg2: memref<4x32x128xf32, #tpu.memory_space<vmem>>, %arg3: memref<9x32x32xf32, #tpu.memory_space<vmem>>, %arg4: memref<32x1xf32, #tpu.memory_space<vmem>>, %arg5: memref<32x128xf32, #tpu.memory_space<vmem>>) attributes {dimension_semantics = [#tpu.dimension_semantics<parallel>], iteration_bounds = array<i64: 1>, scalar_prefetch = 0 : i64, scratch_operands = 0 : i64, tpu.core_type = #tpu.core_type<tc>, window_params = [{transform_indices = @transform_0, window_bounds = array<i64: 4, 32, 128>}, {transform_indices = @transform_1, window_bounds = array<i64: 4, 32, 128>}, {pipeline_mode = #tpu.pipeline_mode<synchronous>, transform_indices = @transform_2, window_bounds = array<i64: 9, 32, 32>}, {pipeline_mode = #tpu.pipeline_mode<synchronous>, transform_indices = @transform_3, window_bounds = array<i64: 32, 1>}, {transform_indices = @transform_4, window_bounds = array<i64: 32, 128>}]} {
    %c0 = arith.constant 0 : index
    %c0_0 = arith.constant 0 : index
    %c0_1 = arith.constant 0 : index
    %0 = vector.load %arg1[%c0, %c0_0, %c0_1] : memref<4x32x128xf32, #tpu.memory_space<vmem>>, vector<1x32x128xf32>
    %1 = vector.shape_cast %0 : vector<1x32x128xf32> to vector<32x128xf32>
    %c0_2 = arith.constant 0 : index
    %c0_3 = arith.constant 0 : index
    %c0_4 = arith.constant 0 : index
    %2 = vector.load %arg2[%c0_2, %c0_3, %c0_4] : memref<4x32x128xf32, #tpu.memory_space<vmem>>, vector<1x32x128xf32>
    %3 = vector.shape_cast %2 : vector<1x32x128xf32> to vector<32x128xf32>
    %4 = tpu.concatenate %1, %3 in 1 : vector<32x128xf32>, vector<32x128xf32> -> vector<32x256xf32>
    %c0_5 = arith.constant 0 : index
    %c0_6 = arith.constant 0 : index
    %c0_7 = arith.constant 0 : index
    %5 = vector.load %arg3[%c0_5, %c0_6, %c0_7] : memref<9x32x32xf32, #tpu.memory_space<vmem>>, vector<1x32x32xf32>
    %6 = vector.shape_cast %5 : vector<1x32x32xf32> to vector<32x32xf32>
    %7 = vector.extract_strided_slice %4 {offsets = [0, 0], sizes = [32, 128], strides = [1, 1]} : vector<32x256xf32> to vector<32x128xf32>
    %cst = arith.constant dense<0.000000e+00> : vector<32x128xf32>
    %8 = tpu.matmul %6, %7, %cst {dimension_numbers = #tpu.dot_dimension_numbers<[1], [0], [0], [1], [0, 0, 1, 1], [], []>} : vector<32x32xf32>, vector<32x128xf32>, vector<32x128xf32> -> vector<32x128xf32>
    %c255_i32 = arith.constant 255 : i32
    %9 = tpu.dynamic_rotate %4 by %c255_i32 dim 1 : vector<32x256xf32>, i32 -> vector<32x256xf32>
    %c2 = arith.constant 2 : index
    %c0_8 = arith.constant 0 : index
    %c0_9 = arith.constant 0 : index
    %10 = vector.load %arg3[%c2, %c0_8, %c0_9] : memref<9x32x32xf32, #tpu.memory_space<vmem>>, vector<1x32x32xf32>
    %11 = vector.shape_cast %10 : vector<1x32x32xf32> to vector<32x32xf32>
    %12 = vector.extract_strided_slice %9 {offsets = [0, 0], sizes = [32, 128], strides = [1, 1]} : vector<32x256xf32> to vector<32x128xf32>
    %cst_10 = arith.constant dense<0.000000e+00> : vector<32x128xf32>
    %13 = tpu.matmul %11, %12, %cst_10 {dimension_numbers = #tpu.dot_dimension_numbers<[1], [0], [0], [1], [0, 0, 1, 1], [], []>} : vector<32x32xf32>, vector<32x128xf32>, vector<32x128xf32> -> vector<32x128xf32>
    %14 = arith.addf %8, %13 : vector<32x128xf32>
    %c251_i32 = arith.constant 251 : i32
    %15 = tpu.dynamic_rotate %4 by %c251_i32 dim 1 : vector<32x256xf32>, i32 -> vector<32x256xf32>
    %c6 = arith.constant 6 : index
    %c0_11 = arith.constant 0 : index
    %c0_12 = arith.constant 0 : index
    %16 = vector.load %arg3[%c6, %c0_11, %c0_12] : memref<9x32x32xf32, #tpu.memory_space<vmem>>, vector<1x32x32xf32>
    %17 = vector.shape_cast %16 : vector<1x32x32xf32> to vector<32x32xf32>
    %18 = vector.extract_strided_slice %15 {offsets = [0, 0], sizes = [32, 128], strides = [1, 1]} : vector<32x256xf32> to vector<32x128xf32>
    %cst_13 = arith.constant dense<0.000000e+00> : vector<32x128xf32>
    %19 = tpu.matmul %17, %18, %cst_13 {dimension_numbers = #tpu.dot_dimension_numbers<[1], [0], [0], [1], [0, 0, 1, 1], [], []>} : vector<32x32xf32>, vector<32x128xf32>, vector<32x128xf32> -> vector<32x128xf32>
    %20 = arith.addf %14, %19 : vector<32x128xf32>
    %c250_i32 = arith.constant 250 : i32
    %21 = tpu.dynamic_rotate %4 by %c250_i32 dim 1 : vector<32x256xf32>, i32 -> vector<32x256xf32>
    %c8 = arith.constant 8 : index
    %c0_14 = arith.constant 0 : index
    %c0_15 = arith.constant 0 : index
    %22 = vector.load %arg3[%c8, %c0_14, %c0_15] : memref<9x32x32xf32, #tpu.memory_space<vmem>>, vector<1x32x32xf32>
    %23 = vector.shape_cast %22 : vector<1x32x32xf32> to vector<32x32xf32>
    %24 = vector.extract_strided_slice %21 {offsets = [0, 0], sizes = [32, 128], strides = [1, 1]} : vector<32x256xf32> to vector<32x128xf32>
    %cst_16 = arith.constant dense<0.000000e+00> : vector<32x128xf32>
    %25 = tpu.matmul %23, %24, %cst_16 {dimension_numbers = #tpu.dot_dimension_numbers<[1], [0], [0], [1], [0, 0, 1, 1], [], []>} : vector<32x32xf32>, vector<32x128xf32>, vector<32x128xf32> -> vector<32x128xf32>
    %26 = arith.addf %20, %25 : vector<32x128xf32>
    %c1 = arith.constant 1 : index
    %c0_17 = arith.constant 0 : index
    %c0_18 = arith.constant 0 : index
    %27 = vector.load %arg1[%c1, %c0_17, %c0_18] : memref<4x32x128xf32, #tpu.memory_space<vmem>>, vector<1x32x128xf32>
    %28 = vector.shape_cast %27 : vector<1x32x128xf32> to vector<32x128xf32>
    %c1_19 = arith.constant 1 : index
    %c0_20 = arith.constant 0 : index
    %c0_21 = arith.constant 0 : index
    %29 = vector.load %arg2[%c1_19, %c0_20, %c0_21] : memref<4x32x128xf32, #tpu.memory_space<vmem>>, vector<1x32x128xf32>
    %30 = vector.shape_cast %29 : vector<1x32x128xf32> to vector<32x128xf32>
    %31 = tpu.concatenate %28, %30 in 1 : vector<32x128xf32>, vector<32x128xf32> -> vector<32x256xf32>
    %c1_22 = arith.constant 1 : index
    %c0_23 = arith.constant 0 : index
    %c0_24 = arith.constant 0 : index
    %32 = vector.load %arg3[%c1_22, %c0_23, %c0_24] : memref<9x32x32xf32, #tpu.memory_space<vmem>>, vector<1x32x32xf32>
    %33 = vector.shape_cast %32 : vector<1x32x32xf32> to vector<32x32xf32>
    %34 = vector.extract_strided_slice %31 {offsets = [0, 0], sizes = [32, 128], strides = [1, 1]} : vector<32x256xf32> to vector<32x128xf32>
    %cst_25 = arith.constant dense<0.000000e+00> : vector<32x128xf32>
    %35 = tpu.matmul %33, %34, %cst_25 {dimension_numbers = #tpu.dot_dimension_numbers<[1], [0], [0], [1], [0, 0, 1, 1], [], []>} : vector<32x32xf32>, vector<32x128xf32>, vector<32x128xf32> -> vector<32x128xf32>
    %36 = arith.addf %26, %35 : vector<32x128xf32>
    %c251_i32_26 = arith.constant 251 : i32
    %37 = tpu.dynamic_rotate %31 by %c251_i32_26 dim 1 : vector<32x256xf32>, i32 -> vector<32x256xf32>
    %c7 = arith.constant 7 : index
    %c0_27 = arith.constant 0 : index
    %c0_28 = arith.constant 0 : index
    %38 = vector.load %arg3[%c7, %c0_27, %c0_28] : memref<9x32x32xf32, #tpu.memory_space<vmem>>, vector<1x32x32xf32>
    %39 = vector.shape_cast %38 : vector<1x32x32xf32> to vector<32x32xf32>
    %40 = vector.extract_strided_slice %37 {offsets = [0, 0], sizes = [32, 128], strides = [1, 1]} : vector<32x256xf32> to vector<32x128xf32>
    %cst_29 = arith.constant dense<0.000000e+00> : vector<32x128xf32>
    %41 = tpu.matmul %39, %40, %cst_29 {dimension_numbers = #tpu.dot_dimension_numbers<[1], [0], [0], [1], [0, 0, 1, 1], [], []>} : vector<32x32xf32>, vector<32x128xf32>, vector<32x128xf32> -> vector<32x128xf32>
    %42 = arith.addf %36, %41 : vector<32x128xf32>
    %c2_30 = arith.constant 2 : index
    %c0_31 = arith.constant 0 : index
    %c0_32 = arith.constant 0 : index
    %43 = vector.load %arg1[%c2_30, %c0_31, %c0_32] : memref<4x32x128xf32, #tpu.memory_space<vmem>>, vector<1x32x128xf32>
    %44 = vector.shape_cast %43 : vector<1x32x128xf32> to vector<32x128xf32>
    %c2_33 = arith.constant 2 : index
    %c0_34 = arith.constant 0 : index
    %c0_35 = arith.constant 0 : index
    %45 = vector.load %arg2[%c2_33, %c0_34, %c0_35] : memref<4x32x128xf32, #tpu.memory_space<vmem>>, vector<1x32x128xf32>
    %46 = vector.shape_cast %45 : vector<1x32x128xf32> to vector<32x128xf32>
    %47 = tpu.concatenate %44, %46 in 1 : vector<32x128xf32>, vector<32x128xf32> -> vector<32x256xf32>
    %c3 = arith.constant 3 : index
    %c0_36 = arith.constant 0 : index
    %c0_37 = arith.constant 0 : index
    %48 = vector.load %arg3[%c3, %c0_36, %c0_37] : memref<9x32x32xf32, #tpu.memory_space<vmem>>, vector<1x32x32xf32>
    %49 = vector.shape_cast %48 : vector<1x32x32xf32> to vector<32x32xf32>
    %50 = vector.extract_strided_slice %47 {offsets = [0, 0], sizes = [32, 128], strides = [1, 1]} : vector<32x256xf32> to vector<32x128xf32>
    %cst_38 = arith.constant dense<0.000000e+00> : vector<32x128xf32>
    %51 = tpu.matmul %49, %50, %cst_38 {dimension_numbers = #tpu.dot_dimension_numbers<[1], [0], [0], [1], [0, 0, 1, 1], [], []>} : vector<32x32xf32>, vector<32x128xf32>, vector<32x128xf32> -> vector<32x128xf32>
    %52 = arith.addf %42, %51 : vector<32x128xf32>
    %c255_i32_39 = arith.constant 255 : i32
    %53 = tpu.dynamic_rotate %47 by %c255_i32_39 dim 1 : vector<32x256xf32>, i32 -> vector<32x256xf32>
    %c5 = arith.constant 5 : index
    %c0_40 = arith.constant 0 : index
    %c0_41 = arith.constant 0 : index
    %54 = vector.load %arg3[%c5, %c0_40, %c0_41] : memref<9x32x32xf32, #tpu.memory_space<vmem>>, vector<1x32x32xf32>
    %55 = vector.shape_cast %54 : vector<1x32x32xf32> to vector<32x32xf32>
    %56 = vector.extract_strided_slice %53 {offsets = [0, 0], sizes = [32, 128], strides = [1, 1]} : vector<32x256xf32> to vector<32x128xf32>
    %cst_42 = arith.constant dense<0.000000e+00> : vector<32x128xf32>
    %57 = tpu.matmul %55, %56, %cst_42 {dimension_numbers = #tpu.dot_dimension_numbers<[1], [0], [0], [1], [0, 0, 1, 1], [], []>} : vector<32x32xf32>, vector<32x128xf32>, vector<32x128xf32> -> vector<32x128xf32>
    %58 = arith.addf %52, %57 : vector<32x128xf32>
    %c3_43 = arith.constant 3 : index
    %c0_44 = arith.constant 0 : index
    %c0_45 = arith.constant 0 : index
    %59 = vector.load %arg1[%c3_43, %c0_44, %c0_45] : memref<4x32x128xf32, #tpu.memory_space<vmem>>, vector<1x32x128xf32>
    %60 = vector.shape_cast %59 : vector<1x32x128xf32> to vector<32x128xf32>
    %c3_46 = arith.constant 3 : index
    %c0_47 = arith.constant 0 : index
    %c0_48 = arith.constant 0 : index
    %61 = vector.load %arg2[%c3_46, %c0_47, %c0_48] : memref<4x32x128xf32, #tpu.memory_space<vmem>>, vector<1x32x128xf32>
    %62 = vector.shape_cast %61 : vector<1x32x128xf32> to vector<32x128xf32>
    %63 = tpu.concatenate %60, %62 in 1 : vector<32x128xf32>, vector<32x128xf32> -> vector<32x256xf32>
    %c4 = arith.constant 4 : index
    %c0_49 = arith.constant 0 : index
    %c0_50 = arith.constant 0 : index
    %64 = vector.load %arg3[%c4, %c0_49, %c0_50] : memref<9x32x32xf32, #tpu.memory_space<vmem>>, vector<1x32x32xf32>
    %65 = vector.shape_cast %64 : vector<1x32x32xf32> to vector<32x32xf32>
    %66 = vector.extract_strided_slice %63 {offsets = [0, 0], sizes = [32, 128], strides = [1, 1]} : vector<32x256xf32> to vector<32x128xf32>
    %cst_51 = arith.constant dense<0.000000e+00> : vector<32x128xf32>
    %67 = tpu.matmul %65, %66, %cst_51 {dimension_numbers = #tpu.dot_dimension_numbers<[1], [0], [0], [1], [0, 0, 1, 1], [], []>} : vector<32x32xf32>, vector<32x128xf32>, vector<32x128xf32> -> vector<32x128xf32>
    %68 = arith.addf %58, %67 : vector<32x128xf32>
    %c0_52 = arith.constant 0 : index
    %c0_53 = arith.constant 0 : index
    %69 = vector.load %arg4[%c0_52, %c0_53] : memref<32x1xf32, #tpu.memory_space<vmem>>, vector<32x1xf32>
    %70 = vector.broadcast %69 : vector<32x1xf32> to vector<32x128xf32>
    %71 = arith.addf %68, %70 : vector<32x128xf32>
    %cst_54 = arith.constant 0.000000e+00 : f32
    %72 = vector.broadcast %cst_54 : f32 to vector<32x128xf32>
    %73 = arith.maximumf %71, %72 : vector<32x128xf32>
    %c0_55 = arith.constant 0 : index
    %c0_56 = arith.constant 0 : index
    %74 = vector.load %arg5[%c0_55, %c0_56] : memref<32x128xf32, #tpu.memory_space<vmem>>, vector<32x128xf32>
    tpu.vector_store %arg5[%c0_55, %c0_56], %73 {strides = array<i32>} : memref<32x128xf32, #tpu.memory_space<vmem>>, vector<32x128xf32>,
    return
  }
  func.func @transform_0(%arg0: i32) -> (i32, i32, i32) {
    %c0_i32 = arith.constant 0 : i32
    %c0_i32_0 = arith.constant 0 : i32
    %c0_i32_1 = arith.constant 0 : i32
    return %c0_i32, %c0_i32_0, %arg0 : i32, i32, i32
  }
  func.func @transform_1(%arg0: i32) -> (i32, i32, i32) {
    %c1_i32 = arith.constant 1 : i32
    %0 = arith.addi %arg0, %c1_i32 : i32
    %c1_i32_0 = arith.constant 1 : i32
    %1 = arith.muli %0, %c1_i32_0 : i32
    %c0_i32 = arith.constant 0 : i32
    %c0_i32_1 = arith.constant 0 : i32
    %c0_i32_2 = arith.constant 0 : i32
    return %c0_i32, %c0_i32_1, %1 : i32, i32, i32
  }
  func.func @transform_2(%arg0: i32) -> (i32, i32, i32) {
    %c0_i32 = arith.constant 0 : i32
    %c0_i32_0 = arith.constant 0 : i32
    %c0_i32_1 = arith.constant 0 : i32
    %c0_i32_2 = arith.constant 0 : i32
    return %c0_i32, %c0_i32_0, %c0_i32_1 : i32, i32, i32
  }
  func.func @transform_3(%arg0: i32) -> (i32, i32) {
    %c0_i32 = arith.constant 0 : i32
    %c0_i32_0 = arith.constant 0 : i32
    %c0_i32_1 = arith.constant 0 : i32
    return %c0_i32, %c0_i32_0 : i32, i32
  }
  func.func @transform_4(%arg0: i32) -> (i32, i32) {
    %c0_i32 = arith.constant 0 : i32
    %c0_i32_0 = arith.constant 0 : i32
    return %c0_i32, %arg0 : i32, i32
  }
}

module attributes {stable_mosaic.version = 11 : i64} {
  func.func @_conv_taps_kernel(%arg0: i32, %arg1: memref<1x32x128xf32, #tpu.memory_space<vmem>>, %arg2: memref<1x32x128xf32, #tpu.memory_space<vmem>>, %arg3: memref<9x3x32xf32, #tpu.memory_space<vmem>>, %arg4: memref<3x1xf32, #tpu.memory_space<vmem>>, %arg5: memref<3x128xf32, #tpu.memory_space<vmem>>) attributes {dimension_semantics = [#tpu.dimension_semantics<parallel>], iteration_bounds = array<i64: 1>, scalar_prefetch = 0 : i64, scratch_operands = 0 : i64, tpu.core_type = #tpu.core_type<tc>, window_params = [{transform_indices = @transform_0, window_bounds = array<i64: 1, 32, 128>}, {transform_indices = @transform_1, window_bounds = array<i64: 1, 32, 128>}, {pipeline_mode = #tpu.pipeline_mode<synchronous>, transform_indices = @transform_2, window_bounds = array<i64: 9, 3, 32>}, {pipeline_mode = #tpu.pipeline_mode<synchronous>, transform_indices = @transform_3, window_bounds = array<i64: 3, 1>}, {transform_indices = @transform_4, window_bounds = array<i64: 3, 128>}]} {
    %c0 = arith.constant 0 : index
    %c0_0 = arith.constant 0 : index
    %c0_1 = arith.constant 0 : index
    %0 = vector.load %arg1[%c0, %c0_0, %c0_1] : memref<1x32x128xf32, #tpu.memory_space<vmem>>, vector<1x32x128xf32>
    %1 = vector.shape_cast %0 : vector<1x32x128xf32> to vector<32x128xf32>
    %c0_2 = arith.constant 0 : index
    %c0_3 = arith.constant 0 : index
    %c0_4 = arith.constant 0 : index
    %2 = vector.load %arg2[%c0_2, %c0_3, %c0_4] : memref<1x32x128xf32, #tpu.memory_space<vmem>>, vector<1x32x128xf32>
    %3 = vector.shape_cast %2 : vector<1x32x128xf32> to vector<32x128xf32>
    %4 = tpu.concatenate %1, %3 in 1 : vector<32x128xf32>, vector<32x128xf32> -> vector<32x256xf32>
    %c0_5 = arith.constant 0 : index
    %c0_6 = arith.constant 0 : index
    %c0_7 = arith.constant 0 : index
    %5 = vector.load %arg3[%c0_5, %c0_6, %c0_7] : memref<9x3x32xf32, #tpu.memory_space<vmem>>, vector<1x3x32xf32>
    %6 = vector.shape_cast %5 : vector<1x3x32xf32> to vector<3x32xf32>
    %7 = vector.extract_strided_slice %4 {offsets = [0, 0], sizes = [32, 128], strides = [1, 1]} : vector<32x256xf32> to vector<32x128xf32>
    %cst = arith.constant dense<0.000000e+00> : vector<3x128xf32>
    %8 = tpu.matmul %6, %7, %cst {dimension_numbers = #tpu.dot_dimension_numbers<[1], [0], [0], [1], [0, 0, 1, 1], [], []>} : vector<3x32xf32>, vector<32x128xf32>, vector<3x128xf32> -> vector<3x128xf32>
    %c255_i32 = arith.constant 255 : i32
    %9 = tpu.dynamic_rotate %4 by %c255_i32 dim 1 : vector<32x256xf32>, i32 -> vector<32x256xf32>
    %c1 = arith.constant 1 : index
    %c0_8 = arith.constant 0 : index
    %c0_9 = arith.constant 0 : index
    %10 = vector.load %arg3[%c1, %c0_8, %c0_9] : memref<9x3x32xf32, #tpu.memory_space<vmem>>, vector<1x3x32xf32>
    %11 = vector.shape_cast %10 : vector<1x3x32xf32> to vector<3x32xf32>
    %12 = vector.extract_strided_slice %9 {offsets = [0, 0], sizes = [32, 128], strides = [1, 1]} : vector<32x256xf32> to vector<32x128xf32>
    %cst_10 = arith.constant dense<0.000000e+00> : vector<3x128xf32>
    %13 = tpu.matmul %11, %12, %cst_10 {dimension_numbers = #tpu.dot_dimension_numbers<[1], [0], [0], [1], [0, 0, 1, 1], [], []>} : vector<3x32xf32>, vector<32x128xf32>, vector<3x128xf32> -> vector<3x128xf32>
    %14 = arith.addf %8, %13 : vector<3x128xf32>
    %c254_i32 = arith.constant 254 : i32
    %15 = tpu.dynamic_rotate %4 by %c254_i32 dim 1 : vector<32x256xf32>, i32 -> vector<32x256xf32>
    %c2 = arith.constant 2 : index
    %c0_11 = arith.constant 0 : index
    %c0_12 = arith.constant 0 : index
    %16 = vector.load %arg3[%c2, %c0_11, %c0_12] : memref<9x3x32xf32, #tpu.memory_space<vmem>>, vector<1x3x32xf32>
    %17 = vector.shape_cast %16 : vector<1x3x32xf32> to vector<3x32xf32>
    %18 = vector.extract_strided_slice %15 {offsets = [0, 0], sizes = [32, 128], strides = [1, 1]} : vector<32x256xf32> to vector<32x128xf32>
    %cst_13 = arith.constant dense<0.000000e+00> : vector<3x128xf32>
    %19 = tpu.matmul %17, %18, %cst_13 {dimension_numbers = #tpu.dot_dimension_numbers<[1], [0], [0], [1], [0, 0, 1, 1], [], []>} : vector<3x32xf32>, vector<32x128xf32>, vector<3x128xf32> -> vector<3x128xf32>
    %20 = arith.addf %14, %19 : vector<3x128xf32>
    %c250_i32 = arith.constant 250 : i32
    %21 = tpu.dynamic_rotate %4 by %c250_i32 dim 1 : vector<32x256xf32>, i32 -> vector<32x256xf32>
    %c3 = arith.constant 3 : index
    %c0_14 = arith.constant 0 : index
    %c0_15 = arith.constant 0 : index
    %22 = vector.load %arg3[%c3, %c0_14, %c0_15] : memref<9x3x32xf32, #tpu.memory_space<vmem>>, vector<1x3x32xf32>
    %23 = vector.shape_cast %22 : vector<1x3x32xf32> to vector<3x32xf32>
    %24 = vector.extract_strided_slice %21 {offsets = [0, 0], sizes = [32, 128], strides = [1, 1]} : vector<32x256xf32> to vector<32x128xf32>
    %cst_16 = arith.constant dense<0.000000e+00> : vector<3x128xf32>
    %25 = tpu.matmul %23, %24, %cst_16 {dimension_numbers = #tpu.dot_dimension_numbers<[1], [0], [0], [1], [0, 0, 1, 1], [], []>} : vector<3x32xf32>, vector<32x128xf32>, vector<3x128xf32> -> vector<3x128xf32>
    %26 = arith.addf %20, %25 : vector<3x128xf32>
    %c249_i32 = arith.constant 249 : i32
    %27 = tpu.dynamic_rotate %4 by %c249_i32 dim 1 : vector<32x256xf32>, i32 -> vector<32x256xf32>
    %c4 = arith.constant 4 : index
    %c0_17 = arith.constant 0 : index
    %c0_18 = arith.constant 0 : index
    %28 = vector.load %arg3[%c4, %c0_17, %c0_18] : memref<9x3x32xf32, #tpu.memory_space<vmem>>, vector<1x3x32xf32>
    %29 = vector.shape_cast %28 : vector<1x3x32xf32> to vector<3x32xf32>
    %30 = vector.extract_strided_slice %27 {offsets = [0, 0], sizes = [32, 128], strides = [1, 1]} : vector<32x256xf32> to vector<32x128xf32>
    %cst_19 = arith.constant dense<0.000000e+00> : vector<3x128xf32>
    %31 = tpu.matmul %29, %30, %cst_19 {dimension_numbers = #tpu.dot_dimension_numbers<[1], [0], [0], [1], [0, 0, 1, 1], [], []>} : vector<3x32xf32>, vector<32x128xf32>, vector<3x128xf32> -> vector<3x128xf32>
    %32 = arith.addf %26, %31 : vector<3x128xf32>
    %c248_i32 = arith.constant 248 : i32
    %33 = tpu.dynamic_rotate %4 by %c248_i32 dim 1 : vector<32x256xf32>, i32 -> vector<32x256xf32>
    %c5 = arith.constant 5 : index
    %c0_20 = arith.constant 0 : index
    %c0_21 = arith.constant 0 : index
    %34 = vector.load %arg3[%c5, %c0_20, %c0_21] : memref<9x3x32xf32, #tpu.memory_space<vmem>>, vector<1x3x32xf32>
    %35 = vector.shape_cast %34 : vector<1x3x32xf32> to vector<3x32xf32>
    %36 = vector.extract_strided_slice %33 {offsets = [0, 0], sizes = [32, 128], strides = [1, 1]} : vector<32x256xf32> to vector<32x128xf32>
    %cst_22 = arith.constant dense<0.000000e+00> : vector<3x128xf32>
    %37 = tpu.matmul %35, %36, %cst_22 {dimension_numbers = #tpu.dot_dimension_numbers<[1], [0], [0], [1], [0, 0, 1, 1], [], []>} : vector<3x32xf32>, vector<32x128xf32>, vector<3x128xf32> -> vector<3x128xf32>
    %38 = arith.addf %32, %37 : vector<3x128xf32>
    %c244_i32 = arith.constant 244 : i32
    %39 = tpu.dynamic_rotate %4 by %c244_i32 dim 1 : vector<32x256xf32>, i32 -> vector<32x256xf32>
    %c6 = arith.constant 6 : index
    %c0_23 = arith.constant 0 : index
    %c0_24 = arith.constant 0 : index
    %40 = vector.load %arg3[%c6, %c0_23, %c0_24] : memref<9x3x32xf32, #tpu.memory_space<vmem>>, vector<1x3x32xf32>
    %41 = vector.shape_cast %40 : vector<1x3x32xf32> to vector<3x32xf32>
    %42 = vector.extract_strided_slice %39 {offsets = [0, 0], sizes = [32, 128], strides = [1, 1]} : vector<32x256xf32> to vector<32x128xf32>
    %cst_25 = arith.constant dense<0.000000e+00> : vector<3x128xf32>
    %43 = tpu.matmul %41, %42, %cst_25 {dimension_numbers = #tpu.dot_dimension_numbers<[1], [0], [0], [1], [0, 0, 1, 1], [], []>} : vector<3x32xf32>, vector<32x128xf32>, vector<3x128xf32> -> vector<3x128xf32>
    %44 = arith.addf %38, %43 : vector<3x128xf32>
    %c243_i32 = arith.constant 243 : i32
    %45 = tpu.dynamic_rotate %4 by %c243_i32 dim 1 : vector<32x256xf32>, i32 -> vector<32x256xf32>
    %c7 = arith.constant 7 : index
    %c0_26 = arith.constant 0 : index
    %c0_27 = arith.constant 0 : index
    %46 = vector.load %arg3[%c7, %c0_26, %c0_27] : memref<9x3x32xf32, #tpu.memory_space<vmem>>, vector<1x3x32xf32>
    %47 = vector.shape_cast %46 : vector<1x3x32xf32> to vector<3x32xf32>
    %48 = vector.extract_strided_slice %45 {offsets = [0, 0], sizes = [32, 128], strides = [1, 1]} : vector<32x256xf32> to vector<32x128xf32>
    %cst_28 = arith.constant dense<0.000000e+00> : vector<3x128xf32>
    %49 = tpu.matmul %47, %48, %cst_28 {dimension_numbers = #tpu.dot_dimension_numbers<[1], [0], [0], [1], [0, 0, 1, 1], [], []>} : vector<3x32xf32>, vector<32x128xf32>, vector<3x128xf32> -> vector<3x128xf32>
    %50 = arith.addf %44, %49 : vector<3x128xf32>
    %c242_i32 = arith.constant 242 : i32
    %51 = tpu.dynamic_rotate %4 by %c242_i32 dim 1 : vector<32x256xf32>, i32 -> vector<32x256xf32>
    %c8 = arith.constant 8 : index
    %c0_29 = arith.constant 0 : index
    %c0_30 = arith.constant 0 : index
    %52 = vector.load %arg3[%c8, %c0_29, %c0_30] : memref<9x3x32xf32, #tpu.memory_space<vmem>>, vector<1x3x32xf32>
    %53 = vector.shape_cast %52 : vector<1x3x32xf32> to vector<3x32xf32>
    %54 = vector.extract_strided_slice %51 {offsets = [0, 0], sizes = [32, 128], strides = [1, 1]} : vector<32x256xf32> to vector<32x128xf32>
    %cst_31 = arith.constant dense<0.000000e+00> : vector<3x128xf32>
    %55 = tpu.matmul %53, %54, %cst_31 {dimension_numbers = #tpu.dot_dimension_numbers<[1], [0], [0], [1], [0, 0, 1, 1], [], []>} : vector<3x32xf32>, vector<32x128xf32>, vector<3x128xf32> -> vector<3x128xf32>
    %56 = arith.addf %50, %55 : vector<3x128xf32>
    %c0_32 = arith.constant 0 : index
    %c0_33 = arith.constant 0 : index
    %57 = vector.load %arg4[%c0_32, %c0_33] : memref<3x1xf32, #tpu.memory_space<vmem>>, vector<3x1xf32>
    %58 = vector.broadcast %57 : vector<3x1xf32> to vector<3x128xf32>
    %59 = arith.addf %56, %58 : vector<3x128xf32>
    %c0_34 = arith.constant 0 : index
    %c0_35 = arith.constant 0 : index
    %60 = vector.load %arg5[%c0_34, %c0_35] : memref<3x128xf32, #tpu.memory_space<vmem>>, vector<3x128xf32>
    tpu.vector_store %arg5[%c0_34, %c0_35], %59 {strides = array<i32>} : memref<3x128xf32, #tpu.memory_space<vmem>>, vector<3x128xf32>,
    return
  }
  func.func @transform_0(%arg0: i32) -> (i32, i32, i32) {
    %c0_i32 = arith.constant 0 : i32
    %c0_i32_0 = arith.constant 0 : i32
    %c0_i32_1 = arith.constant 0 : i32
    return %c0_i32, %c0_i32_0, %arg0 : i32, i32, i32
  }
  func.func @transform_1(%arg0: i32) -> (i32, i32, i32) {
    %c1_i32 = arith.constant 1 : i32
    %0 = arith.addi %arg0, %c1_i32 : i32
    %c1_i32_0 = arith.constant 1 : i32
    %1 = arith.muli %0, %c1_i32_0 : i32
    %c0_i32 = arith.constant 0 : i32
    %c0_i32_1 = arith.constant 0 : i32
    %c0_i32_2 = arith.constant 0 : i32
    return %c0_i32, %c0_i32_1, %1 : i32, i32, i32
  }
  func.func @transform_2(%arg0: i32) -> (i32, i32, i32) {
    %c0_i32 = arith.constant 0 : i32
    %c0_i32_0 = arith.constant 0 : i32
    %c0_i32_1 = arith.constant 0 : i32
    %c0_i32_2 = arith.constant 0 : i32
    return %c0_i32, %c0_i32_0, %c0_i32_1 : i32, i32, i32
  }
  func.func @transform_3(%arg0: i32) -> (i32, i32) {
    %c0_i32 = arith.constant 0 : i32
    %c0_i32_0 = arith.constant 0 : i32
    %c0_i32_1 = arith.constant 0 : i32
    return %c0_i32, %c0_i32_0 : i32, i32
  }
  func.func @transform_4(%arg0: i32) -> (i32, i32) {
    %c0_i32 = arith.constant 0 : i32
    %c0_i32_0 = arith.constant 0 : i32
    return %c0_i32, %arg0 : i32, i32
  }
}

module attributes {stable_mosaic.version = 11 : i64} {
  func.func @_self_attn_jpeg_kernel(%arg0: i32, %arg1: memref<1x3x16xf32, #tpu.memory_space<vmem>>, %arg2: memref<24x3xf32, #tpu.memory_space<vmem>>, %arg3: memref<24x1xf32, #tpu.memory_space<vmem>>, %arg4: memref<1xf32, #tpu.memory_space<smem>>, %arg5: memref<1x3x16xf32, #tpu.memory_space<vmem>>) attributes {dimension_semantics = [#tpu.dimension_semantics<parallel>], iteration_bounds = array<i64: 2>, scalar_prefetch = 0 : i64, scratch_operands = 0 : i64, tpu.core_type = #tpu.core_type<tc>, window_params = [{transform_indices = @transform_0, window_bounds = array<i64: 1, 3, 16>}, {pipeline_mode = #tpu.pipeline_mode<synchronous>, transform_indices = @transform_1, window_bounds = array<i64: 24, 3>}, {pipeline_mode = #tpu.pipeline_mode<synchronous>, transform_indices = @transform_2, window_bounds = array<i64: 24, 1>}, {transform_indices = @transform_3, window_bounds = array<i64: 1>}, {transform_indices = @transform_4, window_bounds = array<i64: 1, 3, 16>}]} {
    %c0 = arith.constant 0 : index
    %c0_0 = arith.constant 0 : index
    %c0_1 = arith.constant 0 : index
    %0 = vector.load %arg1[%c0, %c0_0, %c0_1] : memref<1x3x16xf32, #tpu.memory_space<vmem>>, vector<1x3x16xf32>
    %1 = vector.shape_cast %0 : vector<1x3x16xf32> to vector<3x16xf32>
    %c0_2 = arith.constant 0 : index
    %c0_3 = arith.constant 0 : index
    %2 = vector.load %arg2[%c0_2, %c0_3] : memref<24x3xf32, #tpu.memory_space<vmem>>, vector<24x3xf32>
    %cst = arith.constant dense<0.000000e+00> : vector<24x16xf32>
    %3 = tpu.matmul %2, %1, %cst {dimension_numbers = #tpu.dot_dimension_numbers<[1], [0], [0], [1], [0, 0, 1, 1], [], []>} : vector<24x3xf32>, vector<3x16xf32>, vector<24x16xf32> -> vector<24x16xf32>
    %c0_4 = arith.constant 0 : index
    %c0_5 = arith.constant 0 : index
    %4 = vector.load %arg3[%c0_4, %c0_5] : memref<24x1xf32, #tpu.memory_space<vmem>>, vector<24x1xf32>
    %5 = vector.broadcast %4 : vector<24x1xf32> to vector<24x16xf32>
    %6 = arith.addf %3, %5 : vector<24x16xf32>
    %7 = vector.extract_strided_slice %6 {offsets = [0, 0], sizes = [8, 16], strides = [1, 1]} : vector<24x16xf32> to vector<8x16xf32>
    %8 = vector.extract_strided_slice %6 {offsets = [8, 0], sizes = [8, 16], strides = [1, 1]} : vector<24x16xf32> to vector<8x16xf32>
    %9 = vector.extract_strided_slice %6 {offsets = [16, 0], sizes = [8, 16], strides = [1, 1]} : vector<24x16xf32> to vector<8x16xf32>
    %cst_6 = arith.constant dense<0.000000e+00> : vector<16x16xf32>
    %10 = tpu.matmul %7, %8, %cst_6 {dimension_numbers = #tpu.dot_dimension_numbers<[0], [0], [1], [1], [0, 1, 1, 1], [], []>} : vector<8x16xf32>, vector<8x16xf32>, vector<16x16xf32> -> vector<16x16xf32>
    %cst_7 = arith.constant dense<0xFF800000> : vector<16xf32>
    %11 = vector.multi_reduction <maximumf>, %10, %cst_7 [1] : vector<16x16xf32> to vector<16xf32>
    %12 = vector.shape_cast %11 : vector<16xf32> to vector<16x1xf32>
    %13 = vector.broadcast %12 : vector<16x1xf32> to vector<16x16xf32>
    %14 = arith.subf %10, %13 : vector<16x16xf32>
    %15 = math.exp %14 : vector<16x16xf32>
    %cst_8 = arith.constant dense<0.000000e+00> : vector<16xf32>
    %16 = vector.multi_reduction <add>, %15, %cst_8 [1] : vector<16x16xf32> to vector<16xf32>
    %17 = vector.shape_cast %16 : vector<16xf32> to vector<16x1xf32>
    %18 = vector.broadcast %17 : vector<16x1xf32> to vector<16x16xf32>
    %19 = arith.divf %15, %18 : vector<16x16xf32>
    %cst_9 = arith.constant dense<0.000000e+00> : vector<8x16xf32>
    %20 = tpu.matmul %9, %19, %cst_9 {dimension_numbers = #tpu.dot_dimension_numbers<[1], [1], [0], [0], [0, 0, 1, 0], [], []>} : vector<8x16xf32>, vector<16x16xf32>, vector<8x16xf32> -> vector<8x16xf32>
    %c0_10 = arith.constant 0 : index
    %21 = memref.load %arg4[%c0_10] : memref<1xf32, #tpu.memory_space<smem>>
    %22 = vector.extract_strided_slice %20 {offsets = [0, 0], sizes = [3, 16], strides = [1, 1]} : vector<8x16xf32> to vector<3x16xf32>
    %23 = vector.broadcast %21 : f32 to vector<3x16xf32>
    %24 = arith.mulf %23, %22 : vector<3x16xf32>
    %25 = arith.addf %24, %1 : vector<3x16xf32>
    %26 = vector.shape_cast %25 : vector<3x16xf32> to vector<1x3x16xf32>
    %cst_11 = arith.constant dense<0x7F800000> : vector<1xf32>
    %27 = vector.multi_reduction <minimumf>, %26, %cst_11 [1, 2] : vector<1x3x16xf32> to vector<1xf32>
    %28 = vector.shape_cast %27 : vector<1xf32> to vector<1x1x1xf32>
    %29 = vector.extract %28[0, 0, 0] : f32 from vector<1x1x1xf32>
    %30 = vector.shape_cast %25 : vector<3x16xf32> to vector<1x3x16xf32>
    %cst_12 = arith.constant dense<0xFF800000> : vector<1xf32>
    %31 = vector.multi_reduction <maximumf>, %30, %cst_12 [1, 2] : vector<1x3x16xf32> to vector<1xf32>
    %32 = vector.shape_cast %31 : vector<1xf32> to vector<1x1x1xf32>
    %33 = vector.extract %32[0, 0, 0] : f32 from vector<1x1x1xf32>
    %34 = arith.subf %33, %29 : f32
    %cst_13 = arith.constant 0.000000e+00 : f32
    %35 = arith.cmpf oeq, %34, %cst_13 : f32
    %cst_14 = arith.constant 1.000000e+00 : f32
    %36 = arith.select %35, %cst_14, %34 : f32
    %37 = vector.broadcast %29 : f32 to vector<3x16xf32>
    %38 = arith.subf %25, %37 : vector<3x16xf32>
    %cst_15 = arith.constant 2.550000e+02 : f32
    %39 = arith.divf %cst_15, %36 : f32
    %40 = vector.broadcast %39 : f32 to vector<3x16xf32>
    %41 = arith.mulf %38, %40 : vector<3x16xf32>
    %42 = math.roundeven %41 : vector<3x16xf32>
    %cst_16 = arith.constant 0.00392156886 : f32
    %43 = arith.mulf %36, %cst_16 : f32
    %44 = vector.broadcast %43 : f32 to vector<3x16xf32>
    %45 = arith.mulf %42, %44 : vector<3x16xf32>
    %46 = vector.broadcast %29 : f32 to vector<3x16xf32>
    %47 = arith.addf %45, %46 : vector<3x16xf32>
    %c0_17 = arith.constant 0 : index
    %c0_18 = arith.constant 0 : index
    %c0_19 = arith.constant 0 : index
    %48 = vector.load %arg5[%c0_17, %c0_18, %c0_19] : memref<1x3x16xf32, #tpu.memory_space<vmem>>, vector<1x3x16xf32>
    %49 = vector.shape_cast %48 : vector<1x3x16xf32> to vector<3x16xf32>
    %50 = vector.shape_cast %47 : vector<3x16xf32> to vector<1x3x16xf32>
    tpu.vector_store %arg5[%c0_17, %c0_18, %c0_19], %50 {strides = array<i32>} : memref<1x3x16xf32, #tpu.memory_space<vmem>>, vector<1x3x16xf32>,
    return
  }
  func.func @transform_0(%arg0: i32) -> (i32, i32, i32) {
    %c0_i32 = arith.constant 0 : i32
    %c0_i32_0 = arith.constant 0 : i32
    %c0_i32_1 = arith.constant 0 : i32
    return %arg0, %c0_i32, %c0_i32_0 : i32, i32, i32
  }
  func.func @transform_1(%arg0: i32) -> (i32, i32) {
    %c0_i32 = arith.constant 0 : i32
    %c0_i32_0 = arith.constant 0 : i32
    %c0_i32_1 = arith.constant 0 : i32
    return %c0_i32, %c0_i32_0 : i32, i32
  }
  func.func @transform_2(%arg0: i32) -> (i32, i32) {
    %c0_i32 = arith.constant 0 : i32
    %c0_i32_0 = arith.constant 0 : i32
    %c0_i32_1 = arith.constant 0 : i32
    return %c0_i32, %c0_i32_0 : i32, i32
  }
  func.func @transform_3(%arg0: i32) -> i32 {
    %c0_i32 = arith.constant 0 : i32
    %c0_i32_0 = arith.constant 0 : i32
    return %c0_i32 : i32
  }
  func.func @transform_4(%arg0: i32) -> (i32, i32, i32) {
    %c0_i32 = arith.constant 0 : i32
    %c0_i32_0 = arith.constant 0 : i32
    %c0_i32_1 = arith.constant 0 : i32
    return %arg0, %c0_i32, %c0_i32_0 : i32, i32, i32
  }
}

module attributes {stable_mosaic.version = 11 : i64} {
  func.func @_conv_taps_kernel(%arg0: i32, %arg1: memref<1x3x128xf32, #tpu.memory_space<vmem>>, %arg2: memref<1x3x128xf32, #tpu.memory_space<vmem>>, %arg3: memref<9x32x3xf32, #tpu.memory_space<vmem>>, %arg4: memref<32x1xf32, #tpu.memory_space<vmem>>, %arg5: memref<32x128xf32, #tpu.memory_space<vmem>>) attributes {dimension_semantics = [#tpu.dimension_semantics<parallel>], iteration_bounds = array<i64: 1>, scalar_prefetch = 0 : i64, scratch_operands = 0 : i64, tpu.core_type = #tpu.core_type<tc>, window_params = [{transform_indices = @transform_0, window_bounds = array<i64: 1, 3, 128>}, {transform_indices = @transform_1, window_bounds = array<i64: 1, 3, 128>}, {pipeline_mode = #tpu.pipeline_mode<synchronous>, transform_indices = @transform_2, window_bounds = array<i64: 9, 32, 3>}, {pipeline_mode = #tpu.pipeline_mode<synchronous>, transform_indices = @transform_3, window_bounds = array<i64: 32, 1>}, {transform_indices = @transform_4, window_bounds = array<i64: 32, 128>}]} {
    %c0 = arith.constant 0 : index
    %c0_0 = arith.constant 0 : index
    %c0_1 = arith.constant 0 : index
    %0 = vector.load %arg1[%c0, %c0_0, %c0_1] : memref<1x3x128xf32, #tpu.memory_space<vmem>>, vector<1x3x128xf32>
    %1 = vector.shape_cast %0 : vector<1x3x128xf32> to vector<3x128xf32>
    %c0_2 = arith.constant 0 : index
    %c0_3 = arith.constant 0 : index
    %c0_4 = arith.constant 0 : index
    %2 = vector.load %arg2[%c0_2, %c0_3, %c0_4] : memref<1x3x128xf32, #tpu.memory_space<vmem>>, vector<1x3x128xf32>
    %3 = vector.shape_cast %2 : vector<1x3x128xf32> to vector<3x128xf32>
    %4 = tpu.concatenate %1, %3 in 1 : vector<3x128xf32>, vector<3x128xf32> -> vector<3x256xf32>
    %c0_5 = arith.constant 0 : index
    %c0_6 = arith.constant 0 : index
    %c0_7 = arith.constant 0 : index
    %5 = vector.load %arg3[%c0_5, %c0_6, %c0_7] : memref<9x32x3xf32, #tpu.memory_space<vmem>>, vector<1x32x3xf32>
    %6 = vector.shape_cast %5 : vector<1x32x3xf32> to vector<32x3xf32>
    %7 = vector.extract_strided_slice %4 {offsets = [0, 0], sizes = [3, 128], strides = [1, 1]} : vector<3x256xf32> to vector<3x128xf32>
    %cst = arith.constant dense<0.000000e+00> : vector<32x128xf32>
    %8 = tpu.matmul %6, %7, %cst {dimension_numbers = #tpu.dot_dimension_numbers<[1], [0], [0], [1], [0, 0, 1, 1], [], []>} : vector<32x3xf32>, vector<3x128xf32>, vector<32x128xf32> -> vector<32x128xf32>
    %c255_i32 = arith.constant 255 : i32
    %9 = tpu.dynamic_rotate %4 by %c255_i32 dim 1 : vector<3x256xf32>, i32 -> vector<3x256xf32>
    %c1 = arith.constant 1 : index
    %c0_8 = arith.constant 0 : index
    %c0_9 = arith.constant 0 : index
    %10 = vector.load %arg3[%c1, %c0_8, %c0_9] : memref<9x32x3xf32, #tpu.memory_space<vmem>>, vector<1x32x3xf32>
    %11 = vector.shape_cast %10 : vector<1x32x3xf32> to vector<32x3xf32>
    %12 = vector.extract_strided_slice %9 {offsets = [0, 0], sizes = [3, 128], strides = [1, 1]} : vector<3x256xf32> to vector<3x128xf32>
    %cst_10 = arith.constant dense<0.000000e+00> : vector<32x128xf32>
    %13 = tpu.matmul %11, %12, %cst_10 {dimension_numbers = #tpu.dot_dimension_numbers<[1], [0], [0], [1], [0, 0, 1, 1], [], []>} : vector<32x3xf32>, vector<3x128xf32>, vector<32x128xf32> -> vector<32x128xf32>
    %14 = arith.addf %8, %13 : vector<32x128xf32>
    %c254_i32 = arith.constant 254 : i32
    %15 = tpu.dynamic_rotate %4 by %c254_i32 dim 1 : vector<3x256xf32>, i32 -> vector<3x256xf32>
    %c2 = arith.constant 2 : index
    %c0_11 = arith.constant 0 : index
    %c0_12 = arith.constant 0 : index
    %16 = vector.load %arg3[%c2, %c0_11, %c0_12] : memref<9x32x3xf32, #tpu.memory_space<vmem>>, vector<1x32x3xf32>
    %17 = vector.shape_cast %16 : vector<1x32x3xf32> to vector<32x3xf32>
    %18 = vector.extract_strided_slice %15 {offsets = [0, 0], sizes = [3, 128], strides = [1, 1]} : vector<3x256xf32> to vector<3x128xf32>
    %cst_13 = arith.constant dense<0.000000e+00> : vector<32x128xf32>
    %19 = tpu.matmul %17, %18, %cst_13 {dimension_numbers = #tpu.dot_dimension_numbers<[1], [0], [0], [1], [0, 0, 1, 1], [], []>} : vector<32x3xf32>, vector<3x128xf32>, vector<32x128xf32> -> vector<32x128xf32>
    %20 = arith.addf %14, %19 : vector<32x128xf32>
    %c250_i32 = arith.constant 250 : i32
    %21 = tpu.dynamic_rotate %4 by %c250_i32 dim 1 : vector<3x256xf32>, i32 -> vector<3x256xf32>
    %c3 = arith.constant 3 : index
    %c0_14 = arith.constant 0 : index
    %c0_15 = arith.constant 0 : index
    %22 = vector.load %arg3[%c3, %c0_14, %c0_15] : memref<9x32x3xf32, #tpu.memory_space<vmem>>, vector<1x32x3xf32>
    %23 = vector.shape_cast %22 : vector<1x32x3xf32> to vector<32x3xf32>
    %24 = vector.extract_strided_slice %21 {offsets = [0, 0], sizes = [3, 128], strides = [1, 1]} : vector<3x256xf32> to vector<3x128xf32>
    %cst_16 = arith.constant dense<0.000000e+00> : vector<32x128xf32>
    %25 = tpu.matmul %23, %24, %cst_16 {dimension_numbers = #tpu.dot_dimension_numbers<[1], [0], [0], [1], [0, 0, 1, 1], [], []>} : vector<32x3xf32>, vector<3x128xf32>, vector<32x128xf32> -> vector<32x128xf32>
    %26 = arith.addf %20, %25 : vector<32x128xf32>
    %c249_i32 = arith.constant 249 : i32
    %27 = tpu.dynamic_rotate %4 by %c249_i32 dim 1 : vector<3x256xf32>, i32 -> vector<3x256xf32>
    %c4 = arith.constant 4 : index
    %c0_17 = arith.constant 0 : index
    %c0_18 = arith.constant 0 : index
    %28 = vector.load %arg3[%c4, %c0_17, %c0_18] : memref<9x32x3xf32, #tpu.memory_space<vmem>>, vector<1x32x3xf32>
    %29 = vector.shape_cast %28 : vector<1x32x3xf32> to vector<32x3xf32>
    %30 = vector.extract_strided_slice %27 {offsets = [0, 0], sizes = [3, 128], strides = [1, 1]} : vector<3x256xf32> to vector<3x128xf32>
    %cst_19 = arith.constant dense<0.000000e+00> : vector<32x128xf32>
    %31 = tpu.matmul %29, %30, %cst_19 {dimension_numbers = #tpu.dot_dimension_numbers<[1], [0], [0], [1], [0, 0, 1, 1], [], []>} : vector<32x3xf32>, vector<3x128xf32>, vector<32x128xf32> -> vector<32x128xf32>
    %32 = arith.addf %26, %31 : vector<32x128xf32>
    %c248_i32 = arith.constant 248 : i32
    %33 = tpu.dynamic_rotate %4 by %c248_i32 dim 1 : vector<3x256xf32>, i32 -> vector<3x256xf32>
    %c5 = arith.constant 5 : index
    %c0_20 = arith.constant 0 : index
    %c0_21 = arith.constant 0 : index
    %34 = vector.load %arg3[%c5, %c0_20, %c0_21] : memref<9x32x3xf32, #tpu.memory_space<vmem>>, vector<1x32x3xf32>
    %35 = vector.shape_cast %34 : vector<1x32x3xf32> to vector<32x3xf32>
    %36 = vector.extract_strided_slice %33 {offsets = [0, 0], sizes = [3, 128], strides = [1, 1]} : vector<3x256xf32> to vector<3x128xf32>
    %cst_22 = arith.constant dense<0.000000e+00> : vector<32x128xf32>
    %37 = tpu.matmul %35, %36, %cst_22 {dimension_numbers = #tpu.dot_dimension_numbers<[1], [0], [0], [1], [0, 0, 1, 1], [], []>} : vector<32x3xf32>, vector<3x128xf32>, vector<32x128xf32> -> vector<32x128xf32>
    %38 = arith.addf %32, %37 : vector<32x128xf32>
    %c244_i32 = arith.constant 244 : i32
    %39 = tpu.dynamic_rotate %4 by %c244_i32 dim 1 : vector<3x256xf32>, i32 -> vector<3x256xf32>
    %c6 = arith.constant 6 : index
    %c0_23 = arith.constant 0 : index
    %c0_24 = arith.constant 0 : index
    %40 = vector.load %arg3[%c6, %c0_23, %c0_24] : memref<9x32x3xf32, #tpu.memory_space<vmem>>, vector<1x32x3xf32>
    %41 = vector.shape_cast %40 : vector<1x32x3xf32> to vector<32x3xf32>
    %42 = vector.extract_strided_slice %39 {offsets = [0, 0], sizes = [3, 128], strides = [1, 1]} : vector<3x256xf32> to vector<3x128xf32>
    %cst_25 = arith.constant dense<0.000000e+00> : vector<32x128xf32>
    %43 = tpu.matmul %41, %42, %cst_25 {dimension_numbers = #tpu.dot_dimension_numbers<[1], [0], [0], [1], [0, 0, 1, 1], [], []>} : vector<32x3xf32>, vector<3x128xf32>, vector<32x128xf32> -> vector<32x128xf32>
    %44 = arith.addf %38, %43 : vector<32x128xf32>
    %c243_i32 = arith.constant 243 : i32
    %45 = tpu.dynamic_rotate %4 by %c243_i32 dim 1 : vector<3x256xf32>, i32 -> vector<3x256xf32>
    %c7 = arith.constant 7 : index
    %c0_26 = arith.constant 0 : index
    %c0_27 = arith.constant 0 : index
    %46 = vector.load %arg3[%c7, %c0_26, %c0_27] : memref<9x32x3xf32, #tpu.memory_space<vmem>>, vector<1x32x3xf32>
    %47 = vector.shape_cast %46 : vector<1x32x3xf32> to vector<32x3xf32>
    %48 = vector.extract_strided_slice %45 {offsets = [0, 0], sizes = [3, 128], strides = [1, 1]} : vector<3x256xf32> to vector<3x128xf32>
    %cst_28 = arith.constant dense<0.000000e+00> : vector<32x128xf32>
    %49 = tpu.matmul %47, %48, %cst_28 {dimension_numbers = #tpu.dot_dimension_numbers<[1], [0], [0], [1], [0, 0, 1, 1], [], []>} : vector<32x3xf32>, vector<3x128xf32>, vector<32x128xf32> -> vector<32x128xf32>
    %50 = arith.addf %44, %49 : vector<32x128xf32>
    %c242_i32 = arith.constant 242 : i32
    %51 = tpu.dynamic_rotate %4 by %c242_i32 dim 1 : vector<3x256xf32>, i32 -> vector<3x256xf32>
    %c8 = arith.constant 8 : index
    %c0_29 = arith.constant 0 : index
    %c0_30 = arith.constant 0 : index
    %52 = vector.load %arg3[%c8, %c0_29, %c0_30] : memref<9x32x3xf32, #tpu.memory_space<vmem>>, vector<1x32x3xf32>
    %53 = vector.shape_cast %52 : vector<1x32x3xf32> to vector<32x3xf32>
    %54 = vector.extract_strided_slice %51 {offsets = [0, 0], sizes = [3, 128], strides = [1, 1]} : vector<3x256xf32> to vector<3x128xf32>
    %cst_31 = arith.constant dense<0.000000e+00> : vector<32x128xf32>
    %55 = tpu.matmul %53, %54, %cst_31 {dimension_numbers = #tpu.dot_dimension_numbers<[1], [0], [0], [1], [0, 0, 1, 1], [], []>} : vector<32x3xf32>, vector<3x128xf32>, vector<32x128xf32> -> vector<32x128xf32>
    %56 = arith.addf %50, %55 : vector<32x128xf32>
    %c0_32 = arith.constant 0 : index
    %c0_33 = arith.constant 0 : index
    %57 = vector.load %arg4[%c0_32, %c0_33] : memref<32x1xf32, #tpu.memory_space<vmem>>, vector<32x1xf32>
    %58 = vector.broadcast %57 : vector<32x1xf32> to vector<32x128xf32>
    %59 = arith.addf %56, %58 : vector<32x128xf32>
    %cst_34 = arith.constant 0.000000e+00 : f32
    %60 = vector.broadcast %cst_34 : f32 to vector<32x128xf32>
    %61 = arith.maximumf %59, %60 : vector<32x128xf32>
    %c0_35 = arith.constant 0 : index
    %c0_36 = arith.constant 0 : index
    %62 = vector.load %arg5[%c0_35, %c0_36] : memref<32x128xf32, #tpu.memory_space<vmem>>, vector<32x128xf32>
    tpu.vector_store %arg5[%c0_35, %c0_36], %61 {strides = array<i32>} : memref<32x128xf32, #tpu.memory_space<vmem>>, vector<32x128xf32>,
    return
  }
  func.func @transform_0(%arg0: i32) -> (i32, i32, i32) {
    %c0_i32 = arith.constant 0 : i32
    %c0_i32_0 = arith.constant 0 : i32
    %c0_i32_1 = arith.constant 0 : i32
    return %c0_i32, %c0_i32_0, %arg0 : i32, i32, i32
  }
  func.func @transform_1(%arg0: i32) -> (i32, i32, i32) {
    %c1_i32 = arith.constant 1 : i32
    %0 = arith.addi %arg0, %c1_i32 : i32
    %c1_i32_0 = arith.constant 1 : i32
    %1 = arith.muli %0, %c1_i32_0 : i32
    %c0_i32 = arith.constant 0 : i32
    %c0_i32_1 = arith.constant 0 : i32
    %c0_i32_2 = arith.constant 0 : i32
    return %c0_i32, %c0_i32_1, %1 : i32, i32, i32
  }
  func.func @transform_2(%arg0: i32) -> (i32, i32, i32) {
    %c0_i32 = arith.constant 0 : i32
    %c0_i32_0 = arith.constant 0 : i32
    %c0_i32_1 = arith.constant 0 : i32
    %c0_i32_2 = arith.constant 0 : i32
    return %c0_i32, %c0_i32_0, %c0_i32_1 : i32, i32, i32
  }
  func.func @transform_3(%arg0: i32) -> (i32, i32) {
    %c0_i32 = arith.constant 0 : i32
    %c0_i32_0 = arith.constant 0 : i32
    %c0_i32_1 = arith.constant 0 : i32
    return %c0_i32, %c0_i32_0 : i32, i32
  }
  func.func @transform_4(%arg0: i32) -> (i32, i32) {
    %c0_i32 = arith.constant 0 : i32
    %c0_i32_0 = arith.constant 0 : i32
    return %c0_i32, %arg0 : i32, i32
  }
}

module attributes {stable_mosaic.version = 11 : i64} {
  func.func @_conv_taps_kernel(%arg0: i32, %arg1: memref<1x32x128xf32, #tpu.memory_space<vmem>>, %arg2: memref<1x32x128xf32, #tpu.memory_space<vmem>>, %arg3: memref<9x32x32xf32, #tpu.memory_space<vmem>>, %arg4: memref<32x1xf32, #tpu.memory_space<vmem>>, %arg5: memref<32x128xf32, #tpu.memory_space<vmem>>) attributes {dimension_semantics = [#tpu.dimension_semantics<parallel>], iteration_bounds = array<i64: 2>, scalar_prefetch = 0 : i64, scratch_operands = 0 : i64, tpu.core_type = #tpu.core_type<tc>, window_params = [{transform_indices = @transform_0, window_bounds = array<i64: 1, 32, 128>}, {transform_indices = @transform_1, window_bounds = array<i64: 1, 32, 128>}, {pipeline_mode = #tpu.pipeline_mode<synchronous>, transform_indices = @transform_2, window_bounds = array<i64: 9, 32, 32>}, {pipeline_mode = #tpu.pipeline_mode<synchronous>, transform_indices = @transform_3, window_bounds = array<i64: 32, 1>}, {transform_indices = @transform_4, window_bounds = array<i64: 32, 128>}]} {
    %c0 = arith.constant 0 : index
    %c0_0 = arith.constant 0 : index
    %c0_1 = arith.constant 0 : index
    %0 = vector.load %arg1[%c0, %c0_0, %c0_1] : memref<1x32x128xf32, #tpu.memory_space<vmem>>, vector<1x32x128xf32>
    %1 = vector.shape_cast %0 : vector<1x32x128xf32> to vector<32x128xf32>
    %c0_2 = arith.constant 0 : index
    %c0_3 = arith.constant 0 : index
    %c0_4 = arith.constant 0 : index
    %2 = vector.load %arg2[%c0_2, %c0_3, %c0_4] : memref<1x32x128xf32, #tpu.memory_space<vmem>>, vector<1x32x128xf32>
    %3 = vector.shape_cast %2 : vector<1x32x128xf32> to vector<32x128xf32>
    %4 = tpu.concatenate %1, %3 in 1 : vector<32x128xf32>, vector<32x128xf32> -> vector<32x256xf32>
    %c0_5 = arith.constant 0 : index
    %c0_6 = arith.constant 0 : index
    %c0_7 = arith.constant 0 : index
    %5 = vector.load %arg3[%c0_5, %c0_6, %c0_7] : memref<9x32x32xf32, #tpu.memory_space<vmem>>, vector<1x32x32xf32>
    %6 = vector.shape_cast %5 : vector<1x32x32xf32> to vector<32x32xf32>
    %7 = vector.extract_strided_slice %4 {offsets = [0, 0], sizes = [32, 128], strides = [1, 1]} : vector<32x256xf32> to vector<32x128xf32>
    %cst = arith.constant dense<0.000000e+00> : vector<32x128xf32>
    %8 = tpu.matmul %6, %7, %cst {dimension_numbers = #tpu.dot_dimension_numbers<[1], [0], [0], [1], [0, 0, 1, 1], [], []>} : vector<32x32xf32>, vector<32x128xf32>, vector<32x128xf32> -> vector<32x128xf32>
    %c255_i32 = arith.constant 255 : i32
    %9 = tpu.dynamic_rotate %4 by %c255_i32 dim 1 : vector<32x256xf32>, i32 -> vector<32x256xf32>
    %c1 = arith.constant 1 : index
    %c0_8 = arith.constant 0 : index
    %c0_9 = arith.constant 0 : index
    %10 = vector.load %arg3[%c1, %c0_8, %c0_9] : memref<9x32x32xf32, #tpu.memory_space<vmem>>, vector<1x32x32xf32>
    %11 = vector.shape_cast %10 : vector<1x32x32xf32> to vector<32x32xf32>
    %12 = vector.extract_strided_slice %9 {offsets = [0, 0], sizes = [32, 128], strides = [1, 1]} : vector<32x256xf32> to vector<32x128xf32>
    %cst_10 = arith.constant dense<0.000000e+00> : vector<32x128xf32>
    %13 = tpu.matmul %11, %12, %cst_10 {dimension_numbers = #tpu.dot_dimension_numbers<[1], [0], [0], [1], [0, 0, 1, 1], [], []>} : vector<32x32xf32>, vector<32x128xf32>, vector<32x128xf32> -> vector<32x128xf32>
    %14 = arith.addf %8, %13 : vector<32x128xf32>
    %c254_i32 = arith.constant 254 : i32
    %15 = tpu.dynamic_rotate %4 by %c254_i32 dim 1 : vector<32x256xf32>, i32 -> vector<32x256xf32>
    %c2 = arith.constant 2 : index
    %c0_11 = arith.constant 0 : index
    %c0_12 = arith.constant 0 : index
    %16 = vector.load %arg3[%c2, %c0_11, %c0_12] : memref<9x32x32xf32, #tpu.memory_space<vmem>>, vector<1x32x32xf32>
    %17 = vector.shape_cast %16 : vector<1x32x32xf32> to vector<32x32xf32>
    %18 = vector.extract_strided_slice %15 {offsets = [0, 0], sizes = [32, 128], strides = [1, 1]} : vector<32x256xf32> to vector<32x128xf32>
    %cst_13 = arith.constant dense<0.000000e+00> : vector<32x128xf32>
    %19 = tpu.matmul %17, %18, %cst_13 {dimension_numbers = #tpu.dot_dimension_numbers<[1], [0], [0], [1], [0, 0, 1, 1], [], []>} : vector<32x32xf32>, vector<32x128xf32>, vector<32x128xf32> -> vector<32x128xf32>
    %20 = arith.addf %14, %19 : vector<32x128xf32>
    %c246_i32 = arith.constant 246 : i32
    %21 = tpu.dynamic_rotate %4 by %c246_i32 dim 1 : vector<32x256xf32>, i32 -> vector<32x256xf32>
    %c3 = arith.constant 3 : index
    %c0_14 = arith.constant 0 : index
    %c0_15 = arith.constant 0 : index
    %22 = vector.load %arg3[%c3, %c0_14, %c0_15] : memref<9x32x32xf32, #tpu.memory_space<vmem>>, vector<1x32x32xf32>
    %23 = vector.shape_cast %22 : vector<1x32x32xf32> to vector<32x32xf32>
    %24 = vector.extract_strided_slice %21 {offsets = [0, 0], sizes = [32, 128], strides = [1, 1]} : vector<32x256xf32> to vector<32x128xf32>
    %cst_16 = arith.constant dense<0.000000e+00> : vector<32x128xf32>
    %25 = tpu.matmul %23, %24, %cst_16 {dimension_numbers = #tpu.dot_dimension_numbers<[1], [0], [0], [1], [0, 0, 1, 1], [], []>} : vector<32x32xf32>, vector<32x128xf32>, vector<32x128xf32> -> vector<32x128xf32>
    %26 = arith.addf %20, %25 : vector<32x128xf32>
    %c245_i32 = arith.constant 245 : i32
    %27 = tpu.dynamic_rotate %4 by %c245_i32 dim 1 : vector<32x256xf32>, i32 -> vector<32x256xf32>
    %c4 = arith.constant 4 : index
    %c0_17 = arith.constant 0 : index
    %c0_18 = arith.constant 0 : index
    %28 = vector.load %arg3[%c4, %c0_17, %c0_18] : memref<9x32x32xf32, #tpu.memory_space<vmem>>, vector<1x32x32xf32>
    %29 = vector.shape_cast %28 : vector<1x32x32xf32> to vector<32x32xf32>
    %30 = vector.extract_strided_slice %27 {offsets = [0, 0], sizes = [32, 128], strides = [1, 1]} : vector<32x256xf32> to vector<32x128xf32>
    %cst_19 = arith.constant dense<0.000000e+00> : vector<32x128xf32>
    %31 = tpu.matmul %29, %30, %cst_19 {dimension_numbers = #tpu.dot_dimension_numbers<[1], [0], [0], [1], [0, 0, 1, 1], [], []>} : vector<32x32xf32>, vector<32x128xf32>, vector<32x128xf32> -> vector<32x128xf32>
    %32 = arith.addf %26, %31 : vector<32x128xf32>
    %c244_i32 = arith.constant 244 : i32
    %33 = tpu.dynamic_rotate %4 by %c244_i32 dim 1 : vector<32x256xf32>, i32 -> vector<32x256xf32>
    %c5 = arith.constant 5 : index
    %c0_20 = arith.constant 0 : index
    %c0_21 = arith.constant 0 : index
    %34 = vector.load %arg3[%c5, %c0_20, %c0_21] : memref<9x32x32xf32, #tpu.memory_space<vmem>>, vector<1x32x32xf32>
    %35 = vector.shape_cast %34 : vector<1x32x32xf32> to vector<32x32xf32>
    %36 = vector.extract_strided_slice %33 {offsets = [0, 0], sizes = [32, 128], strides = [1, 1]} : vector<32x256xf32> to vector<32x128xf32>
    %cst_22 = arith.constant dense<0.000000e+00> : vector<32x128xf32>
    %37 = tpu.matmul %35, %36, %cst_22 {dimension_numbers = #tpu.dot_dimension_numbers<[1], [0], [0], [1], [0, 0, 1, 1], [], []>} : vector<32x32xf32>, vector<32x128xf32>, vector<32x128xf32> -> vector<32x128xf32>
    %38 = arith.addf %32, %37 : vector<32x128xf32>
    %c236_i32 = arith.constant 236 : i32
    %39 = tpu.dynamic_rotate %4 by %c236_i32 dim 1 : vector<32x256xf32>, i32 -> vector<32x256xf32>
    %c6 = arith.constant 6 : index
    %c0_23 = arith.constant 0 : index
    %c0_24 = arith.constant 0 : index
    %40 = vector.load %arg3[%c6, %c0_23, %c0_24] : memref<9x32x32xf32, #tpu.memory_space<vmem>>, vector<1x32x32xf32>
    %41 = vector.shape_cast %40 : vector<1x32x32xf32> to vector<32x32xf32>
    %42 = vector.extract_strided_slice %39 {offsets = [0, 0], sizes = [32, 128], strides = [1, 1]} : vector<32x256xf32> to vector<32x128xf32>
    %cst_25 = arith.constant dense<0.000000e+00> : vector<32x128xf32>
    %43 = tpu.matmul %41, %42, %cst_25 {dimension_numbers = #tpu.dot_dimension_numbers<[1], [0], [0], [1], [0, 0, 1, 1], [], []>} : vector<32x32xf32>, vector<32x128xf32>, vector<32x128xf32> -> vector<32x128xf32>
    %44 = arith.addf %38, %43 : vector<32x128xf32>
    %c235_i32 = arith.constant 235 : i32
    %45 = tpu.dynamic_rotate %4 by %c235_i32 dim 1 : vector<32x256xf32>, i32 -> vector<32x256xf32>
    %c7 = arith.constant 7 : index
    %c0_26 = arith.constant 0 : index
    %c0_27 = arith.constant 0 : index
    %46 = vector.load %arg3[%c7, %c0_26, %c0_27] : memref<9x32x32xf32, #tpu.memory_space<vmem>>, vector<1x32x32xf32>
    %47 = vector.shape_cast %46 : vector<1x32x32xf32> to vector<32x32xf32>
    %48 = vector.extract_strided_slice %45 {offsets = [0, 0], sizes = [32, 128], strides = [1, 1]} : vector<32x256xf32> to vector<32x128xf32>
    %cst_28 = arith.constant dense<0.000000e+00> : vector<32x128xf32>
    %49 = tpu.matmul %47, %48, %cst_28 {dimension_numbers = #tpu.dot_dimension_numbers<[1], [0], [0], [1], [0, 0, 1, 1], [], []>} : vector<32x32xf32>, vector<32x128xf32>, vector<32x128xf32> -> vector<32x128xf32>
    %50 = arith.addf %44, %49 : vector<32x128xf32>
    %c234_i32 = arith.constant 234 : i32
    %51 = tpu.dynamic_rotate %4 by %c234_i32 dim 1 : vector<32x256xf32>, i32 -> vector<32x256xf32>
    %c8 = arith.constant 8 : index
    %c0_29 = arith.constant 0 : index
    %c0_30 = arith.constant 0 : index
    %52 = vector.load %arg3[%c8, %c0_29, %c0_30] : memref<9x32x32xf32, #tpu.memory_space<vmem>>, vector<1x32x32xf32>
    %53 = vector.shape_cast %52 : vector<1x32x32xf32> to vector<32x32xf32>
    %54 = vector.extract_strided_slice %51 {offsets = [0, 0], sizes = [32, 128], strides = [1, 1]} : vector<32x256xf32> to vector<32x128xf32>
    %cst_31 = arith.constant dense<0.000000e+00> : vector<32x128xf32>
    %55 = tpu.matmul %53, %54, %cst_31 {dimension_numbers = #tpu.dot_dimension_numbers<[1], [0], [0], [1], [0, 0, 1, 1], [], []>} : vector<32x32xf32>, vector<32x128xf32>, vector<32x128xf32> -> vector<32x128xf32>
    %56 = arith.addf %50, %55 : vector<32x128xf32>
    %c0_32 = arith.constant 0 : index
    %c0_33 = arith.constant 0 : index
    %57 = vector.load %arg4[%c0_32, %c0_33] : memref<32x1xf32, #tpu.memory_space<vmem>>, vector<32x1xf32>
    %58 = vector.broadcast %57 : vector<32x1xf32> to vector<32x128xf32>
    %59 = arith.addf %56, %58 : vector<32x128xf32>
    %cst_34 = arith.constant 0.000000e+00 : f32
    %60 = vector.broadcast %cst_34 : f32 to vector<32x128xf32>
    %61 = arith.maximumf %59, %60 : vector<32x128xf32>
    %c0_35 = arith.constant 0 : index
    %c0_36 = arith.constant 0 : index
    %62 = vector.load %arg5[%c0_35, %c0_36] : memref<32x128xf32, #tpu.memory_space<vmem>>, vector<32x128xf32>
    tpu.vector_store %arg5[%c0_35, %c0_36], %61 {strides = array<i32>} : memref<32x128xf32, #tpu.memory_space<vmem>>, vector<32x128xf32>,
    return
  }
  func.func @transform_0(%arg0: i32) -> (i32, i32, i32) {
    %c0_i32 = arith.constant 0 : i32
    %c0_i32_0 = arith.constant 0 : i32
    %c0_i32_1 = arith.constant 0 : i32
    return %c0_i32, %c0_i32_0, %arg0 : i32, i32, i32
  }
  func.func @transform_1(%arg0: i32) -> (i32, i32, i32) {
    %c1_i32 = arith.constant 1 : i32
    %0 = arith.addi %arg0, %c1_i32 : i32
    %c1_i32_0 = arith.constant 1 : i32
    %1 = arith.muli %0, %c1_i32_0 : i32
    %c0_i32 = arith.constant 0 : i32
    %c0_i32_1 = arith.constant 0 : i32
    %c0_i32_2 = arith.constant 0 : i32
    return %c0_i32, %c0_i32_1, %1 : i32, i32, i32
  }
  func.func @transform_2(%arg0: i32) -> (i32, i32, i32) {
    %c0_i32 = arith.constant 0 : i32
    %c0_i32_0 = arith.constant 0 : i32
    %c0_i32_1 = arith.constant 0 : i32
    %c0_i32_2 = arith.constant 0 : i32
    return %c0_i32, %c0_i32_0, %c0_i32_1 : i32, i32, i32
  }
  func.func @transform_3(%arg0: i32) -> (i32, i32) {
    %c0_i32 = arith.constant 0 : i32
    %c0_i32_0 = arith.constant 0 : i32
    %c0_i32_1 = arith.constant 0 : i32
    return %c0_i32, %c0_i32_0 : i32, i32
  }
  func.func @transform_4(%arg0: i32) -> (i32, i32) {
    %c0_i32 = arith.constant 0 : i32
    %c0_i32_0 = arith.constant 0 : i32
    return %c0_i32, %arg0 : i32, i32
  }
}

module attributes {stable_mosaic.version = 11 : i64} {
  func.func @_conv_taps_kernel(%arg0: i32, %arg1: memref<1x32x128xf32, #tpu.memory_space<vmem>>, %arg2: memref<1x32x128xf32, #tpu.memory_space<vmem>>, %arg3: memref<9x16x32xf32, #tpu.memory_space<vmem>>, %arg4: memref<16x1xf32, #tpu.memory_space<vmem>>, %arg5: memref<16x128xf32, #tpu.memory_space<vmem>>) attributes {dimension_semantics = [#tpu.dimension_semantics<parallel>], iteration_bounds = array<i64: 2>, scalar_prefetch = 0 : i64, scratch_operands = 0 : i64, tpu.core_type = #tpu.core_type<tc>, window_params = [{transform_indices = @transform_0, window_bounds = array<i64: 1, 32, 128>}, {transform_indices = @transform_1, window_bounds = array<i64: 1, 32, 128>}, {pipeline_mode = #tpu.pipeline_mode<synchronous>, transform_indices = @transform_2, window_bounds = array<i64: 9, 16, 32>}, {pipeline_mode = #tpu.pipeline_mode<synchronous>, transform_indices = @transform_3, window_bounds = array<i64: 16, 1>}, {transform_indices = @transform_4, window_bounds = array<i64: 16, 128>}]} {
    %c0 = arith.constant 0 : index
    %c0_0 = arith.constant 0 : index
    %c0_1 = arith.constant 0 : index
    %0 = vector.load %arg1[%c0, %c0_0, %c0_1] : memref<1x32x128xf32, #tpu.memory_space<vmem>>, vector<1x32x128xf32>
    %1 = vector.shape_cast %0 : vector<1x32x128xf32> to vector<32x128xf32>
    %c0_2 = arith.constant 0 : index
    %c0_3 = arith.constant 0 : index
    %c0_4 = arith.constant 0 : index
    %2 = vector.load %arg2[%c0_2, %c0_3, %c0_4] : memref<1x32x128xf32, #tpu.memory_space<vmem>>, vector<1x32x128xf32>
    %3 = vector.shape_cast %2 : vector<1x32x128xf32> to vector<32x128xf32>
    %4 = tpu.concatenate %1, %3 in 1 : vector<32x128xf32>, vector<32x128xf32> -> vector<32x256xf32>
    %c0_5 = arith.constant 0 : index
    %c0_6 = arith.constant 0 : index
    %c0_7 = arith.constant 0 : index
    %5 = vector.load %arg3[%c0_5, %c0_6, %c0_7] : memref<9x16x32xf32, #tpu.memory_space<vmem>>, vector<1x16x32xf32>
    %6 = vector.shape_cast %5 : vector<1x16x32xf32> to vector<16x32xf32>
    %7 = vector.extract_strided_slice %4 {offsets = [0, 0], sizes = [32, 128], strides = [1, 1]} : vector<32x256xf32> to vector<32x128xf32>
    %cst = arith.constant dense<0.000000e+00> : vector<16x128xf32>
    %8 = tpu.matmul %6, %7, %cst {dimension_numbers = #tpu.dot_dimension_numbers<[1], [0], [0], [1], [0, 0, 1, 1], [], []>} : vector<16x32xf32>, vector<32x128xf32>, vector<16x128xf32> -> vector<16x128xf32>
    %c255_i32 = arith.constant 255 : i32
    %9 = tpu.dynamic_rotate %4 by %c255_i32 dim 1 : vector<32x256xf32>, i32 -> vector<32x256xf32>
    %c1 = arith.constant 1 : index
    %c0_8 = arith.constant 0 : index
    %c0_9 = arith.constant 0 : index
    %10 = vector.load %arg3[%c1, %c0_8, %c0_9] : memref<9x16x32xf32, #tpu.memory_space<vmem>>, vector<1x16x32xf32>
    %11 = vector.shape_cast %10 : vector<1x16x32xf32> to vector<16x32xf32>
    %12 = vector.extract_strided_slice %9 {offsets = [0, 0], sizes = [32, 128], strides = [1, 1]} : vector<32x256xf32> to vector<32x128xf32>
    %cst_10 = arith.constant dense<0.000000e+00> : vector<16x128xf32>
    %13 = tpu.matmul %11, %12, %cst_10 {dimension_numbers = #tpu.dot_dimension_numbers<[1], [0], [0], [1], [0, 0, 1, 1], [], []>} : vector<16x32xf32>, vector<32x128xf32>, vector<16x128xf32> -> vector<16x128xf32>
    %14 = arith.addf %8, %13 : vector<16x128xf32>
    %c254_i32 = arith.constant 254 : i32
    %15 = tpu.dynamic_rotate %4 by %c254_i32 dim 1 : vector<32x256xf32>, i32 -> vector<32x256xf32>
    %c2 = arith.constant 2 : index
    %c0_11 = arith.constant 0 : index
    %c0_12 = arith.constant 0 : index
    %16 = vector.load %arg3[%c2, %c0_11, %c0_12] : memref<9x16x32xf32, #tpu.memory_space<vmem>>, vector<1x16x32xf32>
    %17 = vector.shape_cast %16 : vector<1x16x32xf32> to vector<16x32xf32>
    %18 = vector.extract_strided_slice %15 {offsets = [0, 0], sizes = [32, 128], strides = [1, 1]} : vector<32x256xf32> to vector<32x128xf32>
    %cst_13 = arith.constant dense<0.000000e+00> : vector<16x128xf32>
    %19 = tpu.matmul %17, %18, %cst_13 {dimension_numbers = #tpu.dot_dimension_numbers<[1], [0], [0], [1], [0, 0, 1, 1], [], []>} : vector<16x32xf32>, vector<32x128xf32>, vector<16x128xf32> -> vector<16x128xf32>
    %20 = arith.addf %14, %19 : vector<16x128xf32>
    %c246_i32 = arith.constant 246 : i32
    %21 = tpu.dynamic_rotate %4 by %c246_i32 dim 1 : vector<32x256xf32>, i32 -> vector<32x256xf32>
    %c3 = arith.constant 3 : index
    %c0_14 = arith.constant 0 : index
    %c0_15 = arith.constant 0 : index
    %22 = vector.load %arg3[%c3, %c0_14, %c0_15] : memref<9x16x32xf32, #tpu.memory_space<vmem>>, vector<1x16x32xf32>
    %23 = vector.shape_cast %22 : vector<1x16x32xf32> to vector<16x32xf32>
    %24 = vector.extract_strided_slice %21 {offsets = [0, 0], sizes = [32, 128], strides = [1, 1]} : vector<32x256xf32> to vector<32x128xf32>
    %cst_16 = arith.constant dense<0.000000e+00> : vector<16x128xf32>
    %25 = tpu.matmul %23, %24, %cst_16 {dimension_numbers = #tpu.dot_dimension_numbers<[1], [0], [0], [1], [0, 0, 1, 1], [], []>} : vector<16x32xf32>, vector<32x128xf32>, vector<16x128xf32> -> vector<16x128xf32>
    %26 = arith.addf %20, %25 : vector<16x128xf32>
    %c245_i32 = arith.constant 245 : i32
    %27 = tpu.dynamic_rotate %4 by %c245_i32 dim 1 : vector<32x256xf32>, i32 -> vector<32x256xf32>
    %c4 = arith.constant 4 : index
    %c0_17 = arith.constant 0 : index
    %c0_18 = arith.constant 0 : index
    %28 = vector.load %arg3[%c4, %c0_17, %c0_18] : memref<9x16x32xf32, #tpu.memory_space<vmem>>, vector<1x16x32xf32>
    %29 = vector.shape_cast %28 : vector<1x16x32xf32> to vector<16x32xf32>
    %30 = vector.extract_strided_slice %27 {offsets = [0, 0], sizes = [32, 128], strides = [1, 1]} : vector<32x256xf32> to vector<32x128xf32>
    %cst_19 = arith.constant dense<0.000000e+00> : vector<16x128xf32>
    %31 = tpu.matmul %29, %30, %cst_19 {dimension_numbers = #tpu.dot_dimension_numbers<[1], [0], [0], [1], [0, 0, 1, 1], [], []>} : vector<16x32xf32>, vector<32x128xf32>, vector<16x128xf32> -> vector<16x128xf32>
    %32 = arith.addf %26, %31 : vector<16x128xf32>
    %c244_i32 = arith.constant 244 : i32
    %33 = tpu.dynamic_rotate %4 by %c244_i32 dim 1 : vector<32x256xf32>, i32 -> vector<32x256xf32>
    %c5 = arith.constant 5 : index
    %c0_20 = arith.constant 0 : index
    %c0_21 = arith.constant 0 : index
    %34 = vector.load %arg3[%c5, %c0_20, %c0_21] : memref<9x16x32xf32, #tpu.memory_space<vmem>>, vector<1x16x32xf32>
    %35 = vector.shape_cast %34 : vector<1x16x32xf32> to vector<16x32xf32>
    %36 = vector.extract_strided_slice %33 {offsets = [0, 0], sizes = [32, 128], strides = [1, 1]} : vector<32x256xf32> to vector<32x128xf32>
    %cst_22 = arith.constant dense<0.000000e+00> : vector<16x128xf32>
    %37 = tpu.matmul %35, %36, %cst_22 {dimension_numbers = #tpu.dot_dimension_numbers<[1], [0], [0], [1], [0, 0, 1, 1], [], []>} : vector<16x32xf32>, vector<32x128xf32>, vector<16x128xf32> -> vector<16x128xf32>
    %38 = arith.addf %32, %37 : vector<16x128xf32>
    %c236_i32 = arith.constant 236 : i32
    %39 = tpu.dynamic_rotate %4 by %c236_i32 dim 1 : vector<32x256xf32>, i32 -> vector<32x256xf32>
    %c6 = arith.constant 6 : index
    %c0_23 = arith.constant 0 : index
    %c0_24 = arith.constant 0 : index
    %40 = vector.load %arg3[%c6, %c0_23, %c0_24] : memref<9x16x32xf32, #tpu.memory_space<vmem>>, vector<1x16x32xf32>
    %41 = vector.shape_cast %40 : vector<1x16x32xf32> to vector<16x32xf32>
    %42 = vector.extract_strided_slice %39 {offsets = [0, 0], sizes = [32, 128], strides = [1, 1]} : vector<32x256xf32> to vector<32x128xf32>
    %cst_25 = arith.constant dense<0.000000e+00> : vector<16x128xf32>
    %43 = tpu.matmul %41, %42, %cst_25 {dimension_numbers = #tpu.dot_dimension_numbers<[1], [0], [0], [1], [0, 0, 1, 1], [], []>} : vector<16x32xf32>, vector<32x128xf32>, vector<16x128xf32> -> vector<16x128xf32>
    %44 = arith.addf %38, %43 : vector<16x128xf32>
    %c235_i32 = arith.constant 235 : i32
    %45 = tpu.dynamic_rotate %4 by %c235_i32 dim 1 : vector<32x256xf32>, i32 -> vector<32x256xf32>
    %c7 = arith.constant 7 : index
    %c0_26 = arith.constant 0 : index
    %c0_27 = arith.constant 0 : index
    %46 = vector.load %arg3[%c7, %c0_26, %c0_27] : memref<9x16x32xf32, #tpu.memory_space<vmem>>, vector<1x16x32xf32>
    %47 = vector.shape_cast %46 : vector<1x16x32xf32> to vector<16x32xf32>
    %48 = vector.extract_strided_slice %45 {offsets = [0, 0], sizes = [32, 128], strides = [1, 1]} : vector<32x256xf32> to vector<32x128xf32>
    %cst_28 = arith.constant dense<0.000000e+00> : vector<16x128xf32>
    %49 = tpu.matmul %47, %48, %cst_28 {dimension_numbers = #tpu.dot_dimension_numbers<[1], [0], [0], [1], [0, 0, 1, 1], [], []>} : vector<16x32xf32>, vector<32x128xf32>, vector<16x128xf32> -> vector<16x128xf32>
    %50 = arith.addf %44, %49 : vector<16x128xf32>
    %c234_i32 = arith.constant 234 : i32
    %51 = tpu.dynamic_rotate %4 by %c234_i32 dim 1 : vector<32x256xf32>, i32 -> vector<32x256xf32>
    %c8 = arith.constant 8 : index
    %c0_29 = arith.constant 0 : index
    %c0_30 = arith.constant 0 : index
    %52 = vector.load %arg3[%c8, %c0_29, %c0_30] : memref<9x16x32xf32, #tpu.memory_space<vmem>>, vector<1x16x32xf32>
    %53 = vector.shape_cast %52 : vector<1x16x32xf32> to vector<16x32xf32>
    %54 = vector.extract_strided_slice %51 {offsets = [0, 0], sizes = [32, 128], strides = [1, 1]} : vector<32x256xf32> to vector<32x128xf32>
    %cst_31 = arith.constant dense<0.000000e+00> : vector<16x128xf32>
    %55 = tpu.matmul %53, %54, %cst_31 {dimension_numbers = #tpu.dot_dimension_numbers<[1], [0], [0], [1], [0, 0, 1, 1], [], []>} : vector<16x32xf32>, vector<32x128xf32>, vector<16x128xf32> -> vector<16x128xf32>
    %56 = arith.addf %50, %55 : vector<16x128xf32>
    %c0_32 = arith.constant 0 : index
    %c0_33 = arith.constant 0 : index
    %57 = vector.load %arg4[%c0_32, %c0_33] : memref<16x1xf32, #tpu.memory_space<vmem>>, vector<16x1xf32>
    %58 = vector.broadcast %57 : vector<16x1xf32> to vector<16x128xf32>
    %59 = arith.addf %56, %58 : vector<16x128xf32>
    %cst_34 = arith.constant 0.000000e+00 : f32
    %60 = vector.broadcast %cst_34 : f32 to vector<16x128xf32>
    %61 = arith.maximumf %59, %60 : vector<16x128xf32>
    %c0_35 = arith.constant 0 : index
    %c0_36 = arith.constant 0 : index
    %62 = vector.load %arg5[%c0_35, %c0_36] : memref<16x128xf32, #tpu.memory_space<vmem>>, vector<16x128xf32>
    tpu.vector_store %arg5[%c0_35, %c0_36], %61 {strides = array<i32>} : memref<16x128xf32, #tpu.memory_space<vmem>>, vector<16x128xf32>,
    return
  }
  func.func @transform_0(%arg0: i32) -> (i32, i32, i32) {
    %c0_i32 = arith.constant 0 : i32
    %c0_i32_0 = arith.constant 0 : i32
    %c0_i32_1 = arith.constant 0 : i32
    return %c0_i32, %c0_i32_0, %arg0 : i32, i32, i32
  }
  func.func @transform_1(%arg0: i32) -> (i32, i32, i32) {
    %c1_i32 = arith.constant 1 : i32
    %0 = arith.addi %arg0, %c1_i32 : i32
    %c1_i32_0 = arith.constant 1 : i32
    %1 = arith.muli %0, %c1_i32_0 : i32
    %c0_i32 = arith.constant 0 : i32
    %c0_i32_1 = arith.constant 0 : i32
    %c0_i32_2 = arith.constant 0 : i32
    return %c0_i32, %c0_i32_1, %1 : i32, i32, i32
  }
  func.func @transform_2(%arg0: i32) -> (i32, i32, i32) {
    %c0_i32 = arith.constant 0 : i32
    %c0_i32_0 = arith.constant 0 : i32
    %c0_i32_1 = arith.constant 0 : i32
    %c0_i32_2 = arith.constant 0 : i32
    return %c0_i32, %c0_i32_0, %c0_i32_1 : i32, i32, i32
  }
  func.func @transform_3(%arg0: i32) -> (i32, i32) {
    %c0_i32 = arith.constant 0 : i32
    %c0_i32_0 = arith.constant 0 : i32
    %c0_i32_1 = arith.constant 0 : i32
    return %c0_i32, %c0_i32_0 : i32, i32
  }
  func.func @transform_4(%arg0: i32) -> (i32, i32) {
    %c0_i32 = arith.constant 0 : i32
    %c0_i32_0 = arith.constant 0 : i32
    return %c0_i32, %arg0 : i32, i32
  }
}

module attributes {stable_mosaic.version = 11 : i64} {
  func.func @_conv_taps_kernel(%arg0: i32, %arg1: memref<1x16x384xf32, #tpu.memory_space<vmem>>, %arg2: memref<1x16x128xf32, #tpu.memory_space<vmem>>, %arg3: memref<9x3x16xf32, #tpu.memory_space<vmem>>, %arg4: memref<3x1xf32, #tpu.memory_space<vmem>>, %arg5: memref<3x384xf32, #tpu.memory_space<vmem>>) attributes {dimension_semantics = [#tpu.dimension_semantics<parallel>], iteration_bounds = array<i64: 2>, scalar_prefetch = 0 : i64, scratch_operands = 0 : i64, tpu.core_type = #tpu.core_type<tc>, window_params = [{transform_indices = @transform_0, window_bounds = array<i64: 1, 16, 384>}, {transform_indices = @transform_1, window_bounds = array<i64: 1, 16, 128>}, {pipeline_mode = #tpu.pipeline_mode<synchronous>, transform_indices = @transform_2, window_bounds = array<i64: 9, 3, 16>}, {pipeline_mode = #tpu.pipeline_mode<synchronous>, transform_indices = @transform_3, window_bounds = array<i64: 3, 1>}, {transform_indices = @transform_4, window_bounds = array<i64: 3, 384>}]} {
    %c0 = arith.constant 0 : index
    %c0_0 = arith.constant 0 : index
    %c0_1 = arith.constant 0 : index
    %0 = vector.load %arg1[%c0, %c0_0, %c0_1] : memref<1x16x384xf32, #tpu.memory_space<vmem>>, vector<1x16x384xf32>
    %1 = vector.shape_cast %0 : vector<1x16x384xf32> to vector<16x384xf32>
    %c0_2 = arith.constant 0 : index
    %c0_3 = arith.constant 0 : index
    %c0_4 = arith.constant 0 : index
    %2 = vector.load %arg2[%c0_2, %c0_3, %c0_4] : memref<1x16x128xf32, #tpu.memory_space<vmem>>, vector<1x16x128xf32>
    %3 = vector.shape_cast %2 : vector<1x16x128xf32> to vector<16x128xf32>
    %4 = tpu.concatenate %1, %3 in 1 : vector<16x384xf32>, vector<16x128xf32> -> vector<16x512xf32>
    %c0_5 = arith.constant 0 : index
    %c0_6 = arith.constant 0 : index
    %c0_7 = arith.constant 0 : index
    %5 = vector.load %arg3[%c0_5, %c0_6, %c0_7] : memref<9x3x16xf32, #tpu.memory_space<vmem>>, vector<1x3x16xf32>
    %6 = vector.shape_cast %5 : vector<1x3x16xf32> to vector<3x16xf32>
    %7 = vector.extract_strided_slice %4 {offsets = [0, 0], sizes = [16, 384], strides = [1, 1]} : vector<16x512xf32> to vector<16x384xf32>
    %cst = arith.constant dense<0.000000e+00> : vector<3x384xf32>
    %8 = tpu.matmul %6, %7, %cst {dimension_numbers = #tpu.dot_dimension_numbers<[1], [0], [0], [1], [0, 0, 1, 1], [], []>} : vector<3x16xf32>, vector<16x384xf32>, vector<3x384xf32> -> vector<3x384xf32>
    %c511_i32 = arith.constant 511 : i32
    %9 = tpu.dynamic_rotate %4 by %c511_i32 dim 1 : vector<16x512xf32>, i32 -> vector<16x512xf32>
    %c1 = arith.constant 1 : index
    %c0_8 = arith.constant 0 : index
    %c0_9 = arith.constant 0 : index
    %10 = vector.load %arg3[%c1, %c0_8, %c0_9] : memref<9x3x16xf32, #tpu.memory_space<vmem>>, vector<1x3x16xf32>
    %11 = vector.shape_cast %10 : vector<1x3x16xf32> to vector<3x16xf32>
    %12 = vector.extract_strided_slice %9 {offsets = [0, 0], sizes = [16, 384], strides = [1, 1]} : vector<16x512xf32> to vector<16x384xf32>
    %cst_10 = arith.constant dense<0.000000e+00> : vector<3x384xf32>
    %13 = tpu.matmul %11, %12, %cst_10 {dimension_numbers = #tpu.dot_dimension_numbers<[1], [0], [0], [1], [0, 0, 1, 1], [], []>} : vector<3x16xf32>, vector<16x384xf32>, vector<3x384xf32> -> vector<3x384xf32>
    %14 = arith.addf %8, %13 : vector<3x384xf32>
    %c510_i32 = arith.constant 510 : i32
    %15 = tpu.dynamic_rotate %4 by %c510_i32 dim 1 : vector<16x512xf32>, i32 -> vector<16x512xf32>
    %c2 = arith.constant 2 : index
    %c0_11 = arith.constant 0 : index
    %c0_12 = arith.constant 0 : index
    %16 = vector.load %arg3[%c2, %c0_11, %c0_12] : memref<9x3x16xf32, #tpu.memory_space<vmem>>, vector<1x3x16xf32>
    %17 = vector.shape_cast %16 : vector<1x3x16xf32> to vector<3x16xf32>
    %18 = vector.extract_strided_slice %15 {offsets = [0, 0], sizes = [16, 384], strides = [1, 1]} : vector<16x512xf32> to vector<16x384xf32>
    %cst_13 = arith.constant dense<0.000000e+00> : vector<3x384xf32>
    %19 = tpu.matmul %17, %18, %cst_13 {dimension_numbers = #tpu.dot_dimension_numbers<[1], [0], [0], [1], [0, 0, 1, 1], [], []>} : vector<3x16xf32>, vector<16x384xf32>, vector<3x384xf32> -> vector<3x384xf32>
    %20 = arith.addf %14, %19 : vector<3x384xf32>
    %c494_i32 = arith.constant 494 : i32
    %21 = tpu.dynamic_rotate %4 by %c494_i32 dim 1 : vector<16x512xf32>, i32 -> vector<16x512xf32>
    %c3 = arith.constant 3 : index
    %c0_14 = arith.constant 0 : index
    %c0_15 = arith.constant 0 : index
    %22 = vector.load %arg3[%c3, %c0_14, %c0_15] : memref<9x3x16xf32, #tpu.memory_space<vmem>>, vector<1x3x16xf32>
    %23 = vector.shape_cast %22 : vector<1x3x16xf32> to vector<3x16xf32>
    %24 = vector.extract_strided_slice %21 {offsets = [0, 0], sizes = [16, 384], strides = [1, 1]} : vector<16x512xf32> to vector<16x384xf32>
    %cst_16 = arith.constant dense<0.000000e+00> : vector<3x384xf32>
    %25 = tpu.matmul %23, %24, %cst_16 {dimension_numbers = #tpu.dot_dimension_numbers<[1], [0], [0], [1], [0, 0, 1, 1], [], []>} : vector<3x16xf32>, vector<16x384xf32>, vector<3x384xf32> -> vector<3x384xf32>
    %26 = arith.addf %20, %25 : vector<3x384xf32>
    %c493_i32 = arith.constant 493 : i32
    %27 = tpu.dynamic_rotate %4 by %c493_i32 dim 1 : vector<16x512xf32>, i32 -> vector<16x512xf32>
    %c4 = arith.constant 4 : index
    %c0_17 = arith.constant 0 : index
    %c0_18 = arith.constant 0 : index
    %28 = vector.load %arg3[%c4, %c0_17, %c0_18] : memref<9x3x16xf32, #tpu.memory_space<vmem>>, vector<1x3x16xf32>
    %29 = vector.shape_cast %28 : vector<1x3x16xf32> to vector<3x16xf32>
    %30 = vector.extract_strided_slice %27 {offsets = [0, 0], sizes = [16, 384], strides = [1, 1]} : vector<16x512xf32> to vector<16x384xf32>
    %cst_19 = arith.constant dense<0.000000e+00> : vector<3x384xf32>
    %31 = tpu.matmul %29, %30, %cst_19 {dimension_numbers = #tpu.dot_dimension_numbers<[1], [0], [0], [1], [0, 0, 1, 1], [], []>} : vector<3x16xf32>, vector<16x384xf32>, vector<3x384xf32> -> vector<3x384xf32>
    %32 = arith.addf %26, %31 : vector<3x384xf32>
    %c492_i32 = arith.constant 492 : i32
    %33 = tpu.dynamic_rotate %4 by %c492_i32 dim 1 : vector<16x512xf32>, i32 -> vector<16x512xf32>
    %c5 = arith.constant 5 : index
    %c0_20 = arith.constant 0 : index
    %c0_21 = arith.constant 0 : index
    %34 = vector.load %arg3[%c5, %c0_20, %c0_21] : memref<9x3x16xf32, #tpu.memory_space<vmem>>, vector<1x3x16xf32>
    %35 = vector.shape_cast %34 : vector<1x3x16xf32> to vector<3x16xf32>
    %36 = vector.extract_strided_slice %33 {offsets = [0, 0], sizes = [16, 384], strides = [1, 1]} : vector<16x512xf32> to vector<16x384xf32>
    %cst_22 = arith.constant dense<0.000000e+00> : vector<3x384xf32>
    %37 = tpu.matmul %35, %36, %cst_22 {dimension_numbers = #tpu.dot_dimension_numbers<[1], [0], [0], [1], [0, 0, 1, 1], [], []>} : vector<3x16xf32>, vector<16x384xf32>, vector<3x384xf32> -> vector<3x384xf32>
    %38 = arith.addf %32, %37 : vector<3x384xf32>
    %c476_i32 = arith.constant 476 : i32
    %39 = tpu.dynamic_rotate %4 by %c476_i32 dim 1 : vector<16x512xf32>, i32 -> vector<16x512xf32>
    %c6 = arith.constant 6 : index
    %c0_23 = arith.constant 0 : index
    %c0_24 = arith.constant 0 : index
    %40 = vector.load %arg3[%c6, %c0_23, %c0_24] : memref<9x3x16xf32, #tpu.memory_space<vmem>>, vector<1x3x16xf32>
    %41 = vector.shape_cast %40 : vector<1x3x16xf32> to vector<3x16xf32>
    %42 = vector.extract_strided_slice %39 {offsets = [0, 0], sizes = [16, 384], strides = [1, 1]} : vector<16x512xf32> to vector<16x384xf32>
    %cst_25 = arith.constant dense<0.000000e+00> : vector<3x384xf32>
    %43 = tpu.matmul %41, %42, %cst_25 {dimension_numbers = #tpu.dot_dimension_numbers<[1], [0], [0], [1], [0, 0, 1, 1], [], []>} : vector<3x16xf32>, vector<16x384xf32>, vector<3x384xf32> -> vector<3x384xf32>
    %44 = arith.addf %38, %43 : vector<3x384xf32>
    %c475_i32 = arith.constant 475 : i32
    %45 = tpu.dynamic_rotate %4 by %c475_i32 dim 1 : vector<16x512xf32>, i32 -> vector<16x512xf32>
    %c7 = arith.constant 7 : index
    %c0_26 = arith.constant 0 : index
    %c0_27 = arith.constant 0 : index
    %46 = vector.load %arg3[%c7, %c0_26, %c0_27] : memref<9x3x16xf32, #tpu.memory_space<vmem>>, vector<1x3x16xf32>
    %47 = vector.shape_cast %46 : vector<1x3x16xf32> to vector<3x16xf32>
    %48 = vector.extract_strided_slice %45 {offsets = [0, 0], sizes = [16, 384], strides = [1, 1]} : vector<16x512xf32> to vector<16x384xf32>
    %cst_28 = arith.constant dense<0.000000e+00> : vector<3x384xf32>
    %49 = tpu.matmul %47, %48, %cst_28 {dimension_numbers = #tpu.dot_dimension_numbers<[1], [0], [0], [1], [0, 0, 1, 1], [], []>} : vector<3x16xf32>, vector<16x384xf32>, vector<3x384xf32> -> vector<3x384xf32>
    %50 = arith.addf %44, %49 : vector<3x384xf32>
    %c474_i32 = arith.constant 474 : i32
    %51 = tpu.dynamic_rotate %4 by %c474_i32 dim 1 : vector<16x512xf32>, i32 -> vector<16x512xf32>
    %c8 = arith.constant 8 : index
    %c0_29 = arith.constant 0 : index
    %c0_30 = arith.constant 0 : index
    %52 = vector.load %arg3[%c8, %c0_29, %c0_30] : memref<9x3x16xf32, #tpu.memory_space<vmem>>, vector<1x3x16xf32>
    %53 = vector.shape_cast %52 : vector<1x3x16xf32> to vector<3x16xf32>
    %54 = vector.extract_strided_slice %51 {offsets = [0, 0], sizes = [16, 384], strides = [1, 1]} : vector<16x512xf32> to vector<16x384xf32>
    %cst_31 = arith.constant dense<0.000000e+00> : vector<3x384xf32>
    %55 = tpu.matmul %53, %54, %cst_31 {dimension_numbers = #tpu.dot_dimension_numbers<[1], [0], [0], [1], [0, 0, 1, 1], [], []>} : vector<3x16xf32>, vector<16x384xf32>, vector<3x384xf32> -> vector<3x384xf32>
    %56 = arith.addf %50, %55 : vector<3x384xf32>
    %c0_32 = arith.constant 0 : index
    %c0_33 = arith.constant 0 : index
    %57 = vector.load %arg4[%c0_32, %c0_33] : memref<3x1xf32, #tpu.memory_space<vmem>>, vector<3x1xf32>
    %58 = vector.broadcast %57 : vector<3x1xf32> to vector<3x384xf32>
    %59 = arith.addf %56, %58 : vector<3x384xf32>
    %60 = math.tanh %59 : vector<3x384xf32>
    %c0_34 = arith.constant 0 : index
    %c0_35 = arith.constant 0 : index
    %61 = vector.load %arg5[%c0_34, %c0_35] : memref<3x384xf32, #tpu.memory_space<vmem>>, vector<3x384xf32>
    tpu.vector_store %arg5[%c0_34, %c0_35], %60 {strides = array<i32>} : memref<3x384xf32, #tpu.memory_space<vmem>>, vector<3x384xf32>,
    return
  }
  func.func @transform_0(%arg0: i32) -> (i32, i32, i32) {
    %c0_i32 = arith.constant 0 : i32
    %c0_i32_0 = arith.constant 0 : i32
    %c0_i32_1 = arith.constant 0 : i32
    return %c0_i32, %c0_i32_0, %arg0 : i32, i32, i32
  }
  func.func @transform_1(%arg0: i32) -> (i32, i32, i32) {
    %c1_i32 = arith.constant 1 : i32
    %0 = arith.addi %arg0, %c1_i32 : i32
    %c3_i32 = arith.constant 3 : i32
    %1 = arith.muli %0, %c3_i32 : i32
    %c0_i32 = arith.constant 0 : i32
    %c0_i32_0 = arith.constant 0 : i32
    %c0_i32_1 = arith.constant 0 : i32
    return %c0_i32, %c0_i32_0, %1 : i32, i32, i32
  }
  func.func @transform_2(%arg0: i32) -> (i32, i32, i32) {
    %c0_i32 = arith.constant 0 : i32
    %c0_i32_0 = arith.constant 0 : i32
    %c0_i32_1 = arith.constant 0 : i32
    %c0_i32_2 = arith.constant 0 : i32
    return %c0_i32, %c0_i32_0, %c0_i32_1 : i32, i32, i32
  }
  func.func @transform_3(%arg0: i32) -> (i32, i32) {
    %c0_i32 = arith.constant 0 : i32
    %c0_i32_0 = arith.constant 0 : i32
    %c0_i32_1 = arith.constant 0 : i32
    return %c0_i32, %c0_i32_0 : i32, i32
  }
  func.func @transform_4(%arg0: i32) -> (i32, i32) {
    %c0_i32 = arith.constant 0 : i32
    %c0_i32_0 = arith.constant 0 : i32
    return %c0_i32, %arg0 : i32, i32
  }
}

</mosaic_0001>

<bundles_post_ra>
// kernel: jpg_with_attention_forward.10
= control target key start
LH: loop header
LB: loop body
LE: loop exit
PB: predicated region body
PF: predicated region fallthrough
CT: control target
= control target key end

     0   :  { %s1293_s15 = smov 0   ;;  %s1295_s16 = smov 0   ;;  %s1609_s0 = inlined_call_operand.vmem [shape: f32[1,16,384], index: 0, kind: input, shape index: {}, may-alias: {0,1}]   ;;  %s1610_s1 = inlined_call_operand.vmem [shape: f32[1,16,384], index: 1, kind: input, shape index: {}, may-alias: {0,1}]   ;;  %s1611_s2 = inlined_call_operand.vmem [shape: f32[9,32,16], index: 2, kind: input, shape index: {}]   ;;  %s1612_s3 = inlined_call_operand.vmem [shape: f32[32,1], index: 3, kind: input, shape index: {}]   ;;  %s1613_s4 = inlined_call_operand.vmem [shape: f32[32,256], index: 4, kind: output, shape index: {}]  }
   0x1   :  { %s1297_s17 = smov 0   ;;  %s1299_s18 = smov 0  }
   0x2   :  { %s1301_s19 = smov 0  }
   0x3 LB: > { %s995_s20 = sadd.s32 4294967295, %s1257_s19   ;;  %s1320_s21 = sadd.s32 1, %s1257_s19   ;;  %s1257_s19 = sphi %s1301_s19, %s1620_s19   ;;  %s1253_s18 = sphi %s1299_s18, %s1619_s18   ;;  %s1249_s17 = sphi %s1297_s17, %s1618_s17   ;;  %s1245_s16 = sphi %s1295_s16, %s1617_s16   ;;  %s1241_s15 = sphi %s1293_s15, %s1616_s15  }
   0x4   : > { %s18_s22 = ssub.s32 %s1257_s19, %s1320_s21  ;;  %s21_s23 = sadd.s32 1, %s1253_s18 }
   0x5   : > { %p19_p0 = scmp.eq.s32.totalorder %s18_s22, 0  ;;  %p28_p1 = scmp.ne.s32.totalorder %s1253_s18, %s1249_s17 }
   0x6   : > { %p29_p2 = scmp.eq.s32.totalorder %s1257_s19, 0  ;;  %s45_s24 = sadd.s32 1, %s1320_s21 }
   0x7   : > { %s1330_s25 = scalar_select %p19_p0, %s1253_s18, %s21_s23  }
   0x8   : > { %p30_p3 = por %p29_p2, %p28_p1  ;;  %s46_s26 = ssub.s32 %s1320_s21, %s45_s24 }
   0x9   : > { %p47_p4 = scmp.eq.s32.totalorder %s46_s26, 0  ;;  %s49_s27 = sadd.s32 1, %s1245_s16 }
   0xa   : > { %p56_p5 = scmp.ne.s32.totalorder %s1245_s16, %s1241_s15  ;;  %p128_p6 = scmp.eq.s32.totalorder %s995_s20, 1 }
   0xb   : > { %s1339_s28 = scalar_select %p47_p4, %s1245_s16, %s49_s27  }
   0xc   : > { %p1341_p7 = por %p56_p5, %p29_p2  ;;  %p1345_p8 = por %p128_p6, %p28_p1 }
   0xd   : > { %p998_p9 = scmp.ge.s32.totalorder %s1257_s19, 2 }
   0xf   : > { %156 = sbr.rel (%p998_p9) target bundleno = 32 (0x20), region = 24 }
  0x14   : > { %159 = sbr.rel (!%p30_p3) target bundleno = 26 (0x1a), region = 28  ;;  %s161_s5 = sand.u32 (%p30_p3), 1, %s1253_s18  }
  0x15   : > { %s1000_s6 = sshll.u32 (%p30_p3), %s1257_s19, 3  ;;  %s999_s7 = sshll.u32 (%p30_p3), %s161_s5, 4 }
  0x16   : > { %s165_s10 = scalar_lea.vmem (%p30_p3), %s1609_s0, %s1000_s6  ;;  %s163_s11 = scalar_lea.vmem (%p30_p3), [#allocation2], %s999_s7 }
  0x17   : > { %v196_v0 = vld [vmem:[%s165_s10] sm:$0xff] (%p30_p3)  ;;  %v198_v1 = vld [vmem:[%s165_s10 + $0x18] sm:$0xff] (%p30_p3) }
  0x18   : > { %197 = vst [vmem:[%s163_s11] sm:$0xff] (%p30_p3), %v196_v0 }
  0x19   : > { %199 = vst [vmem:[%s163_s11 + $0x8] sm:$0xff] %v198_v1 }
  0x1a PF: > { %205 = sbr.rel (!%p1341_p7) target bundleno = 32 (0x20), region = 66  ;;  %s207_s12 = sand.u32 (%p1341_p7), 1, %s1245_s16  }
  0x1b   : > { %s1002_s13 = sshll.u32 (%p1341_p7), %s1257_s19, 3  ;;  %s1001_s14 = sshll.u32 (%p1341_p7), %s207_s12, 4 }
  0x1c   : > { %s939_s24 = scalar_lea.vmem (%p1341_p7), %s1610_s1, %s1002_s13  ;;  %s209_s26 = scalar_lea.vmem (%p1341_p7), [#allocation3], %s1001_s14 }
  0x1d   : > { %v1003_v2 = vld [vmem:[%s939_s24 + $0x8] sm:$0xff] (%p1341_p7)  ;;  %v1004_v3 = vld [vmem:[%s939_s24 + $0x20] sm:$0xff] (%p1341_p7) }
  0x1e   : > { %244 = vst [vmem:[%s209_s26] sm:$0xff] (%p1341_p7), %v1003_v2 }
  0x1f   : > { %246 = vst [vmem:[%s209_s26 + $0x8] sm:$0xff] %v1004_v3 }
  0x20 PF: > { %p1005_p10 = scmp.ge.s32.totalorder %s1257_s19, 1  ;;  %p251_p11 = scmp.lt.s32.totalorder %s1257_s19, 3 }
  0x22   : > { %p252_p12 = pnand %p1005_p10, %p251_p11 }
  0x23   : > { %s258_s27 = sand.u32 (!%p252_p12), 1, %s1249_s17   ;;  %s265_s29 = sand.u32 (!%p252_p12), 1, %s1241_s15  }
  0x24   : > { %255 = sbr.rel (%p252_p12) target bundleno = 388 (0x184), region = 104  ;;  %s1006_s5 = sshll.u32 (!%p252_p12), %s258_s27, 4 }
  0x25   : > { %s1007_s6 = sshll.u32 (!%p252_p12), %s265_s29, 4  ;;  %s260_s7 = scalar_lea.vmem (!%p252_p12), [#allocation2], %s1006_s5 }
  0x26   : > { %s267_s8 = scalar_lea.vmem (!%p252_p12), [#allocation3], %s1007_s6  ;;  %s1259_s9 = smov (!%p252_p12), 126  }
  0x27   : > { %s1260_s10 = smov (!%p252_p12), 127   ;;  %s1261_s11 = smov (!%p252_p12), 118  }
  0x28   : > { %s1262_s15 = smov (!%p252_p12), 117   ;;  %s1263_s12 = smov (!%p252_p12), 108  }
  0x29   : > { %v1368_v4 = vld [vmem:[%s260_s7 + $0x8] sm:$0xff]  ;;  %v296_v7 = vld [vmem:[%s267_s8] sm:$0xff]  ;;  %s1264_s13 = smov 107   ;;  %s1265_s14 = smov 116   ;;  %v310_v12 = vlaneseq  ;;  %vm320_vm3 = vcmask 130048  }
  0x2a   : > { %v297_v5 = vld [vmem:[%s267_s8 + $0x8] sm:$0xff]  ;;  %v1371_v8 = vld [vmem:[%s260_s7] sm:$0xff]  ;;  %s1266_s22 = smov 106   ;;  %s1008_s23 = sshll.u32 %s258_s27, 5 }
  0x2b   : > { %v1146_v6 = vpack.i.bf16 %v297_v5, %v1368_v4  ;;  %v1151_v9 = vpack.i.bf16 %v296_v7, %v1371_v8  ;;  %v1374_v14 = vand.u32 127, %v310_v12  ;;  %v1010_v33 = vld [vmem:[%s1611_s2 + $0x28] sm:$0xff]  ;;  %v1011_v35 = vld [vmem:[%s1611_s2 + $0x30] sm:$0xff]  ;;  %v1012_v40 = vld [vmem:[%s1611_s2 + $0x38] sm:$0xff]  ;;  %s1576_s24 = scalar_lea.vmem [#allocation4], %s1008_s23  ;;  %s1078_s17 = sshll.u32 (%p1345_p8), %s995_s20, 3 }
  0x2c   : > { %v1009_v47 = vld [vmem:[%s1611_s2 + $0x20] sm:$0xff]  ;;  %s874_s29 = scalar_lea.vmem (%p1345_p8), %s1613_s4, %s1078_s17 }
  0x2d   : > { %1147 = vrot.lane.b32.xlu1 %v1146_v6, %s1259_s9  ;;  %1137 = vrot.lane.b32.xlu0 %v1146_v6, %s1260_s10  ;;  %vm312_vm0 = vcmp.lt.s32.totalorder %v1374_v14, 127  ;;  %vm411_vm1 = vcmp.lt.s32.totalorder %v1374_v14, 126  ;;  %vm472_vm2 = vcmp.lt.s32.totalorder %v1374_v14, 118  ;;  %vm655_vm4 = vcmp.lt.s32.totalorder %v1374_v14, 108  ;;  %v298_v57 = vld [vmem:[%s1611_s2] sm:$0xff] }
  0x2e   : > { %1157 = vrot.lane.b32.xlu2 %v1146_v6, %s1261_s11  ;;  %vm594_vm5 = vcmp.lt.s32.totalorder %v1374_v14, 116  ;;  %vm533_vm6 = vcmp.lt.s32.totalorder %v1374_v14, 117  ;;  %vm777_vm7 = vcmp.lt.s32.totalorder %v1374_v14, 106  ;;  %v1021_v59 = vld [vmem:[%s1611_s2 + $0x40] sm:$0xff]  ;;  %vm716_vm8 = vcmp.lt.s32.totalorder %v1374_v14, 107 }
  0x2f   : > { %v1029_v61 = vld [vmem:[%s1611_s2 + $0x60] sm:$0xff] }
  0x30   : > { %v1037_v63 = vld [vmem:[%s1611_s2 + $0x80] sm:$0xff] }
  0x31   : > { %v1045_v14 = vld [vmem:[%s1611_s2 + $0xa0] sm:$0xff] }
  0x35   : > { %1152 = vrot.lane.b32.xlu1 %v1151_v9, %s1259_s9  ;;  %1142 = vrot.lane.b32.xlu0 %v1151_v9, %s1260_s10 }
  0x36   : > { %1162 = vrot.lane.b32.xlu2 %v1151_v9, %s1261_s11 }
  0x3d   : > { %1172 = vrot.lane.b32.xlu1 %v1151_v9, %s1262_s15  ;;  %1167 = vrot.lane.b32.xlu0 %v1146_v6, %s1262_s15 }
  0x3e   : > { %1177 = vrot.lane.b32.xlu2 %v1146_v6, %s1263_s12 }
  0x45   : > { %1187 = vrot.lane.b32.xlu1 %v1146_v6, %s1264_s13  ;;  %1182 = vrot.lane.b32.xlu0 %v1151_v9, %s1263_s12 }
  0x46   : > { %1192 = vrot.lane.b32.xlu2 %v1146_v6, %s1265_s14 }
  0x4d   : > { %1197 = vrot.lane.b32.xlu0 %v1151_v9, %s1264_s13  ;;  %1202 = vrot.lane.b32.xlu1 %v1151_v9, %s1265_s14 }
  0x4e   : > { %1207 = vrot.lane.b32.xlu2 %v1146_v6, %s1266_s22  ;;  %v299_v6 = vld [vmem:[%s1611_s2 + $0x8] sm:$0xff] }
  0x55   : > { %1212 = vrot.lane.b32.xlu0 %v1151_v9, %s1266_s22 }
  0x88   : > { %v1158_v10 = vpop.permute.xlu2 %1157 }
  0x89   : > { %v1160_v21 = vunpack.i.h.bf16 %v1158_v10  ;;  %v1159_v22 = vunpack.i.l.bf16 %v1158_v10  ;;  %v1030_v10 = vld [vmem:[%s1611_s2 + $0x68] sm:$0xff] }
  0x8b   : > { %v474_v36 = vsel %vm472_vm2, %v1159_v22, %v1160_v21 }
  0x90   : > { %v1163_v11 = vpop.permute.xlu2 %1162 }
  0x91   : > { %v1165_v27 = vunpack.i.h.bf16 %v1163_v11  ;;  %v1164_v28 = vunpack.i.l.bf16 %v1163_v11  ;;  %v1038_v11 = vld [vmem:[%s1611_s2 + $0x88] sm:$0xff] }
  0x93   : > { %v473_v43 = vsel %vm472_vm2, %v1164_v28, %v1165_v27  ;;  %v1267_v27 = vmov 0  }
  0x94   : > { %1216 = vset.pattern.permute.xlu1 %v1267_v27  ;;  %1218 = vset.pattern.permute.xlu0 %v1267_v27 }
  0x95   : > { %1217 = vset.pattern.permute.xlu2 %v1267_v27 }
  0x98   : > { %v1178_v13 = vpop.permute.xlu2 %1177 }
  0x99   : > { %v1180_v37 = vunpack.i.h.bf16 %v1178_v13  ;;  %v1179_v38 = vunpack.i.l.bf16 %v1178_v13 }
  0x9b   : > { %v657_v46 = vsel %vm655_vm4, %v1179_v38, %v1180_v37  ;;  %v831_v37 = vld [vmem:[%s1612_s3 + $0x8] sm:$0xff]  ;;  %v1053_v38 = vld [vmem:[%s1611_s2 + $0xc0] sm:$0xff] }
  0x9c   : > { %841 = vperm.xlu2 %1217, %v831_v37  }
  0x9f   : > { %v1148_v15 = vpop.permute.xlu1 %1147  ;;  %v1138_v16 = vpop.permute.xlu0 %1137 }
  0xa0   : > { %v1140_v17 = vunpack.i.h.bf16 %v1138_v16  ;;  %v1139_v18 = vunpack.i.l.bf16 %v1138_v16  ;;  %v1193_v20 = vpop.permute.xlu2 %1192  ;;  %v1150_v23 = vunpack.i.h.bf16 %v1148_v15  ;;  %v1149_v24 = vunpack.i.l.bf16 %v1148_v15 }
  0xa1   : > { %v1195_v41 = vunpack.i.h.bf16 %v1193_v20  ;;  %v1194_v42 = vunpack.i.l.bf16 %v1193_v20  ;;  %v1023_v20 = vld [vmem:[%s1611_s2 + $0x50] sm:$0xff] }
  0xa2   : > { %v314_v19 = vsel %vm312_vm0, %v1139_v18, %v1140_v17  ;;  %v413_v39 = vsel %vm411_vm1, %v1149_v24, %v1150_v23  ;;  %v1031_v23 = vld [vmem:[%s1611_s2 + $0x70] sm:$0xff] }
  0xa3   : > { %347 = vmatpush.msra.mxu0 %v314_v19  ;;  %1081 = vmatpush.msra.mxu1 %v314_v19  ;;  %v596_v50 = vsel %vm594_vm5, %v1194_v42, %v1195_v41  ;;  %v1039_v24 = vld [vmem:[%s1611_s2 + $0x90] sm:$0xff]  ;;  %v1046_v41 = vld [vmem:[%s1611_s2 + $0xa8] sm:$0xff] }
  0xa4   : > { %1082 = vmatpush.msra.mxu2 %v314_v19  ;;  %1083 = vmatpush.msra.mxu3 %v314_v19  ;;  %v300_v19 = vld [vmem:[%s1611_s2 + $0x10] sm:$0xff]  ;;  %v1054_v42 = vld [vmem:[%s1611_s2 + $0xc8] sm:$0xff] }
  0xa7   : > { %v1153_v25 = vpop.permute.xlu1 %1152  ;;  %v1143_v26 = vpop.permute.xlu0 %1142 }
  0xa8   : > { %v1145_v29 = vunpack.i.h.bf16 %v1143_v26  ;;  %v1144_v30 = vunpack.i.l.bf16 %v1143_v26  ;;  %v1155_v31 = vunpack.i.h.bf16 %v1153_v25  ;;  %v1154_v32 = vunpack.i.l.bf16 %v1153_v25  ;;  %v1208_v44 = vpop.permute.xlu2 %1207  ;;  %v830_v25 = vld [vmem:[%s1612_s3] sm:$0xff] }
  0xa9   : > { %v1210_v51 = vunpack.i.h.bf16 %v1208_v44  ;;  %v1209_v52 = vunpack.i.l.bf16 %v1208_v44  ;;  %836 = vperm.xlu1 %1216, %v830_v25   ;;  %v1070_v44 = vld [vmem:[%s1611_s2 + $0x108] sm:$0xff] }
  0xaa   : > { %v313_v34 = vsel %vm312_vm0, %v1144_v30, %v1145_v29  ;;  %v412_v45 = vsel %vm411_vm1, %v1154_v32, %v1155_v31  ;;  %v301_v30 = vld [vmem:[%s1611_s2 + $0x18] sm:$0xff] }
  0xab   : > { %1084 = vmatpush.msra.mxu1 %v313_v34  ;;  %1085 = vmatpush.msra.mxu2 %v313_v34  ;;  %v779_v62 = vsel %vm777_vm7, %v1209_v52, %v1210_v51  ;;  %v1024_v31 = vld [vmem:[%s1611_s2 + $0x58] sm:$0xff] }
  0xac   : > { %1086 = vmatpush.msra.mxu3 %v313_v34  ;;  %1014 = vmatmul.msk.f32.vlgmr.msra.gmra.mxu1 %vm320_vm3, %v1010_v33  ;;  %v1032_v33 = vld [vmem:[%s1611_s2 + $0x78] sm:$0xff] }
  0xad   : > { %1015 = vmatmul.msk.f32.vlgmr.msra.gmra.mxu2 %vm320_vm3, %v1011_v35  ;;  %1016 = vmatmul.msk.f32.vlgmr.msra.gmra.mxu3 %vm320_vm3, %v1012_v40  ;;  %v832_v35 = vld [vmem:[%s1612_s3 + $0x10] sm:$0xff]  ;;  %v1069_v40 = vld [vmem:[%s1611_s2 + $0x100] sm:$0xff]  ;;  %v1064_v51 = vld [vmem:[%s1611_s2 + $0xf8] sm:$0xff] }
  0xae   : > { %506 = vmatpush.msrb.mxu3 %v474_v36  ;;  %445 = vmatpush.msrb.mxu2 %v413_v39  ;;  %v833_v36 = vld [vmem:[%s1612_s3 + $0x18] sm:$0xff]  ;;  %v1061_v39 = vld [vmem:[%s1611_s2 + $0xe0] sm:$0xff] }
  0xaf   : > { %v1173_v48 = vpop.permute.xlu1 %1172  ;;  %v1168_v49 = vpop.permute.xlu0 %1167  ;;  %348 = vmatpush.msra.mxu0 %v313_v34  ;;  %388 = vmatpush.msrb.mxu1 %v1368_v4  ;;  %v1040_v34 = vld [vmem:[%s1611_s2 + $0x98] sm:$0xff] }
  0xb0   : > { %507 = vmatpush.msrb.mxu3 %v473_v43  ;;  %446 = vmatpush.msrb.mxu2 %v412_v45  ;;  %v1175_v53 = vunpack.i.h.bf16 %v1173_v48  ;;  %v1174_v54 = vunpack.i.l.bf16 %v1173_v48  ;;  %v1170_v55 = vunpack.i.h.bf16 %v1168_v49  ;;  %v1169_v56 = vunpack.i.l.bf16 %v1168_v49  ;;  %v1062_v43 = vld [vmem:[%s1611_s2 + $0xe8] sm:$0xff]  ;;  %v1047_v45 = vld [vmem:[%s1611_s2 + $0xb0] sm:$0xff]  ;;  %v1048_v49 = vld [vmem:[%s1611_s2 + $0xb8] sm:$0xff] }
  0xb1   : > { %1013 = vmatmul.msk.f32.vlgmr.msra.gmra.mxu0 %vm320_vm3, %v1009_v47  ;;  %389 = vmatpush.msrb.mxu1 %v1371_v8  ;;  %v1022_v8 = vld [vmem:[%s1611_s2 + $0x48] sm:$0xff]  ;;  %v1063_v47 = vld [vmem:[%s1611_s2 + $0xf0] sm:$0xff]  ;;  %v1072_v52 = vld [vmem:[%s1611_s2 + $0x118] sm:$0xff] }
  0xb2   : > { %689 = vmatpush.msra.mxu2 %v657_v46  ;;  %v535_v58 = vsel %vm533_vm6, %v1169_v56, %v1170_v55  ;;  %v534_v60 = vsel %vm533_vm6, %v1174_v54, %v1175_v53  ;;  %846 = vperm.xlu0 %1218, %v832_v35   ;;  %v1055_v46 = vld [vmem:[%s1611_s2 + $0xd0] sm:$0xff] }
  0xb3   : > { %567 = vmatpush.msrb.mxu0 %v535_v58  ;;  %628 = vmatpush.msra.mxu1 %v596_v50  ;;  %v1071_v48 = vld [vmem:[%s1611_s2 + $0x110] sm:$0xff]  ;;  %v1056_v50 = vld [vmem:[%s1611_s2 + $0xd8] sm:$0xff] }
  0xb4   : > { %1017 = vmatmul.msk.f32.vlgmr.msrb.gmra.mxu1 %vm320_vm3, %v298_v57  ;;  %851 = vperm.xlu1 %1216, %v833_v36  }
  0xb5   : > { %1025 = vmatmul.msk.f32.vlgmr.msrb.gmra.mxu2 %vm320_vm3, %v1021_v59  ;;  %568 = vmatpush.msrb.mxu0 %v534_v60 }
  0xb6   : > { %1033 = vmatmul.msk.f32.vlgmr.msrb.gmra.mxu3 %vm320_vm3, %v1029_v61 }
  0xb7   : > { %811 = vmatpush.msra.mxu0 %v779_v62  ;;  %v1188_v0 = vpop.permute.xlu1 %1187  ;;  %v1183_v1 = vpop.permute.xlu0 %1182 }
  0xb8   : > { %v1190_v2 = vunpack.i.h.bf16 %v1188_v0  ;;  %v1189_v3 = vunpack.i.l.bf16 %v1188_v0  ;;  %v1185_v4 = vunpack.i.h.bf16 %v1183_v1  ;;  %v1184_v5 = vunpack.i.l.bf16 %v1183_v1 }
  0xb9   : > { %1041 = vmatmul.msk.f32.vlgmr.msrb.gmra.mxu0 %vm320_vm3, %v1037_v63 }
  0xba   : > { %v718_v7 = vsel %vm716_vm8, %v1189_v3, %v1190_v2  ;;  %v656_v9 = vsel %vm655_vm4, %v1184_v5, %v1185_v4 }
  0xbb   : > { %750 = vmatpush.msra.mxu3 %v718_v7  ;;  %690 = vmatpush.msra.mxu2 %v656_v9 }
  0xbc   : > { %1018 = vmatmul.msk.f32.gmra.mxu1 %vm320_vm3, %v299_v6 }
  0xbd   : > { %1026 = vmatmul.msk.f32.gmra.mxu2 %vm320_vm3, %v1022_v8 }
  0xbe   : > { %1034 = vmatmul.msk.f32.gmra.mxu3 %vm320_vm3, %v1030_v10 }
  0xbf   : > { %v1198_v12 = vpop.permute.xlu0 %1197  ;;  %v1203_v13 = vpop.permute.xlu1 %1202 }
  0xc0   : > { %v1200_v15 = vunpack.i.h.bf16 %v1198_v12  ;;  %v1199_v16 = vunpack.i.l.bf16 %v1198_v12  ;;  %v1205_v17 = vunpack.i.h.bf16 %v1203_v13  ;;  %v1204_v18 = vunpack.i.l.bf16 %v1203_v13 }
  0xc1   : > { %1042 = vmatmul.msk.f32.gmra.mxu0 %vm320_vm3, %v1038_v11 }
  0xc2   : > { %v717_v21 = vsel %vm716_vm8, %v1199_v16, %v1200_v15  ;;  %v595_v22 = vsel %vm594_vm5, %v1204_v18, %v1205_v17 }
  0xc3   : > { %751 = vmatpush.msra.mxu3 %v717_v21  ;;  %629 = vmatpush.msra.mxu1 %v595_v22 }
  0xc4   : > { %1019 = vmatmul.msk.f32.gmra.mxu1 %vm320_vm3, %v300_v19 }
  0xc5   : > { %1027 = vmatmul.msk.f32.gmra.mxu2 %vm320_vm3, %v1023_v20 }
  0xc6   : > { %1035 = vmatmul.msk.f32.gmra.mxu3 %vm320_vm3, %v1031_v23 }
  0xc7   : > { %v1213_v26 = vpop.permute.xlu0 %1212 }
  0xc8   : > { %v1215_v28 = vunpack.i.h.bf16 %v1213_v26  ;;  %v1214_v29 = vunpack.i.l.bf16 %v1213_v26 }
  0xc9   : > { %1043 = vmatmul.msk.f32.gmra.mxu0 %vm320_vm3, %v1039_v24 }
  0xca   : > { %v778_v32 = vsel %vm777_vm7, %v1214_v29, %v1215_v28 }
  0xcb   : > { %812 = vmatpush.msra.mxu0 %v778_v32 }
  0xcc   : > { %1020 = vmatmul.msk.f32.gmra.mxu1 %vm320_vm3, %v301_v30 }
  0xcd   : > { %1028 = vmatmul.msk.f32.gmra.mxu2 %vm320_vm3, %v1024_v31 }
  0xce   : > { %1036 = vmatmul.msk.f32.gmra.mxu3 %vm320_vm3, %v1032_v33 }
  0xd1   : > { %1044 = vmatmul.msk.f32.gmra.mxu0 %vm320_vm3, %v1040_v34 }
  0xd4   : > { %1049 = vmatmul.msk.f32.vlgmr.msra.gmra.mxu1 %vm320_vm3, %v1045_v14 }
  0xd5   : > { %1057 = vmatmul.msk.f32.vlgmr.msra.gmra.mxu2 %vm320_vm3, %v1053_v38 }
  0xd6   : > { %1065 = vmatmul.msk.f32.vlgmr.msra.gmra.mxu3 %vm320_vm3, %v1061_v39 }
  0xd9   : > { %1073 = vmatmul.msk.f32.vlgmr.msra.gmra.mxu0 %vm320_vm3, %v1069_v40 }
  0xdc   : > { %1050 = vmatmul.msk.f32.gmra.mxu1 %vm320_vm3, %v1046_v41 }
  0xdd   : > { %1058 = vmatmul.msk.f32.gmra.mxu2 %vm320_vm3, %v1054_v42 }
  0xde   : > { %1066 = vmatmul.msk.f32.gmra.mxu3 %vm320_vm3, %v1062_v43 }
  0xe1   : > { %1074 = vmatmul.msk.f32.gmra.mxu0 %vm320_vm3, %v1070_v44 }
  0xe4   : > { %1051 = vmatmul.msk.f32.gmra.mxu1 %vm320_vm3, %v1047_v45 }
  0xe5   : > { %1059 = vmatmul.msk.f32.gmra.mxu2 %vm320_vm3, %v1055_v46 }
  0xe6   : > { %1067 = vmatmul.msk.f32.gmra.mxu3 %vm320_vm3, %v1063_v47 }
  0xe9   : > { %1075 = vmatmul.msk.f32.gmra.mxu0 %vm320_vm3, %v1071_v48 }
  0xec   : > { %1052 = vmatmul.msk.f32.gmra.mxu1 %vm320_vm3, %v1048_v49 }
  0xed   : > { %1060 = vmatmul.msk.f32.gmra.mxu2 %vm320_vm3, %v1056_v50 }
  0xee   : > { %1068 = vmatmul.msk.f32.gmra.mxu3 %vm320_vm3, %v1064_v51 }
  0xf1   : > { %1076 = vmatmul.msk.f32.gmra.mxu0 %vm320_vm3, %v1072_v52 }
  0xf6   : > { %v842_v40 = vpop.permute.xlu2 %841 }
 0x11b   : > { %v837_v26 = vpop.permute.xlu1 %836 }
 0x129   : > { %v353_v53 = vpop.f32.mrf.mxu1 }
 0x12e   : > { %v350_v54 = vpop.f32.mrf.mxu0 }
 0x130   : > { %v356_v55 = vpop.f32.mrf.mxu2  ;;  %v359_v56 = vpop.f32.mrf.mxu3 }
 0x131   : > { %v391_v57 = vpop.f32.mrf.mxu1 }
 0x132   : > { %v392_v6 = vadd.f32 %v391_v57, %v350_v54  ;;  %v847_v54 = vpop.permute.xlu0 %846 }
 0x136   : > { %v570_v58 = vpop.f32.mrf.mxu0 }
 0x138   : > { %v448_v59 = vpop.f32.mrf.mxu2 }
 0x139   : > { %v394_v60 = vpop.f32.mrf.mxu1  ;;  %v509_v61 = vpop.f32.mrf.mxu3  ;;  %v460_v7 = vadd.f32 %v448_v59, %v392_v6 }
 0x13a   : > { %v395_v13 = vadd.f32 %v394_v60, %v353_v53 }
 0x13b   : > { %v521_v10 = vadd.f32 %v509_v61, %v460_v7 }
 0x13d   : > { %v582_v15 = vadd.f32 %v570_v58, %v521_v10 }
 0x13e   : > { %v573_v62 = vpop.f32.mrf.mxu0 }
 0x140   : > { %v451_v63 = vpop.f32.mrf.mxu2 }
 0x141   : > { %v397_v0 = vpop.f32.mrf.mxu1  ;;  %v512_v1 = vpop.f32.mrf.mxu3  ;;  %v461_v16 = vadd.f32 %v451_v63, %v395_v13 }
 0x142   : > { %v398_v24 = vadd.f32 %v397_v0, %v356_v55 }
 0x143   : > { %v522_v20 = vadd.f32 %v512_v1, %v461_v16 }
 0x145   : > { %v583_v27 = vadd.f32 %v573_v62, %v522_v20 }
 0x146   : > { %v576_v2 = vpop.f32.mrf.mxu0 }
 0x148   : > { %v454_v3 = vpop.f32.mrf.mxu2 }
 0x149   : > { %v400_v4 = vpop.f32.mrf.mxu1  ;;  %v515_v5 = vpop.f32.mrf.mxu3  ;;  %v462_v28 = vadd.f32 %v454_v3, %v398_v24 }
 0x14a   : > { %v401_v38 = vadd.f32 %v400_v4, %v359_v56 }
 0x14b   : > { %v523_v34 = vadd.f32 %v515_v5, %v462_v28 }
 0x14d   : > { %v584_v41 = vadd.f32 %v576_v2, %v523_v34  ;;  %v852_v2 = vpop.permute.xlu1 %851 }
 0x14e   : > { %v579_v8 = vpop.f32.mrf.mxu0 }
 0x150   : > { %v457_v9 = vpop.f32.mrf.mxu2 }
 0x151   : > { %v518_v11 = vpop.f32.mrf.mxu3  ;;  %v631_v12 = vpop.f32.mrf.mxu1  ;;  %v463_v42 = vadd.f32 %v457_v9, %v401_v38 }
 0x152   : > { %v643_v18 = vadd.f32 %v631_v12, %v582_v15 }
 0x153   : > { %v524_v48 = vadd.f32 %v518_v11, %v463_v42 }
 0x155   : > { %v585_v55 = vadd.f32 %v579_v8, %v524_v48 }
 0x156   : > { %v814_v17 = vpop.f32.mrf.mxu0 }
 0x158   : > { %v692_v19 = vpop.f32.mrf.mxu2 }
 0x159   : > { %v704_v21 = vadd.f32 %v692_v19, %v643_v18  ;;  %v634_v22 = vpop.f32.mrf.mxu1  ;;  %v753_v23 = vpop.f32.mrf.mxu3 }
 0x15a   : > { %v644_v31 = vadd.f32 %v634_v22, %v583_v27 }
 0x15b   : > { %v765_v25 = vadd.f32 %v753_v23, %v704_v21 }
 0x15d   : > { %v826_v29 = vadd.f32 %v814_v17, %v765_v25 }
 0x15e   : > { %v817_v30 = vpop.f32.mrf.mxu0 }
 0x15f   : > { %v854_v32 = vadd.f32 %v837_v26, %v826_v29 }
 0x160   : > { %v695_v33 = vpop.f32.mrf.mxu2 }
 0x161   : > { %v858_v14 = vmax.f32 %v854_v32, 0.0  ;;  %v705_v35 = vadd.f32 %v695_v33, %v644_v31  ;;  %v756_v36 = vpop.f32.mrf.mxu3  ;;  %v637_v37 = vpop.f32.mrf.mxu1 }
 0x162   : > { %v645_v44 = vadd.f32 %v637_v37, %v584_v41 }
 0x163   : > { %862 = vst [vmem:[%s1576_s24] sm:$0xff] %v858_v14  ;;  %v766_v39 = vadd.f32 %v756_v36, %v705_v35 }
 0x165   : > { %v827_v43 = vadd.f32 %v817_v30, %v766_v39 }
 0x166   : > { %v820_v47 = vpop.f32.mrf.mxu0 }
 0x167   : > { %v855_v45 = vadd.f32 %v842_v40, %v827_v43 }
 0x168   : > { %v698_v46 = vpop.f32.mrf.mxu2 }
 0x169   : > { %v859_v49 = vmax.f32 %v855_v45, 0.0  ;;  %v706_v50 = vadd.f32 %v698_v46, %v645_v44  ;;  %v759_v51 = vpop.f32.mrf.mxu3  ;;  %v640_v53 = vpop.f32.mrf.mxu1 }
 0x16a   : > { %v646_v57 = vadd.f32 %v640_v53, %v585_v55  ;;  %v909_v5 = vld [vmem:[%s1576_s24] sm:$0xff] (%p1345_p8) }
 0x16b   : > { %863 = vst [vmem:[%s1576_s24 + $0x8] sm:$0xff] %v859_v49  ;;  %v767_v52 = vadd.f32 %v759_v51, %v706_v50 }
 0x16c   : > { %910 = vst [vmem:[%s874_s29] sm:$0xff] (%p1345_p8), %v909_v5 }
 0x16d   : > { %v828_v56 = vadd.f32 %v820_v47, %v767_v52 }
 0x16e   : > { %v823_v63 = vpop.f32.mrf.mxu0 }
 0x16f   : > { %v856_v58 = vadd.f32 %v847_v54, %v828_v56 }
 0x170   : > { %v701_v59 = vpop.f32.mrf.mxu2 }
 0x171   : > { %v860_v60 = vmax.f32 %v856_v58, 0.0  ;;  %v707_v61 = vadd.f32 %v701_v59, %v646_v57  ;;  %v762_v62 = vpop.f32.mrf.mxu3 }
 0x172   : > { %v911_v6 = vld [vmem:[%s1576_s24 + $0x8] sm:$0xff] (%p1345_p8) }
 0x173   : > { %864 = vst [vmem:[%s1576_s24 + $0x10] sm:$0xff] %v860_v60  ;;  %v768_v0 = vadd.f32 %v762_v62, %v707_v61 }
 0x174   : > { %912 = vst [vmem:[%s874_s29 + $0x10] sm:$0xff] (%p1345_p8), %v911_v6 }
 0x175   : > { %v829_v1 = vadd.f32 %v823_v63, %v768_v0 }
 0x177   : > { %v857_v3 = vadd.f32 %v852_v2, %v829_v1  ;;  %872 = sbr.rel (!%p1345_p8) target bundleno = 388 (0x184), region = 116 }
 0x179   : > { %v861_v4 = vmax.f32 %v857_v3, 0.0 }
 0x17a   : > { %v913_v7 = vld [vmem:[%s1576_s24 + $0x10] sm:$0xff] (%p1345_p8) }
 0x17b   : > { %865 = vst [vmem:[%s1576_s24 + $0x18] sm:$0xff] %v861_v4 }
 0x17c   : > { %914 = vst [vmem:[%s874_s29 + $0x20] sm:$0xff] %v913_v7 }
 0x182   : > { %v915_v8 = vld [vmem:[%s1576_s24 + $0x18] sm:$0xff] }
 0x183   : > { %916 = vst [vmem:[%s874_s29 + $0x30] sm:$0xff] %v915_v8 }
 0x184 PF: > { %p11_p13 = scmp.ge.s32.totalorder %s1320_s21, 4   ;;  %s1616_s15 = smov %s1245_s16 }
 0x185   : > { %s1617_s16 = smov %s1339_s28  ;;  %s1618_s17 = smov %s1253_s18 }
 0x186   : > { %s1619_s18 = smov %s1330_s25  ;;  %s1620_s19 = smov %s1320_s21 }
 0x187   :  { %13 = sbr.rel (!%p11_p13) target bundleno = 3 (0x3), region = 201 }

// kernel: jpg_with_attention_forward.9
= control target key start
LH: loop header
LB: loop body
LE: loop exit
PB: predicated region body
PF: predicated region fallthrough
CT: control target
= control target key end

     0   :  { %s1022_s15 = smov 0   ;;  %s1024_s16 = smov 0   ;;  %s1220_s0 = inlined_call_operand.vmem [shape: f32[4,3,384], index: 0, kind: input, shape index: {}, may-alias: {0,1}]   ;;  %s1221_s1 = inlined_call_operand.vmem [shape: f32[4,3,384], index: 1, kind: input, shape index: {}, may-alias: {0,1}]   ;;  %s1222_s2 = inlined_call_operand.vmem [shape: f32[9,16,3], index: 2, kind: input, shape index: {}]   ;;  %s1223_s3 = inlined_call_operand.vmem [shape: f32[16,1], index: 3, kind: input, shape index: {}]   ;;  %s1224_s4 = inlined_call_operand.vmem [shape: f32[16,256], index: 4, kind: output, shape index: {}]  }
   0x1   :  { %s1026_s17 = smov 0   ;;  %s1028_s18 = smov 0  }
   0x2   :  { %s1030_s19 = smov 0  }
   0x3 LB: > { %s837_s20 = sadd.s32 4294967295, %s991_s19   ;;  %s1049_s21 = sadd.s32 1, %s991_s19   ;;  %s991_s19 = sphi %s1030_s19, %s1231_s19   ;;  %s987_s18 = sphi %s1028_s18, %s1230_s18   ;;  %s983_s17 = sphi %s1026_s17, %s1229_s17   ;;  %s979_s16 = sphi %s1024_s16, %s1228_s16   ;;  %s975_s15 = sphi %s1022_s15, %s1227_s15  }
   0x4   : > { %s18_s22 = ssub.s32 %s991_s19, %s1049_s21  ;;  %s21_s23 = sadd.s32 1, %s987_s18 }
   0x5   : > { %p19_p0 = scmp.eq.s32.totalorder %s18_s22, 0  ;;  %p28_p1 = scmp.ne.s32.totalorder %s987_s18, %s983_s17 }
   0x6   : > { %p29_p2 = scmp.eq.s32.totalorder %s991_s19, 0  ;;  %s45_s24 = sadd.s32 1, %s1049_s21 }
   0x7   : > { %s1059_s25 = scalar_select %p19_p0, %s987_s18, %s21_s23  }
   0x8   : > { %p30_p3 = por %p29_p2, %p28_p1  ;;  %s46_s26 = ssub.s32 %s1049_s21, %s45_s24 }
   0x9   : > { %p47_p4 = scmp.eq.s32.totalorder %s46_s26, 0  ;;  %s49_s27 = sadd.s32 1, %s979_s16 }
   0xa   : > { %p56_p5 = scmp.ne.s32.totalorder %s979_s16, %s975_s15  ;;  %p128_p6 = scmp.eq.s32.totalorder %s837_s20, 1 }
   0xb   : > { %s1068_s28 = scalar_select %p47_p4, %s979_s16, %s49_s27  }
   0xc   : > { %p1070_p7 = por %p56_p5, %p29_p2  ;;  %p1074_p8 = por %p128_p6, %p28_p1 }
   0xd   : > { %p840_p9 = scmp.ge.s32.totalorder %s991_s19, 2 }
   0xf   : > { %156 = sbr.rel (%p840_p9) target bundleno = 36 (0x24), region = 24 }
  0x14   : > { %159 = sbr.rel (!%p30_p3) target bundleno = 28 (0x1c), region = 28  ;;  %s161_s5 = sand.u32 (%p30_p3), 1, %s987_s18  }
  0x15   : > { %s842_s6 = sshll.u32 (%p30_p3), %s991_s19, 2  ;;  %s841_s7 = sshll.u32 (%p30_p3), %s161_s5, 4 }
  0x16   : > { %s165_s10 = scalar_lea.vmem (%p30_p3), %s1220_s0, %s842_s6  ;;  %s163_s11 = scalar_lea.vmem (%p30_p3), [#allocation2], %s841_s7 }
  0x17   : > { %v182_v0 = vld [vmem:[%s165_s10] sm:$0xf] (%p30_p3)  ;;  %v184_v1 = vld [vmem:[%s165_s10 + $0xc] sm:$0xf] (%p30_p3)  ;;  %v186_v2 = vld [vmem:[%s165_s10 + $0x18] sm:$0xf] (%p30_p3) }
  0x18   : > { %183 = vst [vmem:[%s163_s11] sm:$0xf] (%p30_p3), %v182_v0  ;;  %v188_v3 = vld [vmem:[%s165_s10 + $0x24] sm:$0xf] (%p30_p3) }
  0x19   : > { %185 = vst [vmem:[%s163_s11 + $0x4] sm:$0xf] %v184_v1 }
  0x1a   : > { %187 = vst [vmem:[%s163_s11 + $0x8] sm:$0xf] %v186_v2 }
  0x1b   : > { %189 = vst [vmem:[%s163_s11 + $0xc] sm:$0xf] %v188_v3 }
  0x1c PF: > { %221 = sbr.rel (!%p1070_p7) target bundleno = 36 (0x24), region = 69  ;;  %s223_s12 = sand.u32 (%p1070_p7), 1, %s979_s16  }
  0x1d   : > { %s844_s13 = sshll.u32 (%p1070_p7), %s991_s19, 2  ;;  %s843_s14 = sshll.u32 (%p1070_p7), %s223_s12, 4 }
  0x1e   : > { %s781_s24 = scalar_lea.vmem (%p1070_p7), %s1221_s1, %s844_s13  ;;  %s225_s26 = scalar_lea.vmem (%p1070_p7), [#allocation3], %s843_s14 }
  0x1f   : > { %v845_v4 = vld [vmem:[%s781_s24 + $0x4] sm:$0xf] (%p1070_p7)  ;;  %v846_v5 = vld [vmem:[%s781_s24 + $0x10] sm:$0xf] (%p1070_p7)  ;;  %v847_v6 = vld [vmem:[%s781_s24 + $0x1c] sm:$0xf] (%p1070_p7) }
  0x20   : > { %246 = vst [vmem:[%s225_s26] sm:$0xf] (%p1070_p7), %v845_v4  ;;  %v848_v7 = vld [vmem:[%s781_s24 + $0x28] sm:$0xf] (%p1070_p7) }
  0x21   : > { %248 = vst [vmem:[%s225_s26 + $0x4] sm:$0xf] %v846_v5 }
  0x22   : > { %250 = vst [vmem:[%s225_s26 + $0x8] sm:$0xf] %v847_v6 }
  0x23   : > { %252 = vst [vmem:[%s225_s26 + $0xc] sm:$0xf] %v848_v7 }
  0x24 PF: > { %p849_p10 = scmp.ge.s32.totalorder %s991_s19, 1  ;;  %p283_p11 = scmp.lt.s32.totalorder %s991_s19, 3 }
  0x26   : > { %p284_p12 = pnand %p849_p10, %p283_p11 }
  0x27   : > { %s290_s27 = sand.u32 (!%p284_p12), 1, %s983_s17   ;;  %s297_s5 = sand.u32 (!%p284_p12), 1, %s975_s15  }
  0x28   : > { %287 = sbr.rel (%p284_p12) target bundleno = 350 (0x15e), region = 110  ;;  %s1094_s29 = sshll.u32 (!%p284_p12), %s290_s27, 4 }
  0x29   : > { %s1098_s6 = scalar_lea.vmem (!%p284_p12), [#allocation2], %s1094_s29  ;;  %s851_s7 = sshll.u32 (!%p284_p12), %s297_s5, 4 }
  0x2a   : > { %s993_s8 = smov (!%p284_p12), 119   ;;  %s994_s9 = smov (!%p284_p12), 127  }
  0x2b   : > { %s995_s10 = smov (!%p284_p12), 118   ;;  %s299_s11 = scalar_lea.vmem (!%p284_p12), [#allocation3], %s851_s7 }
  0x2c   : > { %s324_s23 = scalar_lea.vmem (!%p284_p12), [#allocation4], %s1094_s29 }
  0x2d   : > { %v326_v8 = vld [vmem:[%s1098_s6] sm:$0x7]  ;;  %v884_v10 = vld [vmem:[%s299_s11 + $0x8] sm:$0x7]  ;;  %v871_v12 = vld [vmem:[%s1098_s6 + $0x4] sm:$0x7]  ;;  %v334_v14 = vlaneseq }
  0x2e   : > { %407 = vrot.lane.b32.xlu1 %v326_v8, %s993_s8  ;;  %330 = vrot.lane.b32.xlu0 %v326_v8, %s994_s9  ;;  %v327_v9 = vld [vmem:[%s299_s11] sm:$0x7]  ;;  %v883_v11 = vld [vmem:[%s1098_s6 + $0x8] sm:$0x7]  ;;  %vm348_vm1 = vcmask 1042432   ;;  %vm341_vm2 = vcmask 23552  }
  0x2f   : > { %450 = vrot.lane.b32.xlu2 %v326_v8, %s995_s10  ;;  %v872_v13 = vld [vmem:[%s299_s11 + $0x4] sm:$0x7]  ;;  %v335_v16 = vand.u32 127, %v334_v14  ;;  %v867_v20 = vld [vmem:[%s1222_s2 + $0x88] sm:$0xff]  ;;  %v996_v32 = vmov 0   ;;  %v891_v44 = vld [vmem:[%s1222_s2 + $0x58] sm:$0xff] }
  0x30   : > { %v866_v18 = vld [vmem:[%s1222_s2 + $0x80] sm:$0xff]  ;;  %v854_v25 = vld [vmem:[%s1222_s2 + $0x28] sm:$0xff]  ;;  %950 = vset.pattern.permute.xlu1 %v996_v32  ;;  %v890_v37 = vld [vmem:[%s1222_s2 + $0x50] sm:$0xff]  ;;  %951 = vset.pattern.permute.xlu2 %v996_v32  ;;  %s902_s24 = sshll.u32 (%p1074_p8), %s837_s20, 3 }
  0x31   : > { %vm454_vm0 = vcmp.lt.s32.totalorder %v335_v16, 118  ;;  %vm336_vm3 = vcmp.lt.s32.totalorder %v335_v16, 127  ;;  %vm411_vm4 = vcmp.lt.s32.totalorder %v335_v16, 119  ;;  %v861_v28 = vld [vmem:[%s1222_s2 + $0x60] sm:$0xff]  ;;  %v895_v30 = vld [vmem:[%s1098_s6 + $0xc] sm:$0x7]  ;;  %952 = vset.pattern.permute.xlu0 %v996_v32  ;;  %s724_s5 = scalar_lea.vmem (%p1074_p8), %s1224_s4, %s902_s24 }
  0x32   : > { %v853_v29 = vld [vmem:[%s1222_s2 + $0x20] sm:$0xff]  ;;  %v699_v33 = vld [vmem:[%s1223_s3 + $0x8] sm:$0xff]  ;;  %v873_v40 = vld [vmem:[%s1222_s2 + $0x10] sm:$0xff] }
  0x33   : > { %v698_v31 = vld [vmem:[%s1223_s3] sm:$0xff]  ;;  %v862_v39 = vld [vmem:[%s1222_s2 + $0x68] sm:$0xff]  ;;  %v885_v46 = vld [vmem:[%s1222_s2 + $0x30] sm:$0xff] }
  0x34   : > { %v328_v36 = vld [vmem:[%s1222_s2] sm:$0xff]  ;;  %v329_v43 = vld [vmem:[%s1222_s2 + $0x8] sm:$0xff]  ;;  %v874_v47 = vld [vmem:[%s1222_s2 + $0x18] sm:$0xff] }
  0x35   : > { %v878_v48 = vld [vmem:[%s1222_s2 + $0x70] sm:$0xff]  ;;  %v886_v49 = vld [vmem:[%s1222_s2 + $0x38] sm:$0xff]  ;;  %v896_v50 = vld [vmem:[%s1222_s2 + $0x40] sm:$0xff] }
  0x36   : > { %409 = vrot.lane.b32.xlu1 %v327_v9, %s993_s8  ;;  %332 = vrot.lane.b32.xlu0 %v327_v9, %s994_s9  ;;  %v879_v51 = vld [vmem:[%s1222_s2 + $0x78] sm:$0xff]  ;;  %v897_v52 = vld [vmem:[%s1222_s2 + $0x48] sm:$0xff] }
  0x37   : > { %452 = vrot.lane.b32.xlu2 %v327_v9, %s995_s10 }
  0x3e   : > { %619 = vrot.lane.b32.xlu1 %v884_v10, %s994_s9  ;;  %617 = vrot.lane.b32.xlu0 %v883_v11, %s994_s9 }
  0x3f   : > { %534 = vrot.lane.b32.xlu2 %v871_v12, %s993_s8 }
  0x46   : > { %536 = vrot.lane.b32.xlu0 %v872_v13, %s993_s8  ;;  %702 = vperm.xlu1 %950, %v698_v31  }
  0x47   : > { %707 = vperm.xlu2 %951, %v699_v33  }
  0x89   : > { %v451_v15 = vpop.permute.xlu2 %450 }
  0x91   : > { %v453_v17 = vpop.permute.xlu2 %452 }
  0x92   : > { %v455_v19 = vsel %vm454_vm0, %v451_v15, %v453_v17 }
  0x93   : > { %868 = vmatpush.msk.msra.mxu3 %vm348_vm1, %v455_v19 }
  0x94   : > { %869 = vmatmul.msk.f32.vlgmr.msra.gmra.mxu3 %vm341_vm2, %v866_v18 }
  0x99   : > { %v535_v41 = vpop.permute.xlu2 %534 }
  0x9c   : > { %870 = vmatmul.msk.f32.gmra.mxu3 %vm341_vm2, %v867_v20 }
  0xa0   : > { %v408_v21 = vpop.permute.xlu1 %407  ;;  %v331_v22 = vpop.permute.xlu0 %330 }
  0xa8   : > { %v410_v23 = vpop.permute.xlu1 %409  ;;  %v333_v24 = vpop.permute.xlu0 %332 }
  0xa9   : > { %v337_v26 = vsel %vm336_vm3, %v331_v22, %v333_v24  ;;  %v412_v27 = vsel %vm411_vm4, %v408_v21, %v410_v23 }
  0xaa   : > { %855 = vmatpush.msk.msra.mxu0 %vm348_vm1, %v337_v26  ;;  %905 = vmatpush.msk.msra.mxu1 %vm348_vm1, %v337_v26 }
  0xab   : > { %863 = vmatpush.msk.msra.mxu2 %vm348_vm1, %v412_v27  ;;  %857 = vmatmul.msk.f32.vlgmr.msra.gmra.mxu1 %vm341_vm2, %v854_v25  ;;  %v708_v25 = vpop.permute.xlu2 %707 }
  0xac   : > { %864 = vmatmul.msk.f32.vlgmr.msra.gmra.mxu2 %vm341_vm2, %v861_v28  ;;  %856 = vmatmul.msk.f32.vlgmr.msra.gmra.mxu0 %vm341_vm2, %v853_v29 }
  0xad   : > { %858 = vmatpush.msk.msrb.mxu1 %vm348_vm1, %v326_v8  ;;  %887 = vmatpush.msk.msrb.mxu2 %vm348_vm1, %v883_v11 }
  0xae   : > { %875 = vmatpush.msk.msrb.mxu0 %vm348_vm1, %v871_v12 }
  0xb0   : > { %898 = vmatpush.msk.msra.mxu0 %vm348_vm1, %v895_v30  ;;  %v620_v34 = vpop.permute.xlu1 %619  ;;  %v618_v35 = vpop.permute.xlu0 %617 }
  0xb1   : > { %v621_v38 = vsel %vm336_vm3, %v618_v35, %v620_v34 }
  0xb2   : > { %892 = vmatpush.msk.msrb.mxu3 %vm348_vm1, %v621_v38 }
  0xb3   : > { %859 = vmatmul.msk.f32.vlgmr.msrb.gmra.mxu1 %vm341_vm2, %v328_v36  ;;  %893 = vmatmul.msk.f32.vlgmr.msrb.gmra.mxu3 %vm341_vm2, %v890_v37 }
  0xb4   : > { %865 = vmatmul.msk.f32.gmra.mxu2 %vm341_vm2, %v862_v39  ;;  %876 = vmatmul.msk.f32.vlgmr.msrb.gmra.mxu0 %vm341_vm2, %v873_v40 }
  0xb8   : > { %v537_v42 = vpop.permute.xlu0 %536  ;;  %v703_v13 = vpop.permute.xlu1 %702 }
  0xb9   : > { %v538_v45 = vsel %vm411_vm4, %v535_v41, %v537_v42 }
  0xba   : > { %880 = vmatpush.msk.msra.mxu1 %vm348_vm1, %v538_v45 }
  0xbb   : > { %860 = vmatmul.msk.f32.gmra.mxu1 %vm341_vm2, %v329_v43  ;;  %894 = vmatmul.msk.f32.gmra.mxu3 %vm341_vm2, %v891_v44 }
  0xbc   : > { %888 = vmatmul.msk.f32.vlgmr.msrb.gmra.mxu2 %vm341_vm2, %v885_v46  ;;  %877 = vmatmul.msk.f32.gmra.mxu0 %vm341_vm2, %v874_v47 }
  0xc3   : > { %881 = vmatmul.msk.f32.vlgmr.msra.gmra.mxu1 %vm341_vm2, %v878_v48 }
  0xc4   : > { %889 = vmatmul.msk.f32.gmra.mxu2 %vm341_vm2, %v886_v49  ;;  %899 = vmatmul.msk.f32.vlgmr.msra.gmra.mxu0 %vm341_vm2, %v896_v50 }
  0xcb   : > { %882 = vmatmul.msk.f32.gmra.mxu1 %vm341_vm2, %v879_v51 }
  0xcc   : > { %900 = vmatmul.msk.f32.gmra.mxu0 %vm341_vm2, %v897_v52 }
 0x117   : > { %v485_v55 = vpop.f32.mrf.mxu3 }
 0x11f   : > { %v488_v60 = vpop.f32.mrf.mxu3 }
 0x128   : > { %v372_v53 = vpop.f32.mrf.mxu1 }
 0x129   : > { %v369_v54 = vpop.f32.mrf.mxu0 }
 0x12f   : > { %v442_v56 = vpop.f32.mrf.mxu2 }
 0x130   : > { %v401_v57 = vpop.f32.mrf.mxu1 }
 0x131   : > { %v526_v58 = vpop.f32.mrf.mxu0  ;;  %v402_v59 = vadd.f32 %v401_v57, %v369_v54 }
 0x133   : > { %v448_v61 = vadd.f32 %v442_v56, %v402_v59 }
 0x135   : > { %v491_v1 = vadd.f32 %v485_v55, %v448_v61 }
 0x136   : > { %v651_v7 = vpop.f32.mrf.mxu3 }
 0x137   : > { %v445_v62 = vpop.f32.mrf.mxu2  ;;  %v532_v3 = vadd.f32 %v526_v58, %v491_v1 }
 0x138   : > { %v404_v63 = vpop.f32.mrf.mxu1 }
 0x139   : > { %v529_v0 = vpop.f32.mrf.mxu0  ;;  %v405_v2 = vadd.f32 %v404_v63, %v372_v53 }
 0x13b   : > { %v449_v4 = vadd.f32 %v445_v62, %v405_v2 }
 0x13d   : > { %v492_v10 = vadd.f32 %v488_v60, %v449_v4 }
 0x13e   : > { %v654_v20 = vpop.f32.mrf.mxu3 }
 0x13f   : > { %v609_v5 = vpop.f32.mrf.mxu2  ;;  %v533_v14 = vadd.f32 %v529_v0, %v492_v10 }
 0x140   : > { %v568_v6 = vpop.f32.mrf.mxu1 }
 0x141   : > { %v574_v8 = vadd.f32 %v568_v6, %v532_v3  ;;  %v690_v9 = vpop.f32.mrf.mxu0 }
 0x143   : > { %v615_v11 = vadd.f32 %v609_v5, %v574_v8 }
 0x145   : > { %v657_v12 = vadd.f32 %v651_v7, %v615_v11 }
 0x147   : > { %v696_v15 = vadd.f32 %v690_v9, %v657_v12  ;;  %v612_v17 = vpop.f32.mrf.mxu2 }
 0x148   : > { %v571_v16 = vpop.f32.mrf.mxu1 }
 0x149   : > { %v710_v18 = vadd.f32 %v703_v13, %v696_v15  ;;  %v575_v19 = vadd.f32 %v571_v16, %v533_v14  ;;  %v693_v23 = vpop.f32.mrf.mxu0 }
 0x14b   : > { %v712_v21 = vmax.f32 %v710_v18, 0.0  ;;  %v616_v22 = vadd.f32 %v612_v17, %v575_v19 }
 0x14d   : > { %714 = vst [vmem:[%s324_s23] sm:$0xff] %v712_v21  ;;  %v658_v24 = vadd.f32 %v654_v20, %v616_v22 }
 0x14f   : > { %v697_v26 = vadd.f32 %v693_v23, %v658_v24 }
 0x151   : > { %v711_v27 = vadd.f32 %v708_v25, %v697_v26  ;;  %722 = sbr.rel (!%p1074_p8) target bundleno = 350 (0x15e), region = 122 }
 0x153   : > { %v713_v28 = vmax.f32 %v711_v27, 0.0 }
 0x154   : > { %v755_v29 = vld [vmem:[%s324_s23] sm:$0xff] (%p1074_p8) }
 0x155   : > { %715 = vst [vmem:[%s324_s23 + $0x8] sm:$0xff] %v713_v28 }
 0x156   : > { %756 = vst [vmem:[%s724_s5] sm:$0xff] %v755_v29 }
 0x15c   : > { %v757_v30 = vld [vmem:[%s324_s23 + $0x8] sm:$0xff] }
 0x15d   : > { %758 = vst [vmem:[%s724_s5 + $0x10] sm:$0xff] %v757_v30 }
 0x15e PF: > { %p11_p13 = scmp.ge.s32.totalorder %s1049_s21, 4   ;;  %s1227_s15 = smov %s979_s16 }
 0x15f   : > { %s1228_s16 = smov %s1068_s28  ;;  %s1229_s17 = smov %s987_s18 }
 0x160   : > { %s1230_s18 = smov %s1059_s25  ;;  %s1231_s19 = smov %s1049_s21 }
 0x161   :  { %13 = sbr.rel (!%p11_p13) target bundleno = 3 (0x3), region = 212 }

// kernel: jpg_with_attention_forward.11
= control target key start
LH: loop header
LB: loop body
LE: loop exit
PB: predicated region body
PF: predicated region fallthrough
CT: control target
= control target key end

     0   :  { %s1043_s23 = smov 127   ;;  %s1044_s24 = smov 123   ;;  %v239_v37 = vlaneseq  ;;  %vm251_vm2 = vcmask 261120   ;;  %s1433_s0 = inlined_call_operand.vmem [shape: f32[4,32,256], index: 0, kind: input, shape index: {}, may-alias: {0,1}]   ;;  %s1434_s1 = inlined_call_operand.vmem [shape: f32[4,32,256], index: 1, kind: input, shape index: {}, may-alias: {0,1}]   ;;  %s1435_s2 = inlined_call_operand.vmem [shape: f32[9,32,32], index: 2, kind: input, shape index: {}]   ;;  %s1436_s3 = inlined_call_operand.vmem [shape: f32[32,1], index: 3, kind: input, shape index: {}]   ;;  %s1437_s4 = inlined_call_operand.vmem [shape: f32[32,128], index: 4, kind: output, shape index: {}]  }
   0x1   :  { %v1075_v0 = vld [vmem:[%s1433_s0 + $0x30] sm:$0xff]  ;;  %v843_v1 = vld [vmem:[%s1434_s1 + $0x38] sm:$0xff]  ;;  %v1096_v6 = vld [vmem:[%s1433_s0 + $0x20] sm:$0xff]  ;;  %s1045_s7 = smov 122  }
   0x2   :  { %v1083_v2 = vld [vmem:[%s1433_s0 + $0x10] sm:$0xff]  ;;  %v940_v3 = vpack.i.bf16 %v843_v1, %v1075_v0  ;;  %v841_v4 = vld [vmem:[%s1434_s1 + $0x18] sm:$0xff]  ;;  %v842_v7 = vld [vmem:[%s1434_s1 + $0x28] sm:$0xff]  ;;  %v1196_v38 = vand.u32 127, %v239_v37 }
   0x3   :  { %v950_v5 = vpack.i.bf16 %v841_v4, %v1083_v2  ;;  %v1104_v8 = vld [vmem:[%s1433_s0] sm:$0xff]  ;;  %v840_v9 = vld [vmem:[%s1434_s1 + $0x8] sm:$0xff]  ;;  %v945_v10 = vpack.i.bf16 %v842_v7, %v1096_v6  ;;  %v1119_v12 = vld [vmem:[%s1433_s0 + $0xb0] sm:$0xff] }
   0x4   :  { %941 = vrot.lane.b32.xlu0 %v940_v3, %s1043_s23  ;;  %961 = vrot.lane.b32.xlu2 %v940_v3, %s1044_s24  ;;  %v955_v11 = vpack.i.bf16 %v840_v9, %v1104_v8  ;;  %v851_v13 = vld [vmem:[%s1434_s1 + $0xb8] sm:$0xff]  ;;  %v1127_v14 = vld [vmem:[%s1433_s0 + $0xa0] sm:$0xff]  ;;  %vm241_vm0 = vcmp.lt.s32.totalorder %v1196_v38, 127  ;;  %vm350_vm1 = vcmp.lt.s32.totalorder %v1196_v38, 123  ;;  %vm421_vm3 = vcmp.lt.s32.totalorder %v1196_v38, 122 }
   0x5   :  { %951 = vrot.lane.b32.xlu1 %v950_v5, %s1043_s23  ;;  %v850_v15 = vld [vmem:[%s1434_s1 + $0xa8] sm:$0xff]  ;;  %v1135_v16 = vld [vmem:[%s1433_s0 + $0x70] sm:$0xff]  ;;  %v847_v17 = vld [vmem:[%s1434_s1 + $0x78] sm:$0xff]  ;;  %v1000_v18 = vpack.i.bf16 %v851_v13, %v1119_v12 }
   0x6   :  { %v1010_v19 = vpack.i.bf16 %v850_v15, %v1127_v14  ;;  %v1005_v20 = vpack.i.bf16 %v847_v17, %v1135_v16  ;;  %v1147_v21 = vld [vmem:[%s1433_s0 + $0x60] sm:$0xff]  ;;  %v846_v22 = vld [vmem:[%s1434_s1 + $0x68] sm:$0xff]  ;;  %v1157_v23 = vld [vmem:[%s1433_s0 + $0x50] sm:$0xff] }
   0x7   :  { %v845_v24 = vld [vmem:[%s1434_s1 + $0x58] sm:$0xff]  ;;  %v1165_v25 = vld [vmem:[%s1433_s0 + $0x90] sm:$0xff]  ;;  %v1015_v27 = vpack.i.bf16 %v846_v22, %v1147_v21  ;;  %v1179_v30 = vld [vmem:[%s1433_s0 + $0x80] sm:$0xff] }
   0x8   :  { %v849_v26 = vld [vmem:[%s1434_s1 + $0x98] sm:$0xff]  ;;  %v1025_v28 = vpack.i.bf16 %v845_v24, %v1157_v23  ;;  %v848_v31 = vld [vmem:[%s1434_s1 + $0x88] sm:$0xff]  ;;  %v1187_v32 = vld [vmem:[%s1433_s0 + $0x40] sm:$0xff] }
   0x9   :  { %v1020_v29 = vpack.i.bf16 %v849_v26, %v1165_v25  ;;  %v844_v33 = vld [vmem:[%s1434_s1 + $0x48] sm:$0xff]  ;;  %v1030_v34 = vpack.i.bf16 %v848_v31, %v1179_v30  ;;  %v859_v13 = vld [vmem:[%s1435_s2 + $0x58] sm:$0xff]  ;;  %v219_v22 = vld [vmem:[%s1435_s2] sm:$0xff] }
   0xa   :  { %v1035_v35 = vpack.i.bf16 %v844_v33, %v1187_v32  ;;  %v857_v61 = vld [vmem:[%s1435_s2 + $0x48] sm:$0xff]  ;;  %v99_v37 = vld [vmem:[%s1433_s0 + $0xf0] sm:$0xff] }
   0xb   :  { %v792_v38 = vld [vmem:[%s1436_s3 + $0x8] sm:$0xff] }
   0xc   :  { %946 = vrot.lane.b32.xlu0 %v945_v10, %s1043_s23  ;;  %966 = vrot.lane.b32.xlu2 %v945_v10, %s1044_s24 }
   0xd   :  { %956 = vrot.lane.b32.xlu1 %v955_v11, %s1043_s23 }
  0x14   :  { %971 = vrot.lane.b32.xlu0 %v940_v3, %s1045_s7  ;;  %981 = vrot.lane.b32.xlu2 %v945_v10, %s1045_s7  ;;  %v858_v3 = vld [vmem:[%s1435_s2 + $0x50] sm:$0xff] }
  0x15   :  { %976 = vrot.lane.b32.xlu1 %v950_v5, %s1044_s24 }
  0x1c   :  { %986 = vrot.lane.b32.xlu0 %v955_v11, %s1044_s24  ;;  %996 = vrot.lane.b32.xlu2 %v955_v11, %s1045_s7 }
  0x1d   :  { %991 = vrot.lane.b32.xlu1 %v950_v5, %s1045_s7 }
  0x24   :  { %1001 = vrot.lane.b32.xlu0 %v1000_v18, %s1043_s23  ;;  %1011 = vrot.lane.b32.xlu2 %v1010_v19, %s1043_s23 }
  0x25   :  { %1006 = vrot.lane.b32.xlu1 %v1005_v20, %s1044_s24 }
  0x2c   :  { %1016 = vrot.lane.b32.xlu0 %v1015_v27, %s1044_s24  ;;  %1026 = vrot.lane.b32.xlu2 %v1025_v28, %s1044_s24 }
  0x2d   :  { %1021 = vrot.lane.b32.xlu1 %v1020_v29, %s1043_s23 }
  0x34   :  { %1031 = vrot.lane.b32.xlu0 %v1030_v34, %s1043_s23 }
  0x35   :  { %1036 = vrot.lane.b32.xlu1 %v1035_v35, %s1044_s24 }
  0x5e   :  { %v962_v36 = vpop.permute.xlu2 %961 }
  0x5f   :  { %v964_v55 = vunpack.i.h.bf16 %v962_v36  ;;  %v963_v56 = vunpack.i.l.bf16 %v962_v36  ;;  %v884_v36 = vld [vmem:[%s1435_s2 + $0x20] sm:$0xff] }
  0x61   :  { %v354_v9 = vsel %vm350_vm1, %v963_v56, %v964_v55 }
  0x66   :  { %v967_v39 = vpop.permute.xlu2 %966 }
  0x67   :  { %v969_v58 = vunpack.i.h.bf16 %v967_v39  ;;  %v968_v59 = vunpack.i.l.bf16 %v967_v39 }
  0x69   :  { %v353_v17 = vsel %vm350_vm1, %v968_v59, %v969_v58 }
  0x6e   :  { %v982_v46 = vpop.permute.xlu2 %981 }
  0x6f   :  { %v984_v62 = vunpack.i.h.bf16 %v982_v46  ;;  %v983_v63 = vunpack.i.l.bf16 %v982_v46  ;;  %v869_v46 = vld [vmem:[%s1435_s2 + $0xc8] sm:$0xff] }
  0x71   :  { %v424_v19 = vsel %vm421_vm3, %v983_v63, %v984_v62 }
  0x76   :  { %v942_v40 = vpop.permute.xlu0 %941  ;;  %v997_v15 = vpop.permute.xlu2 %996 }
  0x77   :  { %v944_v41 = vunpack.i.h.bf16 %v942_v40  ;;  %v943_v42 = vunpack.i.l.bf16 %v942_v40  ;;  %v952_v43 = vpop.permute.xlu1 %951  ;;  %v999_v26 = vunpack.i.h.bf16 %v997_v15  ;;  %v998_v27 = vunpack.i.l.bf16 %v997_v15 }
  0x78   :  { %v954_v47 = vunpack.i.h.bf16 %v952_v43  ;;  %v953_v48 = vunpack.i.l.bf16 %v952_v43 }
  0x79   :  { %v245_v44 = vsel %vm241_vm0, %v943_v42, %v944_v41 }
  0x7a   :  { %276 = vmatpush.msra.mxu0 %v245_v44  ;;  %924 = vmatpush.msra.mxu1 %v245_v44  ;;  %v243_v57 = vsel %vm241_vm0, %v953_v48, %v954_v47  ;;  %v95_v48 = vld [vmem:[%s1433_s0 + $0xd0] sm:$0xff] }
  0x7b   :  { %925 = vmatpush.msra.mxu2 %v245_v44  ;;  %926 = vmatpush.msra.mxu3 %v245_v44 }
  0x7e   :  { %v947_v45 = vpop.permute.xlu0 %946  ;;  %v1012_v34 = vpop.permute.xlu2 %1011 }
  0x7f   :  { %v949_v49 = vunpack.i.h.bf16 %v947_v45  ;;  %v948_v50 = vunpack.i.l.bf16 %v947_v45  ;;  %v957_v51 = vpop.permute.xlu1 %956  ;;  %v1014_v39 = vunpack.i.h.bf16 %v1012_v34  ;;  %v1013_v40 = vunpack.i.l.bf16 %v1012_v34  ;;  %v917_v34 = vld [vmem:[%s1435_s2 + $0x88] sm:$0xff] }
  0x80   :  { %v959_v52 = vunpack.i.h.bf16 %v957_v51  ;;  %v958_v53 = vunpack.i.l.bf16 %v957_v51  ;;  %v877_v51 = vld [vmem:[%s1435_s2 + $0x108] sm:$0xff] }
  0x81   :  { %v244_v54 = vsel %vm241_vm0, %v948_v50, %v949_v49  ;;  %v684_v47 = vsel %vm241_vm0, %v1013_v40, %v1014_v39  ;;  %v885_v50 = vld [vmem:[%s1435_s2 + $0x28] sm:$0xff]  ;;  %v919_v39 = vld [vmem:[%s1435_s2 + $0x98] sm:$0xff] }
  0x82   :  { %277 = vmatpush.msra.mxu0 %v244_v54  ;;  %927 = vmatpush.msra.mxu1 %v244_v54  ;;  %v242_v60 = vsel %vm241_vm0, %v958_v53, %v959_v52  ;;  %v93_v52 = vld [vmem:[%s1433_s0 + $0xc0] sm:$0xff]  ;;  %v221_v53 = vld [vmem:[%s1435_s2 + $0x10] sm:$0xff]  ;;  %v911_v40 = vld [vmem:[%s1435_s2 + $0xb8] sm:$0xff] }
  0x83   :  { %928 = vmatpush.msra.mxu2 %v244_v54  ;;  %929 = vmatpush.msra.mxu3 %v244_v54 }
  0x84   :  { %278 = vmatpush.msra.mxu0 %v243_v57  ;;  %930 = vmatpush.msra.mxu1 %v243_v57 }
  0x85   :  { %931 = vmatpush.msra.mxu2 %v243_v57  ;;  %932 = vmatpush.msra.mxu3 %v243_v57 }
  0x86   :  { %v972_v1 = vpop.permute.xlu0 %971  ;;  %279 = vmatpush.msra.mxu0 %v242_v60  ;;  %933 = vmatpush.msra.mxu1 %v242_v60 }
  0x87   :  { %v974_v4 = vunpack.i.h.bf16 %v972_v1  ;;  %v973_v5 = vunpack.i.l.bf16 %v972_v1  ;;  %v977_v7 = vpop.permute.xlu1 %976  ;;  %934 = vmatpush.msra.mxu2 %v242_v60  ;;  %935 = vmatpush.msra.mxu3 %v242_v60 }
  0x88   :  { %v979_v10 = vunpack.i.h.bf16 %v977_v7  ;;  %v978_v11 = vunpack.i.l.bf16 %v977_v7  ;;  %861 = vmatmul.msk.f32.vlgmr.msra.gmra.mxu1 %vm251_vm2, %v857_v61  ;;  %862 = vmatmul.msk.f32.vlgmr.msra.gmra.mxu2 %vm251_vm2, %v858_v3  ;;  %v870_v61 = vld [vmem:[%s1435_s2 + $0xd0] sm:$0xff] }
  0x89   :  { %384 = vmatpush.msrb.mxu2 %v354_v9  ;;  %317 = vmatpush.msrb.mxu1 %v1075_v0  ;;  %v425_v18 = vsel %vm421_vm3, %v973_v5, %v974_v4  ;;  %v856_v0 = vld [vmem:[%s1435_s2 + $0x40] sm:$0xff]  ;;  %v886_v3 = vld [vmem:[%s1435_s2 + $0x30] sm:$0xff]  ;;  %v222_v5 = vld [vmem:[%s1435_s2 + $0x18] sm:$0xff] }
  0x8a   :  { %455 = vmatpush.msrb.mxu3 %v425_v18  ;;  %v352_v20 = vsel %vm350_vm1, %v978_v11, %v979_v10  ;;  %860 = vmatmul.msk.f32.vlgmr.msra.gmra.mxu0 %vm251_vm2, %v856_v0  ;;  %v878_v4 = vld [vmem:[%s1435_s2 + $0x110] sm:$0xff]  ;;  %v879_v0 = vld [vmem:[%s1435_s2 + $0x118] sm:$0xff] }
  0x8b   :  { %385 = vmatpush.msrb.mxu2 %v353_v17  ;;  %318 = vmatpush.msrb.mxu1 %v1096_v6  ;;  %v871_v17 = vld [vmem:[%s1435_s2 + $0xd8] sm:$0xff] }
  0x8c   :  { %863 = vmatmul.msk.f32.vlgmr.msra.gmra.mxu3 %vm251_vm2, %v859_v13  ;;  %515 = vmatpush.msrb.mxu0 %v1135_v16 }
  0x8d   :  { %386 = vmatpush.msrb.mxu2 %v352_v20  ;;  %456 = vmatpush.msrb.mxu3 %v424_v19  ;;  %v887_v20 = vld [vmem:[%s1435_s2 + $0x38] sm:$0xff] }
  0x8e   :  { %319 = vmatpush.msrb.mxu1 %v1083_v2  ;;  %v987_v24 = vpop.permute.xlu0 %986  ;;  %v868_v2 = vld [vmem:[%s1435_s2 + $0xc0] sm:$0xff]  ;;  %516 = vmatpush.msrb.mxu0 %v1147_v21 }
  0x8f   :  { %v989_v28 = vunpack.i.h.bf16 %v987_v24  ;;  %v988_v29 = vunpack.i.l.bf16 %v987_v24  ;;  %v992_v6 = vpop.permute.xlu1 %991  ;;  %v876_v21 = vld [vmem:[%s1435_s2 + $0x100] sm:$0xff]  ;;  %v793_v24 = vld [vmem:[%s1436_s3 + $0x10] sm:$0xff] }
  0x90   :  { %320 = vmatpush.msrb.mxu1 %v1104_v8  ;;  %v994_v31 = vunpack.i.h.bf16 %v992_v6  ;;  %v993_v33 = vunpack.i.l.bf16 %v992_v6  ;;  %v422_v8 = vsel %vm421_vm3, %v998_v27, %v999_v26  ;;  %517 = vmatpush.msrb.mxu0 %v1157_v23  ;;  %v220_v23 = vld [vmem:[%s1435_s2 + $0x8] sm:$0xff]  ;;  %v1046_v26 = vmov 0   ;;  %v791_v27 = vld [vmem:[%s1436_s3] sm:$0xff] }
  0x91   :  { %864 = vmatmul.msk.f32.vlgmr.msrb.gmra.mxu1 %vm251_vm2, %v219_v22  ;;  %v351_v35 = vsel %vm350_vm1, %v988_v29, %v989_v28  ;;  %v892_v22 = vld [vmem:[%s1435_s2 + $0xe0] sm:$0xff]  ;;  %1041 = vset.pattern.permute.xlu0 %v1046_v26 }
  0x92   :  { %387 = vmatpush.msrb.mxu2 %v351_v35  ;;  %v423_v16 = vsel %vm421_vm3, %v993_v33, %v994_v31  ;;  %518 = vmatpush.msrb.mxu0 %v1187_v32  ;;  %v900_v28 = vld [vmem:[%s1435_s2 + $0x60] sm:$0xff]  ;;  %v893_v31 = vld [vmem:[%s1435_s2 + $0xe8] sm:$0xff]  ;;  %v794_v33 = vld [vmem:[%s1436_s3 + $0x18] sm:$0xff] }
  0x93   :  { %457 = vmatpush.msrb.mxu3 %v423_v16  ;;  %872 = vmatmul.msk.f32.vlgmr.msrb.gmra.mxu2 %vm251_vm2, %v868_v2  ;;  %v916_v29 = vld [vmem:[%s1435_s2 + $0x80] sm:$0xff]  ;;  %v901_v2 = vld [vmem:[%s1435_s2 + $0x68] sm:$0xff]  ;;  %v894_v16 = vld [vmem:[%s1435_s2 + $0xf0] sm:$0xff] }
  0x94   :  { %645 = vmatpush.msra.mxu2 %v1119_v12  ;;  %888 = vmatmul.msk.f32.vlgmr.msrb.gmra.mxu0 %vm251_vm2, %v884_v36  ;;  %v97_v12 = vld [vmem:[%s1433_s0 + $0xe0] sm:$0xff]  ;;  %v909_v35 = vld [vmem:[%s1435_s2 + $0xa8] sm:$0xff]  ;;  %v918_v36 = vld [vmem:[%s1435_s2 + $0x90] sm:$0xff] }
  0x95   :  { %458 = vmatpush.msrb.mxu3 %v422_v8  ;;  %770 = vmatpush.msra.mxu0 %v99_v37  ;;  %v908_v6 = vld [vmem:[%s1435_s2 + $0xa0] sm:$0xff]  ;;  %v902_v8 = vld [vmem:[%s1435_s2 + $0x70] sm:$0xff]  ;;  %v895_v37 = vld [vmem:[%s1435_s2 + $0xf8] sm:$0xff] }
  0x96   :  { %880 = vmatmul.msk.f32.vlgmr.msrb.gmra.mxu3 %vm251_vm2, %v876_v21  ;;  %v1002_v41 = vpop.permute.xlu0 %1001  ;;  %646 = vmatpush.msra.mxu2 %v1127_v14  ;;  %v910_v21 = vld [vmem:[%s1435_s2 + $0xb0] sm:$0xff] }
  0x97   :  { %v1004_v32 = vunpack.i.h.bf16 %v1002_v41  ;;  %v1003_v42 = vunpack.i.l.bf16 %v1002_v41  ;;  %v1007_v43 = vpop.permute.xlu1 %1006  ;;  %771 = vmatpush.msra.mxu0 %v97_v12  ;;  %1042 = vset.pattern.permute.xlu1 %v1046_v26 }
  0x98   :  { %v1009_v44 = vunpack.i.h.bf16 %v1007_v43  ;;  %v1008_v45 = vunpack.i.l.bf16 %v1007_v43  ;;  %647 = vmatpush.msra.mxu2 %v1165_v25  ;;  %v1027_v25 = vpop.permute.xlu2 %1026  ;;  %802 = vperm.xlu0 %1041, %v792_v38  }
  0x99   :  { %865 = vmatmul.msk.f32.gmra.mxu1 %vm251_vm2, %v220_v23  ;;  %v685_v14 = vsel %vm241_vm0, %v1003_v42, %v1004_v32  ;;  %772 = vmatpush.msra.mxu0 %v95_v48  ;;  %v1028_v54 = vunpack.i.l.bf16 %v1027_v25  ;;  %v903_v23 = vld [vmem:[%s1435_s2 + $0x78] sm:$0xff] }
  0x9a   :  { %715 = vmatpush.msra.mxu3 %v685_v14  ;;  %v555_v49 = vsel %vm350_vm1, %v1008_v45, %v1009_v44  ;;  %648 = vmatpush.msra.mxu2 %v1179_v30  ;;  %v1029_v30 = vunpack.i.h.bf16 %v1027_v25 }
  0x9b   :  { %873 = vmatmul.msk.f32.gmra.mxu2 %vm251_vm2, %v869_v46  ;;  %585 = vmatpush.msra.mxu1 %v555_v49 }
  0x9c   :  { %716 = vmatpush.msra.mxu3 %v684_v47  ;;  %889 = vmatmul.msk.f32.gmra.mxu0 %vm251_vm2, %v885_v50  ;;  %v553_v63 = vsel %vm350_vm1, %v1028_v54, %v1029_v30 }
  0x9d   :  { %773 = vmatpush.msra.mxu0 %v93_v52  ;;  %807 = vperm.xlu1 %1042, %v793_v24  }
  0x9e   :  { %881 = vmatmul.msk.f32.gmra.mxu3 %vm251_vm2, %v877_v51  ;;  %v1017_v55 = vpop.permute.xlu0 %1016  ;;  %1040 = vset.pattern.permute.xlu2 %v1046_v26 }
  0x9f   :  { %v1019_v56 = vunpack.i.h.bf16 %v1017_v55  ;;  %v1018_v57 = vunpack.i.l.bf16 %v1017_v55  ;;  %v1022_v58 = vpop.permute.xlu1 %1021  ;;  %797 = vperm.xlu2 %1040, %v791_v27  }
  0xa0   :  { %v1024_v59 = vunpack.i.h.bf16 %v1022_v58  ;;  %v1023_v60 = vunpack.i.l.bf16 %v1022_v58 }
  0xa1   :  { %866 = vmatmul.msk.f32.gmra.mxu1 %vm251_vm2, %v221_v53  ;;  %v554_v62 = vsel %vm350_vm1, %v1018_v57, %v1019_v56 }
  0xa2   :  { %586 = vmatpush.msra.mxu1 %v554_v62  ;;  %v683_v1 = vsel %vm241_vm0, %v1023_v60, %v1024_v59 }
  0xa3   :  { %874 = vmatmul.msk.f32.gmra.mxu2 %vm251_vm2, %v870_v61  ;;  %717 = vmatpush.msra.mxu3 %v683_v1 }
  0xa4   :  { %587 = vmatpush.msra.mxu1 %v553_v63  ;;  %890 = vmatmul.msk.f32.gmra.mxu0 %vm251_vm2, %v886_v3 }
  0xa6   :  { %882 = vmatmul.msk.f32.gmra.mxu3 %vm251_vm2, %v878_v4  ;;  %v1032_v7 = vpop.permute.xlu0 %1031 }
  0xa7   :  { %v1037_v9 = vpop.permute.xlu1 %1036  ;;  %v1034_v10 = vunpack.i.h.bf16 %v1032_v7  ;;  %v1033_v11 = vunpack.i.l.bf16 %v1032_v7  ;;  %812 = vperm.xlu2 %1040, %v794_v33  }
  0xa8   :  { %v1039_v13 = vunpack.i.h.bf16 %v1037_v9  ;;  %v1038_v15 = vunpack.i.l.bf16 %v1037_v9 }
  0xa9   :  { %867 = vmatmul.msk.f32.gmra.mxu1 %vm251_vm2, %v222_v5  ;;  %v682_v18 = vsel %vm241_vm0, %v1033_v11, %v1034_v10 }
  0xaa   :  { %v552_v19 = vsel %vm350_vm1, %v1038_v15, %v1039_v13  ;;  %718 = vmatpush.msra.mxu3 %v682_v18 }
  0xab   :  { %875 = vmatmul.msk.f32.gmra.mxu2 %vm251_vm2, %v871_v17  ;;  %588 = vmatpush.msra.mxu1 %v552_v19 }
  0xac   :  { %891 = vmatmul.msk.f32.gmra.mxu0 %vm251_vm2, %v887_v20 }
  0xae   :  { %883 = vmatmul.msk.f32.gmra.mxu3 %vm251_vm2, %v879_v0 }
  0xb1   :  { %896 = vmatmul.msk.f32.vlgmr.msra.gmra.mxu1 %vm251_vm2, %v892_v22 }
  0xb3   :  { %904 = vmatmul.msk.f32.vlgmr.msra.gmra.mxu2 %vm251_vm2, %v900_v28 }
  0xb4   :  { %920 = vmatmul.msk.f32.vlgmr.msra.gmra.mxu0 %vm251_vm2, %v916_v29 }
  0xb6   :  { %912 = vmatmul.msk.f32.vlgmr.msra.gmra.mxu3 %vm251_vm2, %v908_v6 }
  0xb9   :  { %897 = vmatmul.msk.f32.gmra.mxu1 %vm251_vm2, %v893_v31 }
  0xbb   :  { %905 = vmatmul.msk.f32.gmra.mxu2 %vm251_vm2, %v901_v2 }
  0xbc   :  { %921 = vmatmul.msk.f32.gmra.mxu0 %vm251_vm2, %v917_v34 }
  0xbe   :  { %913 = vmatmul.msk.f32.gmra.mxu3 %vm251_vm2, %v909_v35 }
  0xc1   :  { %898 = vmatmul.msk.f32.gmra.mxu1 %vm251_vm2, %v894_v16 }
  0xc3   :  { %906 = vmatmul.msk.f32.gmra.mxu2 %vm251_vm2, %v902_v8 }
  0xc4   :  { %922 = vmatmul.msk.f32.gmra.mxu0 %vm251_vm2, %v918_v36 }
  0xc6   :  { %914 = vmatmul.msk.f32.gmra.mxu3 %vm251_vm2, %v910_v21 }
  0xc9   :  { %899 = vmatmul.msk.f32.gmra.mxu1 %vm251_vm2, %v895_v37 }
  0xcb   :  { %907 = vmatmul.msk.f32.gmra.mxu2 %vm251_vm2, %v903_v23 }
  0xcc   :  { %923 = vmatmul.msk.f32.gmra.mxu0 %vm251_vm2, %v919_v39 }
  0xce   :  { %915 = vmatmul.msk.f32.gmra.mxu3 %vm251_vm2, %v911_v40 }
  0xf9   :  { %v798_v17 = vpop.permute.xlu2 %797 }
 0x105   :  { %v284_v41 = vpop.f32.mrf.mxu1 }
 0x107   :  { %v281_v12 = vpop.f32.mrf.mxu0 }
 0x10a   :  { %v803_v2 = vpop.permute.xlu0 %802 }
 0x10b   :  { %v287_v32 = vpop.f32.mrf.mxu2 }
 0x10e   :  { %v322_v42 = vpop.f32.mrf.mxu1 }
 0x10f   :  { %v290_v43 = vpop.f32.mrf.mxu3  ;;  %v323_v53 = vadd.f32 %v322_v42, %v281_v12 }
 0x111   :  { %v520_v44 = vpop.f32.mrf.mxu0 }
 0x116   :  { %v325_v45 = vpop.f32.mrf.mxu1  ;;  %v389_v46 = vpop.f32.mrf.mxu2 }
 0x117   :  { %v401_v55 = vadd.f32 %v389_v46, %v323_v53  ;;  %v326_v59 = vadd.f32 %v325_v45, %v284_v41 }
 0x119   :  { %v460_v14 = vpop.f32.mrf.mxu3  ;;  %v523_v47 = vpop.f32.mrf.mxu0 }
 0x11a   :  { %v472_v58 = vadd.f32 %v460_v14, %v401_v55 }
 0x11c   :  { %v532_v61 = vadd.f32 %v520_v44, %v472_v58 }
 0x11e   :  { %v328_v48 = vpop.f32.mrf.mxu1  ;;  %v392_v49 = vpop.f32.mrf.mxu2 }
 0x11f   :  { %v402_v62 = vadd.f32 %v392_v49, %v326_v59  ;;  %v329_v9 = vadd.f32 %v328_v48, %v287_v32  ;;  %v808_v32 = vpop.permute.xlu1 %807 }
 0x121   :  { %v463_v50 = vpop.f32.mrf.mxu3  ;;  %v526_v25 = vpop.f32.mrf.mxu0 }
 0x122   :  { %v473_v5 = vadd.f32 %v463_v50, %v402_v62 }
 0x124   :  { %v533_v13 = vadd.f32 %v523_v47, %v473_v5 }
 0x126   :  { %v331_v51 = vpop.f32.mrf.mxu1  ;;  %v395_v52 = vpop.f32.mrf.mxu2 }
 0x127   :  { %v403_v15 = vadd.f32 %v395_v52, %v329_v9  ;;  %v332_v28 = vadd.f32 %v331_v51, %v290_v43 }
 0x129   :  { %v466_v30 = vpop.f32.mrf.mxu3  ;;  %v529_v54 = vpop.f32.mrf.mxu0 }
 0x12a   :  { %v474_v38 = vadd.f32 %v466_v30, %v403_v15 }
 0x12c   :  { %v534_v31 = vadd.f32 %v526_v25, %v474_v38  ;;  %v813_v25 = vpop.permute.xlu2 %812 }
 0x12e   :  { %v590_v56 = vpop.f32.mrf.mxu1  ;;  %v398_v57 = vpop.f32.mrf.mxu2 }
 0x12f   :  { %v602_v1 = vadd.f32 %v590_v56, %v532_v61  ;;  %v404_v33 = vadd.f32 %v398_v57, %v332_v28 }
 0x131   :  { %v469_v60 = vpop.f32.mrf.mxu3  ;;  %v775_v63 = vpop.f32.mrf.mxu0 }
 0x132   :  { %v475_v36 = vadd.f32 %v469_v60, %v404_v33 }
 0x134   :  { %v535_v12 = vadd.f32 %v529_v54, %v475_v36 }
 0x136   :  { %v593_v3 = vpop.f32.mrf.mxu1  ;;  %v650_v4 = vpop.f32.mrf.mxu2 }
 0x137   :  { %v662_v7 = vadd.f32 %v650_v4, %v602_v1  ;;  %v603_v19 = vadd.f32 %v593_v3, %v533_v13 }
 0x139   :  { %v720_v10 = vpop.f32.mrf.mxu3  ;;  %v778_v20 = vpop.f32.mrf.mxu0 }
 0x13a   :  { %v732_v11 = vadd.f32 %v720_v10, %v662_v7 }
 0x13c   :  { %v787_v18 = vadd.f32 %v775_v63, %v732_v11 }
 0x13e   :  { %v815_v0 = vadd.f32 %v798_v17, %v787_v18  ;;  %v653_v22 = vpop.f32.mrf.mxu2  ;;  %v596_v27 = vpop.f32.mrf.mxu1 }
 0x13f   :  { %v663_v24 = vadd.f32 %v653_v22, %v603_v19  ;;  %v604_v35 = vadd.f32 %v596_v27, %v534_v31 }
 0x140   :  { %v819_v26 = vmax.f32 %v815_v0, 0.0 }
 0x141   :  { %v723_v29 = vpop.f32.mrf.mxu3  ;;  %v781_v37 = vpop.f32.mrf.mxu0 }
 0x142   :  { %823 = vst [vmem:[%s1437_s4] sm:$0xff] %v819_v26  ;;  %v733_v6 = vadd.f32 %v723_v29, %v663_v24 }
 0x144   :  { %v788_v34 = vadd.f32 %v778_v20, %v733_v6 }
 0x146   :  { %v816_v16 = vadd.f32 %v803_v2, %v788_v34  ;;  %v656_v8 = vpop.f32.mrf.mxu2  ;;  %v599_v40 = vpop.f32.mrf.mxu1 }
 0x147   :  { %v664_v21 = vadd.f32 %v656_v8, %v604_v35  ;;  %v605_v43 = vadd.f32 %v599_v40, %v535_v12 }
 0x148   :  { %v820_v23 = vmax.f32 %v816_v16, 0.0 }
 0x149   :  { %v726_v39 = vpop.f32.mrf.mxu3  ;;  %v784_v48 = vpop.f32.mrf.mxu0 }
 0x14a   :  { %824 = vst [vmem:[%s1437_s4 + $0x8] sm:$0xff] %v820_v23  ;;  %v734_v41 = vadd.f32 %v726_v39, %v664_v21 }
 0x14c   :  { %v789_v42 = vadd.f32 %v781_v37, %v734_v41 }
 0x14e   :  { %v817_v44 = vadd.f32 %v808_v32, %v789_v42  ;;  %v659_v45 = vpop.f32.mrf.mxu2 }
 0x14f   :  { %v665_v46 = vadd.f32 %v659_v45, %v605_v43 }
 0x150   :  { %v821_v14 = vmax.f32 %v817_v44, 0.0 }
 0x151   :  { %v729_v47 = vpop.f32.mrf.mxu3 }
 0x152   :  { %825 = vst [vmem:[%s1437_s4 + $0x10] sm:$0xff] %v821_v14  ;;  %v735_v49 = vadd.f32 %v729_v47, %v665_v46 }
 0x154   :  { %v790_v50 = vadd.f32 %v784_v48, %v735_v49 }
 0x156   :  { %v818_v51 = vadd.f32 %v813_v25, %v790_v50 }
 0x158   :  { %v822_v52 = vmax.f32 %v818_v51, 0.0 }
 0x15a   :  { %826 = vst [vmem:[%s1437_s4 + $0x18] sm:$0xff] %v822_v52 }

// kernel: jpg_with_attention_forward.12
= control target key start
LH: loop header
LB: loop body
LE: loop exit
PB: predicated region body
PF: predicated region fallthrough
CT: control target
= control target key end

     0   :  { %s738_s23 = smov 126   ;;  %s739_s26 = smov 127   ;;  %v140_v14 = vlaneseq  ;;  %vm149_vm6 = vcmask 261120   ;;  %s912_s0 = inlined_call_operand.vmem [shape: f32[1,32,256], index: 0, kind: input, shape index: {}, may-alias: {0,1}]   ;;  %s913_s1 = inlined_call_operand.vmem [shape: f32[1,32,256], index: 1, kind: input, shape index: {}, may-alias: {0,1}]   ;;  %s914_s2 = inlined_call_operand.vmem [shape: f32[9,3,32], index: 2, kind: input, shape index: {}]   ;;  %s915_s3 = inlined_call_operand.vmem [shape: f32[3,1], index: 3, kind: input, shape index: {}]   ;;  %s916_s4 = inlined_call_operand.vmem [shape: f32[3,128], index: 4, kind: output, shape index: {}]  }
   0x1   :  { %v51_v0 = vld [vmem:[%s912_s0 + $0x30] sm:$0xff]  ;;  %v549_v1 = vld [vmem:[%s913_s1 + $0x38] sm:$0xff]  ;;  %v49_v2 = vld [vmem:[%s912_s0 + $0x20] sm:$0xff]  ;;  %s740_s5 = smov 122   ;;  %s742_s8 = smov 121  }
   0x2   :  { %v576_v3 = vpack.i.bf16 %v549_v1, %v51_v0  ;;  %v548_v4 = vld [vmem:[%s913_s1 + $0x28] sm:$0xff]  ;;  %188 = vmatpush.msra.mxu1 %v51_v0  ;;  %v47_v6 = vld [vmem:[%s912_s0 + $0x10] sm:$0xff]  ;;  %v45_v7 = vld [vmem:[%s912_s0] sm:$0xff]  ;;  %s741_s0 = smov 116   ;;  %s743_s9 = smov 115   ;;  %v796_v16 = vand.u32 127, %v140_v14 }
   0x3   :  { %v586_v5 = vpack.i.bf16 %v548_v4, %v49_v2  ;;  %v547_v8 = vld [vmem:[%s913_s1 + $0x18] sm:$0xff]  ;;  %v546_v10 = vld [vmem:[%s913_s1 + $0x8] sm:$0xff]  ;;  %s744_s10 = smov 120   ;;  %s745_s1 = smov 114  }
   0x4   :  { %577 = vrot.lane.b32.xlu0 %v576_v3, %s738_s23  ;;  %189 = vmatpush.msra.mxu1 %v49_v2  ;;  %v601_v9 = vpack.i.bf16 %v547_v8, %v47_v6  ;;  %v616_v11 = vpack.i.bf16 %v546_v10, %v45_v7  ;;  %vm212_vm0 = vcmp.lt.s32.totalorder %v796_v16, 126  ;;  %vm259_vm1 = vcmp.lt.s32.totalorder %v796_v16, 122 }
   0x5   :  { %587 = vrot.lane.b32.xlu1 %v586_v5, %s738_s23  ;;  %597 = vrot.lane.b32.xlu2 %v586_v5, %s739_s26  ;;  %vm142_vm2 = vcmp.lt.s32.totalorder %v796_v16, 127  ;;  %vm353_vm3 = vcmp.lt.s32.totalorder %v796_v16, 120  ;;  %vm400_vm4 = vcmp.lt.s32.totalorder %v796_v16, 116  ;;  %vm306_vm5 = vcmp.lt.s32.totalorder %v796_v16, 121 }
   0x6   :  { %190 = vmatpush.msra.mxu1 %v47_v6  ;;  %vm447_vm7 = vcmp.lt.s32.totalorder %v796_v16, 115  ;;  %vm494_vm8 = vcmp.lt.s32.totalorder %v796_v16, 114 }
   0x8   :  { %191 = vmatpush.msra.mxu1 %v45_v7 }
   0xc   :  { %582 = vrot.lane.b32.xlu0 %v576_v3, %s739_s26 }
   0xd   :  { %592 = vrot.lane.b32.xlu1 %v576_v3, %s740_s5  ;;  %602 = vrot.lane.b32.xlu2 %v601_v9, %s738_s23 }
  0x14   :  { %607 = vrot.lane.b32.xlu0 %v586_v5, %s740_s5 }
  0x15   :  { %612 = vrot.lane.b32.xlu1 %v601_v9, %s739_s26  ;;  %617 = vrot.lane.b32.xlu2 %v616_v11, %s738_s23 }
  0x1c   :  { %622 = vrot.lane.b32.xlu0 %v601_v9, %s740_s5 }
  0x1d   :  { %627 = vrot.lane.b32.xlu1 %v616_v11, %s739_s26  ;;  %632 = vrot.lane.b32.xlu2 %v616_v11, %s740_s5 }
  0x24   :  { %637 = vrot.lane.b32.xlu0 %v576_v3, %s741_s0 }
  0x25   :  { %642 = vrot.lane.b32.xlu1 %v576_v3, %s742_s8  ;;  %647 = vrot.lane.b32.xlu2 %v586_v5, %s741_s0 }
  0x2c   :  { %652 = vrot.lane.b32.xlu0 %v576_v3, %s743_s9 }
  0x2d   :  { %657 = vrot.lane.b32.xlu1 %v586_v5, %s742_s8  ;;  %662 = vrot.lane.b32.xlu2 %v576_v3, %s744_s10 }
  0x34   :  { %667 = vrot.lane.b32.xlu0 %v601_v9, %s741_s0 }
  0x35   :  { %672 = vrot.lane.b32.xlu1 %v586_v5, %s743_s9  ;;  %677 = vrot.lane.b32.xlu2 %v601_v9, %s742_s8 }
  0x3c   :  { %682 = vrot.lane.b32.xlu0 %v586_v5, %s744_s10 }
  0x3d   :  { %687 = vrot.lane.b32.xlu1 %v616_v11, %s741_s0  ;;  %692 = vrot.lane.b32.xlu2 %v601_v9, %s743_s9 }
  0x44   :  { %697 = vrot.lane.b32.xlu0 %v616_v11, %s742_s8 }
  0x45   :  { %702 = vrot.lane.b32.xlu1 %v601_v9, %s744_s10  ;;  %707 = vrot.lane.b32.xlu2 %v616_v11, %s743_s9 }
  0x4c   :  { %712 = vrot.lane.b32.xlu0 %v616_v11, %s744_s10 }
  0x4d   :  { %717 = vrot.lane.b32.xlu1 %v576_v3, %s745_s1  ;;  %722 = vrot.lane.b32.xlu2 %v586_v5, %s745_s1 }
  0x54   :  { %727 = vrot.lane.b32.xlu0 %v601_v9, %s745_s1 }
  0x55   :  { %732 = vrot.lane.b32.xlu1 %v616_v11, %s745_s1 }
  0x5f   :  { %v598_v12 = vpop.permute.xlu2 %597 }
  0x60   :  { %v600_v32 = vunpack.i.h.bf16 %v598_v12  ;;  %v599_v34 = vunpack.i.l.bf16 %v598_v12  ;;  %v553_v12 = vld [vmem:[%s914_s2 + $0x8] sm:$0x7] }
  0x62   :  { %v145_v43 = vsel %vm142_vm2, %v599_v34, %v600_v32 }
  0x67   :  { %v603_v13 = vpop.permute.xlu2 %602 }
  0x68   :  { %v605_v21 = vunpack.i.h.bf16 %v603_v13  ;;  %v604_v22 = vunpack.i.l.bf16 %v603_v13 }
  0x6a   :  { %v214_v30 = vsel %vm212_vm0, %v604_v22, %v605_v21 }
  0x6f   :  { %v618_v15 = vpop.permute.xlu2 %617 }
  0x70   :  { %v620_v27 = vunpack.i.h.bf16 %v618_v15  ;;  %v619_v28 = vunpack.i.l.bf16 %v618_v15 }
  0x72   :  { %v213_v31 = vsel %vm212_vm0, %v619_v28, %v620_v27 }
  0x76   :  { %v578_v17 = vpop.permute.xlu0 %577 }
  0x77   :  { %v580_v18 = vunpack.i.h.bf16 %v578_v17  ;;  %v579_v19 = vunpack.i.l.bf16 %v578_v17  ;;  %v588_v20 = vpop.permute.xlu1 %587  ;;  %v633_v25 = vpop.permute.xlu2 %632  ;;  %v550_v17 = vld [vmem:[%s914_s2 + $0x4] sm:$0x7] }
  0x78   :  { %v590_v23 = vunpack.i.h.bf16 %v588_v20  ;;  %v589_v24 = vunpack.i.l.bf16 %v588_v20  ;;  %v635_v56 = vunpack.i.h.bf16 %v633_v25  ;;  %v634_v57 = vunpack.i.l.bf16 %v633_v25  ;;  %v123_v20 = vld [vmem:[%s914_s2] sm:$0x7] }
  0x79   :  { %v216_v26 = vsel %vm212_vm0, %v579_v19, %v580_v18  ;;  %v555_v18 = vld [vmem:[%s914_s2 + $0xc] sm:$0x7]  ;;  %552 = vmatmul.msk.f32.vlgmr.msra.gmra.mxu1 %vm149_vm6, %v123_v20 }
  0x7a   :  { %234 = vmatpush.msra.mxu2 %v216_v26  ;;  %v215_v29 = vsel %vm212_vm0, %v589_v24, %v590_v23  ;;  %v260_v1 = vsel %vm259_vm1, %v634_v57, %v635_v56  ;;  %v561_v57 = vld [vmem:[%s914_s2 + $0x18] sm:$0x7] }
  0x7c   :  { %235 = vmatpush.msra.mxu2 %v215_v29 }
  0x7e   :  { %v583_v33 = vpop.permute.xlu0 %582  ;;  %236 = vmatpush.msra.mxu2 %v214_v30 }
  0x7f   :  { %v585_v35 = vunpack.i.h.bf16 %v583_v33  ;;  %v584_v36 = vunpack.i.l.bf16 %v583_v33  ;;  %v593_v37 = vpop.permute.xlu1 %592  ;;  %v648_v40 = vpop.permute.xlu2 %647 }
  0x80   :  { %v595_v38 = vunpack.i.h.bf16 %v593_v37  ;;  %v594_v39 = vunpack.i.l.bf16 %v593_v37  ;;  %237 = vmatpush.msra.mxu2 %v213_v31  ;;  %v650_v4 = vunpack.i.h.bf16 %v648_v40  ;;  %v649_v5 = vunpack.i.l.bf16 %v648_v40 }
  0x81   :  { %v146_v41 = vsel %vm142_vm2, %v584_v36, %v585_v35  ;;  %554 = vmatmul.msk.f32.vlgmr.msra.gmra.mxu2 %vm149_vm6, %v553_v12 }
  0x82   :  { %165 = vmatpush.msra.mxu0 %v146_v41  ;;  %v263_v42 = vsel %vm259_vm1, %v594_v39, %v595_v38  ;;  %v403_v14 = vsel %vm400_vm4, %v649_v5, %v650_v4 }
  0x83   :  { %281 = vmatpush.msra.mxu3 %v263_v42 }
  0x84   :  { %166 = vmatpush.msra.mxu0 %v145_v43 }
  0x86   :  { %v608_v44 = vpop.permute.xlu0 %607 }
  0x87   :  { %v610_v45 = vunpack.i.h.bf16 %v608_v44  ;;  %v609_v46 = vunpack.i.l.bf16 %v608_v44  ;;  %v613_v47 = vpop.permute.xlu1 %612  ;;  %v663_v50 = vpop.permute.xlu2 %662 }
  0x88   :  { %v615_v48 = vunpack.i.h.bf16 %v613_v47  ;;  %v614_v49 = vunpack.i.l.bf16 %v613_v47  ;;  %v665_v52 = vunpack.i.h.bf16 %v663_v50  ;;  %v664_v53 = vunpack.i.l.bf16 %v663_v50  ;;  %v563_v47 = vld [vmem:[%s914_s2 + $0x1c] sm:$0x7] }
  0x89   :  { %v262_v51 = vsel %vm259_vm1, %v609_v46, %v610_v45  ;;  %v746_v50 = vmov 0  }
  0x8a   :  { %282 = vmatpush.msra.mxu3 %v262_v51  ;;  %v144_v54 = vsel %vm142_vm2, %v614_v49, %v615_v48  ;;  %v357_v55 = vsel %vm353_vm3, %v664_v53, %v665_v52  ;;  %v525_v48 = vld [vmem:[%s915_s3] sm:$0x7]  ;;  %736 = vset.pattern.permute.xlu2 %v746_v50 }
  0x8b   :  { %167 = vmatpush.msra.mxu0 %v144_v54  ;;  %375 = vmatpush.msrb.mxu1 %v357_v55 }
  0x8c   :  { %737 = vset.pattern.permute.xlu0 %v746_v50  ;;  %528 = vperm.xlu2 %736, %v525_v48  }
  0x8e   :  { %v623_v58 = vpop.permute.xlu0 %622 }
  0x8f   :  { %v625_v59 = vunpack.i.h.bf16 %v623_v58  ;;  %v624_v60 = vunpack.i.l.bf16 %v623_v58  ;;  %v628_v61 = vpop.permute.xlu1 %627  ;;  %v678_v2 = vpop.permute.xlu2 %677 }
  0x90   :  { %v630_v62 = vunpack.i.h.bf16 %v628_v61  ;;  %v629_v63 = vunpack.i.l.bf16 %v628_v61  ;;  %v680_v22 = vunpack.i.h.bf16 %v678_v2  ;;  %v679_v23 = vunpack.i.l.bf16 %v678_v2 }
  0x91   :  { %v261_v0 = vsel %vm259_vm1, %v624_v60, %v625_v59 }
  0x92   :  { %283 = vmatpush.msra.mxu3 %v261_v0  ;;  %v143_v3 = vsel %vm142_vm2, %v629_v63, %v630_v62  ;;  %v308_v31 = vsel %vm306_vm5, %v679_v23, %v680_v22 }
  0x93   :  { %168 = vmatpush.msra.mxu0 %v143_v3 }
  0x94   :  { %284 = vmatpush.msra.mxu3 %v260_v1  ;;  %551 = vmatmul.msk.f32.vlgmr.msra.gmra.mxu0 %vm149_vm6, %v550_v17  ;;  %v557_v1 = vld [vmem:[%s914_s2 + $0x10] sm:$0x7] }
  0x95   :  { %556 = vmatmul.msk.f32.vlgmr.msra.gmra.mxu3 %vm149_vm6, %v555_v18 }
  0x96   :  { %v638_v6 = vpop.permute.xlu0 %637 }
  0x97   :  { %v640_v7 = vunpack.i.h.bf16 %v638_v6  ;;  %v639_v8 = vunpack.i.l.bf16 %v638_v6  ;;  %v643_v9 = vpop.permute.xlu1 %642  ;;  %v693_v19 = vpop.permute.xlu2 %692 }
  0x98   :  { %v645_v10 = vunpack.i.h.bf16 %v643_v9  ;;  %v644_v11 = vunpack.i.l.bf16 %v643_v9  ;;  %v695_v34 = vunpack.i.h.bf16 %v693_v19  ;;  %v694_v35 = vunpack.i.l.bf16 %v693_v19 }
  0x99   :  { %v404_v13 = vsel %vm400_vm4, %v639_v8, %v640_v7 }
  0x9a   :  { %422 = vmatpush.msrb.mxu2 %v404_v13  ;;  %v310_v15 = vsel %vm306_vm5, %v644_v11, %v645_v10  ;;  %v449_v45 = vsel %vm447_vm7, %v694_v35, %v695_v34  ;;  %v559_v13 = vld [vmem:[%s914_s2 + $0x14] sm:$0x7] }
  0x9b   :  { %328 = vmatpush.msrb.mxu0 %v310_v15 }
  0x9c   :  { %423 = vmatpush.msrb.mxu2 %v403_v14 }
  0x9e   :  { %v653_v21 = vpop.permute.xlu0 %652 }
  0x9f   :  { %v655_v24 = vunpack.i.h.bf16 %v653_v21  ;;  %v654_v25 = vunpack.i.l.bf16 %v653_v21  ;;  %v658_v26 = vpop.permute.xlu1 %657  ;;  %v708_v32 = vpop.permute.xlu2 %707 }
  0xa0   :  { %v660_v27 = vunpack.i.h.bf16 %v658_v26  ;;  %v659_v28 = vunpack.i.l.bf16 %v658_v26  ;;  %v710_v41 = vunpack.i.h.bf16 %v708_v32  ;;  %v709_v42 = vunpack.i.l.bf16 %v708_v32  ;;  %v565_v26 = vld [vmem:[%s914_s2 + $0x20] sm:$0x7] }
  0xa1   :  { %v451_v29 = vsel %vm447_vm7, %v654_v25, %v655_v24 }
  0xa2   :  { %469 = vmatpush.msrb.mxu3 %v451_v29  ;;  %v309_v30 = vsel %vm306_vm5, %v659_v28, %v660_v27  ;;  %v448_v46 = vsel %vm447_vm7, %v709_v42, %v710_v41 }
  0xa3   :  { %329 = vmatpush.msrb.mxu0 %v309_v30 }
  0xa5   :  { %330 = vmatpush.msrb.mxu0 %v308_v31 }
  0xa6   :  { %v668_v33 = vpop.permute.xlu0 %667 }
  0xa7   :  { %v670_v36 = vunpack.i.h.bf16 %v668_v33  ;;  %v669_v37 = vunpack.i.l.bf16 %v668_v33  ;;  %v673_v38 = vpop.permute.xlu1 %672  ;;  %v723_v4 = vpop.permute.xlu2 %722 }
  0xa8   :  { %v675_v39 = vunpack.i.h.bf16 %v673_v38  ;;  %v674_v40 = vunpack.i.l.bf16 %v673_v38  ;;  %v725_v6 = vunpack.i.h.bf16 %v723_v4  ;;  %v724_v7 = vunpack.i.l.bf16 %v723_v4 }
  0xa9   :  { %v402_v43 = vsel %vm400_vm4, %v669_v37, %v670_v36 }
  0xaa   :  { %424 = vmatpush.msrb.mxu2 %v402_v43  ;;  %v450_v44 = vsel %vm447_vm7, %v674_v40, %v675_v39  ;;  %v497_v17 = vsel %vm494_vm8, %v724_v7, %v725_v6 }
  0xab   :  { %470 = vmatpush.msrb.mxu3 %v450_v44 }
  0xad   :  { %471 = vmatpush.msrb.mxu3 %v449_v45 }
  0xae   :  { %v683_v49 = vpop.permute.xlu0 %682 }
  0xaf   :  { %v685_v51 = vunpack.i.h.bf16 %v683_v49  ;;  %v684_v52 = vunpack.i.l.bf16 %v683_v49  ;;  %v688_v53 = vpop.permute.xlu1 %687  ;;  %472 = vmatpush.msrb.mxu3 %v448_v46 }
  0xb0   :  { %v690_v54 = vunpack.i.h.bf16 %v688_v53  ;;  %v689_v55 = vunpack.i.l.bf16 %v688_v53  ;;  %564 = vmatmul.msk.f32.vlgmr.msrb.gmra.mxu3 %vm149_vm6, %v563_v47 }
  0xb1   :  { %v356_v56 = vsel %vm353_vm3, %v684_v52, %v685_v51 }
  0xb2   :  { %376 = vmatpush.msrb.mxu1 %v356_v56  ;;  %v401_v58 = vsel %vm400_vm4, %v689_v55, %v690_v54 }
  0xb3   :  { %425 = vmatpush.msrb.mxu2 %v401_v58 }
  0xb4   :  { %562 = vmatmul.msk.f32.vlgmr.msrb.gmra.mxu2 %vm149_vm6, %v561_v57 }
  0xb6   :  { %v698_v59 = vpop.permute.xlu0 %697 }
  0xb7   :  { %v700_v60 = vunpack.i.h.bf16 %v698_v59  ;;  %v699_v61 = vunpack.i.l.bf16 %v698_v59  ;;  %v703_v62 = vpop.permute.xlu1 %702 }
  0xb8   :  { %v705_v63 = vunpack.i.h.bf16 %v703_v62  ;;  %v704_v0 = vunpack.i.l.bf16 %v703_v62 }
  0xb9   :  { %v307_v2 = vsel %vm306_vm5, %v699_v61, %v700_v60 }
  0xba   :  { %331 = vmatpush.msrb.mxu0 %v307_v2  ;;  %v355_v3 = vsel %vm353_vm3, %v704_v0, %v705_v63 }
  0xbb   :  { %377 = vmatpush.msrb.mxu1 %v355_v3  ;;  %558 = vmatmul.msk.f32.vlgmr.msrb.gmra.mxu0 %vm149_vm6, %v557_v1 }
  0xbe   :  { %v713_v5 = vpop.permute.xlu0 %712 }
  0xbf   :  { %v715_v8 = vunpack.i.h.bf16 %v713_v5  ;;  %v714_v9 = vunpack.i.l.bf16 %v713_v5  ;;  %v718_v10 = vpop.permute.xlu1 %717 }
  0xc0   :  { %v720_v11 = vunpack.i.h.bf16 %v718_v10  ;;  %v719_v12 = vunpack.i.l.bf16 %v718_v10 }
  0xc1   :  { %v354_v14 = vsel %vm353_vm3, %v714_v9, %v715_v8 }
  0xc2   :  { %378 = vmatpush.msrb.mxu1 %v354_v14  ;;  %v498_v15 = vsel %vm494_vm8, %v719_v12, %v720_v11 }
  0xc3   :  { %516 = vmatpush.msra.mxu0 %v498_v15  ;;  %560 = vmatmul.msk.f32.vlgmr.msrb.gmra.mxu1 %vm149_vm6, %v559_v13 }
  0xc5   :  { %517 = vmatpush.msra.mxu0 %v497_v17 }
  0xc6   :  { %v728_v18 = vpop.permute.xlu0 %727 }
  0xc7   :  { %v730_v19 = vunpack.i.h.bf16 %v728_v18  ;;  %v729_v20 = vunpack.i.l.bf16 %v728_v18  ;;  %v733_v21 = vpop.permute.xlu1 %732 }
  0xc8   :  { %v735_v22 = vunpack.i.h.bf16 %v733_v21  ;;  %v734_v23 = vunpack.i.l.bf16 %v733_v21 }
  0xc9   :  { %v496_v24 = vsel %vm494_vm8, %v729_v20, %v730_v19 }
  0xca   :  { %518 = vmatpush.msra.mxu0 %v496_v24  ;;  %v495_v25 = vsel %vm494_vm8, %v734_v23, %v735_v22 }
  0xcc   :  { %519 = vmatpush.msra.mxu0 %v495_v25 }
  0xcd   :  { %566 = vmatmul.msk.f32.vlgmr.msra.gmra.mxu0 %vm149_vm6, %v565_v26 }
  0xe6   :  { %v529_v42 = vpop.permute.xlu2 %528 }
  0xf6   :  { %v193_v27 = vpop.f32.mrf.mxu1 }
 0x104   :  { %v239_v30 = vpop.f32.mrf.mxu2 }
 0x111   :  { %v170_v28 = vpop.f32.mrf.mxu0 }
 0x112   :  { %v194_v29 = vadd.f32 %v193_v27, %v170_v28 }
 0x114   :  { %v242_v31 = vadd.f32 %v239_v30, %v194_v29 }
 0x118   :  { %v286_v32 = vpop.f32.mrf.mxu3 }
 0x119   :  { %v289_v33 = vadd.f32 %v286_v32, %v242_v31 }
 0x133   :  { %v474_v39 = vpop.f32.mrf.mxu3 }
 0x137   :  { %v427_v16 = vpop.f32.mrf.mxu2 }
 0x138   :  { %v333_v34 = vpop.f32.mrf.mxu0 }
 0x139   :  { %v336_v35 = vadd.f32 %v333_v34, %v289_v33 }
 0x140   :  { %v380_v36 = vpop.f32.mrf.mxu1 }
 0x141   :  { %v383_v37 = vadd.f32 %v380_v36, %v336_v35 }
 0x143   :  { %v430_v38 = vadd.f32 %v427_v16, %v383_v37 }
 0x145   :  { %v477_v40 = vadd.f32 %v474_v39, %v430_v38 }
 0x14a   :  { %v521_v41 = vpop.f32.mrf.mxu0 }
 0x14b   :  { %v524_v43 = vadd.f32 %v521_v41, %v477_v40 }
 0x14d   :  { %v531_v44 = vadd.f32 %v529_v42, %v524_v43 }
 0x14f   :  { %532 = vst [vmem:[%s916_s4] sm:$0x7] %v531_v44 }

// kernel: jpg_with_attention_forward.13
= control target key start
LH: loop header
LB: loop body
LE: loop exit
PB: predicated region body
PF: predicated region fallthrough
CT: control target
= control target key end

     0   :  { %s596_s17 = smov 0   ;;  %s664_s0 = inlined_call_operand.vmem [shape: f32[2,3,16], index: 0, kind: input, shape index: {}]   ;;  %s665_s1 = inlined_call_operand.vmem [shape: f32[24,3], index: 1, kind: input, shape index: {}]   ;;  %s666_s2 = inlined_call_operand.vmem [shape: f32[24,1], index: 2, kind: input, shape index: {}]   ;;  %s667_s3 = inlined_call_operand.<no memory space> [shape: f32[1], index: 3, kind: input, shape index: {}]   ;;  %s668_s4 = inlined_call_operand.vmem [shape: f32[2,3,16], index: 4, kind: output, shape index: {}]  }
   0x1   :  { %9 = sst [smem:[#allocation2]] %s667_s3 }
   0x2 LB: > { %s504_s18 = sadd.s32 4294967295, %s565_s17   ;;  %p508_p0 = scmp.ge.s32.totalorder %s565_s17, 1  ;;  %s565_s17 = sphi %s596_s17, %s15_s17  }
   0x3   : > { %p162_p1 = scmp.lt.s32.totalorder %s565_s17, 3 }
   0x5   : > { %p163_p2 = pnand %p508_p0, %p162_p1 }
   0x6   : > { %p186_p3 = scmp.lt.s32.totalorder (!%p163_p2), %s504_s18, 1  ;;  %s396_s8 = sld [smem:[#allocation2]] (!%p163_p2) }
   0x7   : > { %166 = sbr.rel (%p163_p2) target bundleno = 1123 (0x463), region = 36 }
   0xc   : > { %v567_v0 = vmov 0   ;;  %v198_v1 = vld [vmem:[%s666_s2] sm:$0xff]  ;;  %s670_s18 = smov (!%p186_p3, %s504_s18), 1  ;;  %vm226_vm0 = vcmask 1042432   ;;  %vm216_vm1 = vcmask 23552   ;;  %v196_v3 = vld [vmem:[%s665_s1 + $0x8] sm:$0xff]  ;;  %v397_v57 = vstv %s396_s8 }
   0xd   : > { %547 = vset.pattern.permute.xlu0 %v567_v0  ;;  %548 = vset.pattern.permute.xlu2 %v567_v0  ;;  %s509_s20 = sshll.u32 %s670_s18, 2  ;;  %v195_v2 = vld [vmem:[%s665_s1] sm:$0xff]  ;;  %v199_v5 = vld [vmem:[%s666_s2 + $0x8] sm:$0xff]  ;;  %vm288_vm2 = vcmask 64512   ;;  %vm318_vm3 = vcmask 130048   ;;  %v197_v18 = vld [vmem:[%s665_s1 + $0x10] sm:$0xff] }
   0xe   : > { %203 = vperm.xlu0 %547, %v198_v1   ;;  %s189_s23 = scalar_lea.vmem %s664_s0, %s509_s20  ;;  %v200_v29 = vld [vmem:[%s666_s2 + $0x10] sm:$0xff]  ;;  %vm400_vm12 = vcmask 124928   ;;  %s193_s19 = scalar_lea.vmem %s668_s4, %s509_s20 }
   0xf   : > { %v621_v4 = vld [vmem:[%s189_s23] sm:$0x7] }
  0x10   : > { %511 = vmatpush.msk.msra.mxu0 %vm226_vm0, %v621_v4  ;;  %522 = vmatpush.msk.msra.mxu3 %vm226_vm0, %v621_v4 }
  0x11   : > { %512 = vmatmul.msk.f32.vlgmr.msra.gmra.mxu0 %vm216_vm1, %v195_v2  ;;  %513 = vmatmul.msk.f32.vlgmr.msra.gmra.mxu3 %vm216_vm1, %v196_v3 }
  0x16   : > { %208 = vperm.xlu0 %547, %v199_v5  }
  0x19   : > { %514 = vmatmul.msk.f32.gmra.mxu3 %vm216_vm1, %v197_v18 }
  0x80   : > { %v204_v6 = vpop.permute.xlu0 %203 }
  0x88   : > { %v209_v9 = vpop.permute.xlu0 %208 }
  0x8e   : > { %v247_v7 = vpop.f32.mrf.mxu0 }
  0x8f   : > { %v248_v8 = vadd.f32 %v247_v7, %v204_v6 }
  0x91   : > { %256 = vxpose.xlu1.b32.start.end [1/1] (short) (narrow) %v248_v8, 16 }
  0x94   : > { %v250_v10 = vpop.f32.mrf.mxu3 }
  0x95   : > { %v251_v11 = vadd.f32 %v250_v10, %v209_v9 }
  0x97   : > { %310 = vmatpush.msra.mxu1 %v251_v11 }
  0x9c   : > { %v253_v53 = vpop.f32.mrf.mxu3 }
 0x135   : > { %v272_v12 = vpop.trf.xlu1 }
 0x136   : > { %515 = vmatmul.msk.f32.vlgmr.msra.gmra.mxu1 %vm288_vm2, %v272_v12 }
 0x13d   : > { %v273_v13 = vpop.trf.xlu1 }
 0x13e   : > { %516 = vmatmul.msk.f32.gmra.mxu1 %vm288_vm2, %v273_v13 }
 0x1b3   : > { %v312_v14 = vpop.f32.mrf.mxu1 }
 0x1b4   : > { %v319_v15 = vsel %vm318_vm3, %v312_v14, -inf }
 0x1b5   : > { %320 = vmax.xlane.f32.xlu2 %v319_v15 }
 0x1bb   : > { %v315_v16 = vpop.f32.mrf.mxu1 }
 0x1bc   : > { %v322_v17 = vsel %vm318_vm3, %v315_v16, -inf }
 0x1bd   : > { %323 = vmax.xlane.f32.xlu1 %v322_v17 }
 0x228   : > { %v321_v19 = vpop.xlane.xlu2 %320 }
 0x229   : > { %v325_v20 = vsub.f32 %v312_v14, %v321_v19 }
 0x22b   : > { %v327_v21 = vmul.f32 1.442695, %v325_v20 }
 0x22d   : > { %549 = vpow2.f32 %v327_v21 }
 0x230   : > { %v324_v22 = vpop.xlane.xlu1 %323 }
 0x231   : > { %v326_v23 = vsub.f32 %v315_v16, %v324_v22 }
 0x233   : > { %v550_v24 = vpop.eup %549  ;;  %v329_v25 = vmul.f32 1.442695, %v326_v23 }
 0x234   : > { %v331_v26 = vsel %vm318_vm3, %v550_v24, 0.0 }
 0x235   : > { %551 = vpow2.f32 %v329_v25  ;;  %332 = vadd.xlane.f32.xlu0 %v331_v26 }
 0x23b   : > { %v552_v27 = vpop.eup %551 }
 0x23c   : > { %v334_v28 = vsel %vm318_vm3, %v552_v27, 0.0 }
 0x23d   : > { %335 = vadd.xlane.f32.xlu2 %v334_v28 }
 0x255   : > { %213 = vperm.xlu2 %548, %v200_v29  }
 0x2a8   : > { %v333_v30 = vpop.xlane.xlu0 %332 }
 0x2a9   : > { %553 = vrcp.f32 %v333_v30  ;;  %vm342_vm6 = vweird.f32 %v333_v30  ;;  %v348_v43 = vand.u32 2147483648, %v333_v30  ;;  %v346_v45 = vand.u32 2147483647, %v333_v30 }
 0x2ab   : > { %v349_v49 = vor.u32 1.1754944e-38, %v348_v43  ;;  %vm347_vm11 = vcmp.eq.f32.partialorder %v346_v45, 8.507059e+37 }
 0x2af   : > { %v554_v31 = vpop.eup %553 }
 0x2b0   : > { %v338_v32 = vmul.f32 %v554_v31, %v333_v30  ;;  %v336_v33 = vpop.xlane.xlu2 %335  ;;  %vm343_vm4 = vweird.f32 %v554_v31 }
 0x2b1   : > { %555 = vrcp.f32 %v336_v33  ;;  %v363_v39 = vand.u32 2147483648, %v336_v33  ;;  %v361_v41 = vand.u32 2147483647, %v336_v33  ;;  %vm357_vm7 = vweird.f32 %v336_v33  ;;  %vm344_vm8 = vmor %vm342_vm6, %vm343_vm4 }
 0x2b2   : > { %v339_v34 = vsub.f32 1.0, %v338_v32 }
 0x2b3   : > { %v364_v46 = vor.u32 1.1754944e-38, %v363_v39  ;;  %vm362_vm10 = vcmp.eq.f32.partialorder %v361_v41, 8.507059e+37 }
 0x2b4   : > { %v340_v36 = vmul.f32 %v554_v31, %v339_v34 }
 0x2b6   : > { %v341_v42 = vadd.f32 %v554_v31, %v340_v36 }
 0x2b7   : > { %v556_v35 = vpop.eup %555 }
 0x2b8   : > { %v353_v37 = vmul.f32 %v556_v35, %v336_v33  ;;  %vm358_vm5 = vweird.f32 %v556_v35  ;;  %v345_v48 = vsel %vm344_vm8, %v554_v31, %v341_v42  ;;  %v214_v54 = vpop.permute.xlu2 %213 }
 0x2b9   : > { %vm359_vm9 = vmor %vm357_vm7, %vm358_vm5  ;;  %v350_v52 = vsel %vm347_vm11, %v349_v49, %v345_v48  ;;  %v254_v56 = vadd.f32 %v253_v53, %v214_v54 }
 0x2ba   : > { %v354_v38 = vsub.f32 1.0, %v353_v37  ;;  %v351_v55 = vmul.f32 %v550_v24, %v350_v52 }
 0x2bc   : > { %v355_v40 = vmul.f32 %v556_v35, %v354_v38 }
 0x2be   : > { %v356_v44 = vadd.f32 %v556_v35, %v355_v40 }
 0x2c0   : > { %v360_v47 = vsel %vm359_vm9, %v556_v35, %v356_v44 }
 0x2c1   : > { %v365_v50 = vsel %vm362_vm10, %v364_v46, %v360_v47 }
 0x2c2   : > { %v366_v51 = vmul.f32 %v552_v27, %v365_v50 }
 0x2c4   : > { %517 = vmatpush.xpose.msk.msra.mxu2 %vm318_vm3, %v366_v51 }
 0x2c8   : > { %518 = vmatpush.xpose.msk.msra.mxu2 %vm318_vm3, %v351_v55 }
 0x2cb   : > { %519 = vmatmul.msk.f32.vlgmr.msra.gmra.mxu2 %vm318_vm3, %v254_v56 }
 0x34e   : > { %v393_v58 = vpop.f32.mrf.mxu2 }
 0x34f   : > { %v398_v59 = vmul.f32 %v397_v57, %v393_v58 }
 0x351   : > { %v399_v60 = vadd.f32 %v398_v59, %v621_v4 }
 0x353   : > { %v411_v61 = vsel %vm400_vm12, %v399_v60, -inf  ;;  %v401_v62 = vsel %vm400_vm12, %v399_v60, inf }
 0x354   : > { %412 = vmax.xlane.f32.xlu0 %v411_v61  ;;  %402 = vmin.xlane.f32.xlu2 %v401_v62 }
 0x3c7   : > { %v413_v63 = vpop.xlane.xlu0 %412  ;;  %v403_v0 = vpop.xlane.xlu2 %402 }
 0x3c8   : > { %v414_v1 = vrot.slane %v413_v63, 4  ;;  %v404_v2 = vrot.slane %v403_v0, 4 }
 0x3ca   : > { %v415_v3 = vmax.f32 %v413_v63, %v414_v1  ;;  %v405_v5 = vmin.f32 %v403_v0, %v404_v2 }
 0x3cc   : > { %v416_v6 = vrot.slane %v415_v3, 2  ;;  %v406_v7 = vrot.slane %v405_v5, 2 }
 0x3ce   : > { %v417_v8 = vmax.f32 %v415_v3, %v416_v6  ;;  %v407_v9 = vmin.f32 %v405_v5, %v406_v7 }
 0x3d0   : > { %v408_v10 = vrot.slane %v407_v9, 1  ;;  %v418_v11 = vrot.slane %v417_v8, 1 }
 0x3d2   : > { %v409_v12 = vmin.f32 %v407_v9, %v408_v10  ;;  %v419_v4 = vmax.f32 %v417_v8, %v418_v11 }
 0x3d4   : > { %523 = vpush %v409_v12 }
 0x3d5   : > { %525 = vpush %v419_v4 }
 0x405   : > { %s647_s9 = spop %523 }
 0x406   : > { %s526_s10 = spop %525  ;;  %v424_v24 = vstv %s647_s9 }
 0x407   : > { %s421_s11 = ssub.f32 %s526_s10, %s647_s9  ;;  %v425_v25 = vsub.f32 %v399_v60, %v424_v24 }
 0x409   : > { %p422_p4 = scmp.eq.f32.partialorder %s421_s11, 0.0 }
 0x40b   : > { %s672_s11 = smov (%p422_p4, %s421_s11), 1.0 }
 0x40c   : > { %v426_v13 = vstv %s672_s11  ;;  %s446_s14 = smul.f32 0.003921569, %s672_s11 }
 0x40d   : > { %557 = vrcp.f32 %v426_v13  ;;  %v438_v17 = vand.u32 2147483648, %v426_v13  ;;  %v436_v19 = vand.u32 2147483647, %v426_v13  ;;  %vm432_vm14 = vweird.f32 %v426_v13 }
 0x40e   : > { %v447_v34 = vstv %s446_s14 }
 0x40f   : > { %v439_v21 = vor.u32 1.1754944e-38, %v438_v17  ;;  %vm437_vm0 = vcmp.eq.f32.partialorder %v436_v19, 8.507059e+37 }
 0x413   : > { %v558_v14 = vpop.eup %557 }
 0x414   : > { %v428_v15 = vmul.f32 %v558_v14, %v426_v13  ;;  %vm433_vm13 = vweird.f32 %v558_v14 }
 0x415   : > { %vm434_vm15 = vmor %vm432_vm14, %vm433_vm13 }
 0x416   : > { %v429_v16 = vsub.f32 1.0, %v428_v15 }
 0x418   : > { %v430_v18 = vmul.f32 %v558_v14, %v429_v16 }
 0x41a   : > { %v431_v20 = vadd.f32 %v558_v14, %v430_v18 }
 0x41c   : > { %v435_v22 = vsel %vm434_vm15, %v558_v14, %v431_v20 }
 0x41d   : > { %v440_v23 = vsel %vm437_vm0, %v439_v21, %v435_v22 }
 0x41e   : > { %527 = vpush %v440_v23 }
 0x44f   : > { %s528_s12 = spop %527 }
 0x450   : > { %s442_s13 = smul.f32 255.0, %s528_s12 }
 0x452   : > { %v443_v26 = vstv %s442_s13 }
 0x453   : > { %v444_v27 = vmul.f32 %v443_v26, %v425_v25 }
 0x455   : > { %v531_v28 = vcvt.f32.s32 %v444_v27  ;;  %v529_v30 = vand.u32 2147483647, %v444_v27  ;;  %v534_v32 = vand.u32 2147483648, %v444_v27 }
 0x457   : > { %v532_v29 = vcvt.s32.f32 %v531_v28  ;;  %vm530_vm1 = vcmp.lt.f32.partialorder %v529_v30, 8388608.0 }
 0x459   : > { %v533_v31 = vand.u32 2147483647, %v532_v29 }
 0x45b   : > { %v535_v33 = vor.u32 %v534_v32, %v533_v31 }
 0x45d   : > { %v536_v35 = vsel %vm530_vm1, %v535_v33, %v444_v27 }
 0x45e   : > { %v448_v36 = vmul.f32 %v536_v35, %v447_v34 }
 0x460   : > { %v449_v37 = vadd.f32 %v448_v36, %v424_v24 }
 0x462   : > { %450 = vst.msk [vmem:[%s193_s19] sm:$0x7] %vm400_vm12, %v449_v37 }
 0x463 PF: > { %s15_s17 = sadd.s32 1, %s565_s17  }
 0x464   : > { %p12_p5 = scmp.ge.s32.totalorder %s15_s17, 4  }
 0x466   :  { %14 = sbr.rel (!%p12_p5) target bundleno = 2 (0x2), region = 66 }

// kernel: jpg_with_attention_forward.14
= control target key start
LH: loop header
LB: loop body
LE: loop exit
PB: predicated region body
PF: predicated region fallthrough
CT: control target
= control target key end

     0   :  { %s695_s17 = smov 126   ;;  %s696_s18 = smov 127   ;;  %v44_v3 = vlaneseq  ;;  %vm66_vm1 = vcmask 1042432   ;;  %vm53_vm4 = vcmask 23552   ;;  %v703_v43 = vmov 0   ;;  %s925_s0 = inlined_call_operand.vmem [shape: f32[1,3,256], index: 0, kind: input, shape index: {}, may-alias: {0,1}]   ;;  %s926_s1 = inlined_call_operand.vmem [shape: f32[1,3,256], index: 1, kind: input, shape index: {}, may-alias: {0,1}]   ;;  %s927_s2 = inlined_call_operand.vmem [shape: f32[9,32,3], index: 2, kind: input, shape index: {}]   ;;  %s928_s3 = inlined_call_operand.vmem [shape: f32[32,1], index: 3, kind: input, shape index: {}]   ;;  %s929_s4 = inlined_call_operand.vmem [shape: f32[32,128], index: 4, kind: output, shape index: {}]  }
   0x1   :  { %v34_v0 = vld [vmem:[%s925_s0] sm:$0x7]  ;;  %s697_s19 = smov 122   ;;  %v602_v1 = vld [vmem:[%s926_s1 + $0x4] sm:$0x7]  ;;  %s698_s22 = smov 121   ;;  %692 = vset.pattern.permute.xlu1 %v703_v43  ;;  %694 = vset.pattern.permute.xlu0 %v703_v43 }
   0x2   :  { %143 = vrot.lane.b32.xlu1 %v34_v0, %s695_s17  ;;  %40 = vrot.lane.b32.xlu0 %v34_v0, %s696_s18  ;;  %s699_s23 = smov 116   ;;  %s700_s24 = smov 115   ;;  %v735_v6 = vand.u32 127, %v44_v3  ;;  %v604_v11 = vld [vmem:[%s927_s2 + $0x28] sm:$0xff]  ;;  %v605_v12 = vld [vmem:[%s927_s2 + $0x30] sm:$0xff] }
   0x3   :  { %202 = vrot.lane.b32.xlu2 %v34_v0, %s697_s19  ;;  %s701_s0 = smov 120   ;;  %s702_s25 = smov 114   ;;  %v606_v15 = vld [vmem:[%s927_s2 + $0x38] sm:$0xff]  ;;  %v603_v17 = vld [vmem:[%s927_s2 + $0x20] sm:$0xff]  ;;  %v37_v30 = vld [vmem:[%s927_s2 + $0x8] sm:$0xff] }
   0x4   :  { %vm46_vm0 = vcmp.lt.s32.totalorder %v735_v6, 127  ;;  %vm147_vm2 = vcmp.lt.s32.totalorder %v735_v6, 126  ;;  %vm206_vm3 = vcmp.lt.s32.totalorder %v735_v6, 122  ;;  %vm265_vm5 = vcmp.lt.s32.totalorder %v735_v6, 121  ;;  %v36_v21 = vld [vmem:[%s927_s2] sm:$0xff]  ;;  %v618_v31 = vld [vmem:[%s927_s2 + $0x48] sm:$0xff]  ;;  %693 = vset.pattern.permute.xlu2 %v703_v43 }
   0x5   :  { %v617_v22 = vld [vmem:[%s927_s2 + $0x40] sm:$0xff]  ;;  %vm383_vm6 = vcmp.lt.s32.totalorder %v735_v6, 116  ;;  %vm442_vm7 = vcmp.lt.s32.totalorder %v735_v6, 115  ;;  %v627_v32 = vld [vmem:[%s927_s2 + $0x68] sm:$0xff]  ;;  %vm324_vm8 = vcmp.lt.s32.totalorder %v735_v6, 120  ;;  %v38_v37 = vld [vmem:[%s927_s2 + $0x10] sm:$0xff] }
   0x6   :  { %v626_v23 = vld [vmem:[%s927_s2 + $0x60] sm:$0xff]  ;;  %v636_v33 = vld [vmem:[%s927_s2 + $0x88] sm:$0xff]  ;;  %v619_v38 = vld [vmem:[%s927_s2 + $0x50] sm:$0xff]  ;;  %vm501_vm9 = vcmp.lt.s32.totalorder %v735_v6, 114 }
   0x7   :  { %v635_v24 = vld [vmem:[%s927_s2 + $0x80] sm:$0xff]  ;;  %v628_v39 = vld [vmem:[%s927_s2 + $0x70] sm:$0xff]  ;;  %v39_v46 = vld [vmem:[%s927_s2 + $0x18] sm:$0xff] }
   0x8   :  { %v637_v40 = vld [vmem:[%s927_s2 + $0x90] sm:$0xff]  ;;  %v556_v42 = vld [vmem:[%s928_s3] sm:$0xff]  ;;  %v620_v47 = vld [vmem:[%s927_s2 + $0x58] sm:$0xff] }
   0x9   :  { %v629_v48 = vld [vmem:[%s927_s2 + $0x78] sm:$0xff]  ;;  %v558_v50 = vld [vmem:[%s928_s3 + $0x10] sm:$0xff]  ;;  %v557_v52 = vld [vmem:[%s928_s3 + $0x8] sm:$0xff] }
   0xa   :  { %145 = vrot.lane.b32.xlu1 %v602_v1, %s695_s17  ;;  %42 = vrot.lane.b32.xlu0 %v602_v1, %s696_s18  ;;  %v638_v49 = vld [vmem:[%s927_s2 + $0x98] sm:$0xff]  ;;  %v644_v53 = vld [vmem:[%s927_s2 + $0xa0] sm:$0xff] }
   0xb   :  { %204 = vrot.lane.b32.xlu2 %v602_v1, %s697_s19  ;;  %v559_v51 = vld [vmem:[%s928_s3 + $0x18] sm:$0xff]  ;;  %v653_v54 = vld [vmem:[%s927_s2 + $0xc0] sm:$0xff]  ;;  %v645_v57 = vld [vmem:[%s927_s2 + $0xa8] sm:$0xff] }
   0xc   :  { %v662_v55 = vld [vmem:[%s927_s2 + $0xe0] sm:$0xff]  ;;  %v654_v58 = vld [vmem:[%s927_s2 + $0xc8] sm:$0xff]  ;;  %v646_v61 = vld [vmem:[%s927_s2 + $0xb0] sm:$0xff] }
   0xd   :  { %v671_v56 = vld [vmem:[%s927_s2 + $0x100] sm:$0xff]  ;;  %v663_v59 = vld [vmem:[%s927_s2 + $0xe8] sm:$0xff]  ;;  %v655_v62 = vld [vmem:[%s927_s2 + $0xd0] sm:$0xff] }
   0xe   :  { %v672_v60 = vld [vmem:[%s927_s2 + $0x108] sm:$0xff]  ;;  %v664_v63 = vld [vmem:[%s927_s2 + $0xf0] sm:$0xff]  ;;  %v665_v3 = vld [vmem:[%s927_s2 + $0xf8] sm:$0xff] }
  0x12   :  { %263 = vrot.lane.b32.xlu1 %v602_v1, %s698_s22  ;;  %261 = vrot.lane.b32.xlu0 %v34_v0, %s698_s22 }
  0x13   :  { %379 = vrot.lane.b32.xlu2 %v34_v0, %s699_s23 }
  0x1a   :  { %438 = vrot.lane.b32.xlu1 %v34_v0, %s700_s24  ;;  %381 = vrot.lane.b32.xlu0 %v602_v1, %s699_s23 }
  0x1b   :  { %440 = vrot.lane.b32.xlu2 %v602_v1, %s700_s24 }
  0x22   :  { %322 = vrot.lane.b32.xlu1 %v602_v1, %s701_s0  ;;  %320 = vrot.lane.b32.xlu0 %v34_v0, %s701_s0 }
  0x23   :  { %497 = vrot.lane.b32.xlu2 %v34_v0, %s702_s25 }
  0x2a   :  { %499 = vrot.lane.b32.xlu0 %v602_v1, %s702_s25  ;;  %562 = vperm.xlu1 %692, %v556_v42   ;;  %v647_v1 = vld [vmem:[%s927_s2 + $0xb8] sm:$0xff] }
  0x2b   :  { %567 = vperm.xlu2 %693, %v557_v52  }
  0x32   :  { %572 = vperm.xlu0 %694, %v558_v50   ;;  %577 = vperm.xlu1 %692, %v559_v51  }
  0x5d   :  { %v203_v2 = vpop.permute.xlu2 %202 }
  0x65   :  { %v205_v7 = vpop.permute.xlu2 %204 }
  0x66   :  { %v207_v14 = vsel %vm206_vm3, %v203_v2, %v205_v7  ;;  %v656_v2 = vld [vmem:[%s927_s2 + $0xd8] sm:$0xff] }
  0x6d   :  { %v380_v16 = vpop.permute.xlu2 %379 }
  0x74   :  { %v144_v4 = vpop.permute.xlu1 %143  ;;  %v41_v5 = vpop.permute.xlu0 %40 }
  0x75   :  { %v441_v25 = vpop.permute.xlu2 %440 }
  0x7c   :  { %v146_v8 = vpop.permute.xlu1 %145  ;;  %v43_v9 = vpop.permute.xlu0 %42 }
  0x7d   :  { %v47_v10 = vsel %vm46_vm0, %v41_v5, %v43_v9  ;;  %v148_v13 = vsel %vm147_vm2, %v144_v4, %v146_v8  ;;  %v498_v41 = vpop.permute.xlu2 %497  ;;  %v674_v4 = vld [vmem:[%s927_s2 + $0x118] sm:$0xff] }
  0x7e   :  { %607 = vmatpush.msk.msra.mxu0 %vm66_vm1, %v47_v10  ;;  %680 = vmatpush.msk.msra.mxu1 %vm66_vm1, %v47_v10 }
  0x7f   :  { %681 = vmatpush.msk.msra.mxu2 %vm66_vm1, %v47_v10  ;;  %682 = vmatpush.msk.msra.mxu3 %vm66_vm1, %v47_v10 }
  0x80   :  { %609 = vmatmul.msk.f32.vlgmr.msra.gmra.mxu1 %vm53_vm4, %v604_v11  ;;  %610 = vmatmul.msk.f32.vlgmr.msra.gmra.mxu2 %vm53_vm4, %v605_v12 }
  0x81   :  { %621 = vmatpush.msk.msrb.mxu2 %vm66_vm1, %v148_v13  ;;  %630 = vmatpush.msk.msrb.mxu3 %vm66_vm1, %v207_v14 }
  0x82   :  { %611 = vmatmul.msk.f32.vlgmr.msra.gmra.mxu3 %vm53_vm4, %v606_v15  ;;  %612 = vmatpush.msk.msrb.mxu1 %vm66_vm1, %v34_v0  ;;  %v673_v0 = vld [vmem:[%s927_s2 + $0x110] sm:$0xff] }
  0x83   :  { %608 = vmatmul.msk.f32.vlgmr.msra.gmra.mxu0 %vm53_vm4, %v603_v17 }
  0x84   :  { %v264_v18 = vpop.permute.xlu1 %263  ;;  %v262_v19 = vpop.permute.xlu0 %261 }
  0x85   :  { %v266_v20 = vsel %vm265_vm5, %v262_v19, %v264_v18 }
  0x86   :  { %639 = vmatpush.msk.msrb.mxu0 %vm66_vm1, %v266_v20 }
  0x88   :  { %613 = vmatmul.msk.f32.vlgmr.msrb.gmra.mxu1 %vm53_vm4, %v36_v21  ;;  %622 = vmatmul.msk.f32.vlgmr.msrb.gmra.mxu2 %vm53_vm4, %v617_v22 }
  0x8a   :  { %631 = vmatmul.msk.f32.vlgmr.msrb.gmra.mxu3 %vm53_vm4, %v626_v23 }
  0x8b   :  { %640 = vmatmul.msk.f32.vlgmr.msrb.gmra.mxu0 %vm53_vm4, %v635_v24 }
  0x8c   :  { %v439_v26 = vpop.permute.xlu1 %438  ;;  %v382_v27 = vpop.permute.xlu0 %381 }
  0x8d   :  { %v384_v28 = vsel %vm383_vm6, %v380_v16, %v382_v27  ;;  %v443_v29 = vsel %vm442_vm7, %v439_v26, %v441_v25 }
  0x8e   :  { %657 = vmatpush.msk.msra.mxu2 %vm66_vm1, %v384_v28  ;;  %666 = vmatpush.msk.msra.mxu3 %vm66_vm1, %v443_v29 }
  0x90   :  { %614 = vmatmul.msk.f32.gmra.mxu1 %vm53_vm4, %v37_v30  ;;  %623 = vmatmul.msk.f32.gmra.mxu2 %vm53_vm4, %v618_v31 }
  0x92   :  { %632 = vmatmul.msk.f32.gmra.mxu3 %vm53_vm4, %v627_v32 }
  0x93   :  { %641 = vmatmul.msk.f32.gmra.mxu0 %vm53_vm4, %v636_v33 }
  0x94   :  { %v323_v34 = vpop.permute.xlu1 %322  ;;  %v321_v35 = vpop.permute.xlu0 %320 }
  0x95   :  { %v325_v36 = vsel %vm324_vm8, %v321_v35, %v323_v34 }
  0x96   :  { %648 = vmatpush.msk.msra.mxu1 %vm66_vm1, %v325_v36 }
  0x98   :  { %615 = vmatmul.msk.f32.gmra.mxu1 %vm53_vm4, %v38_v37  ;;  %624 = vmatmul.msk.f32.gmra.mxu2 %vm53_vm4, %v619_v38 }
  0x9a   :  { %633 = vmatmul.msk.f32.gmra.mxu3 %vm53_vm4, %v628_v39 }
  0x9b   :  { %642 = vmatmul.msk.f32.gmra.mxu0 %vm53_vm4, %v637_v40 }
  0x9c   :  { %v500_v44 = vpop.permute.xlu0 %499 }
  0x9d   :  { %v502_v45 = vsel %vm501_vm9, %v498_v41, %v500_v44  ;;  %v563_v41 = vpop.permute.xlu1 %562 }
  0x9e   :  { %675 = vmatpush.msk.msra.mxu0 %vm66_vm1, %v502_v45 }
  0xa0   :  { %616 = vmatmul.msk.f32.gmra.mxu1 %vm53_vm4, %v39_v46  ;;  %625 = vmatmul.msk.f32.gmra.mxu2 %vm53_vm4, %v620_v47 }
  0xa2   :  { %634 = vmatmul.msk.f32.gmra.mxu3 %vm53_vm4, %v629_v48 }
  0xa3   :  { %643 = vmatmul.msk.f32.gmra.mxu0 %vm53_vm4, %v638_v49 }
  0xa8   :  { %649 = vmatmul.msk.f32.vlgmr.msra.gmra.mxu1 %vm53_vm4, %v644_v53  ;;  %658 = vmatmul.msk.f32.vlgmr.msra.gmra.mxu2 %vm53_vm4, %v653_v54 }
  0xaa   :  { %667 = vmatmul.msk.f32.vlgmr.msra.gmra.mxu3 %vm53_vm4, %v662_v55 }
  0xab   :  { %676 = vmatmul.msk.f32.vlgmr.msra.gmra.mxu0 %vm53_vm4, %v671_v56  ;;  %v568_v56 = vpop.permute.xlu2 %567 }
  0xb0   :  { %650 = vmatmul.msk.f32.gmra.mxu1 %vm53_vm4, %v645_v57  ;;  %659 = vmatmul.msk.f32.gmra.mxu2 %vm53_vm4, %v654_v58 }
  0xb2   :  { %668 = vmatmul.msk.f32.gmra.mxu3 %vm53_vm4, %v663_v59 }
  0xb3   :  { %677 = vmatmul.msk.f32.gmra.mxu0 %vm53_vm4, %v672_v60 }
  0xb8   :  { %651 = vmatmul.msk.f32.gmra.mxu1 %vm53_vm4, %v646_v61  ;;  %660 = vmatmul.msk.f32.gmra.mxu2 %vm53_vm4, %v655_v62 }
  0xba   :  { %669 = vmatmul.msk.f32.gmra.mxu3 %vm53_vm4, %v664_v63 }
  0xbb   :  { %678 = vmatmul.msk.f32.gmra.mxu0 %vm53_vm4, %v673_v0 }
  0xc0   :  { %652 = vmatmul.msk.f32.gmra.mxu1 %vm53_vm4, %v647_v1  ;;  %661 = vmatmul.msk.f32.gmra.mxu2 %vm53_vm4, %v656_v2 }
  0xc2   :  { %670 = vmatmul.msk.f32.gmra.mxu3 %vm53_vm4, %v665_v3 }
  0xc3   :  { %679 = vmatmul.msk.f32.gmra.mxu0 %vm53_vm4, %v674_v4 }
  0xfd   :  { %v90_v5 = vpop.f32.mrf.mxu1 }
 0x100   :  { %v87_v6 = vpop.f32.mrf.mxu0 }
 0x103   :  { %v93_v7 = vpop.f32.mrf.mxu2 }
 0x105   :  { %v96_v8 = vpop.f32.mrf.mxu3  ;;  %v131_v9 = vpop.f32.mrf.mxu1 }
 0x106   :  { %v132_v22 = vadd.f32 %v131_v9, %v87_v6  ;;  %v573_v6 = vpop.permute.xlu0 %572 }
 0x108   :  { %v304_v10 = vpop.f32.mrf.mxu0 }
 0x10b   :  { %v186_v11 = vpop.f32.mrf.mxu2 }
 0x10c   :  { %v198_v23 = vadd.f32 %v186_v11, %v132_v22 }
 0x10d   :  { %v134_v12 = vpop.f32.mrf.mxu1  ;;  %v245_v13 = vpop.f32.mrf.mxu3 }
 0x10e   :  { %v257_v26 = vadd.f32 %v245_v13, %v198_v23  ;;  %v135_v29 = vadd.f32 %v134_v12, %v90_v5 }
 0x110   :  { %v307_v14 = vpop.f32.mrf.mxu0  ;;  %v316_v30 = vadd.f32 %v304_v10, %v257_v26 }
 0x113   :  { %v189_v15 = vpop.f32.mrf.mxu2 }
 0x114   :  { %v199_v31 = vadd.f32 %v189_v15, %v135_v29 }
 0x115   :  { %v137_v16 = vpop.f32.mrf.mxu1  ;;  %v248_v17 = vpop.f32.mrf.mxu3 }
 0x116   :  { %v258_v35 = vadd.f32 %v248_v17, %v199_v31  ;;  %v138_v39 = vadd.f32 %v137_v16, %v93_v7 }
 0x118   :  { %v310_v18 = vpop.f32.mrf.mxu0  ;;  %v317_v42 = vadd.f32 %v307_v14, %v258_v35 }
 0x11b   :  { %v192_v19 = vpop.f32.mrf.mxu2 }
 0x11c   :  { %v200_v43 = vadd.f32 %v192_v19, %v138_v39 }
 0x11d   :  { %v140_v20 = vpop.f32.mrf.mxu1  ;;  %v251_v21 = vpop.f32.mrf.mxu3 }
 0x11e   :  { %v259_v49 = vadd.f32 %v251_v21, %v200_v43  ;;  %v141_v54 = vadd.f32 %v140_v20, %v96_v8 }
 0x120   :  { %v313_v24 = vpop.f32.mrf.mxu0  ;;  %v318_v57 = vadd.f32 %v310_v18, %v259_v49  ;;  %v578_v18 = vpop.permute.xlu1 %577 }
 0x123   :  { %v195_v25 = vpop.f32.mrf.mxu2 }
 0x124   :  { %v201_v58 = vadd.f32 %v195_v25, %v141_v54 }
 0x125   :  { %v254_v27 = vpop.f32.mrf.mxu3  ;;  %v363_v28 = vpop.f32.mrf.mxu1 }
 0x126   :  { %v375_v33 = vadd.f32 %v363_v28, %v316_v30  ;;  %v260_v0 = vadd.f32 %v254_v27, %v201_v58 }
 0x128   :  { %v540_v32 = vpop.f32.mrf.mxu0  ;;  %v319_v7 = vadd.f32 %v313_v24, %v260_v0 }
 0x12b   :  { %v422_v34 = vpop.f32.mrf.mxu2 }
 0x12c   :  { %v434_v36 = vadd.f32 %v422_v34, %v375_v33 }
 0x12d   :  { %v366_v37 = vpop.f32.mrf.mxu1  ;;  %v481_v38 = vpop.f32.mrf.mxu3 }
 0x12e   :  { %v493_v40 = vadd.f32 %v481_v38, %v434_v36  ;;  %v376_v46 = vadd.f32 %v366_v37, %v317_v42 }
 0x130   :  { %v552_v44 = vadd.f32 %v540_v32, %v493_v40  ;;  %v543_v45 = vpop.f32.mrf.mxu0 }
 0x132   :  { %v580_v47 = vadd.f32 %v563_v41, %v552_v44 }
 0x133   :  { %v425_v48 = vpop.f32.mrf.mxu2 }
 0x134   :  { %v584_v50 = vmax.f32 %v580_v47, 0.0  ;;  %v435_v51 = vadd.f32 %v425_v48, %v376_v46 }
 0x135   :  { %v369_v52 = vpop.f32.mrf.mxu1  ;;  %v484_v53 = vpop.f32.mrf.mxu3 }
 0x136   :  { %588 = vst [vmem:[%s929_s4] sm:$0xff] %v584_v50  ;;  %v494_v55 = vadd.f32 %v484_v53, %v435_v51  ;;  %v377_v60 = vadd.f32 %v369_v52, %v318_v57 }
 0x138   :  { %v553_v59 = vadd.f32 %v543_v45, %v494_v55  ;;  %v546_v63 = vpop.f32.mrf.mxu0 }
 0x13a   :  { %v581_v61 = vadd.f32 %v568_v56, %v553_v59 }
 0x13b   :  { %v428_v62 = vpop.f32.mrf.mxu2 }
 0x13c   :  { %v585_v1 = vmax.f32 %v581_v61, 0.0  ;;  %v436_v2 = vadd.f32 %v428_v62, %v377_v60 }
 0x13d   :  { %v487_v3 = vpop.f32.mrf.mxu3  ;;  %v372_v5 = vpop.f32.mrf.mxu1 }
 0x13e   :  { %589 = vst [vmem:[%s929_s4 + $0x8] sm:$0xff] %v585_v1  ;;  %v495_v4 = vadd.f32 %v487_v3, %v436_v2  ;;  %v378_v9 = vadd.f32 %v372_v5, %v319_v7 }
 0x140   :  { %v554_v8 = vadd.f32 %v546_v63, %v495_v4  ;;  %v549_v15 = vpop.f32.mrf.mxu0 }
 0x142   :  { %v582_v10 = vadd.f32 %v573_v6, %v554_v8 }
 0x143   :  { %v431_v11 = vpop.f32.mrf.mxu2 }
 0x144   :  { %v586_v12 = vmax.f32 %v582_v10, 0.0  ;;  %v437_v13 = vadd.f32 %v431_v11, %v378_v9 }
 0x145   :  { %v490_v14 = vpop.f32.mrf.mxu3 }
 0x146   :  { %590 = vst [vmem:[%s929_s4 + $0x10] sm:$0xff] %v586_v12  ;;  %v496_v16 = vadd.f32 %v490_v14, %v437_v13 }
 0x148   :  { %v555_v17 = vadd.f32 %v549_v15, %v496_v16 }
 0x14a   :  { %v583_v19 = vadd.f32 %v578_v18, %v555_v17 }
 0x14c   :  { %v587_v20 = vmax.f32 %v583_v19, 0.0 }
 0x14e   :  { %591 = vst [vmem:[%s929_s4 + $0x18] sm:$0xff] %v587_v20 }

// kernel: jpg_with_attention_forward.15
= control target key start
LH: loop header
LB: loop body
LE: loop exit
PB: predicated region body
PF: predicated region fallthrough
CT: control target
= control target key end

     0   :  { %s1481_s15 = smov 0   ;;  %s1483_s16 = smov 0   ;;  %s1853_s0 = inlined_call_operand.vmem [shape: f32[1,32,384], index: 0, kind: input, shape index: {}, may-alias: {0,1}]   ;;  %s1854_s1 = inlined_call_operand.vmem [shape: f32[1,32,384], index: 1, kind: input, shape index: {}, may-alias: {0,1}]   ;;  %s1855_s2 = inlined_call_operand.vmem [shape: f32[9,32,32], index: 2, kind: input, shape index: {}]   ;;  %s1856_s3 = inlined_call_operand.vmem [shape: f32[32,1], index: 3, kind: input, shape index: {}]   ;;  %s1857_s4 = inlined_call_operand.vmem [shape: f32[32,256], index: 4, kind: output, shape index: {}]  }
   0x1   :  { %s1485_s17 = smov 0   ;;  %s1487_s18 = smov 0  }
   0x2   :  { %s1489_s19 = smov 0  }
   0x3 LB: > { %s1095_s20 = sadd.s32 4294967295, %s1445_s19   ;;  %s1508_s21 = sadd.s32 1, %s1445_s19   ;;  %s1445_s19 = sphi %s1489_s19, %s1864_s19   ;;  %s1441_s18 = sphi %s1487_s18, %s1863_s18   ;;  %s1437_s17 = sphi %s1485_s17, %s1862_s17   ;;  %s1433_s16 = sphi %s1483_s16, %s1861_s16   ;;  %s1429_s15 = sphi %s1481_s15, %s1860_s15  }
   0x4   : > { %s18_s22 = ssub.s32 %s1445_s19, %s1508_s21  ;;  %s21_s23 = sadd.s32 1, %s1441_s18 }
   0x5   : > { %p19_p0 = scmp.eq.s32.totalorder %s18_s22, 0  ;;  %p28_p1 = scmp.ne.s32.totalorder %s1441_s18, %s1437_s17 }
   0x6   : > { %p29_p2 = scmp.eq.s32.totalorder %s1445_s19, 0  ;;  %s45_s24 = sadd.s32 1, %s1508_s21 }
   0x7   : > { %s1518_s25 = scalar_select %p19_p0, %s1441_s18, %s21_s23  }
   0x8   : > { %p30_p3 = por %p29_p2, %p28_p1  ;;  %s46_s26 = ssub.s32 %s1508_s21, %s45_s24 }
   0x9   : > { %p47_p4 = scmp.eq.s32.totalorder %s46_s26, 0  ;;  %s49_s27 = sadd.s32 1, %s1433_s16 }
   0xa   : > { %p56_p5 = scmp.ne.s32.totalorder %s1433_s16, %s1429_s15  ;;  %p128_p6 = scmp.eq.s32.totalorder %s1095_s20, 1 }
   0xb   : > { %s1527_s28 = scalar_select %p47_p4, %s1433_s16, %s49_s27  }
   0xc   : > { %p1529_p7 = por %p56_p5, %p29_p2  ;;  %p1533_p8 = por %p128_p6, %p28_p1 }
   0xd   : > { %p1098_p9 = scmp.ge.s32.totalorder %s1445_s19, 2 }
   0xf   : > { %156 = sbr.rel (%p1098_p9) target bundleno = 36 (0x24), region = 24 }
  0x14   : > { %159 = sbr.rel (!%p30_p3) target bundleno = 28 (0x1c), region = 28  ;;  %s161_s5 = sand.u32 (%p30_p3), 1, %s1441_s18  }
  0x15   : > { %s1100_s6 = sshll.u32 (%p30_p3), %s1445_s19, 3  ;;  %s1099_s7 = sshll.u32 (%p30_p3), %s161_s5, 5 }
  0x16   : > { %s165_s10 = scalar_lea.vmem (%p30_p3), %s1853_s0, %s1100_s6  ;;  %s163_s11 = scalar_lea.vmem (%p30_p3), [#allocation2], %s1099_s7 }
  0x17   : > { %v200_v0 = vld [vmem:[%s165_s10] sm:$0xff] (%p30_p3)  ;;  %v202_v1 = vld [vmem:[%s165_s10 + $0x18] sm:$0xff] (%p30_p3)  ;;  %v204_v2 = vld [vmem:[%s165_s10 + $0x30] sm:$0xff] (%p30_p3) }
  0x18   : > { %201 = vst [vmem:[%s163_s11] sm:$0xff] (%p30_p3), %v200_v0  ;;  %v206_v3 = vld [vmem:[%s165_s10 + $0x48] sm:$0xff] (%p30_p3) }
  0x19   : > { %203 = vst [vmem:[%s163_s11 + $0x8] sm:$0xff] %v202_v1 }
  0x1a   : > { %205 = vst [vmem:[%s163_s11 + $0x10] sm:$0xff] %v204_v2 }
  0x1b   : > { %207 = vst [vmem:[%s163_s11 + $0x18] sm:$0xff] %v206_v3 }
  0x1c PF: > { %213 = sbr.rel (!%p1529_p7) target bundleno = 36 (0x24), region = 66  ;;  %s215_s12 = sand.u32 (%p1529_p7), 1, %s1433_s16  }
  0x1d   : > { %s1102_s13 = sshll.u32 (%p1529_p7), %s1445_s19, 3  ;;  %s1101_s14 = sshll.u32 (%p1529_p7), %s215_s12, 5 }
  0x1e   : > { %s1039_s24 = scalar_lea.vmem (%p1529_p7), %s1854_s1, %s1102_s13  ;;  %s217_s26 = scalar_lea.vmem (%p1529_p7), [#allocation3], %s1101_s14 }
  0x1f   : > { %v1103_v4 = vld [vmem:[%s1039_s24 + $0x8] sm:$0xff] (%p1529_p7)  ;;  %v1104_v5 = vld [vmem:[%s1039_s24 + $0x20] sm:$0xff] (%p1529_p7)  ;;  %v1105_v6 = vld [vmem:[%s1039_s24 + $0x38] sm:$0xff] (%p1529_p7) }
  0x20   : > { %256 = vst [vmem:[%s217_s26] sm:$0xff] (%p1529_p7), %v1103_v4  ;;  %v1106_v7 = vld [vmem:[%s1039_s24 + $0x50] sm:$0xff] (%p1529_p7) }
  0x21   : > { %258 = vst [vmem:[%s217_s26 + $0x8] sm:$0xff] %v1104_v5 }
  0x22   : > { %260 = vst [vmem:[%s217_s26 + $0x10] sm:$0xff] %v1105_v6 }
  0x23   : > { %262 = vst [vmem:[%s217_s26 + $0x18] sm:$0xff] %v1106_v7 }
  0x24 PF: > { %p1107_p10 = scmp.ge.s32.totalorder %s1445_s19, 1  ;;  %p267_p11 = scmp.lt.s32.totalorder %s1445_s19, 3 }
  0x26   : > { %p268_p12 = pnand %p1107_p10, %p267_p11 }
  0x27   : > { %s274_s27 = sand.u32 (!%p268_p12), 1, %s1437_s17   ;;  %s281_s29 = sand.u32 (!%p268_p12), 1, %s1429_s15  }
  0x28   : > { %271 = sbr.rel (%p268_p12) target bundleno = 415 (0x19f), region = 104  ;;  %s1554_s5 = sshll.u32 (!%p268_p12), %s274_s27, 5 }
  0x29   : > { %s1109_s6 = sshll.u32 (!%p268_p12), %s281_s29, 5  ;;  %s276_s7 = scalar_lea.vmem (!%p268_p12), [#allocation2], %s1554_s5 }
  0x2a   : > { %s283_s8 = scalar_lea.vmem (!%p268_p12), [#allocation3], %s1109_s6  ;;  %s1447_s9 = smov (!%p268_p12), 127  }
  0x2b   : > { %s1448_s17 = smov (!%p268_p12), 126   ;;  %s1449_s15 = smov (!%p268_p12), 118  }
  0x2c   : > { %s1450_s10 = smov (!%p268_p12), 117   ;;  %s1451_s11 = smov (!%p268_p12), 108  }
  0x2d   : > { %v1557_v8 = vld [vmem:[%s276_s7 + $0x18] sm:$0xff]  ;;  %v1559_v10 = vld [vmem:[%s276_s7 + $0x8] sm:$0xff]  ;;  %v1563_v14 = vld [vmem:[%s276_s7 + $0x10] sm:$0xff]  ;;  %s1452_s12 = smov 107   ;;  %s1453_s13 = smov 116   ;;  %v338_v22 = vlaneseq  ;;  %vm350_vm3 = vcmask 261120  }
  0x2e   : > { %v317_v9 = vld [vmem:[%s283_s8 + $0x18] sm:$0xff]  ;;  %v315_v12 = vld [vmem:[%s283_s8 + $0x8] sm:$0xff]  ;;  %v316_v15 = vld [vmem:[%s283_s8 + $0x10] sm:$0xff]  ;;  %s1454_s14 = smov 106  }
  0x2f   : > { %v1244_v11 = vpack.i.bf16 %v317_v9, %v1557_v8  ;;  %v1254_v13 = vpack.i.bf16 %v315_v12, %v1559_v10  ;;  %v1565_v16 = vld [vmem:[%s276_s7] sm:$0xff]  ;;  %v1249_v18 = vpack.i.bf16 %v316_v15, %v1563_v14  ;;  %v1571_v24 = vand.u32 127, %v338_v22  ;;  %v1114_v49 = vld [vmem:[%s1855_s2 + $0x38] sm:$0xff]  ;;  %v1113_v51 = vld [vmem:[%s1855_s2 + $0x30] sm:$0xff] }
  0x30   : > { %v314_v17 = vld [vmem:[%s283_s8] sm:$0xff]  ;;  %v1112_v52 = vld [vmem:[%s1855_s2 + $0x28] sm:$0xff] }
  0x31   : > { %1245 = vrot.lane.b32.xlu0 %v1244_v11, %s1447_s9  ;;  %1265 = vrot.lane.b32.xlu2 %v1244_v11, %s1448_s17  ;;  %v1259_v19 = vpack.i.bf16 %v314_v17, %v1565_v16  ;;  %vm340_vm0 = vcmp.lt.s32.totalorder %v1571_v24, 127  ;;  %vm449_vm1 = vcmp.lt.s32.totalorder %v1571_v24, 126  ;;  %vm520_vm2 = vcmp.lt.s32.totalorder %v1571_v24, 118  ;;  %v1111_v60 = vld [vmem:[%s1855_s2 + $0x20] sm:$0xff]  ;;  %v319_v22 = vld [vmem:[%s1855_s2 + $0x8] sm:$0xff] }
  0x32   : > { %1255 = vrot.lane.b32.xlu1 %v1254_v13, %s1447_s9  ;;  %v318_v7 = vld [vmem:[%s1855_s2] sm:$0xff]  ;;  %vm591_vm4 = vcmp.lt.s32.totalorder %v1571_v24, 117  ;;  %vm733_vm5 = vcmp.lt.s32.totalorder %v1571_v24, 108  ;;  %vm804_vm6 = vcmp.lt.s32.totalorder %v1571_v24, 107  ;;  %vm662_vm7 = vcmp.lt.s32.totalorder %v1571_v24, 116 }
  0x33   : > { %vm875_vm8 = vcmp.lt.s32.totalorder %v1571_v24, 106  ;;  %v1149_v24 = vld [vmem:[%s1855_s2 + $0xb0] sm:$0xff] }
  0x39   : > { %1250 = vrot.lane.b32.xlu0 %v1249_v18, %s1447_s9  ;;  %1270 = vrot.lane.b32.xlu2 %v1249_v18, %s1448_s17 }
  0x3a   : > { %1260 = vrot.lane.b32.xlu1 %v1259_v19, %s1447_s9 }
  0x41   : > { %1275 = vrot.lane.b32.xlu0 %v1244_v11, %s1449_s15  ;;  %1285 = vrot.lane.b32.xlu2 %v1249_v18, %s1449_s15 }
  0x42   : > { %1280 = vrot.lane.b32.xlu1 %v1254_v13, %s1448_s17 }
  0x49   : > { %1290 = vrot.lane.b32.xlu0 %v1259_v19, %s1448_s17  ;;  %1300 = vrot.lane.b32.xlu2 %v1259_v19, %s1449_s15 }
  0x4a   : > { %1295 = vrot.lane.b32.xlu1 %v1254_v13, %s1449_s15 }
  0x51   : > { %1305 = vrot.lane.b32.xlu0 %v1244_v11, %s1450_s10  ;;  %1315 = vrot.lane.b32.xlu2 %v1254_v13, %s1450_s10 }
  0x52   : > { %1310 = vrot.lane.b32.xlu1 %v1249_v18, %s1450_s10 }
  0x59   : > { %1320 = vrot.lane.b32.xlu0 %v1259_v19, %s1450_s10  ;;  %1330 = vrot.lane.b32.xlu2 %v1249_v18, %s1451_s11  ;;  %s1820_s10 = scalar_lea.vmem [#allocation4], %s1554_s5  ;;  %s1180_s5 = sshll.u32 (%p1533_p8), %s1095_s20, 3 }
  0x5a   : > { %1325 = vrot.lane.b32.xlu1 %v1244_v11, %s1451_s11 }
  0x61   : > { %1335 = vrot.lane.b32.xlu0 %v1244_v11, %s1452_s12  ;;  %1345 = vrot.lane.b32.xlu2 %v1254_v13, %s1451_s11 }
  0x62   : > { %1340 = vrot.lane.b32.xlu1 %v1244_v11, %s1453_s13 }
  0x69   : > { %1350 = vrot.lane.b32.xlu0 %v1249_v18, %s1452_s12  ;;  %1360 = vrot.lane.b32.xlu2 %v1259_v19, %s1451_s11 }
  0x6a   : > { %1355 = vrot.lane.b32.xlu1 %v1249_v18, %s1453_s13 }
  0x71   : > { %1365 = vrot.lane.b32.xlu0 %v1254_v13, %s1452_s12  ;;  %1375 = vrot.lane.b32.xlu2 %v1259_v19, %s1452_s12 }
  0x72   : > { %1370 = vrot.lane.b32.xlu1 %v1254_v13, %s1453_s13 }
  0x79   : > { %1380 = vrot.lane.b32.xlu0 %v1259_v19, %s1453_s13  ;;  %1390 = vrot.lane.b32.xlu2 %v1249_v18, %s1454_s14  ;;  %s974_s13 = scalar_lea.vmem (%p1533_p8), %s1857_s4, %s1180_s5 }
  0x7a   : > { %1385 = vrot.lane.b32.xlu1 %v1244_v11, %s1454_s14  ;;  %v1123_v11 = vld [vmem:[%s1855_s2 + $0x40] sm:$0xff] }
  0x81   : > { %1395 = vrot.lane.b32.xlu0 %v1254_v13, %s1454_s14 }
  0x82   : > { %1400 = vrot.lane.b32.xlu1 %v1259_v19, %s1454_s14 }
  0x8b   : > { %v1266_v20 = vpop.permute.xlu2 %1265 }
  0x8c   : > { %v1268_v41 = vunpack.i.h.bf16 %v1266_v20  ;;  %v1267_v42 = vunpack.i.l.bf16 %v1266_v20 }
  0x8e   : > { %v453_v56 = vsel %vm449_vm1, %v1267_v42, %v1268_v41  ;;  %v1139_v41 = vld [vmem:[%s1855_s2 + $0x80] sm:$0xff] }
  0x93   : > { %v1271_v21 = vpop.permute.xlu2 %1270 }
  0x94   : > { %v1273_v43 = vunpack.i.h.bf16 %v1271_v21  ;;  %v1272_v44 = vunpack.i.l.bf16 %v1271_v21 }
  0x96   : > { %v452_v57 = vsel %vm449_vm1, %v1272_v44, %v1273_v43 }
  0x9b   : > { %v1569_v23 = vpop.permute.xlu2 %1285 }
  0x9c   : > { %v1288_v47 = vunpack.i.h.bf16 %v1569_v23  ;;  %v1287_v48 = vunpack.i.l.bf16 %v1569_v23 }
  0x9e   : > { %v523_v62 = vsel %vm520_vm2, %v1287_v48, %v1288_v47 }
  0xa3   : > { %v1246_v25 = vpop.permute.xlu0 %1245  ;;  %v1576_v30 = vpop.permute.xlu2 %1300 }
  0xa4   : > { %v1248_v26 = vunpack.i.h.bf16 %v1246_v25  ;;  %v1247_v27 = vunpack.i.l.bf16 %v1246_v25  ;;  %v1256_v28 = vpop.permute.xlu1 %1255  ;;  %v1303_v2 = vunpack.i.h.bf16 %v1576_v30  ;;  %v1302_v3 = vunpack.i.l.bf16 %v1576_v30  ;;  %v1132_v30 = vld [vmem:[%s1855_s2 + $0x68] sm:$0xff] }
  0xa5   : > { %v1258_v32 = vunpack.i.h.bf16 %v1256_v28  ;;  %v1257_v33 = vunpack.i.l.bf16 %v1256_v28 }
  0xa6   : > { %v344_v29 = vsel %vm340_vm0, %v1247_v27, %v1248_v26  ;;  %v1124_v26 = vld [vmem:[%s1855_s2 + $0x48] sm:$0xff] }
  0xa7   : > { %375 = vmatpush.msra.mxu0 %v344_v29  ;;  %1183 = vmatpush.msra.mxu1 %v344_v29  ;;  %v342_v45 = vsel %vm340_vm0, %v1257_v33, %v1258_v32 }
  0xa8   : > { %1184 = vmatpush.msra.mxu2 %v344_v29  ;;  %1185 = vmatpush.msra.mxu3 %v344_v29 }
  0xab   : > { %v1251_v31 = vpop.permute.xlu0 %1250  ;;  %v1580_v40 = vpop.permute.xlu2 %1315 }
  0xac   : > { %v1253_v34 = vunpack.i.h.bf16 %v1251_v31  ;;  %v1252_v35 = vunpack.i.l.bf16 %v1251_v31  ;;  %v1261_v36 = vpop.permute.xlu1 %1260  ;;  %v1318_v20 = vunpack.i.h.bf16 %v1580_v40  ;;  %v1317_v21 = vunpack.i.l.bf16 %v1580_v40 }
  0xad   : > { %v1263_v37 = vunpack.i.h.bf16 %v1261_v36  ;;  %v1262_v38 = vunpack.i.l.bf16 %v1261_v36 }
  0xae   : > { %v343_v39 = vsel %vm340_vm0, %v1252_v35, %v1253_v34  ;;  %v593_v29 = vsel %vm591_vm4, %v1317_v21, %v1318_v20  ;;  %v1142_v20 = vld [vmem:[%s1855_s2 + $0x98] sm:$0xff] }
  0xaf   : > { %376 = vmatpush.msra.mxu0 %v343_v39  ;;  %1186 = vmatpush.msra.mxu1 %v343_v39  ;;  %v341_v46 = vsel %vm340_vm0, %v1262_v38, %v1263_v37  ;;  %v320_v37 = vld [vmem:[%s1855_s2 + $0x10] sm:$0xff] }
  0xb0   : > { %1187 = vmatpush.msra.mxu2 %v343_v39  ;;  %1188 = vmatpush.msra.mxu3 %v343_v39 }
  0xb1   : > { %377 = vmatpush.msra.mxu0 %v342_v45  ;;  %1189 = vmatpush.msra.mxu1 %v342_v45 }
  0xb2   : > { %1190 = vmatpush.msra.mxu2 %v342_v45  ;;  %1191 = vmatpush.msra.mxu3 %v342_v45  ;;  %v1125_v45 = vld [vmem:[%s1855_s2 + $0x50] sm:$0xff] }
  0xb3   : > { %v1276_v50 = vpop.permute.xlu0 %1275  ;;  %378 = vmatpush.msra.mxu0 %v341_v46  ;;  %1192 = vmatpush.msra.mxu1 %v341_v46  ;;  %v1617_v0 = vpop.permute.xlu2 %1330 }
  0xb4   : > { %v1278_v53 = vunpack.i.h.bf16 %v1276_v50  ;;  %v1277_v54 = vunpack.i.l.bf16 %v1276_v50  ;;  %v1281_v55 = vpop.permute.xlu1 %1280  ;;  %1193 = vmatpush.msra.mxu2 %v341_v46  ;;  %1194 = vmatpush.msra.mxu3 %v341_v46  ;;  %v1333_v32 = vunpack.i.h.bf16 %v1617_v0  ;;  %v1332_v33 = vunpack.i.l.bf16 %v1617_v0  ;;  %v1133_v50 = vld [vmem:[%s1855_s2 + $0x70] sm:$0xff]  ;;  %v1134_v0 = vld [vmem:[%s1855_s2 + $0x78] sm:$0xff] }
  0xb5   : > { %v1283_v58 = vunpack.i.h.bf16 %v1281_v55  ;;  %v1282_v59 = vunpack.i.l.bf16 %v1281_v55  ;;  %1118 = vmatmul.msk.f32.vlgmr.msra.gmra.mxu3 %vm350_vm3, %v1114_v49  ;;  %1117 = vmatmul.msk.f32.vlgmr.msra.gmra.mxu2 %vm350_vm3, %v1113_v51 }
  0xb6   : > { %483 = vmatpush.msrb.mxu2 %v453_v56  ;;  %v524_v61 = vsel %vm520_vm2, %v1277_v54, %v1278_v53  ;;  %1116 = vmatmul.msk.f32.vlgmr.msra.gmra.mxu1 %vm350_vm3, %v1112_v52  ;;  %v736_v47 = vsel %vm733_vm5, %v1332_v33, %v1333_v32  ;;  %v1455_v32 = vmov 0  }
  0xb7   : > { %v451_v63 = vsel %vm449_vm1, %v1282_v59, %v1283_v58  ;;  %554 = vmatpush.msrb.mxu3 %v524_v61  ;;  %416 = vmatpush.msrb.mxu1 %v1557_v8 }
  0xb8   : > { %484 = vmatpush.msrb.mxu2 %v452_v57  ;;  %1115 = vmatmul.msk.f32.vlgmr.msra.gmra.mxu0 %vm350_vm3, %v1111_v60  ;;  %v321_v57 = vld [vmem:[%s1855_s2 + $0x18] sm:$0xff]  ;;  %v1140_v60 = vld [vmem:[%s1855_s2 + $0x88] sm:$0xff] }
  0xb9   : > { %555 = vmatpush.msrb.mxu3 %v523_v62  ;;  %417 = vmatpush.msrb.mxu1 %v1563_v14  ;;  %v1131_v14 = vld [vmem:[%s1855_s2 + $0x60] sm:$0xff]  ;;  %v1126_v62 = vld [vmem:[%s1855_s2 + $0x58] sm:$0xff] }
  0xba   : > { %485 = vmatpush.msrb.mxu2 %v451_v63  ;;  %1405 = vset.pattern.permute.xlu0 %v1455_v32 }
  0xbb   : > { %v1291_v1 = vpop.permute.xlu0 %1290  ;;  %418 = vmatpush.msrb.mxu1 %v1559_v10  ;;  %v521_v10 = vsel %vm520_vm2, %v1302_v3, %v1303_v2  ;;  %v1346_v15 = vpop.permute.xlu2 %1345  ;;  %1406 = vset.pattern.permute.xlu1 %v1455_v32 }
  0xbc   : > { %v1293_v4 = vunpack.i.h.bf16 %v1291_v1  ;;  %v1292_v5 = vunpack.i.l.bf16 %v1291_v1  ;;  %v1296_v6 = vpop.permute.xlu1 %1295  ;;  %v1348_v42 = vunpack.i.h.bf16 %v1346_v15  ;;  %v1347_v43 = vunpack.i.l.bf16 %v1346_v15  ;;  %1404 = vset.pattern.permute.xlu2 %v1455_v32 }
  0xbd   : > { %v1298_v8 = vunpack.i.h.bf16 %v1296_v6  ;;  %v1297_v9 = vunpack.i.l.bf16 %v1296_v6  ;;  %419 = vmatpush.msrb.mxu1 %v1565_v16 }
  0xbe   : > { %v450_v12 = vsel %vm449_vm1, %v1292_v5, %v1293_v4  ;;  %1119 = vmatmul.msk.f32.vlgmr.msrb.gmra.mxu1 %vm350_vm3, %v318_v7  ;;  %v735_v51 = vsel %vm733_vm5, %v1347_v43, %v1348_v42  ;;  %v1141_v7 = vld [vmem:[%s1855_s2 + $0x90] sm:$0xff]  ;;  %v1164_v43 = vld [vmem:[%s1855_s2 + $0xe8] sm:$0xff] }
  0xbf   : > { %v522_v13 = vsel %vm520_vm2, %v1297_v9, %v1298_v8  ;;  %486 = vmatpush.msrb.mxu2 %v450_v12 }
  0xc0   : > { %556 = vmatpush.msrb.mxu3 %v522_v13  ;;  %1127 = vmatmul.msk.f32.vlgmr.msrb.gmra.mxu2 %vm350_vm3, %v1123_v11  ;;  %v1155_v11 = vld [vmem:[%s1855_s2 + $0xc0] sm:$0xff] }
  0xc2   : > { %557 = vmatpush.msrb.mxu3 %v521_v10 }
  0xc3   : > { %v1306_v17 = vpop.permute.xlu0 %1305  ;;  %1135 = vmatmul.msk.f32.vlgmr.msrb.gmra.mxu3 %vm350_vm3, %v1131_v14  ;;  %v1361_v38 = vpop.permute.xlu2 %1360 }
  0xc4   : > { %v1308_v16 = vunpack.i.h.bf16 %v1306_v17  ;;  %v1307_v18 = vunpack.i.l.bf16 %v1306_v17  ;;  %v1311_v19 = vpop.permute.xlu1 %1310  ;;  %v1363_v48 = vunpack.i.h.bf16 %v1361_v38  ;;  %v1362_v49 = vunpack.i.l.bf16 %v1361_v38  ;;  %v1147_v38 = vld [vmem:[%s1855_s2 + $0xa0] sm:$0xff] }
  0xc5   : > { %v1313_v23 = vunpack.i.h.bf16 %v1311_v19  ;;  %v1312_v25 = vunpack.i.l.bf16 %v1311_v19 }
  0xc6   : > { %v595_v27 = vsel %vm591_vm4, %v1307_v18, %v1308_v16  ;;  %1120 = vmatmul.msk.f32.gmra.mxu1 %vm350_vm3, %v319_v22  ;;  %v734_v53 = vsel %vm733_vm5, %v1362_v49, %v1363_v48 }
  0xc7   : > { %625 = vmatpush.msrb.mxu0 %v595_v27  ;;  %v594_v28 = vsel %vm591_vm4, %v1312_v25, %v1313_v23  ;;  %v1156_v23 = vld [vmem:[%s1855_s2 + $0xc8] sm:$0xff] }
  0xc8   : > { %1128 = vmatmul.msk.f32.gmra.mxu2 %vm350_vm3, %v1124_v26  ;;  %v1163_v26 = vld [vmem:[%s1855_s2 + $0xe0] sm:$0xff] }
  0xc9   : > { %626 = vmatpush.msrb.mxu0 %v594_v28  ;;  %v931_v28 = vld [vmem:[%s1856_s3 + $0x8] sm:$0xff] }
  0xca   : > { %941 = vperm.xlu0 %1405, %v931_v28  }
  0xcb   : > { %v1321_v31 = vpop.permute.xlu0 %1320  ;;  %627 = vmatpush.msrb.mxu0 %v593_v29  ;;  %1136 = vmatmul.msk.f32.gmra.mxu3 %vm350_vm3, %v1132_v30  ;;  %v1376_v9 = vpop.permute.xlu2 %1375 }
  0xcc   : > { %v1323_v34 = vunpack.i.h.bf16 %v1321_v31  ;;  %v1322_v35 = vunpack.i.l.bf16 %v1321_v31  ;;  %v1326_v36 = vpop.permute.xlu1 %1325  ;;  %v1378_v13 = vunpack.i.h.bf16 %v1376_v9  ;;  %v1377_v10 = vunpack.i.l.bf16 %v1376_v9 }
  0xcd   : > { %v1328_v39 = vunpack.i.h.bf16 %v1326_v36  ;;  %v1327_v40 = vunpack.i.l.bf16 %v1326_v36 }
  0xce   : > { %v592_v44 = vsel %vm591_vm4, %v1322_v35, %v1323_v34  ;;  %1121 = vmatmul.msk.f32.gmra.mxu1 %vm350_vm3, %v320_v37  ;;  %v805_v22 = vsel %vm804_vm6, %v1377_v10, %v1378_v13 }
  0xcf   : > { %v737_v46 = vsel %vm733_vm5, %v1327_v40, %v1328_v39  ;;  %628 = vmatpush.msrb.mxu0 %v592_v44  ;;  %v1157_v40 = vld [vmem:[%s1855_s2 + $0xd0] sm:$0xff] }
  0xd0   : > { %767 = vmatpush.msra.mxu2 %v737_v46  ;;  %1143 = vmatmul.msk.f32.vlgmr.msrb.gmra.mxu0 %vm350_vm3, %v1139_v41  ;;  %v932_v44 = vld [vmem:[%s1856_s3 + $0x10] sm:$0xff] }
  0xd1   : > { %1129 = vmatmul.msk.f32.gmra.mxu2 %vm350_vm3, %v1125_v45  ;;  %v930_v45 = vld [vmem:[%s1856_s3] sm:$0xff]  ;;  %946 = vperm.xlu1 %1406, %v932_v44  }
  0xd2   : > { %768 = vmatpush.msra.mxu2 %v736_v47  ;;  %936 = vperm.xlu2 %1404, %v930_v45  }
  0xd3   : > { %v1336_v52 = vpop.permute.xlu0 %1335  ;;  %1137 = vmatmul.msk.f32.gmra.mxu3 %vm350_vm3, %v1133_v50  ;;  %v1391_v27 = vpop.permute.xlu2 %1390 }
  0xd4   : > { %v1338_v54 = vunpack.i.h.bf16 %v1336_v52  ;;  %v1337_v55 = vunpack.i.l.bf16 %v1336_v52  ;;  %v1341_v56 = vpop.permute.xlu1 %1340  ;;  %769 = vmatpush.msra.mxu2 %v735_v51  ;;  %v1393_v30 = vunpack.i.h.bf16 %v1391_v27  ;;  %v1392_v31 = vunpack.i.l.bf16 %v1391_v27  ;;  %v1148_v52 = vld [vmem:[%s1855_s2 + $0xa8] sm:$0xff] }
  0xd5   : > { %v1343_v58 = vunpack.i.h.bf16 %v1341_v56  ;;  %v1342_v59 = vunpack.i.l.bf16 %v1341_v56  ;;  %v1171_v56 = vld [vmem:[%s1855_s2 + $0x100] sm:$0xff] }
  0xd6   : > { %v808_v61 = vsel %vm804_vm6, %v1337_v55, %v1338_v54  ;;  %770 = vmatpush.msra.mxu2 %v734_v53  ;;  %1122 = vmatmul.msk.f32.gmra.mxu1 %vm350_vm3, %v321_v57  ;;  %v878_v42 = vsel %vm875_vm8, %v1392_v31, %v1393_v30  ;;  %v1158_v54 = vld [vmem:[%s1855_s2 + $0xd8] sm:$0xff]  ;;  %v1165_v57 = vld [vmem:[%s1855_s2 + $0xf0] sm:$0xff] }
  0xd7   : > { %v666_v63 = vsel %vm662_vm7, %v1342_v59, %v1343_v58  ;;  %838 = vmatpush.msra.mxu3 %v808_v61  ;;  %v933_v58 = vld [vmem:[%s1856_s3 + $0x18] sm:$0xff]  ;;  %v1172_v59 = vld [vmem:[%s1855_s2 + $0x108] sm:$0xff] }
  0xd8   : > { %696 = vmatpush.msra.mxu1 %v666_v63  ;;  %1144 = vmatmul.msk.f32.gmra.mxu0 %vm350_vm3, %v1140_v60  ;;  %v1166_v60 = vld [vmem:[%s1855_s2 + $0xf8] sm:$0xff] }
  0xd9   : > { %1130 = vmatmul.msk.f32.gmra.mxu2 %vm350_vm3, %v1126_v62  ;;  %v1150_v61 = vld [vmem:[%s1855_s2 + $0xb8] sm:$0xff]  ;;  %v1173_v62 = vld [vmem:[%s1855_s2 + $0x110] sm:$0xff] }
  0xda   : > { %951 = vperm.xlu2 %1404, %v933_v58   ;;  %v1174_v63 = vld [vmem:[%s1855_s2 + $0x118] sm:$0xff] }
  0xdb   : > { %v1351_v1 = vpop.permute.xlu0 %1350  ;;  %1138 = vmatmul.msk.f32.gmra.mxu3 %vm350_vm3, %v1134_v0 }
  0xdc   : > { %v1353_v2 = vunpack.i.h.bf16 %v1351_v1  ;;  %v1352_v3 = vunpack.i.l.bf16 %v1351_v1  ;;  %v1356_v4 = vpop.permute.xlu1 %1355 }
  0xdd   : > { %v1358_v5 = vunpack.i.h.bf16 %v1356_v4  ;;  %v1357_v6 = vunpack.i.l.bf16 %v1356_v4 }
  0xde   : > { %v807_v8 = vsel %vm804_vm6, %v1352_v3, %v1353_v2 }
  0xdf   : > { %v665_v12 = vsel %vm662_vm7, %v1357_v6, %v1358_v5  ;;  %839 = vmatpush.msra.mxu3 %v807_v8 }
  0xe0   : > { %697 = vmatpush.msra.mxu1 %v665_v12  ;;  %1145 = vmatmul.msk.f32.gmra.mxu0 %vm350_vm3, %v1141_v7 }
  0xe1   : > { %1159 = vmatmul.msk.f32.vlgmr.msra.gmra.mxu2 %vm350_vm3, %v1155_v11 }
  0xe3   : > { %v1366_v14 = vpop.permute.xlu0 %1365 }
  0xe4   : > { %v1368_v15 = vunpack.i.h.bf16 %v1366_v14  ;;  %v1367_v17 = vunpack.i.l.bf16 %v1366_v14  ;;  %v1371_v16 = vpop.permute.xlu1 %1370 }
  0xe5   : > { %v1373_v18 = vunpack.i.h.bf16 %v1371_v16  ;;  %v1372_v19 = vunpack.i.l.bf16 %v1371_v16 }
  0xe6   : > { %v806_v21 = vsel %vm804_vm6, %v1367_v17, %v1368_v15 }
  0xe7   : > { %v664_v25 = vsel %vm662_vm7, %v1372_v19, %v1373_v18  ;;  %840 = vmatpush.msra.mxu3 %v806_v21 }
  0xe8   : > { %698 = vmatpush.msra.mxu1 %v664_v25  ;;  %1146 = vmatmul.msk.f32.gmra.mxu0 %vm350_vm3, %v1142_v20 }
  0xe9   : > { %841 = vmatpush.msra.mxu3 %v805_v22  ;;  %1160 = vmatmul.msk.f32.gmra.mxu2 %vm350_vm3, %v1156_v23 }
  0xea   : > { %1167 = vmatmul.msk.f32.vlgmr.msra.gmra.mxu3 %vm350_vm3, %v1163_v26 }
  0xeb   : > { %v1381_v29 = vpop.permute.xlu0 %1380 }
  0xec   : > { %v1383_v33 = vunpack.i.h.bf16 %v1381_v29  ;;  %v1382_v34 = vunpack.i.l.bf16 %v1381_v29  ;;  %v1386_v35 = vpop.permute.xlu1 %1385 }
  0xed   : > { %v1388_v36 = vunpack.i.h.bf16 %v1386_v35  ;;  %v1387_v37 = vunpack.i.l.bf16 %v1386_v35 }
  0xee   : > { %v663_v39 = vsel %vm662_vm7, %v1382_v34, %v1383_v33 }
  0xef   : > { %699 = vmatpush.msra.mxu1 %v663_v39  ;;  %v879_v41 = vsel %vm875_vm8, %v1387_v37, %v1388_v36 }
  0xf0   : > { %909 = vmatpush.msra.mxu0 %v879_v41  ;;  %1151 = vmatmul.msk.f32.vlgmr.msra.gmra.mxu1 %vm350_vm3, %v1147_v38 }
  0xf1   : > { %1161 = vmatmul.msk.f32.gmra.mxu2 %vm350_vm3, %v1157_v40 }
  0xf2   : > { %910 = vmatpush.msra.mxu0 %v878_v42  ;;  %1168 = vmatmul.msk.f32.gmra.mxu3 %vm350_vm3, %v1164_v43 }
  0xf3   : > { %v1396_v46 = vpop.permute.xlu0 %1395 }
  0xf4   : > { %v1398_v47 = vunpack.i.h.bf16 %v1396_v46  ;;  %v1397_v48 = vunpack.i.l.bf16 %v1396_v46  ;;  %v1401_v49 = vpop.permute.xlu1 %1400 }
  0xf5   : > { %v1403_v50 = vunpack.i.h.bf16 %v1401_v49  ;;  %v1402_v51 = vunpack.i.l.bf16 %v1401_v49 }
  0xf6   : > { %v877_v53 = vsel %vm875_vm8, %v1397_v48, %v1398_v47 }
  0xf7   : > { %911 = vmatpush.msra.mxu0 %v877_v53  ;;  %v876_v55 = vsel %vm875_vm8, %v1402_v51, %v1403_v50 }
  0xf8   : > { %1152 = vmatmul.msk.f32.gmra.mxu1 %vm350_vm3, %v1148_v52 }
  0xf9   : > { %912 = vmatpush.msra.mxu0 %v876_v55  ;;  %1162 = vmatmul.msk.f32.gmra.mxu2 %vm350_vm3, %v1158_v54 }
  0xfa   : > { %1175 = vmatmul.msk.f32.vlgmr.msra.gmra.mxu0 %vm350_vm3, %v1171_v56  ;;  %1169 = vmatmul.msk.f32.gmra.mxu3 %vm350_vm3, %v1165_v57 }
 0x100   : > { %1153 = vmatmul.msk.f32.gmra.mxu1 %vm350_vm3, %v1149_v24 }
 0x102   : > { %1176 = vmatmul.msk.f32.gmra.mxu0 %vm350_vm3, %v1172_v59  ;;  %1170 = vmatmul.msk.f32.gmra.mxu3 %vm350_vm3, %v1166_v60 }
 0x108   : > { %1154 = vmatmul.msk.f32.gmra.mxu1 %vm350_vm3, %v1150_v61 }
 0x10a   : > { %1177 = vmatmul.msk.f32.gmra.mxu0 %vm350_vm3, %v1173_v62 }
 0x112   : > { %1178 = vmatmul.msk.f32.gmra.mxu0 %vm350_vm3, %v1174_v63 }
 0x12c   : > { %v937_v40 = vpop.permute.xlu2 %936 }
 0x133   : > { %v383_v1 = vpop.f32.mrf.mxu1 }
 0x135   : > { %v380_v5 = vpop.f32.mrf.mxu0 }
 0x138   : > { %v386_v0 = vpop.f32.mrf.mxu2  ;;  %v389_v2 = vpop.f32.mrf.mxu3 }
 0x13b   : > { %v421_v4 = vpop.f32.mrf.mxu1 }
 0x13c   : > { %v422_v15 = vadd.f32 %v421_v4, %v380_v5  ;;  %v942_v56 = vpop.permute.xlu0 %941 }
 0x143   : > { %v488_v3 = vpop.f32.mrf.mxu2  ;;  %v424_v8 = vpop.f32.mrf.mxu1 }
 0x144   : > { %v500_v16 = vadd.f32 %v488_v3, %v422_v15  ;;  %v425_v23 = vadd.f32 %v424_v8, %v383_v1 }
 0x146   : > { %v559_v6 = vpop.f32.mrf.mxu3 }
 0x147   : > { %v571_v21 = vadd.f32 %v559_v6, %v500_v16 }
 0x14b   : > { %v491_v7 = vpop.f32.mrf.mxu2  ;;  %v427_v13 = vpop.f32.mrf.mxu1 }
 0x14c   : > { %v501_v28 = vadd.f32 %v491_v7, %v425_v23  ;;  %v428_v35 = vadd.f32 %v427_v13, %v386_v0 }
 0x14d   : > { %v630_v9 = vpop.f32.mrf.mxu0 }
 0x14e   : > { %v562_v11 = vpop.f32.mrf.mxu3  ;;  %v642_v25 = vadd.f32 %v630_v9, %v571_v21 }
 0x14f   : > { %v572_v31 = vadd.f32 %v562_v11, %v501_v28 }
 0x153   : > { %v430_v18 = vpop.f32.mrf.mxu1 }
 0x154   : > { %v494_v12 = vpop.f32.mrf.mxu2  ;;  %v431_v48 = vadd.f32 %v430_v18, %v389_v2  ;;  %v947_v2 = vpop.permute.xlu1 %946 }
 0x155   : > { %v633_v10 = vpop.f32.mrf.mxu0  ;;  %v502_v37 = vadd.f32 %v494_v12, %v428_v35 }
 0x156   : > { %v565_v14 = vpop.f32.mrf.mxu3  ;;  %v643_v34 = vadd.f32 %v633_v10, %v572_v31  ;;  %v952_v10 = vpop.permute.xlu2 %951 }
 0x157   : > { %v573_v44 = vadd.f32 %v565_v14, %v502_v37 }
 0x15c   : > { %v497_v17 = vpop.f32.mrf.mxu2 }
 0x15d   : > { %v636_v19 = vpop.f32.mrf.mxu0  ;;  %v503_v52 = vadd.f32 %v497_v17, %v431_v48 }
 0x15e   : > { %v568_v20 = vpop.f32.mrf.mxu3  ;;  %v644_v47 = vadd.f32 %v636_v19, %v573_v44 }
 0x15f   : > { %v574_v24 = vadd.f32 %v568_v20, %v503_v52 }
 0x164   : > { %v772_v22 = vpop.f32.mrf.mxu2 }
 0x165   : > { %v639_v30 = vpop.f32.mrf.mxu0 }
 0x166   : > { %v645_v61 = vadd.f32 %v639_v30, %v574_v24 }
 0x16c   : > { %v775_v33 = vpop.f32.mrf.mxu2 }
 0x16d   : > { %v701_v26 = vpop.f32.mrf.mxu1  ;;  %v843_v27 = vpop.f32.mrf.mxu3 }
 0x16e   : > { %v713_v29 = vadd.f32 %v701_v26, %v642_v25 }
 0x170   : > { %v784_v32 = vadd.f32 %v772_v22, %v713_v29 }
 0x172   : > { %v855_v38 = vadd.f32 %v843_v27, %v784_v32 }
 0x174   : > { %v778_v51 = vpop.f32.mrf.mxu2 }
 0x175   : > { %v704_v36 = vpop.f32.mrf.mxu1  ;;  %v846_v42 = vpop.f32.mrf.mxu3 }
 0x176   : > { %v714_v39 = vadd.f32 %v704_v36, %v643_v34 }
 0x177   : > { %v914_v41 = vpop.f32.mrf.mxu0 }
 0x178   : > { %v926_v43 = vadd.f32 %v914_v41, %v855_v38  ;;  %v785_v45 = vadd.f32 %v775_v33, %v714_v39 }
 0x17a   : > { %v954_v46 = vadd.f32 %v937_v40, %v926_v43  ;;  %v856_v53 = vadd.f32 %v846_v42, %v785_v45 }
 0x17c   : > { %v958_v49 = vmax.f32 %v954_v46, 0.0  ;;  %v781_v3 = vpop.f32.mrf.mxu2 }
 0x17d   : > { %v707_v50 = vpop.f32.mrf.mxu1  ;;  %v849_v58 = vpop.f32.mrf.mxu3 }
 0x17e   : > { %962 = vst [vmem:[%s1820_s10] sm:$0xff] %v958_v49  ;;  %v715_v54 = vadd.f32 %v707_v50, %v644_v47 }
 0x17f   : > { %v917_v55 = vpop.f32.mrf.mxu0 }
 0x180   : > { %v927_v57 = vadd.f32 %v917_v55, %v856_v53  ;;  %v786_v59 = vadd.f32 %v778_v51, %v715_v54 }
 0x182   : > { %v955_v60 = vadd.f32 %v942_v56, %v927_v57  ;;  %v857_v0 = vadd.f32 %v849_v58, %v786_v59 }
 0x184   : > { %v959_v62 = vmax.f32 %v955_v60, 0.0 }
 0x185   : > { %v710_v63 = vpop.f32.mrf.mxu1  ;;  %v852_v8 = vpop.f32.mrf.mxu3  ;;  %v1009_v17 = vld [vmem:[%s1820_s10] sm:$0xff] (%p1533_p8) }
 0x186   : > { %963 = vst [vmem:[%s1820_s10 + $0x8] sm:$0xff] %v959_v62  ;;  %v716_v1 = vadd.f32 %v710_v63, %v645_v61 }
 0x187   : > { %v920_v4 = vpop.f32.mrf.mxu0  ;;  %1010 = vst [vmem:[%s974_s13] sm:$0xff] (%p1533_p8), %v1009_v17 }
 0x188   : > { %v928_v5 = vadd.f32 %v920_v4, %v857_v0  ;;  %v787_v6 = vadd.f32 %v781_v3, %v716_v1 }
 0x18a   : > { %v956_v7 = vadd.f32 %v947_v2, %v928_v5  ;;  %v858_v11 = vadd.f32 %v852_v8, %v787_v6 }
 0x18c   : > { %v960_v9 = vmax.f32 %v956_v7, 0.0 }
 0x18d   : > { %v1011_v16 = vld [vmem:[%s1820_s10 + $0x8] sm:$0xff] (%p1533_p8) }
 0x18e   : > { %964 = vst [vmem:[%s1820_s10 + $0x10] sm:$0xff] %v960_v9 }
 0x18f   : > { %v923_v12 = vpop.f32.mrf.mxu0  ;;  %1012 = vst [vmem:[%s974_s13 + $0x10] sm:$0xff] (%p1533_p8), %v1011_v16 }
 0x190   : > { %v929_v13 = vadd.f32 %v923_v12, %v858_v11 }
 0x192   : > { %v957_v14 = vadd.f32 %v952_v10, %v929_v13  ;;  %972 = sbr.rel (!%p1533_p8) target bundleno = 415 (0x19f), region = 116 }
 0x194   : > { %v961_v15 = vmax.f32 %v957_v14, 0.0 }
 0x195   : > { %v1013_v18 = vld [vmem:[%s1820_s10 + $0x10] sm:$0xff] (%p1533_p8) }
 0x196   : > { %965 = vst [vmem:[%s1820_s10 + $0x18] sm:$0xff] %v961_v15 }
 0x197   : > { %1014 = vst [vmem:[%s974_s13 + $0x20] sm:$0xff] %v1013_v18 }
 0x19d   : > { %v1015_v19 = vld [vmem:[%s1820_s10 + $0x18] sm:$0xff] }
 0x19e   : > { %1016 = vst [vmem:[%s974_s13 + $0x30] sm:$0xff] %v1015_v19 }
 0x19f PF: > { %p11_p13 = scmp.ge.s32.totalorder %s1508_s21, 4   ;;  %s1860_s15 = smov %s1433_s16 }
 0x1a0   : > { %s1861_s16 = smov %s1527_s28  ;;  %s1862_s17 = smov %s1441_s18 }
 0x1a1   : > { %s1863_s18 = smov %s1518_s25  ;;  %s1864_s19 = smov %s1508_s21 }
 0x1a2   :  { %13 = sbr.rel (!%p11_p13) target bundleno = 3 (0x3), region = 201 }

// kernel: jpg_with_attention_forward.16
= control target key start
LH: loop header
LB: loop body
LE: loop exit
PB: predicated region body
PF: predicated region fallthrough
CT: control target
= control target key end

     0   :  { %s1272_s15 = smov 0   ;;  %s1274_s16 = smov 0   ;;  %s1552_s0 = inlined_call_operand.vmem [shape: f32[1,32,384], index: 0, kind: input, shape index: {}, may-alias: {0,1}]   ;;  %s1553_s1 = inlined_call_operand.vmem [shape: f32[1,32,384], index: 1, kind: input, shape index: {}, may-alias: {0,1}]   ;;  %s1554_s2 = inlined_call_operand.vmem [shape: f32[9,16,32], index: 2, kind: input, shape index: {}]   ;;  %s1555_s3 = inlined_call_operand.vmem [shape: f32[16,1], index: 3, kind: input, shape index: {}]   ;;  %s1556_s4 = inlined_call_operand.vmem [shape: f32[16,256], index: 4, kind: output, shape index: {}]  }
   0x1   :  { %s1276_s17 = smov 0   ;;  %s1278_s18 = smov 0  }
   0x2   :  { %s1280_s19 = smov 0  }
   0x3 LB: > { %s929_s20 = sadd.s32 4294967295, %s1236_s19   ;;  %s1299_s21 = sadd.s32 1, %s1236_s19   ;;  %s1236_s19 = sphi %s1280_s19, %s1563_s19   ;;  %s1232_s18 = sphi %s1278_s18, %s1562_s18   ;;  %s1228_s17 = sphi %s1276_s17, %s1561_s17   ;;  %s1224_s16 = sphi %s1274_s16, %s1560_s16   ;;  %s1220_s15 = sphi %s1272_s15, %s1559_s15  }
   0x4   : > { %s18_s22 = ssub.s32 %s1236_s19, %s1299_s21  ;;  %s21_s23 = sadd.s32 1, %s1232_s18 }
   0x5   : > { %p19_p0 = scmp.eq.s32.totalorder %s18_s22, 0  ;;  %p28_p1 = scmp.ne.s32.totalorder %s1232_s18, %s1228_s17 }
   0x6   : > { %p29_p2 = scmp.eq.s32.totalorder %s1236_s19, 0  ;;  %s45_s24 = sadd.s32 1, %s1299_s21 }
   0x7   : > { %s1309_s25 = scalar_select %p19_p0, %s1232_s18, %s21_s23  }
   0x8   : > { %p30_p3 = por %p29_p2, %p28_p1  ;;  %s46_s26 = ssub.s32 %s1299_s21, %s45_s24 }
   0x9   : > { %p47_p4 = scmp.eq.s32.totalorder %s46_s26, 0  ;;  %s49_s27 = sadd.s32 1, %s1224_s16 }
   0xa   : > { %p56_p5 = scmp.ne.s32.totalorder %s1224_s16, %s1220_s15  ;;  %p128_p6 = scmp.eq.s32.totalorder %s929_s20, 1 }
   0xb   : > { %s1318_s28 = scalar_select %p47_p4, %s1224_s16, %s49_s27  }
   0xc   : > { %p1320_p7 = por %p56_p5, %p29_p2  ;;  %p1324_p8 = por %p128_p6, %p28_p1 }
   0xd   : > { %p932_p9 = scmp.ge.s32.totalorder %s1236_s19, 2 }
   0xf   : > { %156 = sbr.rel (%p932_p9) target bundleno = 36 (0x24), region = 24 }
  0x14   : > { %159 = sbr.rel (!%p30_p3) target bundleno = 28 (0x1c), region = 28  ;;  %s161_s5 = sand.u32 (%p30_p3), 1, %s1232_s18  }
  0x15   : > { %s934_s6 = sshll.u32 (%p30_p3), %s1236_s19, 3  ;;  %s933_s7 = sshll.u32 (%p30_p3), %s161_s5, 5 }
  0x16   : > { %s165_s10 = scalar_lea.vmem (%p30_p3), %s1552_s0, %s934_s6  ;;  %s163_s11 = scalar_lea.vmem (%p30_p3), [#allocation2], %s933_s7 }
  0x17   : > { %v200_v0 = vld [vmem:[%s165_s10] sm:$0xff] (%p30_p3)  ;;  %v202_v1 = vld [vmem:[%s165_s10 + $0x18] sm:$0xff] (%p30_p3)  ;;  %v204_v2 = vld [vmem:[%s165_s10 + $0x30] sm:$0xff] (%p30_p3) }
  0x18   : > { %201 = vst [vmem:[%s163_s11] sm:$0xff] (%p30_p3), %v200_v0  ;;  %v206_v3 = vld [vmem:[%s165_s10 + $0x48] sm:$0xff] (%p30_p3) }
  0x19   : > { %203 = vst [vmem:[%s163_s11 + $0x8] sm:$0xff] %v202_v1 }
  0x1a   : > { %205 = vst [vmem:[%s163_s11 + $0x10] sm:$0xff] %v204_v2 }
  0x1b   : > { %207 = vst [vmem:[%s163_s11 + $0x18] sm:$0xff] %v206_v3 }
  0x1c PF: > { %213 = sbr.rel (!%p1320_p7) target bundleno = 36 (0x24), region = 66  ;;  %s215_s12 = sand.u32 (%p1320_p7), 1, %s1224_s16  }
  0x1d   : > { %s936_s13 = sshll.u32 (%p1320_p7), %s1236_s19, 3  ;;  %s935_s14 = sshll.u32 (%p1320_p7), %s215_s12, 5 }
  0x1e   : > { %s873_s24 = scalar_lea.vmem (%p1320_p7), %s1553_s1, %s936_s13  ;;  %s217_s26 = scalar_lea.vmem (%p1320_p7), [#allocation3], %s935_s14 }
  0x1f   : > { %v937_v4 = vld [vmem:[%s873_s24 + $0x8] sm:$0xff] (%p1320_p7)  ;;  %v938_v5 = vld [vmem:[%s873_s24 + $0x20] sm:$0xff] (%p1320_p7)  ;;  %v939_v6 = vld [vmem:[%s873_s24 + $0x38] sm:$0xff] (%p1320_p7) }
  0x20   : > { %256 = vst [vmem:[%s217_s26] sm:$0xff] (%p1320_p7), %v937_v4  ;;  %v940_v7 = vld [vmem:[%s873_s24 + $0x50] sm:$0xff] (%p1320_p7) }
  0x21   : > { %258 = vst [vmem:[%s217_s26 + $0x8] sm:$0xff] %v938_v5 }
  0x22   : > { %260 = vst [vmem:[%s217_s26 + $0x10] sm:$0xff] %v939_v6 }
  0x23   : > { %262 = vst [vmem:[%s217_s26 + $0x18] sm:$0xff] %v940_v7 }
  0x24 PF: > { %p941_p10 = scmp.ge.s32.totalorder %s1236_s19, 1  ;;  %p267_p11 = scmp.lt.s32.totalorder %s1236_s19, 3 }
  0x26   : > { %p268_p12 = pnand %p941_p10, %p267_p11 }
  0x27   : > { %s274_s27 = sand.u32 (!%p268_p12), 1, %s1228_s17   ;;  %s281_s29 = sand.u32 (!%p268_p12), 1, %s1220_s15  }
  0x28   : > { %271 = sbr.rel (%p268_p12) target bundleno = 399 (0x18f), region = 104  ;;  %s942_s5 = sshll.u32 (!%p268_p12), %s274_s27, 5 }
  0x29   : > { %s943_s6 = sshll.u32 (!%p268_p12), %s281_s29, 5  ;;  %s276_s7 = scalar_lea.vmem (!%p268_p12), [#allocation2], %s942_s5 }
  0x2a   : > { %s283_s8 = scalar_lea.vmem (!%p268_p12), [#allocation3], %s943_s6  ;;  %s1238_s9 = smov (!%p268_p12), 127  }
  0x2b   : > { %s1239_s15 = smov (!%p268_p12), 126   ;;  %s1240_s10 = smov (!%p268_p12), 118  }
  0x2c   : > { %s1241_s11 = smov (!%p268_p12), 117   ;;  %s1242_s12 = smov (!%p268_p12), 108  }
  0x2d   : > { %v1347_v8 = vld [vmem:[%s276_s7 + $0x18] sm:$0xff]  ;;  %v1349_v10 = vld [vmem:[%s276_s7 + $0x8] sm:$0xff]  ;;  %v1353_v14 = vld [vmem:[%s276_s7] sm:$0xff]  ;;  %s1243_s13 = smov 107   ;;  %s1244_s14 = smov 116   ;;  %v336_v22 = vlaneseq  ;;  %vm346_vm2 = vcmask 261120  }
  0x2e   : > { %v317_v9 = vld [vmem:[%s283_s8 + $0x18] sm:$0xff]  ;;  %v315_v12 = vld [vmem:[%s283_s8 + $0x8] sm:$0xff]  ;;  %v314_v15 = vld [vmem:[%s283_s8] sm:$0xff]  ;;  %s1245_s22 = smov 106   ;;  %s980_s17 = sshll.u32 (%p1324_p8), %s929_s20, 3 }
  0x2f   : > { %v1036_v11 = vpack.i.bf16 %v317_v9, %v1347_v8  ;;  %v1046_v13 = vpack.i.bf16 %v315_v12, %v1349_v10  ;;  %v1056_v16 = vpack.i.bf16 %v314_v15, %v1353_v14  ;;  %v1356_v17 = vld [vmem:[%s276_s7 + $0x10] sm:$0xff]  ;;  %v1359_v24 = vand.u32 127, %v336_v22  ;;  %v946_v52 = vld [vmem:[%s1554_s2 + $0x18] sm:$0xff]  ;;  %v318_v63 = vld [vmem:[%s1554_s2] sm:$0xff] }
  0x30   : > { %v316_v18 = vld [vmem:[%s283_s8 + $0x10] sm:$0xff] }
  0x31   : > { %1037 = vrot.lane.b32.xlu0 %v1036_v11, %s1238_s9  ;;  %1047 = vrot.lane.b32.xlu1 %v1046_v13, %s1238_s9  ;;  %v1041_v19 = vpack.i.bf16 %v316_v18, %v1356_v17  ;;  %vm338_vm0 = vcmp.lt.s32.totalorder %v1359_v24, 127  ;;  %vm421_vm1 = vcmp.lt.s32.totalorder %v1359_v24, 126  ;;  %v945_v48 = vld [vmem:[%s1554_s2 + $0x10] sm:$0xff]  ;;  %vm476_vm3 = vcmp.lt.s32.totalorder %v1359_v24, 118 }
  0x32   : > { %1057 = vrot.lane.b32.xlu2 %v1056_v16, %s1238_s9  ;;  %v955_v12 = vld [vmem:[%s1554_s2 + $0x30] sm:$0xff]  ;;  %vm531_vm4 = vcmp.lt.s32.totalorder %v1359_v24, 117  ;;  %vm641_vm5 = vcmp.lt.s32.totalorder %v1359_v24, 108  ;;  %vm696_vm6 = vcmp.lt.s32.totalorder %v1359_v24, 107  ;;  %vm586_vm7 = vcmp.lt.s32.totalorder %v1359_v24, 116 }
  0x33   : > { %vm751_vm8 = vcmp.lt.s32.totalorder %v1359_v24, 106 }
  0x39   : > { %1042 = vrot.lane.b32.xlu0 %v1041_v19, %s1238_s9  ;;  %1052 = vrot.lane.b32.xlu1 %v1036_v11, %s1239_s15  ;;  %s944_s9 = sshll.u32 %s274_s27, 4 }
  0x3a   : > { %1062 = vrot.lane.b32.xlu2 %v1041_v19, %s1239_s15 }
  0x41   : > { %1067 = vrot.lane.b32.xlu0 %v1036_v11, %s1240_s10  ;;  %1072 = vrot.lane.b32.xlu1 %v1046_v13, %s1239_s15 }
  0x42   : > { %1077 = vrot.lane.b32.xlu2 %v1041_v19, %s1240_s10 }
  0x49   : > { %1082 = vrot.lane.b32.xlu0 %v1056_v16, %s1239_s15  ;;  %1087 = vrot.lane.b32.xlu1 %v1046_v13, %s1240_s10  ;;  %s308_s15 = scalar_lea.vmem [#allocation4], %s944_s9 }
  0x4a   : > { %1092 = vrot.lane.b32.xlu2 %v1056_v16, %s1240_s10 }
  0x51   : > { %1097 = vrot.lane.b32.xlu0 %v1036_v11, %s1241_s11  ;;  %1102 = vrot.lane.b32.xlu1 %v1041_v19, %s1241_s11 }
  0x52   : > { %1107 = vrot.lane.b32.xlu2 %v1046_v13, %s1241_s11 }
  0x59   : > { %1112 = vrot.lane.b32.xlu0 %v1056_v16, %s1241_s11  ;;  %1117 = vrot.lane.b32.xlu1 %v1036_v11, %s1242_s12  ;;  %s816_s11 = scalar_lea.vmem (%p1324_p8), %s1556_s4, %s980_s17 }
  0x5a   : > { %1122 = vrot.lane.b32.xlu2 %v1041_v19, %s1242_s12 }
  0x61   : > { %1127 = vrot.lane.b32.xlu0 %v1036_v11, %s1243_s13  ;;  %1132 = vrot.lane.b32.xlu1 %v1036_v11, %s1244_s14 }
  0x62   : > { %1137 = vrot.lane.b32.xlu2 %v1046_v13, %s1242_s12 }
  0x69   : > { %1142 = vrot.lane.b32.xlu0 %v1041_v19, %s1243_s13  ;;  %1147 = vrot.lane.b32.xlu1 %v1041_v19, %s1244_s14 }
  0x6a   : > { %1152 = vrot.lane.b32.xlu2 %v1056_v16, %s1242_s12 }
  0x71   : > { %1157 = vrot.lane.b32.xlu0 %v1046_v13, %s1243_s13  ;;  %1162 = vrot.lane.b32.xlu1 %v1046_v13, %s1244_s14 }
  0x72   : > { %1167 = vrot.lane.b32.xlu2 %v1056_v16, %s1243_s13 }
  0x79   : > { %1172 = vrot.lane.b32.xlu0 %v1056_v16, %s1244_s14  ;;  %1177 = vrot.lane.b32.xlu1 %v1036_v11, %s1245_s22 }
  0x7a   : > { %1182 = vrot.lane.b32.xlu2 %v1041_v19, %s1245_s22 }
  0x81   : > { %1187 = vrot.lane.b32.xlu0 %v1046_v13, %s1245_s22  ;;  %1192 = vrot.lane.b32.xlu1 %v1056_v16, %s1245_s22 }
  0x8c   : > { %v1058_v20 = vpop.permute.xlu2 %1057 }
  0x8d   : > { %v1060_v41 = vunpack.i.h.bf16 %v1058_v20  ;;  %v1059_v42 = vunpack.i.l.bf16 %v1058_v20 }
  0x8f   : > { %v339_v49 = vsel %vm338_vm0, %v1059_v42, %v1060_v41 }
  0x94   : > { %v1063_v21 = vpop.permute.xlu2 %1062 }
  0x95   : > { %v1065_v32 = vunpack.i.h.bf16 %v1063_v21  ;;  %v1064_v33 = vunpack.i.l.bf16 %v1063_v21 }
  0x97   : > { %v424_v46 = vsel %vm421_vm1, %v1064_v33, %v1065_v32 }
  0x9c   : > { %v1078_v23 = vpop.permute.xlu2 %1077 }
  0x9d   : > { %v1080_v50 = vunpack.i.h.bf16 %v1078_v23  ;;  %v1079_v51 = vunpack.i.l.bf16 %v1078_v23  ;;  %v952_v23 = vld [vmem:[%s1554_s2 + $0x28] sm:$0xff] }
  0x9f   : > { %v479_v60 = vsel %vm476_vm3, %v1079_v51, %v1080_v50 }
  0xa3   : > { %v1038_v25 = vpop.permute.xlu0 %1037  ;;  %v1048_v28 = vpop.permute.xlu1 %1047 }
  0xa4   : > { %v1040_v26 = vunpack.i.h.bf16 %v1038_v25  ;;  %v1039_v27 = vunpack.i.l.bf16 %v1038_v25  ;;  %v1362_v29 = vpop.permute.xlu2 %1092  ;;  %v1050_v34 = vunpack.i.h.bf16 %v1048_v28  ;;  %v1049_v35 = vunpack.i.l.bf16 %v1048_v28  ;;  %v956_v28 = vld [vmem:[%s1554_s2 + $0x38] sm:$0xff] }
  0xa5   : > { %v1095_v1 = vunpack.i.h.bf16 %v1362_v29  ;;  %v1094_v2 = vunpack.i.l.bf16 %v1362_v29 }
  0xa6   : > { %v342_v30 = vsel %vm338_vm0, %v1039_v27, %v1040_v26  ;;  %v340_v47 = vsel %vm338_vm0, %v1049_v35, %v1050_v34 }
  0xa7   : > { %365 = vmatpush.msra.mxu0 %v342_v30  ;;  %983 = vmatpush.msra.mxu1 %v342_v30  ;;  %v477_v11 = vsel %vm476_vm3, %v1094_v2, %v1095_v1 }
  0xab   : > { %v1043_v31 = vpop.permute.xlu0 %1042  ;;  %v1053_v38 = vpop.permute.xlu1 %1052 }
  0xac   : > { %v1045_v36 = vunpack.i.h.bf16 %v1043_v31  ;;  %v1044_v37 = vunpack.i.l.bf16 %v1043_v31  ;;  %v1055_v39 = vunpack.i.h.bf16 %v1053_v38  ;;  %v1054_v40 = vunpack.i.l.bf16 %v1053_v38  ;;  %v1369_v44 = vpop.permute.xlu2 %1107 }
  0xad   : > { %v1110_v19 = vunpack.i.h.bf16 %v1369_v44  ;;  %v1109_v20 = vunpack.i.l.bf16 %v1369_v44 }
  0xae   : > { %v341_v43 = vsel %vm338_vm0, %v1044_v37, %v1045_v36  ;;  %v425_v45 = vsel %vm421_vm1, %v1054_v40, %v1055_v39  ;;  %v959_v40 = vld [vmem:[%s1554_s2 + $0x40] sm:$0xff] }
  0xaf   : > { %366 = vmatpush.msra.mxu0 %v341_v43  ;;  %984 = vmatpush.msra.mxu1 %v341_v43  ;;  %v533_v27 = vsel %vm531_vm4, %v1109_v20, %v1110_v19 }
  0xb0   : > { %447 = vmatpush.msra.mxu2 %v425_v45 }
  0xb1   : > { %367 = vmatpush.msra.mxu0 %v340_v47  ;;  %985 = vmatpush.msra.mxu1 %v340_v47 }
  0xb2   : > { %448 = vmatpush.msra.mxu2 %v424_v46 }
  0xb3   : > { %v1068_v53 = vpop.permute.xlu0 %1067  ;;  %368 = vmatpush.msra.mxu0 %v339_v49  ;;  %986 = vmatpush.msra.mxu1 %v339_v49  ;;  %v1073_v56 = vpop.permute.xlu1 %1072 }
  0xb4   : > { %v1070_v54 = vunpack.i.h.bf16 %v1068_v53  ;;  %v1069_v55 = vunpack.i.l.bf16 %v1068_v53  ;;  %947 = vmatmul.msk.f32.vlgmr.msra.gmra.mxu0 %vm346_vm2, %v945_v48  ;;  %v1075_v57 = vunpack.i.h.bf16 %v1073_v56  ;;  %v1074_v58 = vunpack.i.l.bf16 %v1073_v56  ;;  %948 = vmatmul.msk.f32.vlgmr.msra.gmra.mxu1 %vm346_vm2, %v946_v52  ;;  %v1396_v62 = vpop.permute.xlu2 %1122  ;;  %v967_v52 = vld [vmem:[%s1554_s2 + $0x60] sm:$0xff] }
  0xb5   : > { %394 = vmatpush.msrb.mxu1 %v1347_v8  ;;  %v951_v8 = vld [vmem:[%s1554_s2 + $0x20] sm:$0xff]  ;;  %v1125_v30 = vunpack.i.h.bf16 %v1396_v62  ;;  %v1124_v31 = vunpack.i.l.bf16 %v1396_v62  ;;  %v968_v62 = vld [vmem:[%s1554_s2 + $0x68] sm:$0xff] }
  0xb6   : > { %v480_v59 = vsel %vm476_vm3, %v1069_v55, %v1070_v54  ;;  %v423_v61 = vsel %vm421_vm1, %v1074_v58, %v1075_v57  ;;  %v960_v55 = vld [vmem:[%s1554_s2 + $0x48] sm:$0xff] }
  0xb7   : > { %395 = vmatpush.msrb.mxu1 %v1356_v17  ;;  %502 = vmatpush.msra.mxu3 %v480_v59  ;;  %v644_v43 = vsel %vm641_vm5, %v1124_v31, %v1125_v30 }
  0xb8   : > { %449 = vmatpush.msra.mxu2 %v423_v61 }
  0xb9   : > { %396 = vmatpush.msrb.mxu1 %v1349_v10  ;;  %503 = vmatpush.msra.mxu3 %v479_v60 }
  0xbb   : > { %397 = vmatpush.msrb.mxu1 %v1353_v14  ;;  %v1083_v0 = vpop.permute.xlu0 %1082  ;;  %v1088_v3 = vpop.permute.xlu1 %1087  ;;  %v319_v14 = vld [vmem:[%s1554_s2 + $0x8] sm:$0xff] }
  0xbc   : > { %v1085_v4 = vunpack.i.h.bf16 %v1083_v0  ;;  %v1084_v5 = vunpack.i.l.bf16 %v1083_v0  ;;  %v1090_v6 = vunpack.i.h.bf16 %v1088_v3  ;;  %v1089_v7 = vunpack.i.l.bf16 %v1088_v3  ;;  %949 = vmatmul.msk.f32.vlgmr.msrb.gmra.mxu1 %vm346_vm2, %v318_v63  ;;  %v1138_v13 = vpop.permute.xlu2 %1137 }
  0xbd   : > { %v1140_v38 = vunpack.i.h.bf16 %v1138_v13  ;;  %v1139_v39 = vunpack.i.l.bf16 %v1138_v13 }
  0xbe   : > { %v422_v9 = vsel %vm421_vm1, %v1084_v5, %v1085_v4  ;;  %v478_v10 = vsel %vm476_vm3, %v1089_v7, %v1090_v6  ;;  %v791_v6 = vld [vmem:[%s1555_s3 + $0x8] sm:$0xff]  ;;  %v790_v7 = vld [vmem:[%s1555_s3] sm:$0xff] }
  0xbf   : > { %450 = vmatpush.msra.mxu2 %v422_v9  ;;  %504 = vmatpush.msra.mxu3 %v478_v10  ;;  %v643_v46 = vsel %vm641_vm5, %v1139_v39, %v1140_v38  ;;  %v1246_v9 = vmov 0  }
  0xc0   : > { %953 = vmatmul.msk.f32.vlgmr.msra.gmra.mxu2 %vm346_vm2, %v951_v8  ;;  %1197 = vset.pattern.permute.xlu0 %v1246_v9 }
  0xc1   : > { %505 = vmatpush.msra.mxu3 %v477_v11  ;;  %1196 = vset.pattern.permute.xlu2 %v1246_v9 }
  0xc2   : > { %957 = vmatmul.msk.f32.vlgmr.msra.gmra.mxu3 %vm346_vm2, %v955_v12  ;;  %799 = vperm.xlu0 %1197, %v791_v6  }
  0xc3   : > { %v1098_v15 = vpop.permute.xlu0 %1097  ;;  %v1103_v16 = vpop.permute.xlu1 %1102  ;;  %794 = vperm.xlu2 %1196, %v790_v7  }
  0xc4   : > { %v1100_v17 = vunpack.i.h.bf16 %v1098_v15  ;;  %v1099_v18 = vunpack.i.l.bf16 %v1098_v15  ;;  %v1105_v21 = vunpack.i.h.bf16 %v1103_v16  ;;  %v1104_v22 = vunpack.i.l.bf16 %v1103_v16  ;;  %950 = vmatmul.msk.f32.gmra.mxu1 %vm346_vm2, %v319_v14  ;;  %v1153_v35 = vpop.permute.xlu2 %1152 }
  0xc5   : > { %v1155_v44 = vunpack.i.h.bf16 %v1153_v35  ;;  %v1154_v45 = vunpack.i.l.bf16 %v1153_v35 }
  0xc6   : > { %v535_v25 = vsel %vm531_vm4, %v1099_v18, %v1100_v17  ;;  %v534_v26 = vsel %vm531_vm4, %v1104_v22, %v1105_v21  ;;  %v971_v18 = vld [vmem:[%s1554_s2 + $0x70] sm:$0xff] }
  0xc7   : > { %557 = vmatpush.msrb.mxu0 %v535_v25  ;;  %v642_v48 = vsel %vm641_vm5, %v1154_v45, %v1155_v44  ;;  %v976_v44 = vld [vmem:[%s1554_s2 + $0x88] sm:$0xff] }
  0xc8   : > { %954 = vmatmul.msk.f32.gmra.mxu2 %vm346_vm2, %v952_v23 }
  0xc9   : > { %558 = vmatpush.msrb.mxu0 %v534_v26 }
  0xca   : > { %958 = vmatmul.msk.f32.gmra.mxu3 %vm346_vm2, %v956_v28 }
  0xcb   : > { %v1113_v29 = vpop.permute.xlu0 %1112  ;;  %559 = vmatpush.msrb.mxu0 %v533_v27  ;;  %v1118_v32 = vpop.permute.xlu1 %1117 }
  0xcc   : > { %v1115_v33 = vunpack.i.h.bf16 %v1113_v29  ;;  %v1114_v34 = vunpack.i.l.bf16 %v1113_v29  ;;  %v1120_v36 = vunpack.i.h.bf16 %v1118_v32  ;;  %v1119_v37 = vunpack.i.l.bf16 %v1118_v32  ;;  %v1168_v2 = vpop.permute.xlu2 %1167  ;;  %v963_v29 = vld [vmem:[%s1554_s2 + $0x50] sm:$0xff] }
  0xcd   : > { %v1170_v4 = vunpack.i.h.bf16 %v1168_v2  ;;  %v1169_v5 = vunpack.i.l.bf16 %v1168_v2 }
  0xce   : > { %v532_v41 = vsel %vm531_vm4, %v1114_v34, %v1115_v33  ;;  %v645_v42 = vsel %vm641_vm5, %v1119_v37, %v1120_v36  ;;  %v972_v33 = vld [vmem:[%s1554_s2 + $0x78] sm:$0xff] }
  0xcf   : > { %560 = vmatpush.msrb.mxu0 %v532_v41  ;;  %667 = vmatpush.msrb.mxu2 %v645_v42  ;;  %v697_v16 = vsel %vm696_vm6, %v1169_v5, %v1170_v4 }
  0xd0   : > { %961 = vmatmul.msk.f32.vlgmr.msrb.gmra.mxu0 %vm346_vm2, %v959_v40  ;;  %v964_v40 = vld [vmem:[%s1554_s2 + $0x58] sm:$0xff] }
  0xd1   : > { %668 = vmatpush.msrb.mxu2 %v644_v43  ;;  %v975_v43 = vld [vmem:[%s1554_s2 + $0x80] sm:$0xff] }
  0xd3   : > { %v1128_v47 = vpop.permute.xlu0 %1127  ;;  %v1133_v49 = vpop.permute.xlu1 %1132  ;;  %669 = vmatpush.msrb.mxu2 %v643_v46 }
  0xd4   : > { %v1130_v50 = vunpack.i.h.bf16 %v1128_v47  ;;  %v1129_v51 = vunpack.i.l.bf16 %v1128_v47  ;;  %v1135_v53 = vunpack.i.h.bf16 %v1133_v49  ;;  %v1134_v54 = vunpack.i.l.bf16 %v1133_v49  ;;  %v1183_v19 = vpop.permute.xlu2 %1182 }
  0xd5   : > { %670 = vmatpush.msrb.mxu2 %v642_v48  ;;  %v1185_v21 = vunpack.i.h.bf16 %v1183_v19  ;;  %v1184_v22 = vunpack.i.l.bf16 %v1183_v19 }
  0xd6   : > { %v700_v56 = vsel %vm696_vm6, %v1129_v51, %v1130_v50  ;;  %v590_v57 = vsel %vm586_vm7, %v1134_v54, %v1135_v53  ;;  %969 = vmatmul.msk.f32.vlgmr.msrb.gmra.mxu2 %vm346_vm2, %v967_v52 }
  0xd7   : > { %722 = vmatpush.msrb.mxu3 %v700_v56  ;;  %612 = vmatpush.msra.mxu1 %v590_v57  ;;  %v754_v32 = vsel %vm751_vm8, %v1184_v22, %v1185_v21 }
  0xd8   : > { %962 = vmatmul.msk.f32.gmra.mxu0 %vm346_vm2, %v960_v55 }
  0xdb   : > { %v1143_v58 = vpop.permute.xlu0 %1142  ;;  %v1148_v59 = vpop.permute.xlu1 %1147 }
  0xdc   : > { %v1145_v60 = vunpack.i.h.bf16 %v1143_v58  ;;  %v1144_v61 = vunpack.i.l.bf16 %v1143_v58  ;;  %v1150_v63 = vunpack.i.h.bf16 %v1148_v59  ;;  %v1149_v0 = vunpack.i.l.bf16 %v1148_v59 }
  0xde   : > { %v699_v1 = vsel %vm696_vm6, %v1144_v61, %v1145_v60  ;;  %v589_v3 = vsel %vm586_vm7, %v1149_v0, %v1150_v63  ;;  %970 = vmatmul.msk.f32.gmra.mxu2 %vm346_vm2, %v968_v62 }
  0xdf   : > { %723 = vmatpush.msrb.mxu3 %v699_v1  ;;  %613 = vmatpush.msra.mxu1 %v589_v3 }
  0xe3   : > { %v1158_v8 = vpop.permute.xlu0 %1157  ;;  %v1163_v10 = vpop.permute.xlu1 %1162 }
  0xe4   : > { %v1160_v11 = vunpack.i.h.bf16 %v1158_v8  ;;  %v1159_v12 = vunpack.i.l.bf16 %v1158_v8  ;;  %v1165_v13 = vunpack.i.h.bf16 %v1163_v10  ;;  %v1164_v14 = vunpack.i.l.bf16 %v1163_v10 }
  0xe6   : > { %v698_v15 = vsel %vm696_vm6, %v1159_v12, %v1160_v11  ;;  %v588_v17 = vsel %vm586_vm7, %v1164_v14, %v1165_v13 }
  0xe7   : > { %724 = vmatpush.msrb.mxu3 %v698_v15  ;;  %614 = vmatpush.msra.mxu1 %v588_v17 }
  0xe9   : > { %725 = vmatpush.msrb.mxu3 %v697_v16 }
  0xea   : > { %973 = vmatmul.msk.f32.vlgmr.msrb.gmra.mxu3 %vm346_vm2, %v971_v18 }
  0xeb   : > { %v1173_v20 = vpop.permute.xlu0 %1172  ;;  %v1178_v23 = vpop.permute.xlu1 %1177 }
  0xec   : > { %v1175_v25 = vunpack.i.h.bf16 %v1173_v20  ;;  %v1174_v26 = vunpack.i.l.bf16 %v1173_v20  ;;  %v1180_v27 = vunpack.i.h.bf16 %v1178_v23  ;;  %v1179_v28 = vunpack.i.l.bf16 %v1178_v23 }
  0xee   : > { %v587_v30 = vsel %vm586_vm7, %v1174_v26, %v1175_v25  ;;  %v755_v31 = vsel %vm751_vm8, %v1179_v28, %v1180_v27 }
  0xef   : > { %615 = vmatpush.msra.mxu1 %v587_v30  ;;  %777 = vmatpush.msra.mxu0 %v755_v31 }
  0xf0   : > { %965 = vmatmul.msk.f32.vlgmr.msra.gmra.mxu1 %vm346_vm2, %v963_v29 }
  0xf1   : > { %778 = vmatpush.msra.mxu0 %v754_v32 }
  0xf2   : > { %974 = vmatmul.msk.f32.gmra.mxu3 %vm346_vm2, %v972_v33 }
  0xf3   : > { %v1188_v34 = vpop.permute.xlu0 %1187  ;;  %v1193_v37 = vpop.permute.xlu1 %1192 }
  0xf4   : > { %v1190_v35 = vunpack.i.h.bf16 %v1188_v34  ;;  %v1189_v36 = vunpack.i.l.bf16 %v1188_v34  ;;  %v1195_v38 = vunpack.i.h.bf16 %v1193_v37  ;;  %v1194_v39 = vunpack.i.l.bf16 %v1193_v37 }
  0xf6   : > { %v753_v41 = vsel %vm751_vm8, %v1189_v36, %v1190_v35  ;;  %v752_v42 = vsel %vm751_vm8, %v1194_v39, %v1195_v38 }
  0xf7   : > { %779 = vmatpush.msra.mxu0 %v753_v41 }
  0xf8   : > { %966 = vmatmul.msk.f32.gmra.mxu1 %vm346_vm2, %v964_v40 }
  0xf9   : > { %780 = vmatpush.msra.mxu0 %v752_v42 }
  0xfa   : > { %977 = vmatmul.msk.f32.vlgmr.msra.gmra.mxu0 %vm346_vm2, %v975_v43 }
 0x102   : > { %978 = vmatmul.msk.f32.gmra.mxu0 %vm346_vm2, %v976_v44 }
 0x11d   : > { %v795_v6 = vpop.permute.xlu2 %794 }
 0x131   : > { %v373_v45 = vpop.f32.mrf.mxu1  ;;  %v370_v47 = vpop.f32.mrf.mxu0 }
 0x134   : > { %v800_v16 = vpop.permute.xlu0 %799 }
 0x139   : > { %v399_v46 = vpop.f32.mrf.mxu1 }
 0x13a   : > { %v400_v49 = vadd.f32 %v399_v46, %v370_v47 }
 0x141   : > { %v402_v51 = vpop.f32.mrf.mxu1 }
 0x142   : > { %v403_v55 = vadd.f32 %v402_v51, %v373_v45 }
 0x143   : > { %v452_v24 = vpop.f32.mrf.mxu2 }
 0x144   : > { %v458_v50 = vadd.f32 %v452_v24, %v400_v49 }
 0x145   : > { %v507_v48 = vpop.f32.mrf.mxu3 }
 0x146   : > { %v513_v54 = vadd.f32 %v507_v48, %v458_v50 }
 0x14b   : > { %v455_v53 = vpop.f32.mrf.mxu2 }
 0x14c   : > { %v459_v58 = vadd.f32 %v455_v53, %v403_v55 }
 0x14d   : > { %v562_v52 = vpop.f32.mrf.mxu0  ;;  %v510_v56 = vpop.f32.mrf.mxu3 }
 0x14e   : > { %v568_v57 = vadd.f32 %v562_v52, %v513_v54  ;;  %v514_v63 = vadd.f32 %v510_v56, %v459_v58 }
 0x155   : > { %v565_v62 = vpop.f32.mrf.mxu0 }
 0x156   : > { %v569_v2 = vadd.f32 %v565_v62, %v514_v63 }
 0x159   : > { %v672_v60 = vpop.f32.mrf.mxu2 }
 0x161   : > { %v675_v7 = vpop.f32.mrf.mxu2 }
 0x16d   : > { %v617_v59 = vpop.f32.mrf.mxu1  ;;  %v727_v0 = vpop.f32.mrf.mxu3 }
 0x16e   : > { %v623_v61 = vadd.f32 %v617_v59, %v568_v57 }
 0x170   : > { %v678_v1 = vadd.f32 %v672_v60, %v623_v61 }
 0x172   : > { %v733_v4 = vadd.f32 %v727_v0, %v678_v1 }
 0x175   : > { %v620_v3 = vpop.f32.mrf.mxu1  ;;  %v730_v12 = vpop.f32.mrf.mxu3 }
 0x176   : > { %v624_v5 = vadd.f32 %v620_v3, %v569_v2 }
 0x177   : > { %v782_v8 = vpop.f32.mrf.mxu0 }
 0x178   : > { %v788_v9 = vadd.f32 %v782_v8, %v733_v4  ;;  %v679_v10 = vadd.f32 %v675_v7, %v624_v5 }
 0x17a   : > { %v802_v11 = vadd.f32 %v795_v6, %v788_v9  ;;  %v734_v14 = vadd.f32 %v730_v12, %v679_v10 }
 0x17c   : > { %v804_v13 = vmax.f32 %v802_v11, 0.0 }
 0x17e   : > { %806 = vst [vmem:[%s308_s15] sm:$0xff] %v804_v13 }
 0x17f   : > { %v785_v15 = vpop.f32.mrf.mxu0 }
 0x180   : > { %v789_v17 = vadd.f32 %v785_v15, %v734_v14 }
 0x182   : > { %v803_v18 = vadd.f32 %v800_v16, %v789_v17  ;;  %814 = sbr.rel (!%p1324_p8) target bundleno = 399 (0x18f), region = 116 }
 0x184   : > { %v805_v19 = vmax.f32 %v803_v18, 0.0 }
 0x185   : > { %v847_v20 = vld [vmem:[%s308_s15] sm:$0xff] (%p1324_p8) }
 0x186   : > { %807 = vst [vmem:[%s308_s15 + $0x8] sm:$0xff] %v805_v19 }
 0x187   : > { %848 = vst [vmem:[%s816_s11] sm:$0xff] %v847_v20 }
 0x18d   : > { %v849_v21 = vld [vmem:[%s308_s15 + $0x8] sm:$0xff] }
 0x18e   : > { %850 = vst [vmem:[%s816_s11 + $0x10] sm:$0xff] %v849_v21 }
 0x18f PF: > { %p11_p13 = scmp.ge.s32.totalorder %s1299_s21, 4   ;;  %s1559_s15 = smov %s1224_s16 }
 0x190   : > { %s1560_s16 = smov %s1318_s28  ;;  %s1561_s17 = smov %s1232_s18 }
 0x191   : > { %s1562_s18 = smov %s1309_s25  ;;  %s1563_s19 = smov %s1299_s21 }
 0x192   :  { %13 = sbr.rel (!%p11_p13) target bundleno = 3 (0x3), region = 201 }

// kernel: jpg_with_attention_forward.17
= control target key start
LH: loop header
LB: loop body
LE: loop exit
PB: predicated region body
PF: predicated region fallthrough
CT: control target
= control target key end

     0   :  { %s2701_s0 = inlined_call_operand.vmem [shape: f32[1,16,896], index: 0, kind: input, shape index: {}, may-alias: {0,1}]   ;;  %s2702_s1 = inlined_call_operand.vmem [shape: f32[1,16,896], index: 1, kind: input, shape index: {}, may-alias: {0,1}]   ;;  %s2703_s2 = inlined_call_operand.vmem [shape: f32[9,3,16], index: 2, kind: input, shape index: {}]   ;;  %s2704_s3 = inlined_call_operand.vmem [shape: f32[3,1], index: 3, kind: input, shape index: {}]   ;;  %s2705_s4 = inlined_call_operand.vmem [shape: f32[3,768], index: 4, kind: output, shape index: {}]  }
   0x1   :  { %2706 = sst [smem:[#allocation5_spill]] %s2701_s0 }
   0x2   :  { %s2169_s15 = smov 0   ;;  %s2171_s16 = smov 0  }
   0x3   :  { %s2173_s17 = smov 0   ;;  %s2175_s18 = smov 0  }
   0x4   :  { %s2177_s19 = smov 0  }
   0x5 LB: > { %s2196_s21 = sadd.s32 1, %s2067_s19   ;;  %s21_s23 = sadd.s32 1, %s2063_s18  ;;  %s2067_s19 = sphi %s2177_s19, %s2726_s19   ;;  %s2063_s18 = sphi %s2175_s18, %s2725_s18   ;;  %s2059_s17 = sphi %s2173_s17, %s2724_s17   ;;  %s2055_s16 = sphi %s2171_s16, %s2723_s16   ;;  %s2051_s15 = sphi %s2169_s15, %s2722_s15  }
   0x6   : > { %s18_s22 = ssub.s32 %s2067_s19, %s2196_s21  ;;  %p28_p1 = scmp.ne.s32.totalorder %s2063_s18, %s2059_s17 }
   0x7   : > { %p19_p0 = scmp.eq.s32.totalorder %s18_s22, 0  ;;  %p29_p2 = scmp.eq.s32.totalorder %s2067_s19, 0 }
   0x8   : > { %s45_s24 = smul.u32 3, %s2196_s21  ;;  %s46_s26 = sadd.s32 1, %s2196_s21 }
   0x9   : > { %s2206_s25 = scalar_select %p19_p0, %s2063_s18, %s21_s23  }
   0xa   : > { %p30_p3 = por %p29_p2, %p28_p1  ;;  %s47_s27 = smul.u32 3, %s46_s26 }
   0xb   : > { %2707 = sst [smem:[#allocation4_spill]] %s2206_s25  ;;  %p58_p4 = scmp.ne.s32.totalorder %s2055_s16, %s2051_s15 }
   0xc   : > { %s48_s28 = ssub.s32 %s45_s24, %s47_s27  ;;  %s51_s29 = sadd.s32 1, %s2055_s16 }
   0xd   : > { %p49_p5 = scmp.eq.s32.totalorder %s48_s28, 0  ;;  %p2212_p6 = por %p58_p4, %p29_p2 }
   0xe   : > { %p1540_p7 = scmp.ge.s32.totalorder %s2067_s19, 2 }
   0xf   : > { %s2217_s5 = scalar_select %p49_p5, %s2055_s16, %s51_s29  }
  0x10   : > { %158 = sbr.rel (%p1540_p7) target bundleno = 158 (0x9e), region = 24 }
  0x15   : > { %161 = sbr.rel (!%p30_p3) target bundleno = 151 (0x97), region = 28  ;;  %s163_s6 = sand.u32 (%p30_p3), 1, %s2063_s18  }
  0x16   : > { %s166_s7 = smul.u32 (%p30_p3), 3, %s2067_s19  ;;  %s2709_s0 = sld [smem:[#allocation5_spill]] (%p30_p3) }
  0x17   : > { %s1616_s8 = smul.u32 (%p30_p3), 48, %s163_s6 }
  0x18   : > { %s167_s9 = ssub.s32 (%p30_p3), 7, %s166_s7  ;;  %s1611_s10 = smul.u32 (%p30_p3), 24, %s2067_s19 }
  0x19   : > { %p168_p8 = scmp.lt.s32.totalorder (%p30_p3), %s167_s9, 3  ;;  %s2230_s23 = scalar_lea.vmem (%p30_p3), [#allocation2], %s1616_s8  }
  0x1b   : > { %s2728_s9 = smov (!%p168_p8, %s167_s9), 3 }
  0x1c   : > { %s2226_s13 = scalar_lea.vmem %s2709_s0, %s1611_s10   ;;  %s1541_s14 = sshll.u32 %s2728_s9, 4 }
  0x1d   : > { %s2228_s22 = sshll.u32 %s2728_s9, 3  ;;  %p1545_p9 = scmp.eq.s32.totalorder %s1541_s14, 0 }
  0x1e   : > { %p178_p10 = scmp.lt.u32.totalorder (!%p1545_p9), %s2228_s22, 8 }
  0x1f   : > { %177 = sbr.rel (%p1545_p9) target bundleno = 151 (0x97), region = 32 }
  0x24   : > { %181 = sbr.rel (%p178_p10) target bundleno = 141 (0x8d), region = 36  ;;  %s2234_s24 = sand.u32 (!%p178_p10), 7, %s2228_s22  }
  0x25   : > { %p200_p11 = scmp.eq.s32.totalorder (!%p178_p10), %s2234_s24, 0  ;;  %p1546_p12 = scmp.ne.s32.totalorder (!%p178_p10), %s2234_s24, 0 }
  0x29   : > { %203 = sbr.rel (%p1546_p12) target bundleno = 88 (0x58), region = 51  ;;  %s204_s26 = sshrl.u32 (!%p1546_p12), %s2228_s22, 3 }
  0x2a   : > { %s2241_s27 = sshrl.u32 (!%p1546_p12), %s204_s26, 4 }
  0x2b   : > { %p1547_p13 = scmp.le.s32.totalorder (!%p1546_p12), %s2241_s27, 0 }
  0x2e   : > { %1460 = sbr.rel (%p1547_p13) target bundleno = 71 (0x47), region = 203  ;;  %s2710_s28 = smov (!%p1547_p13), %s2230_s23 }
  0x2f   : > { %s2711_s29 = smov (!%p1547_p13), %s2226_s13  ;;  %s2250_s6 = smov (!%p1547_p13), 0  }
  0x30   : > { %s2252_s7 = smov (!%p1547_p13), 0  }
  0x33 LB: >> { %v229_v0 = vld [vmem:[%s2075_s29 + $0x38] sm:$0xff]  ;;  %v231_v1 = vld [vmem:[%s2075_s29 + $0x40] sm:$0xff]  ;;  %v233_v2 = vld [vmem:[%s2075_s29 + $0x48] sm:$0xff]  ;;  %s279_s8 = sadd.s32 1, %s2079_s6  ;;  %s209_s7 = sadd.s32 1, %s2083_s7   ;;  %s2083_s7 = sphi %s2252_s7, %s209_s7   ;;  %s2079_s6 = sphi %s2250_s6, %s2714_s6   ;;  %s2075_s29 = sphi %s2711_s29, %s2713_s29   ;;  %s2071_s28 = sphi %s2710_s28, %s2712_s28  }
  0x34   : >> { %248 = vst [vmem:[%s2071_s28 + $0x18] sm:$0xff] %v229_v0  ;;  %v215_v3 = vld [vmem:[%s2075_s29] sm:$0xff]  ;;  %v217_v4 = vld [vmem:[%s2075_s29 + $0x8] sm:$0xff]  ;;  %v219_v5 = vld [vmem:[%s2075_s29 + $0x10] sm:$0xff]  ;;  %p280_p0 = scmp.ge.s32.totalorder %s279_s8, %s2241_s27  ;;  %p208_p1 = scmp.ge.s32.totalorder %s209_s7, %s2241_s27 }
  0x35   : >> { %250 = vst [vmem:[%s2071_s28 + $0x20] sm:$0xff] %v231_v1  ;;  %v235_v6 = vld [vmem:[%s2075_s29 + $0x50] sm:$0xff]  ;;  %v237_v7 = vld [vmem:[%s2075_s29 + $0x58] sm:$0xff]  ;;  %v239_v8 = vld [vmem:[%s2075_s29 + $0x60] sm:$0xff] }
  0x36   : >> { %252 = vst [vmem:[%s2071_s28 + $0x28] sm:$0xff] %v233_v2  ;;  %s2730_s8 = smov (%p280_p0, %s279_s8), 0  ;;  %v241_v9 = vld [vmem:[%s2075_s29 + $0x68] sm:$0xff]  ;;  %v243_v10 = vld [vmem:[%s2075_s29 + $0x70] sm:$0xff]  ;;  %v245_v11 = vld [vmem:[%s2075_s29 + $0x78] sm:$0xff] }
  0x37   : >> { %216 = vst [vmem:[%s2071_s28] sm:$0xff] %v215_v3  ;;  %s1548_s9 = sshll.u32 %s2730_s8, 7  ;;  %v265_v12 = vld [vmem:[%s2075_s29 + $0x80] sm:$0xff]  ;;  %v267_v13 = vld [vmem:[%s2075_s29 + $0x88] sm:$0xff]  ;;  %v269_v14 = vld [vmem:[%s2075_s29 + $0x90] sm:$0xff]  ;;  %s2714_s6 = smov %s2730_s8 }
  0x38   : >> { %218 = vst [vmem:[%s2071_s28 + $0x8] sm:$0xff] %v217_v4  ;;  %s284_s10 = scalar_lea.vmem %s2226_s13, %s1548_s9   ;;  %s285_s11 = scalar_lea.vmem %s2230_s23, %s1548_s9 [#allocation2]   ;;  %v271_v15 = vld [vmem:[%s2075_s29 + $0x98] sm:$0xff]  ;;  %v273_v16 = vld [vmem:[%s2075_s29 + $0xa0] sm:$0xff]  ;;  %v275_v17 = vld [vmem:[%s2075_s29 + $0xa8] sm:$0xff] }
  0x39   : >> { %220 = vst [vmem:[%s2071_s28 + $0x10] sm:$0xff] %v219_v5  ;;  %v277_v18 = vld [vmem:[%s2075_s29 + $0xb0] sm:$0xff]  ;;  %s2713_s29 = smov %s284_s10 }
  0x3a   : >> { %254 = vst [vmem:[%s2071_s28 + $0x30] sm:$0xff] %v235_v6 }
  0x3b   : >> { %256 = vst [vmem:[%s2071_s28 + $0x38] sm:$0xff] %v237_v7 }
  0x3c   : >> { %258 = vst [vmem:[%s2071_s28 + $0x40] sm:$0xff] %v239_v8 }
  0x3d   : >> { %260 = vst [vmem:[%s2071_s28 + $0x48] sm:$0xff] %v241_v9 }
  0x3e   : >> { %262 = vst [vmem:[%s2071_s28 + $0x50] sm:$0xff] %v243_v10 }
  0x3f   : >> { %264 = vst [vmem:[%s2071_s28 + $0x58] sm:$0xff] %v245_v11 }
  0x40   : >> { %266 = vst [vmem:[%s2071_s28 + $0x60] sm:$0xff] %v265_v12 }
  0x41   : >> { %268 = vst [vmem:[%s2071_s28 + $0x68] sm:$0xff] %v267_v13 }
  0x42   : >> { %270 = vst [vmem:[%s2071_s28 + $0x70] sm:$0xff] %v269_v14  ;;  %211 = sbr.rel (!%p208_p1) target bundleno = 51 (0x33), region = 209 }
  0x43   : >> { %272 = vst [vmem:[%s2071_s28 + $0x78] sm:$0xff] %v271_v15 }
  0x44   : >> { %274 = vst [vmem:[%s2071_s28 + $0x80] sm:$0xff] %v273_v16 }
  0x45   : >> { %276 = vst [vmem:[%s2071_s28 + $0x88] sm:$0xff] %v275_v17 }
  0x46   : >> { %278 = vst [vmem:[%s2071_s28 + $0x90] sm:$0xff] %v277_v18  ;;  %s2712_s28 = smov %s285_s11 }
  0x47 PF: > { %s2321_s12 = sand.u32 15, %s204_s26   ;;  %s1612_s14 = sshll.u32 %s2241_s27, 7 }
  0x48   : > { %s2325_s9 = scalar_lea.vmem %s2226_s13, %s1612_s14   ;;  %s292_s20 = scalar_lea.vmem %s2230_s23, %s1612_s14 [#allocation2]  }
  0x49   : > { %p1553_p2 = scmp.le.s32.totalorder %s2321_s12, 0 }
  0x4a   : > { %s2085_s10 = smov (!%p1553_p2), %s292_s20   ;;  %s2089_s8 = smov (!%p1553_p2), %s2325_s9  }
  0x4b   : > { %1474 = sbr.rel (%p1553_p2) target bundleno = 88 (0x58), region = 214  ;;  %s2093_s7 = smov (!%p1553_p2), 0  }
  0x4c   : > { %s2097_s11 = smov (!%p1553_p2), 0  }
  0x50 LB: >> { %v302_v19 = vld [vmem:[%s2091_s8] sm:$0xff]  ;;  %v304_v20 = vld [vmem:[%s2091_s8 + $0x38] sm:$0xff]  ;;  %s306_s26 = sadd.s32 1, %s2095_s7  ;;  %s296_s11 = sadd.s32 1, %s2099_s11   ;;  %s2099_s11 = sphi %s2097_s11, %s296_s11   ;;  %s2095_s7 = sphi %s2093_s7, %s2094_s7   ;;  %s2091_s8 = sphi %s2089_s8, %s311_s8   ;;  %s2087_s10 = sphi %s2085_s10, %s312_s10  }
  0x51   : >> { %303 = vst [vmem:[%s2087_s10] sm:$0xff] %v302_v19  ;;  %p307_p3 = scmp.ge.s32.totalorder %s306_s26, %s2321_s12  ;;  %p295_p4 = scmp.ge.s32.totalorder %s296_s11, %s2321_s12 }
  0x52   : >> { %305 = vst [vmem:[%s2087_s10 + $0x18] sm:$0xff] %v304_v20 }
  0x53   : >> { %s2732_s26 = smov (%p307_p3, %s306_s26), 0  ;;  %298 = sbr.rel (!%p295_p4) target bundleno = 80 (0x50), region = 220 }
  0x54   : >> { %s1554_s27 = sshll.u32 %s2732_s26, 3  ;;  %s2094_s7 = smov %s2732_s26  }
  0x55   : >> { %s311_s8 = scalar_lea.vmem %s2325_s9, %s1554_s27   ;;  %s312_s10 = scalar_lea.vmem %s292_s20, %s1554_s27 [#allocation2]  }
  0x58 PF: > { %315 = sbr.rel (%p200_p11) target bundleno = 141 (0x8d), region = 69  ;;  %s317_s28 = ssub.s32 (!%p200_p11), %s2228_s22, %s2234_s24 }
  0x59   : > { %s321_s29 = sshrl.u32 (!%p200_p11), %s2228_s22, 3  ;;  %s2339_s6 = scalar_lea.vmem (!%p200_p11), %s2226_s13, %s317_s28 }
  0x5a   : > { %s2342_s14 = scalar_lea.vmem (!%p200_p11), %s2230_s23, %s317_s28 [#allocation2]  ;;  %s2346_s10 = sshrl.u32 (!%p200_p11), %s321_s29, 4 }
  0x5b   : > { %p1556_p5 = scmp.le.s32.totalorder (!%p200_p11), %s2346_s10, 0 }
  0x5d   : > { %1488 = sbr.rel (%p1556_p5) target bundleno = 118 (0x76), region = 225  ;;  %s2715_s20 = smov (!%p1556_p5), %s2230_s23 }
  0x5e   : > { %s2716_s12 = smov (!%p1556_p5), %s2226_s13  ;;  %s2355_s9 = smov (!%p1556_p5), 0  }
  0x5f   : > { %s2357_s8 = smov (!%p1556_p5), 0  }
  0x62 LB: >> { %v346_v21 = vld [vmem:[%s2107_s12 + $0x38] sm:$0xff]  ;;  %v348_v22 = vld [vmem:[%s2107_s12 + $0x40] sm:$0xff]  ;;  %v350_v23 = vld [vmem:[%s2107_s12 + $0x48] sm:$0xff]  ;;  %s396_s7 = sadd.s32 1, %s2111_s9  ;;  %s326_s8 = sadd.s32 1, %s2115_s8   ;;  %s2115_s8 = sphi %s2357_s8, %s326_s8   ;;  %s2111_s9 = sphi %s2355_s9, %s2719_s9   ;;  %s2107_s12 = sphi %s2716_s12, %s2718_s12   ;;  %s2103_s20 = sphi %s2715_s20, %s2717_s20  }
  0x63   : >> { %365 = vst [vmem:[%s2103_s20 + $0x18] sm:$0xff] %v346_v21  ;;  %v332_v24 = vld [vmem:[%s2107_s12] sm:$0xff]  ;;  %v334_v25 = vld [vmem:[%s2107_s12 + $0x8] sm:$0xff]  ;;  %v336_v26 = vld [vmem:[%s2107_s12 + $0x10] sm:$0xff]  ;;  %p397_p7 = scmp.ge.s32.totalorder %s396_s7, %s2346_s10  ;;  %p325_p8 = scmp.ge.s32.totalorder %s326_s8, %s2346_s10 }
  0x64   : >> { %367 = vst [vmem:[%s2103_s20 + $0x20] sm:$0xff] %v348_v22  ;;  %v352_v27 = vld [vmem:[%s2107_s12 + $0x50] sm:$0xff]  ;;  %v354_v28 = vld [vmem:[%s2107_s12 + $0x58] sm:$0xff]  ;;  %v356_v29 = vld [vmem:[%s2107_s12 + $0x60] sm:$0xff] }
  0x65   : >> { %369 = vst [vmem:[%s2103_s20 + $0x28] sm:$0xff] %v350_v23  ;;  %s2734_s7 = smov (%p397_p7, %s396_s7), 0  ;;  %v358_v30 = vld [vmem:[%s2107_s12 + $0x68] sm:$0xff]  ;;  %v360_v31 = vld [vmem:[%s2107_s12 + $0x70] sm:$0xff]  ;;  %v362_v32 = vld [vmem:[%s2107_s12 + $0x78] sm:$0xff] }
  0x66   : >> { %333 = vst [vmem:[%s2103_s20] sm:$0xff] %v332_v24  ;;  %s1557_s11 = sshll.u32 %s2734_s7, 7  ;;  %v382_v33 = vld [vmem:[%s2107_s12 + $0x80] sm:$0xff]  ;;  %v384_v34 = vld [vmem:[%s2107_s12 + $0x88] sm:$0xff]  ;;  %v386_v35 = vld [vmem:[%s2107_s12 + $0x90] sm:$0xff]  ;;  %s2719_s9 = smov %s2734_s7 }
  0x67   : >> { %335 = vst [vmem:[%s2103_s20 + $0x8] sm:$0xff] %v334_v25  ;;  %s401_s26 = scalar_lea.vmem %s2226_s13, %s1557_s11   ;;  %s402_s27 = scalar_lea.vmem %s2230_s23, %s1557_s11 [#allocation2]   ;;  %v388_v36 = vld [vmem:[%s2107_s12 + $0x98] sm:$0xff]  ;;  %v390_v37 = vld [vmem:[%s2107_s12 + $0xa0] sm:$0xff]  ;;  %v392_v38 = vld [vmem:[%s2107_s12 + $0xa8] sm:$0xff] }
  0x68   : >> { %337 = vst [vmem:[%s2103_s20 + $0x10] sm:$0xff] %v336_v26  ;;  %v394_v39 = vld [vmem:[%s2107_s12 + $0xb0] sm:$0xff]  ;;  %s2718_s12 = smov %s401_s26 }
  0x69   : >> { %371 = vst [vmem:[%s2103_s20 + $0x30] sm:$0xff] %v352_v27 }
  0x6a   : >> { %373 = vst [vmem:[%s2103_s20 + $0x38] sm:$0xff] %v354_v28 }
  0x6b   : >> { %375 = vst [vmem:[%s2103_s20 + $0x40] sm:$0xff] %v356_v29 }
  0x6c   : >> { %377 = vst [vmem:[%s2103_s20 + $0x48] sm:$0xff] %v358_v30 }
  0x6d   : >> { %379 = vst [vmem:[%s2103_s20 + $0x50] sm:$0xff] %v360_v31 }
  0x6e   : >> { %381 = vst [vmem:[%s2103_s20 + $0x58] sm:$0xff] %v362_v32 }
  0x6f   : >> { %383 = vst [vmem:[%s2103_s20 + $0x60] sm:$0xff] %v382_v33 }
  0x70   : >> { %385 = vst [vmem:[%s2103_s20 + $0x68] sm:$0xff] %v384_v34 }
  0x71   : >> { %387 = vst [vmem:[%s2103_s20 + $0x70] sm:$0xff] %v386_v35  ;;  %328 = sbr.rel (!%p325_p8) target bundleno = 98 (0x62), region = 231 }
  0x72   : >> { %389 = vst [vmem:[%s2103_s20 + $0x78] sm:$0xff] %v388_v36 }
  0x73   : >> { %391 = vst [vmem:[%s2103_s20 + $0x80] sm:$0xff] %v390_v37 }
  0x74   : >> { %393 = vst [vmem:[%s2103_s20 + $0x88] sm:$0xff] %v392_v38 }
  0x75   : >> { %395 = vst [vmem:[%s2103_s20 + $0x90] sm:$0xff] %v394_v39  ;;  %s2717_s20 = smov %s402_s27 }
  0x76 PF: > { %s2426_s28 = sand.u32 15, %s321_s29   ;;  %s1614_s11 = sshll.u32 %s2346_s10, 7 }
  0x77   : > { %s2430_s0 = scalar_lea.vmem %s2226_s13, %s1614_s11   ;;  %s409_s25 = scalar_lea.vmem %s2230_s23, %s1614_s11 [#allocation2]  }
  0x78   : > { %p1562_p9 = scmp.le.s32.totalorder %s2426_s28, 0 }
  0x79   : > { %s2117_s26 = smov (!%p1562_p9), %s409_s25   ;;  %s2121_s7 = smov (!%p1562_p9), %s2430_s0  }
  0x7a   : > { %1502 = sbr.rel (%p1562_p9) target bundleno = 135 (0x87), region = 236  ;;  %s2125_s8 = smov (!%p1562_p9), 0  }
  0x7b   : > { %s2129_s27 = smov (!%p1562_p9), 0  }
  0x7f LB: >> { %v419_v40 = vld [vmem:[%s2123_s7] sm:$0xff]  ;;  %v421_v41 = vld [vmem:[%s2123_s7 + $0x38] sm:$0xff]  ;;  %s423_s29 = sadd.s32 1, %s2127_s8  ;;  %s413_s27 = sadd.s32 1, %s2131_s27   ;;  %s2131_s27 = sphi %s2129_s27, %s413_s27   ;;  %s2127_s8 = sphi %s2125_s8, %s2126_s8   ;;  %s2123_s7 = sphi %s2121_s7, %s428_s7   ;;  %s2119_s26 = sphi %s2117_s26, %s429_s26  }
  0x80   : >> { %420 = vst [vmem:[%s2119_s26] sm:$0xff] %v419_v40  ;;  %p424_p10 = scmp.ge.s32.totalorder %s423_s29, %s2426_s28  ;;  %p412_p11 = scmp.ge.s32.totalorder %s413_s27, %s2426_s28 }
  0x81   : >> { %422 = vst [vmem:[%s2119_s26 + $0x18] sm:$0xff] %v421_v41 }
  0x82   : >> { %s2736_s29 = smov (%p424_p10, %s423_s29), 0  ;;  %415 = sbr.rel (!%p412_p11) target bundleno = 127 (0x7f), region = 242 }
  0x83   : >> { %s1563_s10 = sshll.u32 %s2736_s29, 3  ;;  %s2126_s8 = smov %s2736_s29  }
  0x84   : >> { %s428_s7 = scalar_lea.vmem %s2430_s0, %s1563_s10   ;;  %s429_s26 = scalar_lea.vmem %s409_s25, %s1563_s10 [#allocation2]  }
  0x87 PF: > { %s2133_s20 = smov 1  }
  0x88   : > { %s430_s12 = sshll.u32 %s2133_s20, %s2234_s24 }
  0x89   : > { %s1565_s9 = sadd.s32 4294967295, %s430_s12 }
  0x8a   : > { %v440_v42 = vld [vmem:[%s2339_s6] sm:%s1565_s9]  ;;  %v442_v43 = vld [vmem:[%s2339_s6 + $0x38] sm:%s1565_s9] }
  0x8b   : > { %441 = vst [vmem:[%s2342_s14] sm:%s1565_s9] %v440_v42 }
  0x8c   : > { %443 = vst [vmem:[%s2342_s14 + $0x18] sm:%s1565_s9] %v442_v43 }
  0x8d PF: > { %p1566_p12 = scmp.ge.u32.totalorder %s2228_s22, 8 }
  0x8e   : > { %s2134_s11 = smov (!%p1566_p12), 1  }
  0x8f   : > { %184 = sbr.rel (%p1566_p12) target bundleno = 151 (0x97), region = 40  ;;  %s185_s0 = sshll.u32 (!%p1566_p12), %s2134_s11, %s2228_s22 }
  0x90   : > { %s1567_s25 = sadd.s32 (!%p1566_p12), 4294967295, %s185_s0 }
  0x94   : > { %v195_v44 = vld [vmem:[%s2226_s13] sm:%s1567_s25]  ;;  %v197_v45 = vld [vmem:[%s2226_s13 + $0x38] sm:%s1567_s25] }
  0x95   : > { %196 = vst [vmem:[%s2230_s23] sm:%s1567_s25] %v195_v44 }
  0x96   : > { %198 = vst [vmem:[%s2230_s23 + $0x18] sm:%s1567_s25] %v197_v45 }
  0x97 PF: > { %447 = sbr.rel (!%p2212_p6) target bundleno = 158 (0x9e), region = 94  ;;  %s449_s24 = sand.u32 (%p2212_p6), 1, %s2055_s16  }
  0x98   : > { %s1424_s6 = smul.u32 (%p2212_p6), 24, %s2067_s19  ;;  %s1568_s14 = sshll.u32 (%p2212_p6), %s449_s24, 4 }
  0x99   : > { %s451_s13 = scalar_lea.vmem (%p2212_p6), [#allocation3], %s1568_s14 }
  0x9a   : > { %s1425_s22 = scalar_lea.vmem (%p2212_p6), %s2702_s1, %s1424_s6 }
  0x9b   : > { %v1569_v46 = vld [vmem:[%s1425_s22 + $0x18] sm:$0xff] (%p2212_p6)  ;;  %v1570_v47 = vld [vmem:[%s1425_s22 + $0x50] sm:$0xff] (%p2212_p6) }
  0x9c   : > { %487 = vst [vmem:[%s451_s13] sm:$0xff] %v1569_v46 }
  0x9d   : > { %489 = vst [vmem:[%s451_s13 + $0x8] sm:$0xff] %v1570_v47 }
  0x9e PF: > { %p1571_p13 = scmp.ge.s32.totalorder %s2067_s19, 1  ;;  %p494_p6 = scmp.lt.s32.totalorder %s2067_s19, 3 }
  0xa0   : > { %p495_p0 = pnand %p1571_p13, %p494_p6 }
  0xa1   : > { %s501_s30 = sand.u32 (!%p495_p0), 1, %s2059_s17   ;;  %s508_s23 = sand.u32 (!%p495_p0), 1, %s2051_s15  }
  0xa2   : > { %498 = sbr.rel (%p495_p0) target bundleno = 513 (0x201), region = 132  ;;  %s1572_s8 = sshll.u32 (!%p495_p0), %s508_s23, 4 }
  0xa3   : > { %s1617_s7 = smul.u32 (!%p495_p0), 48, %s501_s30  ;;  %s510_s27 = scalar_lea.vmem (!%p495_p0), [#allocation3], %s1572_s8 }
  0xa4   : > { %s2135_s10 = smov (!%p495_p0), 127   ;;  %s2136_s15 = smov (!%p495_p0), 126  }
  0xa5   : > { %s503_s29 = scalar_lea.vmem (!%p495_p0), [#allocation2], %s1617_s7  ;;  %s2137_s17 = smov (!%p495_p0), 110  }
  0xa6   : > { %s2138_s20 = smov (!%p495_p0), 109   ;;  %s2139_s12 = smov (!%p495_p0), 108  }
  0xa7   : > { %v557_v48 = vld [vmem:[%s510_s27 + $0x8] sm:$0xff]  ;;  %v553_v50 = vld [vmem:[%s503_s29 + $0x18] sm:$0xff]  ;;  %v2462_v51 = vld [vmem:[%s503_s29 + $0x20] sm:$0xff]  ;;  %s2140_s9 = smov 92   ;;  %s2141_s11 = smov 91   ;;  %vm586_vm0 = vcmask 130048   ;;  %v575_v6 = vlaneseq }
  0xa8   : > { %v2460_v49 = vld [vmem:[%s503_s29 + $0x28] sm:$0xff]  ;;  %v1807_v53 = vpack.i.bf16 %v553_v50, %v2462_v51  ;;  %v1817_v54 = vpack.i.bf16 %v2462_v51, %v553_v50  ;;  %667 = vmatpush.msra.mxu3 %v553_v50  ;;  %v550_v55 = vld [vmem:[%s503_s29] sm:$0xff]  ;;  %v2467_v57 = vld [vmem:[%s503_s29 + $0x10] sm:$0xff]  ;;  %s2142_s0 = smov 90   ;;  %vm1365_vm9 = vcmask 1043456  }
  0xa9   : > { %v1797_v52 = vpack.i.bf16 %v557_v48, %v2460_v49  ;;  %v556_v56 = vld [vmem:[%s510_s27] sm:$0xff]  ;;  %v2469_v58 = vld [vmem:[%s503_s29 + $0x8] sm:$0xff]  ;;  %v1827_v62 = vpack.i.bf16 %v2467_v57, %v2460_v49  ;;  %v1832_v63 = vpack.i.bf16 %v2460_v49, %v2462_v51  ;;  %v1842_v1 = vpack.i.bf16 %v550_v55, %v553_v50 }
  0xaa   : > { %1808 = vrot.lane.b32.xlu1 %v1807_v53, %s2135_s10  ;;  %1818 = vrot.lane.b32.xlu2 %v1817_v54, %s2136_s15  ;;  %v1802_v59 = vpack.i.bf16 %v556_v56, %v2467_v57  ;;  %v1812_v60 = vpack.i.bf16 %v550_v55, %v2469_v58  ;;  %v1822_v61 = vpack.i.bf16 %v2469_v58, %v550_v55  ;;  %v2487_v5 = vld [vmem:[%s2703_s2] sm:$0x7]  ;;  %v2493_v8 = vand.u32 127, %v575_v6  ;;  %v1574_v32 = vld [vmem:[%s2703_s2 + $0x4] sm:$0x7] }
  0xab   : > { %1798 = vrot.lane.b32.xlu0 %v1797_v52, %s2135_s10  ;;  %668 = vmatpush.msra.mxu3 %v550_v55  ;;  %v1837_v0 = vpack.i.bf16 %v2467_v57, %v2469_v58  ;;  %v1847_v2 = vpack.i.bf16 %v556_v56, %v557_v48  ;;  %v1581_v50 = vld [vmem:[%s2703_s2 + $0x8] sm:$0x7] }
  0xac   : > { %1578 = vmatmul.msk.f32.vlgmr.msra.gmra.mxu3 %vm586_vm0, %v2487_v5  ;;  %vm577_vm1 = vcmp.lt.s32.totalorder %v2493_v8, 127  ;;  %vm729_vm2 = vcmp.lt.s32.totalorder %v2493_v8, 126  ;;  %vm820_vm3 = vcmp.lt.s32.totalorder %v2493_v8, 110  ;;  %vm911_vm4 = vcmp.lt.s32.totalorder %v2493_v8, 109 }
  0xad   : > { %vm1002_vm5 = vcmp.lt.s32.totalorder %v2493_v8, 108  ;;  %vm1093_vm6 = vcmp.lt.s32.totalorder %v2493_v8, 92  ;;  %vm1184_vm7 = vcmp.lt.s32.totalorder %v2493_v8, 91  ;;  %vm1275_vm8 = vcmp.lt.s32.totalorder %v2493_v8, 90 }
  0xb2   : > { %1813 = vrot.lane.b32.xlu1 %v1812_v60, %s2135_s10  ;;  %1823 = vrot.lane.b32.xlu2 %v1822_v61, %s2136_s15 }
  0xb3   : > { %1803 = vrot.lane.b32.xlu0 %v1802_v59, %s2135_s10 }
  0xba   : > { %1833 = vrot.lane.b32.xlu1 %v1832_v63, %s2137_s17  ;;  %1838 = vrot.lane.b32.xlu2 %v1837_v0, %s2137_s17 }
  0xbb   : > { %1828 = vrot.lane.b32.xlu0 %v1827_v62, %s2136_s15 }
  0xc2   : > { %1848 = vrot.lane.b32.xlu1 %v1847_v2, %s2136_s15  ;;  %1853 = vrot.lane.b32.xlu2 %v1847_v2, %s2137_s17 }
  0xc3   : > { %1843 = vrot.lane.b32.xlu0 %v1842_v1, %s2137_s17 }
  0xca   : > { %1863 = vrot.lane.b32.xlu1 %v1802_v59, %s2138_s20  ;;  %1868 = vrot.lane.b32.xlu2 %v1807_v53, %s2138_s20 }
  0xcb   : > { %1858 = vrot.lane.b32.xlu0 %v1797_v52, %s2138_s20 }
  0xd2   : > { %1878 = vrot.lane.b32.xlu1 %v1817_v54, %s2139_s12  ;;  %1883 = vrot.lane.b32.xlu2 %v1822_v61, %s2139_s12 }
  0xd3   : > { %1873 = vrot.lane.b32.xlu0 %v1812_v60, %s2138_s20 }
  0xda   : > { %1893 = vrot.lane.b32.xlu1 %v1822_v61, %s2140_s9  ;;  %1898 = vrot.lane.b32.xlu2 %v1797_v52, %s2139_s12 }
  0xdb   : > { %1888 = vrot.lane.b32.xlu0 %v1817_v54, %s2140_s9 }
  0xe2   : > { %1908 = vrot.lane.b32.xlu1 %v1827_v62, %s2140_s9  ;;  %1913 = vrot.lane.b32.xlu2 %v1832_v63, %s2141_s11 }
  0xe3   : > { %1903 = vrot.lane.b32.xlu0 %v1802_v59, %s2139_s12 }
  0xea   : > { %1923 = vrot.lane.b32.xlu1 %v1842_v1, %s2141_s11  ;;  %1928 = vrot.lane.b32.xlu2 %v1847_v2, %s2140_s9 }
  0xeb   : > { %1918 = vrot.lane.b32.xlu0 %v1837_v0, %s2141_s11  ;;  %v1585_v0 = vld [vmem:[%s2703_s2 + $0xc] sm:$0x7] }
  0xf2   : > { %1938 = vrot.lane.b32.xlu1 %v1797_v52, %s2142_s0  ;;  %1943 = vrot.lane.b32.xlu2 %v1802_v59, %s2142_s0 }
  0xf3   : > { %1933 = vrot.lane.b32.xlu0 %v1847_v2, %s2141_s11  ;;  %s2720_s11 = sadd.s32 4294967295, %s2067_s19  }
  0xfa   : > { %1953 = vrot.lane.b32.xlu1 %v1812_v60, %s2142_s0 }
  0xfb   : > { %1948 = vrot.lane.b32.xlu0 %v1807_v53, %s2142_s0  ;;  %s544_s0 = smul.u32 3, %s2720_s11 }
  0xfd   : > { %p545_p1 = scmp.lt.s32.totalorder %s544_s0, 5 }
  0xff   : > { %s2738_s0 = smov (!%p545_p1, %s544_s0), 5 }
 0x100   : > { %s1573_s19 = sshll.u32 %s2738_s0, 2 }
 0x101   : > { %s548_s6 = scalar_lea.vmem %s2705_s4, %s1573_s19 }
 0x104   : > { %v2480_v3 = vpop.permute.xlu2 %1818 }
 0x105   : > { %v1821_v19 = vunpack.i.h.bf16 %v2480_v3  ;;  %v1820_v20 = vunpack.i.l.bf16 %v2480_v3 }
 0x107   : > { %v735_v33 = vsel %vm729_vm2, %v1820_v20, %v1821_v19 }
 0x10c   : > { %v2482_v4 = vpop.permute.xlu2 %1823 }
 0x10d   : > { %v1826_v21 = vunpack.i.h.bf16 %v2482_v4  ;;  %v1825_v22 = vunpack.i.l.bf16 %v2482_v4 }
 0x10f   : > { %v734_v34 = vsel %vm729_vm2, %v1825_v22, %v1826_v21 }
 0x114   : > { %v2491_v7 = vpop.permute.xlu2 %1838 }
 0x115   : > { %v1841_v36 = vunpack.i.h.bf16 %v2491_v7  ;;  %v1840_v37 = vunpack.i.l.bf16 %v2491_v7 }
 0x117   : > { %v823_v48 = vsel %vm820_vm3, %v1840_v37, %v1841_v36 }
 0x11c   : > { %v1809_v10 = vpop.permute.xlu1 %1808  ;;  %v1854_v18 = vpop.permute.xlu2 %1853 }
 0x11d   : > { %v1799_v9 = vpop.permute.xlu0 %1798  ;;  %v1811_v13 = vunpack.i.h.bf16 %v1809_v10  ;;  %v1810_v14 = vunpack.i.l.bf16 %v1809_v10  ;;  %v1855_v40 = vunpack.i.l.bf16 %v1854_v18  ;;  %v1856_v45 = vunpack.i.h.bf16 %v1854_v18 }
 0x11e   : > { %v1801_v11 = vunpack.i.h.bf16 %v1799_v9  ;;  %v1800_v12 = vunpack.i.l.bf16 %v1799_v9 }
 0x11f   : > { %v583_v17 = vsel %vm577_vm1, %v1811_v13, %v1810_v14  ;;  %v821_v52 = vsel %vm820_vm3, %v1841_v36, %v1856_v45 }
 0x120   : > { %v581_v15 = vsel %vm577_vm1, %v1810_v14, %v1800_v12  ;;  %v579_v16 = vsel %vm577_vm1, %v1800_v12, %v1801_v11  ;;  %604 = vmatpush.msra.mxu0 %v583_v17 }
 0x121   : > { %624 = vmatpush.msra.mxu1 %v581_v15  ;;  %644 = vmatpush.msra.mxu2 %v579_v16  ;;  %v1589_v15 = vld [vmem:[%s2703_s2 + $0x10] sm:$0x7] }
 0x124   : > { %v1814_v24 = vpop.permute.xlu1 %1813  ;;  %v2520_v35 = vpop.permute.xlu2 %1868 }
 0x125   : > { %v1804_v23 = vpop.permute.xlu0 %1803  ;;  %v1816_v27 = vunpack.i.h.bf16 %v1814_v24  ;;  %v1815_v28 = vunpack.i.l.bf16 %v1814_v24  ;;  %v1871_v56 = vunpack.i.h.bf16 %v2520_v35  ;;  %v1870_v61 = vunpack.i.l.bf16 %v2520_v35 }
 0x126   : > { %v1806_v25 = vunpack.i.h.bf16 %v1804_v23  ;;  %v1805_v26 = vunpack.i.l.bf16 %v1804_v23 }
 0x127   : > { %v582_v31 = vsel %vm577_vm1, %v1816_v27, %v1815_v28  ;;  %v917_v1 = vsel %vm911_vm4, %v1871_v56, %v1870_v61 }
 0x128   : > { %v580_v29 = vsel %vm577_vm1, %v1815_v28, %v1805_v26  ;;  %v578_v30 = vsel %vm577_vm1, %v1805_v26, %v1806_v25  ;;  %605 = vmatpush.msra.mxu0 %v582_v31 }
 0x129   : > { %625 = vmatpush.msra.mxu1 %v580_v29  ;;  %645 = vmatpush.msra.mxu2 %v578_v30 }
 0x12a   : > { %1577 = vmatmul.msk.f32.vlgmr.msra.gmra.mxu2 %vm586_vm0, %v1574_v32  ;;  %687 = vmatpush.msrb.mxu0 %v2462_v51 }
 0x12b   : > { %755 = vmatpush.msrb.mxu2 %v735_v33  ;;  %707 = vmatpush.msrb.mxu1 %v2460_v49  ;;  %v1593_v33 = vld [vmem:[%s2703_s2 + $0x14] sm:$0x7] }
 0x12c   : > { %v1834_v39 = vpop.permute.xlu1 %1833  ;;  %1576 = vmatmul.msk.f32.vlgmr.msra.gmra.mxu1 %vm586_vm0, %v1574_v32  ;;  %688 = vmatpush.msrb.mxu0 %v2469_v58  ;;  %v2548_v53 = vpop.permute.xlu2 %1883 }
 0x12d   : > { %756 = vmatpush.msrb.mxu2 %v734_v34  ;;  %v1829_v38 = vpop.permute.xlu0 %1828  ;;  %v1836_v43 = vunpack.i.h.bf16 %v1834_v39  ;;  %v1835_v44 = vunpack.i.l.bf16 %v1834_v39  ;;  %708 = vmatpush.msrb.mxu1 %v2467_v57  ;;  %v1886_v17 = vunpack.i.h.bf16 %v2548_v53  ;;  %v1885_v18 = vunpack.i.l.bf16 %v2548_v53 }
 0x12e   : > { %v1831_v41 = vunpack.i.h.bf16 %v1829_v38  ;;  %v1830_v42 = vunpack.i.l.bf16 %v1829_v38  ;;  %1575 = vmatmul.msk.f32.vlgmr.msra.gmra.mxu0 %vm586_vm0, %v1574_v32 }
 0x12f   : > { %v824_v47 = vsel %vm820_vm3, %v1835_v44, %v1836_v43  ;;  %v822_v49 = vsel %vm820_vm3, %v1836_v43, %v1855_v40  ;;  %v1007_v31 = vsel %vm1002_vm5, %v1885_v18, %v1886_v17 }
 0x130   : > { %v733_v46 = vsel %vm729_vm2, %v1821_v19, %v1830_v42  ;;  %866 = vmatpush.msra.mxu2 %v824_v47  ;;  %v732_v51 = vsel %vm729_vm2, %v1826_v21, %v1831_v41  ;;  %v1350_v47 = vld [vmem:[%s2704_s3] sm:$0x7] }
 0x131   : > { %775 = vmatpush.msrb.mxu3 %v733_v46 }
 0x132   : > { %867 = vmatpush.msra.mxu2 %v823_v48 }
 0x133   : > { %776 = vmatpush.msrb.mxu3 %v732_v51  ;;  %1582 = vmatmul.msk.f32.vlgmr.msrb.gmra.mxu2 %vm586_vm0, %v1581_v50  ;;  %v2143_v51 = vmov 0  }
 0x134   : > { %v1849_v55 = vpop.permute.xlu1 %1848  ;;  %1583 = vmatmul.msk.f32.vlgmr.msrb.gmra.mxu3 %vm586_vm0, %v1581_v50  ;;  %1580 = vmatmul.msk.f32.vlgmr.msrb.gmra.mxu1 %vm586_vm0, %v2487_v5  ;;  %v1899_v11 = vpop.permute.xlu2 %1898 }
 0x135   : > { %886 = vmatpush.msra.mxu3 %v822_v49  ;;  %v1844_v54 = vpop.permute.xlu0 %1843  ;;  %v1851_v59 = vunpack.i.h.bf16 %v1849_v55  ;;  %v1850_v60 = vunpack.i.l.bf16 %v1849_v55  ;;  %v1900_v16 = vunpack.i.l.bf16 %v1899_v11  ;;  %v1901_v21 = vunpack.i.h.bf16 %v1899_v11  ;;  %1957 = vset.pattern.permute.xlu2 %v2143_v51 }
 0x136   : > { %v1846_v57 = vunpack.i.h.bf16 %v1844_v54  ;;  %v1845_v58 = vunpack.i.l.bf16 %v1844_v54  ;;  %1579 = vmatmul.msk.f32.vlgmr.msrb.gmra.mxu0 %vm586_vm0, %v2487_v5  ;;  %1353 = vperm.xlu2 %1957, %v1350_v47  }
 0x137   : > { %887 = vmatpush.msra.mxu3 %v821_v52  ;;  %v731_v62 = vsel %vm729_vm2, %v1830_v42, %v1850_v60  ;;  %v730_v2 = vsel %vm729_vm2, %v1831_v41, %v1851_v59  ;;  %v1004_v32 = vsel %vm1002_vm5, %v1900_v16, %v1901_v21  ;;  %1958 = vset.pattern.permute.xlu0 %v2143_v51 }
 0x138   : > { %v826_v63 = vsel %vm820_vm3, %v1845_v58, %v1835_v44  ;;  %795 = vmatpush.msra.mxu0 %v731_v62  ;;  %v825_v3 = vsel %vm820_vm3, %v1846_v57, %v1840_v37  ;;  %v1597_v44 = vld [vmem:[%s2703_s2 + $0x18] sm:$0x7] }
 0x139   : > { %846 = vmatpush.msra.mxu1 %v826_v63 }
 0x13a   : > { %796 = vmatpush.msra.mxu0 %v730_v2 }
 0x13b   : > { %847 = vmatpush.msra.mxu1 %v825_v3  ;;  %1587 = vmatmul.msk.f32.vlgmr.msra.gmra.mxu2 %vm586_vm0, %v1585_v0 }
 0x13c   : > { %937 = vmatpush.msrb.mxu0 %v917_v1  ;;  %v1864_v5 = vpop.permute.xlu1 %1863  ;;  %1588 = vmatmul.msk.f32.vlgmr.msra.gmra.mxu3 %vm586_vm0, %v1585_v0  ;;  %v2596_v30 = vpop.permute.xlu2 %1913 }
 0x13d   : > { %v1859_v4 = vpop.permute.xlu0 %1858  ;;  %1586 = vmatmul.msk.f32.vlgmr.msra.gmra.mxu1 %vm586_vm0, %v1585_v0  ;;  %v1866_v9 = vunpack.i.h.bf16 %v1864_v5  ;;  %v1865_v10 = vunpack.i.l.bf16 %v1864_v5  ;;  %v1916_v36 = vunpack.i.h.bf16 %v2596_v30  ;;  %v1915_v37 = vunpack.i.l.bf16 %v2596_v30  ;;  %v1601_v5 = vld [vmem:[%s2703_s2 + $0x1c] sm:$0x7] }
 0x13e   : > { %v1861_v6 = vunpack.i.h.bf16 %v1859_v4  ;;  %v1860_v7 = vunpack.i.l.bf16 %v1859_v4  ;;  %1584 = vmatmul.msk.f32.vlgmr.msra.gmra.mxu0 %vm586_vm0, %v1581_v50 }
 0x13f   : > { %v912_v14 = vsel %vm911_vm4, %v1865_v10, %v1866_v9  ;;  %v1188_v46 = vsel %vm1184_vm7, %v1915_v37, %v1916_v36 }
 0x140   : > { %v915_v12 = vsel %vm911_vm4, %v1870_v61, %v1860_v7  ;;  %v913_v13 = vsel %vm911_vm4, %v1860_v7, %v1861_v6 }
 0x141   : > { %957 = vmatpush.msrb.mxu1 %v915_v12  ;;  %977 = vmatpush.msrb.mxu2 %v913_v13 }
 0x143   : > { %978 = vmatpush.msrb.mxu2 %v912_v14 }
 0x144   : > { %1592 = vmatmul.msk.f32.vlgmr.msrb.gmra.mxu2 %vm586_vm0, %v1589_v15  ;;  %v1879_v20 = vpop.permute.xlu1 %1878  ;;  %v1929_v45 = vpop.permute.xlu2 %1928 }
 0x145   : > { %v1874_v19 = vpop.permute.xlu0 %1873  ;;  %v1881_v24 = vunpack.i.h.bf16 %v1879_v20  ;;  %v1880_v25 = vunpack.i.l.bf16 %v1879_v20  ;;  %v1930_v50 = vunpack.i.l.bf16 %v1929_v45  ;;  %v1931_v55 = vunpack.i.h.bf16 %v1929_v45 }
 0x146   : > { %v1876_v22 = vunpack.i.h.bf16 %v1874_v19  ;;  %v1875_v23 = vunpack.i.l.bf16 %v1874_v19 }
 0x147   : > { %v1008_v28 = vsel %vm1002_vm5, %v1880_v25, %v1881_v24  ;;  %v1006_v29 = vsel %vm1002_vm5, %v1881_v24, %v1900_v16 }
 0x148   : > { %v916_v26 = vsel %vm911_vm4, %v1876_v22, %v1875_v23  ;;  %v914_v27 = vsel %vm911_vm4, %v1875_v23, %v1865_v10  ;;  %1028 = vmatpush.msrb.mxu3 %v1008_v28  ;;  %v1605_v22 = vld [vmem:[%s2703_s2 + $0x20] sm:$0x7] }
 0x149   : > { %938 = vmatpush.msrb.mxu0 %v916_v26  ;;  %958 = vmatpush.msrb.mxu1 %v914_v27 }
 0x14a   : > { %1591 = vmatmul.msk.f32.vlgmr.msrb.gmra.mxu1 %vm586_vm0, %v1589_v15  ;;  %1590 = vmatmul.msk.f32.vlgmr.msrb.gmra.mxu0 %vm586_vm0, %v1589_v15 }
 0x14b   : > { %1048 = vmatpush.msra.mxu0 %v1006_v29  ;;  %1029 = vmatpush.msrb.mxu3 %v1007_v31 }
 0x14c   : > { %1068 = vmatpush.msra.mxu1 %v1004_v32  ;;  %v1894_v35 = vpop.permute.xlu1 %1893  ;;  %1594 = vmatmul.msk.f32.vlgmr.msrb.gmra.mxu3 %vm586_vm0, %v1593_v33  ;;  %v1944_v9 = vpop.permute.xlu2 %1943 }
 0x14d   : > { %v1889_v34 = vpop.permute.xlu0 %1888  ;;  %v1896_v40 = vunpack.i.h.bf16 %v1894_v35  ;;  %v1895_v41 = vunpack.i.l.bf16 %v1894_v35  ;;  %v1946_v11 = vunpack.i.h.bf16 %v1944_v9  ;;  %v1945_v12 = vunpack.i.l.bf16 %v1944_v9 }
 0x14e   : > { %v1891_v38 = vunpack.i.h.bf16 %v1889_v34  ;;  %v1890_v39 = vunpack.i.l.bf16 %v1889_v34 }
 0x14f   : > { %v1098_v43 = vsel %vm1093_vm6, %v1895_v41, %v1896_v40  ;;  %v1276_v21 = vsel %vm1275_vm8, %v1945_v12, %v1946_v11 }
 0x150   : > { %v1099_v42 = vsel %vm1093_vm6, %v1890_v39, %v1891_v38 }
 0x151   : > { %1119 = vmatpush.msra.mxu2 %v1099_v42 }
 0x153   : > { %1120 = vmatpush.msra.mxu2 %v1098_v43 }
 0x154   : > { %1598 = vmatmul.msk.f32.vlgmr.msra.gmra.mxu2 %vm586_vm0, %v1597_v44  ;;  %v1909_v49 = vpop.permute.xlu1 %1908 }
 0x155   : > { %v1904_v48 = vpop.permute.xlu0 %1903  ;;  %1230 = vmatpush.msrb.mxu2 %v1188_v46  ;;  %v1910_v54 = vunpack.i.l.bf16 %v1909_v49  ;;  %v1911_v56 = vunpack.i.h.bf16 %v1909_v49 }
 0x156   : > { %v1906_v52 = vunpack.i.h.bf16 %v1904_v48  ;;  %v1905_v53 = vunpack.i.l.bf16 %v1904_v48 }
 0x157   : > { %v1097_v59 = vsel %vm1093_vm6, %v1891_v38, %v1910_v54  ;;  %v1095_v60 = vsel %vm1093_vm6, %v1910_v54, %v1930_v50  ;;  %v1094_v61 = vsel %vm1093_vm6, %v1911_v56, %v1931_v55  ;;  %v1096_v62 = vsel %vm1093_vm6, %v1896_v40, %v1911_v56 }
 0x158   : > { %v1005_v57 = vsel %vm1002_vm5, %v1886_v17, %v1905_v53  ;;  %v1003_v58 = vsel %vm1002_vm5, %v1905_v53, %v1906_v52  ;;  %1139 = vmatpush.msra.mxu3 %v1097_v59 }
 0x159   : > { %1049 = vmatpush.msra.mxu0 %v1005_v57  ;;  %1069 = vmatpush.msra.mxu1 %v1003_v58 }
 0x15a   : > { %1595 = vmatmul.msk.f32.vlgmr.msra.gmra.mxu0 %vm586_vm0, %v1593_v33  ;;  %1596 = vmatmul.msk.f32.vlgmr.msra.gmra.mxu1 %vm586_vm0, %v1593_v33 }
 0x15b   : > { %1159 = vmatpush.msrb.mxu0 %v1095_v60  ;;  %1140 = vmatpush.msra.mxu3 %v1096_v62 }
 0x15c   : > { %1599 = vmatmul.msk.f32.vlgmr.msra.gmra.mxu3 %vm586_vm0, %v1597_v44  ;;  %v1924_v0 = vpop.permute.xlu1 %1923 }
 0x15d   : > { %v1919_v63 = vpop.permute.xlu0 %1918  ;;  %1160 = vmatpush.msrb.mxu0 %v1094_v61  ;;  %v1926_v3 = vunpack.i.h.bf16 %v1924_v0  ;;  %v1925_v4 = vunpack.i.l.bf16 %v1924_v0 }
 0x15e   : > { %v1921_v1 = vunpack.i.h.bf16 %v1919_v63  ;;  %v1920_v2 = vunpack.i.l.bf16 %v1919_v63 }
 0x15f   : > { %v1190_v6 = vsel %vm1184_vm7, %v1925_v4, %v1915_v37  ;;  %v670_v37 = vpop.f32.mrf.mxu3 }
 0x160   : > { %v1187_v7 = vsel %vm1184_vm7, %v1920_v2, %v1921_v1  ;;  %1210 = vmatpush.msrb.mxu1 %v1190_v6  ;;  %v1189_v10 = vsel %vm1184_vm7, %v1926_v3, %v1920_v2 }
 0x161   : > { %1231 = vmatpush.msrb.mxu2 %v1187_v7 }
 0x162   : > { %1600 = vmatmul.msk.f32.vlgmr.msrb.gmra.mxu0 %vm586_vm0, %v1597_v44  ;;  %1603 = vmatmul.msk.f32.vlgmr.msrb.gmra.mxu2 %vm586_vm0, %v1601_v5 }
 0x163   : > { %1211 = vmatpush.msrb.mxu1 %v1189_v10 }
 0x164   : > { %1602 = vmatmul.msk.f32.vlgmr.msrb.gmra.mxu1 %vm586_vm0, %v1601_v5  ;;  %v1939_v14 = vpop.permute.xlu1 %1938 }
 0x165   : > { %v1934_v13 = vpop.permute.xlu0 %1933  ;;  %v1941_v17 = vunpack.i.h.bf16 %v1939_v14  ;;  %v1940_v18 = vunpack.i.l.bf16 %v1939_v14 }
 0x166   : > { %v1936_v15 = vunpack.i.h.bf16 %v1934_v13  ;;  %v1935_v16 = vunpack.i.l.bf16 %v1934_v13 }
 0x167   : > { %v1277_v20 = vsel %vm1275_vm8, %v1940_v18, %v1941_v17 }
 0x168   : > { %v1186_v19 = vsel %vm1184_vm7, %v1916_v36, %v1935_v16  ;;  %1341 = vmatpush.msra.mxu2 %v1277_v20  ;;  %v1185_v23 = vsel %vm1184_vm7, %v1921_v1, %v1936_v15 }
 0x169   : > { %1250 = vmatpush.msrb.mxu3 %v1186_v19 }
 0x16a   : > { %1342 = vmatpush.msra.mxu2 %v1276_v21 }
 0x16b   : > { %1251 = vmatpush.msrb.mxu3 %v1185_v23  ;;  %1608 = vmatmul.msk.f32.vlgmr.msra.gmra.mxu2 %vm586_vm0, %v1605_v22 }
 0x16c   : > { %1604 = vmatmul.msk.f32.vlgmr.msrb.gmra.mxu3 %vm586_vm0, %v1601_v5  ;;  %v1954_v25 = vpop.permute.xlu1 %1953 }
 0x16d   : > { %v1949_v24 = vpop.permute.xlu0 %1948  ;;  %v1956_v28 = vunpack.i.h.bf16 %v1954_v25  ;;  %v1955_v29 = vunpack.i.l.bf16 %v1954_v25 }
 0x16e   : > { %v1951_v26 = vunpack.i.h.bf16 %v1949_v24  ;;  %v1950_v27 = vunpack.i.l.bf16 %v1949_v24 }
 0x16f   : > { %v1280_v32 = vsel %vm1275_vm8, %v1956_v28, %v1955_v29  ;;  %v1278_v33 = vsel %vm1275_vm8, %v1955_v29, %v1945_v12 }
 0x170   : > { %v1281_v30 = vsel %vm1275_vm8, %v1951_v26, %v1950_v27  ;;  %v1279_v31 = vsel %vm1275_vm8, %v1950_v27, %v1940_v18 }
 0x171   : > { %1301 = vmatpush.msra.mxu0 %v1281_v30  ;;  %1321 = vmatpush.msra.mxu1 %v1279_v31 }
 0x173   : > { %1302 = vmatpush.msra.mxu0 %v1280_v32  ;;  %1322 = vmatpush.msra.mxu1 %v1278_v33 }
 0x174   : > { %1606 = vmatmul.msk.f32.vlgmr.msra.gmra.mxu0 %vm586_vm0, %v1605_v22  ;;  %1607 = vmatmul.msk.f32.vlgmr.msra.gmra.mxu1 %vm586_vm0, %v1605_v22 }
 0x190   : > { %v1354_v16 = vpop.permute.xlu2 %1353 }
 0x1a9   : > { %v627_v36 = vpop.f32.mrf.mxu1 }
 0x1ab   : > { %v607_v34 = vpop.f32.mrf.mxu0 }
 0x1ac   : > { %v671_v48 = vadd.f32 %v670_v37, %v607_v34 }
 0x1ad   : > { %v647_v35 = vpop.f32.mrf.mxu2 }
 0x1b1   : > { %v710_v40 = vpop.f32.mrf.mxu1 }
 0x1b2   : > { %v711_v49 = vadd.f32 %v710_v40, %v647_v35 }
 0x1b3   : > { %v690_v38 = vpop.f32.mrf.mxu0 }
 0x1b4   : > { %v691_v50 = vadd.f32 %v690_v38, %v627_v36 }
 0x1b6   : > { %v758_v39 = vpop.f32.mrf.mxu2 }
 0x1b7   : > { %v778_v41 = vpop.f32.mrf.mxu3  ;;  %v801_v55 = vadd.f32 %v758_v39, %v671_v48 }
 0x1b8   : > { %v802_v56 = vadd.f32 %v778_v41, %v691_v50 }
 0x1ba   : > { %v849_v44 = vpop.f32.mrf.mxu1 }
 0x1bb   : > { %v798_v42 = vpop.f32.mrf.mxu0  ;;  %v892_v58 = vadd.f32 %v849_v44, %v801_v55 }
 0x1bc   : > { %v803_v57 = vadd.f32 %v798_v42, %v711_v49 }
 0x1be   : > { %v869_v43 = vpop.f32.mrf.mxu2 }
 0x1bf   : > { %v889_v45 = vpop.f32.mrf.mxu3  ;;  %v893_v59 = vadd.f32 %v869_v43, %v802_v56 }
 0x1c0   : > { %v894_v60 = vadd.f32 %v889_v45, %v803_v57 }
 0x1c7   : > { %v940_v8 = vpop.f32.mrf.mxu0  ;;  %v980_v46 = vpop.f32.mrf.mxu2 }
 0x1c8   : > { %v960_v47 = vpop.f32.mrf.mxu1  ;;  %v983_v2 = vadd.f32 %v940_v8, %v892_v58  ;;  %v985_v3 = vadd.f32 %v980_v46, %v894_v60 }
 0x1c9   : > { %v984_v1 = vadd.f32 %v960_v47, %v893_v59 }
 0x1cf   : > { %v1031_v51 = vpop.f32.mrf.mxu3 }
 0x1d0   : > { %v1074_v4 = vadd.f32 %v1031_v51, %v983_v2 }
 0x1d7   : > { %v1051_v52 = vpop.f32.mrf.mxu0  ;;  %v1122_v53 = vpop.f32.mrf.mxu2 }
 0x1d8   : > { %v1071_v54 = vpop.f32.mrf.mxu1  ;;  %v1075_v5 = vadd.f32 %v1051_v52, %v984_v1  ;;  %v1165_v7 = vadd.f32 %v1122_v53, %v1074_v4 }
 0x1d9   : > { %v1076_v6 = vadd.f32 %v1071_v54, %v985_v3 }
 0x1df   : > { %v1142_v61 = vpop.f32.mrf.mxu3  ;;  %v1162_v63 = vpop.f32.mrf.mxu0 }
 0x1e0   : > { %v1166_v9 = vadd.f32 %v1142_v61, %v1075_v5  ;;  %v1167_v10 = vadd.f32 %v1162_v63, %v1076_v6 }
 0x1e1   : > { %v1213_v0 = vpop.f32.mrf.mxu1 }
 0x1e2   : > { %v1256_v13 = vadd.f32 %v1213_v0, %v1165_v7 }
 0x1e5   : > { %v1233_v62 = vpop.f32.mrf.mxu2 }
 0x1e6   : > { %v1257_v14 = vadd.f32 %v1233_v62, %v1166_v9 }
 0x1ee   : > { %v1344_v12 = vpop.f32.mrf.mxu2 }
 0x1ef   : > { %v1253_v11 = vpop.f32.mrf.mxu3 }
 0x1f0   : > { %v1258_v15 = vadd.f32 %v1253_v11, %v1167_v10 }
 0x1f1   : > { %v1304_v17 = vpop.f32.mrf.mxu0  ;;  %v1324_v18 = vpop.f32.mrf.mxu1 }
 0x1f2   : > { %v1347_v19 = vadd.f32 %v1304_v17, %v1256_v13  ;;  %v1348_v20 = vadd.f32 %v1324_v18, %v1257_v14  ;;  %v1349_v21 = vadd.f32 %v1344_v12, %v1258_v15 }
 0x1f4   : > { %v1357_v22 = vadd.f32 %v1354_v16, %v1348_v20  ;;  %v1358_v23 = vadd.f32 %v1354_v16, %v1349_v21  ;;  %v1356_v24 = vadd.f32 %v1354_v16, %v1347_v19 }
 0x1f6   : > { %1959 = vtanh.f32 %v1357_v22 }
 0x1f7   : > { %1961 = vtanh.f32 %v1358_v23 }
 0x1f8   : > { %1963 = vtanh.f32 %v1356_v24 }
 0x1fc   : > { %v1960_v25 = vpop.eup %1959 }
 0x1fd   : > { %v1962_v26 = vpop.eup %1961  ;;  %v1364_v27 = vrot.slane %v1960_v25, 4 }
 0x1fe   : > { %v1964_v28 = vpop.eup %1963  ;;  %1369 = vst [vmem:[%s548_s6 + $0x8] sm:$0x7] %v1962_v26 }
 0x1ff   : > { %v1366_v29 = vsel %vm1365_vm9, %v1964_v28, %v1364_v27 }
 0x200   : > { %1368 = vst [vmem:[%s548_s6] sm:$0x77] %v1366_v29 }
 0x201 PF: > { %s2721_s14 = sld [smem:[#allocation4_spill]]  ;;  %p11_p2 = scmp.ge.s32.totalorder %s2196_s21, 4  }
 0x202   : > { %s2722_s15 = smov %s2055_s16  ;;  %s2723_s16 = smov %s2217_s5 }
 0x203   : > { %s2724_s17 = smov %s2063_s18  ;;  %s2726_s19 = smov %s2196_s21 }
 0x204   :  { %13 = sbr.rel (!%p11_p2) target bundleno = 5 (0x5), region = 253 }
 0x207   : > { %s2725_s18 = smov %s2721_s14 }

</bundles_post_ra>
